<compile_context>
chip_gen: v7x
topology: tpu7x:2x2x1
jax: 0.10.0
libtpu: 0.0.40
codegen_flags: <defaults>
</compile_context>

<pallas_src>
import functools

import jax
import jax.numpy as jnp
from jax import lax
from jax.experimental import pallas as pl
from jax.experimental.pallas import tpu as pltpu

LEAKY_SLOPE = 0.3
LN_EPS = 1e-5
HIDDEN = (4096, 1024, 256)
HEAD_HIDDEN = 32
HEAD_PACK = 128            # lane-padded width of the packed head-1 activations
OUT_PAD = 128              # lane-dense packed width of the head-output slab
N_SHARDS = 2               # hidden-1 reduction shards (v7x megacore "parallel" axis)
W1_RESIDENT_MAX_BYTES = 6 * 1024 * 1024


def _leaky(y):
    return jnp.where(y >= 0, y, LEAKY_SLOPE * y)


def _ln(y, g, b):
    mean = jnp.mean(y, axis=-1, keepdims=True)
    var = jnp.mean(jnp.square(y - mean), axis=-1, keepdims=True)
    return (y - mean) * lax.rsqrt(var + LN_EPS) * g + b


def _sigmoid(y):
    # exp on the EUP; the single (B,128) divide is negligible.
    return 1.0 / (1.0 + jnp.exp(-y))


# ----------------------------------------------------------------------------
# Stage 1: layer 1 + layer-2 partial accumulation.
# grid = (N_SHARDS, steps); axis 0 "parallel" (megacore), axis 1 "arbitrary"
# (reduction).  The output block (1, B, N2) is the per-shard accumulator.
# ----------------------------------------------------------------------------
def _stage1_kernel(x_ref, w1_ref, b1_ref, w2_ref, part_ref, *, tn1, w1_resident):
    k = pl.program_id(1)

    @pl.when(k == 0)
    def _():
        part_ref[...] = jnp.zeros_like(part_ref)

    if w1_resident:
        start = pl.multiple_of(k * tn1, 128)
        w1 = w1_ref[:, pl.ds(start, tn1)]
        b1 = b1_ref[:, pl.ds(start, tn1)]
    else:
        w1 = w1_ref[...]
        b1 = b1_ref[...]

    h1 = jnp.dot(x_ref[...], w1, preferred_element_type=jnp.float32) + b1
    h1 = _leaky(h1)                       # Dropout(p=0.3) == identity (eval mode)
    part_ref[...] += jnp.dot(h1.astype(jnp.bfloat16), w2_ref[...],
                             preferred_element_type=jnp.float32)[None]


# ----------------------------------------------------------------------------
# Stage 2 (tiny): combine partials, layer-2 epilogue, layer 3, fused heads.
# ----------------------------------------------------------------------------
def _stage2_kernel(part_ref, b2_ref, g2_ref, be2_ref,
                   w3_ref, b3_ref, g3_ref, be3_ref,
                   wh1_ref, bh1_ref, gh1_ref, beh1_ref,
                   wo2_ref, wm2_ref, ws2_ref, bh2_ref,
                   out_ref):
    f32, bf16 = jnp.float32, jnp.bfloat16
    H = HEAD_HIDDEN

    parts = part_ref[...]                          # (N_SHARDS, B, N2)
    acc2 = parts[0]
    for s in range(1, N_SHARDS):
        acc2 = acc2 + parts[s]

    h2 = _ln(_leaky(acc2 + b2_ref[...]), g2_ref[...], be2_ref[...])

    h3 = jnp.dot(h2.astype(bf16), w3_ref[...],
                 preferred_element_type=f32) + b3_ref[...]
    h3 = _ln(_leaky(h3), g3_ref[...], be3_ref[...])

    # Fused head-1: one (B, 256) x (256, 128) dot instead of three 32-wide dots.
    hh = jnp.dot(h3.astype(bf16), wh1_ref[...],
                 preferred_element_type=f32) + bh1_ref[...]
    gh, bh = gh1_ref[...], beh1_ref[...]
    ho = _ln(hh[:, 0:H], gh[:, 0:H], bh[:, 0:H])                       # output head (no leaky)
    hm = _ln(_leaky(hh[:, H:2 * H]), gh[:, H:2 * H], bh[:, H:2 * H])   # moca head
    hs = _ln(_leaky(hh[:, 2 * H:3 * H]), gh[:, 2 * H:3 * H], bh[:, 2 * H:3 * H])  # mmse head

    # Head-2: lane-padded matmuls summed into one (B, 128) slab -> a single
    # unmasked, lane-dense store.  Unused lanes hold sigmoid(0).
    logits = (jnp.dot(ho.astype(bf16), wo2_ref[...], preferred_element_type=f32)
              + jnp.dot(hm.astype(bf16), wm2_ref[...], preferred_element_type=f32)
              + jnp.dot(hs.astype(bf16), ws2_ref[...], preferred_element_type=f32)
              + bh2_ref[...])
    out_ref[...] = _sigmoid(logits)


def forward_pallas(x, p, output_dim, moca_dim, mmse_dim, *, block_n1=1024):
    f32, bf16 = jnp.float32, jnp.bfloat16
    x = x.astype(f32)
    if x.ndim == 3:
        x = x.reshape(x.shape[0], -1)
    B, K0 = x.shape
    N1, N2, N3 = HIDDEN
    H = HEAD_HIDDEN

    assert N1 % N_SHARDS == 0
    n1_per_shard = N1 // N_SHARDS
    tn1 = min(block_n1, n1_per_shard)
    assert n1_per_shard % tn1 == 0
    steps = n1_per_shard // tn1

    # Keep W1/b1 fully VMEM-resident (per-core half) when small enough.
    w1_resident = (K0 * N1 * 2) <= W1_RESIDENT_MAX_BYTES

    def row(v):
        return v.reshape(1, -1).astype(f32)

    w1 = p["w1"].astype(bf16)
    b1 = row(p["b1"])
    w2 = p["w2"].astype(bf16)

    # ---------------- stage 1: the weight-bandwidth-bound bulk ----------------
    if w1_resident:
        w1_spec = pl.BlockSpec((K0, n1_per_shard), lambda c, k: (0, c))
        b1_spec = pl.BlockSpec((1, n1_per_shard), lambda c, k: (0, c))
    else:
        w1_spec = pl.BlockSpec((K0, tn1), lambda c, k: (0, c * steps + k))
        b1_spec = pl.BlockSpec((1, tn1), lambda c, k: (0, c * steps + k))

    stage1_cost = pl.CostEstimate(
        flops=2 * B * (K0 * N1 + N1 * N2),
        transcendentals=0,
        bytes_accessed=int(B * K0 * 2 + K0 * N1 * 2 + N1 * 4 + N1 * N2 * 2
                           + N_SHARDS * B * N2 * 4))

    parts = pl.pallas_call(
        functools.partial(_stage1_kernel, tn1=tn1, w1_resident=w1_resident),
        out_shape=jax.ShapeDtypeStruct((N_SHARDS, B, N2), f32),
        grid_spec=pltpu.PrefetchScalarGridSpec(
            num_scalar_prefetch=0,
            grid=(N_SHARDS, steps),
            in_specs=[
                pl.BlockSpec((B, K0), lambda c, k: (0, 0)),   # x resident
                w1_spec,                                       # W1 resident-half / streamed
                b1_spec,                                       # b1 with W1
                pl.BlockSpec((tn1, N2), lambda c, k: (c * steps + k, 0)),  # W2 streamed
            ],
            out_specs=pl.BlockSpec((1, B, N2), lambda c, k: (c, 0, 0)),
        ),
        compiler_params=pltpu.CompilerParams(
            dimension_semantics=("parallel", "arbitrary"),
            vmem_limit_bytes=32 * 1024 * 1024),
        cost_estimate=stage1_cost,
    )(x.astype(bf16), w1, b1, w2)

    # ---------------- stage 2: tiny epilogue + heads ----------------
    o0, o1 = 0, output_dim
    m0, m1 = o1, o1 + moca_dim
    s0, s1 = m1, m1 + mmse_dim
    assert output_dim >= 2 and s1 <= OUT_PAD

    # Fused head-1 weight/bias/LN params packed into 128 lanes (32 per head).
    wh1p = (jnp.zeros((N3, HEAD_PACK), f32)
            .at[:, 0:H].set(p["wo1"])
            .at[:, H:2 * H].set(p["wm1"])
            .at[:, 2 * H:3 * H].set(p["ws1"])).astype(bf16)
    bh1p = (jnp.zeros((1, HEAD_PACK), f32)
            .at[0, 0:H].set(p["bo1"]).at[0, H:2 * H].set(p["bm1"])
            .at[0, 2 * H:3 * H].set(p["bs1"]))
    gh1p = (jnp.ones((1, HEAD_PACK), f32)
            .at[0, 0:H].set(p["go1"]).at[0, H:2 * H].set(p["gm1"])
            .at[0, 2 * H:3 * H].set(p["gs1"]))
    beh1p = (jnp.zeros((1, HEAD_PACK), f32)
             .at[0, 0:H].set(p["beo1"]).at[0, H:2 * H].set(p["bem1"])
             .at[0, 2 * H:3 * H].set(p["bes1"]))

    # Lane-padded head-2 weights: each head's columns land in its slot of the
    # packed (B, OUT_PAD) output slab; other columns are zero.
    wo2p = jnp.zeros((H, OUT_PAD), f32).at[:, o0:o1].set(p["wo2"]).astype(bf16)
    wm2p = jnp.zeros((H, OUT_PAD), f32).at[:, m0:m1].set(p["wm2"]).astype(bf16)
    ws2p = jnp.zeros((H, OUT_PAD), f32).at[:, s0:s1].set(p["ws2"]).astype(bf16)
    bh2p = (jnp.zeros((1, OUT_PAD), f32)
            .at[0, o0:o1].set(p["bo2"])
            .at[0, m0:m1].set(p["bm2"])
            .at[0, s0:s1].set(p["bs2"]))

    args2 = [parts,
             row(p["b2"]), row(p["g2"]), row(p["be2"]),
             p["w3"].astype(bf16), row(p["b3"]), row(p["g3"]), row(p["be3"]),
             wh1p, bh1p, gh1p, beh1p,
             wo2p, wm2p, ws2p, bh2p]

    def full_spec(shape):
        nd = len(shape)
        return pl.BlockSpec(shape, lambda i, _nd=nd: (0,) * _nd)

    stage2_cost = pl.CostEstimate(
        flops=2 * B * (N2 * N3 + N3 * HEAD_PACK + 3 * H * OUT_PAD),
        transcendentals=B * OUT_PAD,
        bytes_accessed=int(sum(a.size * a.dtype.itemsize for a in args2)
                           + B * OUT_PAD * 4))

    out = pl.pallas_call(
        _stage2_kernel,
        out_shape=jax.ShapeDtypeStruct((B, OUT_PAD), f32),
        grid_spec=pltpu.PrefetchScalarGridSpec(
            num_scalar_prefetch=0,
            grid=(1,),
            in_specs=[full_spec(a.shape) for a in args2],
            out_specs=full_spec((B, OUT_PAD)),
        ),
        compiler_params=pltpu.CompilerParams(
            dimension_semantics=("arbitrary",)),
        cost_estimate=stage2_cost,
    )(*args2)

    return out[:, 0], out[:, 1], out[:, m0:m1], out[:, s0:s1]


# ----------------------------------------------------------------------------
# Parameter init (deterministic, PyTorch-Linear-like uniform(-1/sqrt(fan_in)))
# ----------------------------------------------------------------------------
def init_params(key, input_dim, output_dim, moca_dim, mmse_dim):
    def linear(key, fan_in, fan_out):
        kw, kb = jax.random.split(key)
        bound = 1.0 / jnp.sqrt(fan_in)
        w = jax.random.uniform(kw, (fan_in, fan_out), jnp.float32, -bound, bound)
        b = jax.random.uniform(kb, (fan_out,), jnp.float32, -bound, bound)
        return w, b

    keys = jax.random.split(key, 16)
    p = {}
    h1, h2, h3 = HIDDEN
    p["w1"], p["b1"] = linear(keys[0], input_dim, h1)
    p["w2"], p["b2"] = linear(keys[1], h1, h2)
    p["g2"], p["be2"] = jnp.ones((h2,)), jnp.zeros((h2,))
    p["w3"], p["b3"] = linear(keys[2], h2, h3)
    p["g3"], p["be3"] = jnp.ones((h3,)), jnp.zeros((h3,))
    p["wo1"], p["bo1"] = linear(keys[3], h3, HEAD_HIDDEN)
    p["go1"], p["beo1"] = jnp.ones((HEAD_HIDDEN,)), jnp.zeros((HEAD_HIDDEN,))
    p["wo2"], p["bo2"] = linear(keys[4], HEAD_HIDDEN, output_dim)
    p["wm1"], p["bm1"] = linear(keys[5], h3, HEAD_HIDDEN)
    p["gm1"], p["bem1"] = jnp.ones((HEAD_HIDDEN,)), jnp.zeros((HEAD_HIDDEN,))
    p["wm2"], p["bm2"] = linear(keys[6], HEAD_HIDDEN, moca_dim)
    p["ws1"], p["bs1"] = linear(keys[7], h3, HEAD_HIDDEN)
    p["gs1"], p["bes1"] = jnp.ones((HEAD_HIDDEN,)), jnp.zeros((HEAD_HIDDEN,))
    p["ws2"], p["bs2"] = linear(keys[8], HEAD_HIDDEN, mmse_dim)
    return p


# ----------------------------------------------------------------------------
# Pure-JAX reference (same bf16-weight / f32-accumulation math as the kernel)
# ----------------------------------------------------------------------------
def forward_ref(x, p, output_dim, moca_dim, mmse_dim):
    bf16, f32 = jnp.bfloat16, jnp.float32

    def mm(a, w):
        return jnp.dot(a.astype(bf16), w.astype(bf16), preferred_element_type=f32)

    x = x.astype(f32)
    if x.ndim == 3:
        x = x.reshape(x.shape[0], -1)
    h = _leaky(mm(x, p["w1"]) + p["b1"])
    h = _ln(_leaky(mm(h, p["w2"]) + p["b2"]), p["g2"], p["be2"])
    h = _ln(_leaky(mm(h, p["w3"]) + p["b3"]), p["g3"], p["be3"])

    o = _ln(mm(h, p["wo1"]) + p["bo1"], p["go1"], p["beo1"])
    o = _sigmoid(mm(o, p["wo2"]) + p["bo2"])
    m = _ln(_leaky(mm(h, p["wm1"]) + p["bm1"]), p["gm1"], p["bem1"])
    m = _sigmoid(mm(m, p["wm2"]) + p["bm2"])
    s = _ln(_leaky(mm(h, p["ws1"]) + p["bs1"]), p["gs1"], p["bes1"])
    s = _sigmoid(mm(s, p["ws2"]) + p["bs2"])
    return o[:, 0], o[:, 1], m, s


if __name__ == "__main__":
    B = 8
    INPUT_DIM = 512
    OUTPUT_DIM = 2
    MOCA_DIM = 7
    MMSE_DIM = 6

    key = jax.random.PRNGKey(0)
    kx, kp = jax.random.split(key)
    # 3-D input to exercise the flatten branch: (B, 8, 64) -> (B, 512)
    x = jax.random.normal(kx, (B, 8, INPUT_DIM // 8), jnp.float32)
    params = init_params(kp, INPUT_DIM, OUTPUT_DIM, MOCA_DIM, MMSE_DIM)

    fwd = jax.jit(functools.partial(forward_pallas, output_dim=OUTPUT_DIM,
                                    moca_dim=MOCA_DIM, mmse_dim=MMSE_DIM))
    out = jax.block_until_ready(fwd(x, params))

    ref = forward_ref(x, params, OUTPUT_DIM, MOCA_DIM, MMSE_DIM)
    for a, b in zip(out, ref):
        assert a.shape == b.shape, (a.shape, b.shape)
        assert jnp.allclose(a, b, rtol=1e-3, atol=1e-3), (
            float(jnp.max(jnp.abs(a - b))))

    print("KERNEL_OK")
</pallas_src>

<mosaic_0001>
module attributes {stable_mosaic.version = 11 : i64} {
  func.func @_stage1_kernel(%arg0: i32, %arg1: i32, %arg2: memref<8x512xbf16, #tpu.memory_space<vmem>>, %arg3: memref<512x2048xbf16, #tpu.memory_space<vmem>>, %arg4: memref<1x2048xf32, #tpu.memory_space<vmem>>, %arg5: memref<1024x1024xbf16, #tpu.memory_space<vmem>>, %arg6: memref<1x8x1024xf32, #tpu.memory_space<vmem>>) attributes {dimension_semantics = [#tpu.dimension_semantics<parallel>, #tpu.dimension_semantics<arbitrary>], iteration_bounds = array<i64: 2, 2>, scalar_prefetch = 0 : i64, scratch_operands = 0 : i64, tpu.core_type = #tpu.core_type<tc>, window_params = [{pipeline_mode = #tpu.pipeline_mode<synchronous>, transform_indices = @transform_0, window_bounds = array<i64: 8, 512>}, {transform_indices = @transform_1, window_bounds = array<i64: 512, 2048>}, {transform_indices = @transform_2, window_bounds = array<i64: 1, 2048>}, {transform_indices = @transform_3, window_bounds = array<i64: 1024, 1024>}, {transform_indices = @transform_4, window_bounds = array<i64: 1, 8, 1024>}]} {
    %c0_i32 = arith.constant 0 : i32
    %0 = arith.cmpi eq, %arg1, %c0_i32 : i32
    %1 = arith.extui %0 : i1 to i32
    %c0_i32_0 = arith.constant 0 : i32
    %2 = arith.cmpi ne, %1, %c0_i32_0 : i32
    scf.if %2 {
      %cst_15 = arith.constant 0.000000e+00 : f32
      %25 = vector.broadcast %cst_15 : f32 to vector<1x8x1024xf32>
      %c0_16 = arith.constant 0 : index
      %c0_17 = arith.constant 0 : index
      %c0_18 = arith.constant 0 : index
      %26 = vector.load %arg6[%c0_16, %c0_17, %c0_18] : memref<1x8x1024xf32, #tpu.memory_space<vmem>>, vector<1x8x1024xf32>
      tpu.vector_store %arg6[%c0_16, %c0_17, %c0_18], %25 {strides = array<i32>} : memref<1x8x1024xf32, #tpu.memory_space<vmem>>, vector<1x8x1024xf32>,
    } else {
    }
    %c1024_i32 = arith.constant 1024 : i32
    %3 = arith.muli %arg1, %c1024_i32 : i32
    %4 = tpu.assume_multiple %3, 128 : i32
    %c0 = arith.constant 0 : index
    %5 = arith.index_cast %4 : i32 to index
    %6 = vector.load %arg3[%c0, %5] : memref<512x2048xbf16, #tpu.memory_space<vmem>>, vector<512x1024xbf16>
    %c0_1 = arith.constant 0 : index
    %7 = arith.index_cast %4 : i32 to index
    %8 = vector.load %arg4[%c0_1, %7] : memref<1x2048xf32, #tpu.memory_space<vmem>>, vector<1x1024xf32>
    %c0_2 = arith.constant 0 : index
    %c0_3 = arith.constant 0 : index
    %9 = vector.load %arg2[%c0_2, %c0_3] : memref<8x512xbf16, #tpu.memory_space<vmem>>, vector<8x512xbf16>
    %cst = arith.constant dense<0.000000e+00> : vector<8x1024xf32>
    %10 = tpu.matmul %9, %6, %cst {dimension_numbers = #tpu.dot_dimension_numbers<[1], [0], [0], [1], [0, 0, 1, 1], [], []>} : vector<8x512xbf16>, vector<512x1024xbf16>, vector<8x1024xf32> -> vector<8x1024xf32>
    %11 = vector.broadcast %8 : vector<1x1024xf32> to vector<8x1024xf32>
    %12 = arith.addf %10, %11 : vector<8x1024xf32>
    %cst_4 = arith.constant 0.000000e+00 : f32
    %13 = vector.broadcast %cst_4 : f32 to vector<8x1024xf32>
    %14 = arith.cmpf oge, %12, %13 : vector<8x1024xf32>
    %cst_5 = arith.constant 3.000000e-01 : f32
    %15 = vector.broadcast %cst_5 : f32 to vector<8x1024xf32>
    %16 = arith.mulf %15, %12 : vector<8x1024xf32>
    %17 = arith.select %14, %12, %16 : vector<8x1024xi1>, vector<8x1024xf32>
    %c0_6 = arith.constant 0 : index
    %c0_7 = arith.constant 0 : index
    %c0_8 = arith.constant 0 : index
    %18 = vector.load %arg6[%c0_6, %c0_7, %c0_8] : memref<1x8x1024xf32, #tpu.memory_space<vmem>>, vector<1x8x1024xf32>
    %19 = arith.truncf %17 : vector<8x1024xf32> to vector<8x1024xbf16>
    %c0_9 = arith.constant 0 : index
    %c0_10 = arith.constant 0 : index
    %20 = vector.load %arg5[%c0_9, %c0_10] : memref<1024x1024xbf16, #tpu.memory_space<vmem>>, vector<1024x1024xbf16>
    %cst_11 = arith.constant dense<0.000000e+00> : vector<8x1024xf32>
    %21 = tpu.matmul %19, %20, %cst_11 {dimension_numbers = #tpu.dot_dimension_numbers<[1], [0], [0], [1], [0, 0, 1, 1], [], []>} : vector<8x1024xbf16>, vector<1024x1024xbf16>, vector<8x1024xf32> -> vector<8x1024xf32>
    %22 = vector.shape_cast %21 : vector<8x1024xf32> to vector<1x8x1024xf32>
    %23 = arith.addf %18, %22 : vector<1x8x1024xf32>
    %c0_12 = arith.constant 0 : index
    %c0_13 = arith.constant 0 : index
    %c0_14 = arith.constant 0 : index
    %24 = vector.load %arg6[%c0_12, %c0_13, %c0_14] : memref<1x8x1024xf32, #tpu.memory_space<vmem>>, vector<1x8x1024xf32>
    tpu.vector_store %arg6[%c0_12, %c0_13, %c0_14], %23 {strides = array<i32>} : memref<1x8x1024xf32, #tpu.memory_space<vmem>>, vector<1x8x1024xf32>,
    return
  }
  func.func @transform_0(%arg0: i32, %arg1: i32) -> (i32, i32) {
    %c0_i32 = arith.constant 0 : i32
    %c0_i32_0 = arith.constant 0 : i32
    %c0_i32_1 = arith.constant 0 : i32
    return %c0_i32, %c0_i32_0 : i32, i32
  }
  func.func @transform_1(%arg0: i32, %arg1: i32) -> (i32, i32) {
    %c0_i32 = arith.constant 0 : i32
    %c0_i32_0 = arith.constant 0 : i32
    return %c0_i32, %arg0 : i32, i32
  }
  func.func @transform_2(%arg0: i32, %arg1: i32) -> (i32, i32) {
    %c0_i32 = arith.constant 0 : i32
    %c0_i32_0 = arith.constant 0 : i32
    return %c0_i32, %arg0 : i32, i32
  }
  func.func @transform_3(%arg0: i32, %arg1: i32) -> (i32, i32) {
    %c2_i32 = arith.constant 2 : i32
    %0 = arith.muli %arg0, %c2_i32 : i32
    %1 = arith.addi %0, %arg1 : i32
    %c0_i32 = arith.constant 0 : i32
    %c0_i32_0 = arith.constant 0 : i32
    return %1, %c0_i32 : i32, i32
  }
  func.func @transform_4(%arg0: i32, %arg1: i32) -> (i32, i32, i32) {
    %c0_i32 = arith.constant 0 : i32
    %c0_i32_0 = arith.constant 0 : i32
    %c0_i32_1 = arith.constant 0 : i32
    return %arg0, %c0_i32, %c0_i32_0 : i32, i32, i32
  }
}

module attributes {stable_mosaic.version = 11 : i64} {
  func.func @_stage2_kernel(%arg0: i32, %arg1: memref<2x8x1024xf32, #tpu.memory_space<vmem>>, %arg2: memref<1x1024xf32, #tpu.memory_space<vmem>>, %arg3: memref<1x1024xf32, #tpu.memory_space<vmem>>, %arg4: memref<1x1024xf32, #tpu.memory_space<vmem>>, %arg5: memref<1024x256xbf16, #tpu.memory_space<vmem>>, %arg6: memref<1x256xf32, #tpu.memory_space<vmem>>, %arg7: memref<1x256xf32, #tpu.memory_space<vmem>>, %arg8: memref<1x256xf32, #tpu.memory_space<vmem>>, %arg9: memref<256x128xbf16, #tpu.memory_space<vmem>>, %arg10: memref<1x128xf32, #tpu.memory_space<vmem>>, %arg11: memref<1x128xf32, #tpu.memory_space<vmem>>, %arg12: memref<1x128xf32, #tpu.memory_space<vmem>>, %arg13: memref<32x128xbf16, #tpu.memory_space<vmem>>, %arg14: memref<32x128xbf16, #tpu.memory_space<vmem>>, %arg15: memref<32x128xbf16, #tpu.memory_space<vmem>>, %arg16: memref<1x128xf32, #tpu.memory_space<vmem>>, %arg17: memref<8x128xf32, #tpu.memory_space<vmem>>) attributes {dimension_semantics = [#tpu.dimension_semantics<arbitrary>], iteration_bounds = array<i64: 1>, scalar_prefetch = 0 : i64, scratch_operands = 0 : i64, tpu.core_type = #tpu.core_type<tc>, window_params = [{pipeline_mode = #tpu.pipeline_mode<synchronous>, transform_indices = @transform_0, window_bounds = array<i64: 2, 8, 1024>}, {pipeline_mode = #tpu.pipeline_mode<synchronous>, transform_indices = @transform_1, window_bounds = array<i64: 1, 1024>}, {pipeline_mode = #tpu.pipeline_mode<synchronous>, transform_indices = @transform_2, window_bounds = array<i64: 1, 1024>}, {pipeline_mode = #tpu.pipeline_mode<synchronous>, transform_indices = @transform_3, window_bounds = array<i64: 1, 1024>}, {pipeline_mode = #tpu.pipeline_mode<synchronous>, transform_indices = @transform_4, window_bounds = array<i64: 1024, 256>}, {pipeline_mode = #tpu.pipeline_mode<synchronous>, transform_indices = @transform_5, window_bounds = array<i64: 1, 256>}, {pipeline_mode = #tpu.pipeline_mode<synchronous>, transform_indices = @transform_6, window_bounds = array<i64: 1, 256>}, {pipeline_mode = #tpu.pipeline_mode<synchronous>, transform_indices = @transform_7, window_bounds = array<i64: 1, 256>}, {pipeline_mode = #tpu.pipeline_mode<synchronous>, transform_indices = @transform_8, window_bounds = array<i64: 256, 128>}, {pipeline_mode = #tpu.pipeline_mode<synchronous>, transform_indices = @transform_9, window_bounds = array<i64: 1, 128>}, {pipeline_mode = #tpu.pipeline_mode<synchronous>, transform_indices = @transform_10, window_bounds = array<i64: 1, 128>}, {pipeline_mode = #tpu.pipeline_mode<synchronous>, transform_indices = @transform_11, window_bounds = array<i64: 1, 128>}, {pipeline_mode = #tpu.pipeline_mode<synchronous>, transform_indices = @transform_12, window_bounds = array<i64: 32, 128>}, {pipeline_mode = #tpu.pipeline_mode<synchronous>, transform_indices = @transform_13, window_bounds = array<i64: 32, 128>}, {pipeline_mode = #tpu.pipeline_mode<synchronous>, transform_indices = @transform_14, window_bounds = array<i64: 32, 128>}, {pipeline_mode = #tpu.pipeline_mode<synchronous>, transform_indices = @transform_15, window_bounds = array<i64: 1, 128>}, {pipeline_mode = #tpu.pipeline_mode<synchronous>, transform_indices = @transform_16, window_bounds = array<i64: 8, 128>}]} {
    %c0 = arith.constant 0 : index
    %c0_0 = arith.constant 0 : index
    %c0_1 = arith.constant 0 : index
    %0 = vector.load %arg1[%c0, %c0_0, %c0_1] : memref<2x8x1024xf32, #tpu.memory_space<vmem>>, vector<2x8x1024xf32>
    %1 = vector.extract_strided_slice %0 {offsets = [0, 0, 0], sizes = [1, 8, 1024], strides = [1, 1, 1]} : vector<2x8x1024xf32> to vector<1x8x1024xf32>
    %2 = vector.shape_cast %1 : vector<1x8x1024xf32> to vector<8x1024xf32>
    %3 = vector.extract_strided_slice %0 {offsets = [1, 0, 0], sizes = [1, 8, 1024], strides = [1, 1, 1]} : vector<2x8x1024xf32> to vector<1x8x1024xf32>
    %4 = vector.shape_cast %3 : vector<1x8x1024xf32> to vector<8x1024xf32>
    %5 = arith.addf %2, %4 : vector<8x1024xf32>
    %c0_2 = arith.constant 0 : index
    %c0_3 = arith.constant 0 : index
    %6 = vector.load %arg2[%c0_2, %c0_3] : memref<1x1024xf32, #tpu.memory_space<vmem>>, vector<1x1024xf32>
    %7 = vector.broadcast %6 : vector<1x1024xf32> to vector<8x1024xf32>
    %8 = arith.addf %5, %7 : vector<8x1024xf32>
    %cst = arith.constant 0.000000e+00 : f32
    %9 = vector.broadcast %cst : f32 to vector<8x1024xf32>
    %10 = arith.cmpf oge, %8, %9 : vector<8x1024xf32>
    %cst_4 = arith.constant 3.000000e-01 : f32
    %11 = vector.broadcast %cst_4 : f32 to vector<8x1024xf32>
    %12 = arith.mulf %11, %8 : vector<8x1024xf32>
    %13 = arith.select %10, %8, %12 : vector<8x1024xi1>, vector<8x1024xf32>
    %c0_5 = arith.constant 0 : index
    %c0_6 = arith.constant 0 : index
    %14 = vector.load %arg3[%c0_5, %c0_6] : memref<1x1024xf32, #tpu.memory_space<vmem>>, vector<1x1024xf32>
    %c0_7 = arith.constant 0 : index
    %c0_8 = arith.constant 0 : index
    %15 = vector.load %arg4[%c0_7, %c0_8] : memref<1x1024xf32, #tpu.memory_space<vmem>>, vector<1x1024xf32>
    %cst_9 = arith.constant dense<0.000000e+00> : vector<8xf32>
    %16 = vector.multi_reduction <add>, %13, %cst_9 [1] : vector<8x1024xf32> to vector<8xf32>
    %17 = vector.shape_cast %16 : vector<8xf32> to vector<8x1xf32>
    %cst_10 = arith.constant 1.024000e+03 : f32
    %18 = vector.broadcast %cst_10 : f32 to vector<8x1xf32>
    %19 = arith.divf %17, %18 : vector<8x1xf32>
    %20 = vector.broadcast %19 : vector<8x1xf32> to vector<8x1024xf32>
    %21 = arith.subf %13, %20 : vector<8x1024xf32>
    %22 = arith.mulf %21, %21 : vector<8x1024xf32>
    %cst_11 = arith.constant dense<0.000000e+00> : vector<8xf32>
    %23 = vector.multi_reduction <add>, %22, %cst_11 [1] : vector<8x1024xf32> to vector<8xf32>
    %24 = vector.shape_cast %23 : vector<8xf32> to vector<8x1xf32>
    %cst_12 = arith.constant 1.024000e+03 : f32
    %25 = vector.broadcast %cst_12 : f32 to vector<8x1xf32>
    %26 = arith.divf %24, %25 : vector<8x1xf32>
    %27 = vector.broadcast %19 : vector<8x1xf32> to vector<8x1024xf32>
    %28 = arith.subf %13, %27 : vector<8x1024xf32>
    %cst_13 = arith.constant 9.99999974E-6 : f32
    %29 = vector.broadcast %cst_13 : f32 to vector<8x1xf32>
    %30 = arith.addf %26, %29 : vector<8x1xf32>
    %31 = math.rsqrt %30 : vector<8x1xf32>
    %32 = vector.broadcast %31 : vector<8x1xf32> to vector<8x1024xf32>
    %33 = arith.mulf %28, %32 : vector<8x1024xf32>
    %34 = vector.broadcast %14 : vector<1x1024xf32> to vector<8x1024xf32>
    %35 = arith.mulf %33, %34 : vector<8x1024xf32>
    %36 = vector.broadcast %15 : vector<1x1024xf32> to vector<8x1024xf32>
    %37 = arith.addf %35, %36 : vector<8x1024xf32>
    %38 = arith.truncf %37 : vector<8x1024xf32> to vector<8x1024xbf16>
    %c0_14 = arith.constant 0 : index
    %c0_15 = arith.constant 0 : index
    %39 = vector.load %arg5[%c0_14, %c0_15] : memref<1024x256xbf16, #tpu.memory_space<vmem>>, vector<1024x256xbf16>
    %cst_16 = arith.constant dense<0.000000e+00> : vector<8x256xf32>
    %40 = tpu.matmul %38, %39, %cst_16 {dimension_numbers = #tpu.dot_dimension_numbers<[1], [0], [0], [1], [0, 0, 1, 1], [], []>} : vector<8x1024xbf16>, vector<1024x256xbf16>, vector<8x256xf32> -> vector<8x256xf32>
    %c0_17 = arith.constant 0 : index
    %c0_18 = arith.constant 0 : index
    %41 = vector.load %arg6[%c0_17, %c0_18] : memref<1x256xf32, #tpu.memory_space<vmem>>, vector<1x256xf32>
    %42 = vector.broadcast %41 : vector<1x256xf32> to vector<8x256xf32>
    %43 = arith.addf %40, %42 : vector<8x256xf32>
    %cst_19 = arith.constant 0.000000e+00 : f32
    %44 = vector.broadcast %cst_19 : f32 to vector<8x256xf32>
    %45 = arith.cmpf oge, %43, %44 : vector<8x256xf32>
    %cst_20 = arith.constant 3.000000e-01 : f32
    %46 = vector.broadcast %cst_20 : f32 to vector<8x256xf32>
    %47 = arith.mulf %46, %43 : vector<8x256xf32>
    %48 = arith.select %45, %43, %47 : vector<8x256xi1>, vector<8x256xf32>
    %c0_21 = arith.constant 0 : index
    %c0_22 = arith.constant 0 : index
    %49 = vector.load %arg7[%c0_21, %c0_22] : memref<1x256xf32, #tpu.memory_space<vmem>>, vector<1x256xf32>
    %c0_23 = arith.constant 0 : index
    %c0_24 = arith.constant 0 : index
    %50 = vector.load %arg8[%c0_23, %c0_24] : memref<1x256xf32, #tpu.memory_space<vmem>>, vector<1x256xf32>
    %cst_25 = arith.constant dense<0.000000e+00> : vector<8xf32>
    %51 = vector.multi_reduction <add>, %48, %cst_25 [1] : vector<8x256xf32> to vector<8xf32>
    %52 = vector.shape_cast %51 : vector<8xf32> to vector<8x1xf32>
    %cst_26 = arith.constant 2.560000e+02 : f32
    %53 = vector.broadcast %cst_26 : f32 to vector<8x1xf32>
    %54 = arith.divf %52, %53 : vector<8x1xf32>
    %55 = vector.broadcast %54 : vector<8x1xf32> to vector<8x256xf32>
    %56 = arith.subf %48, %55 : vector<8x256xf32>
    %57 = arith.mulf %56, %56 : vector<8x256xf32>
    %cst_27 = arith.constant dense<0.000000e+00> : vector<8xf32>
    %58 = vector.multi_reduction <add>, %57, %cst_27 [1] : vector<8x256xf32> to vector<8xf32>
    %59 = vector.shape_cast %58 : vector<8xf32> to vector<8x1xf32>
    %cst_28 = arith.constant 2.560000e+02 : f32
    %60 = vector.broadcast %cst_28 : f32 to vector<8x1xf32>
    %61 = arith.divf %59, %60 : vector<8x1xf32>
    %62 = vector.broadcast %54 : vector<8x1xf32> to vector<8x256xf32>
    %63 = arith.subf %48, %62 : vector<8x256xf32>
    %cst_29 = arith.constant 9.99999974E-6 : f32
    %64 = vector.broadcast %cst_29 : f32 to vector<8x1xf32>
    %65 = arith.addf %61, %64 : vector<8x1xf32>
    %66 = math.rsqrt %65 : vector<8x1xf32>
    %67 = vector.broadcast %66 : vector<8x1xf32> to vector<8x256xf32>
    %68 = arith.mulf %63, %67 : vector<8x256xf32>
    %69 = vector.broadcast %49 : vector<1x256xf32> to vector<8x256xf32>
    %70 = arith.mulf %68, %69 : vector<8x256xf32>
    %71 = vector.broadcast %50 : vector<1x256xf32> to vector<8x256xf32>
    %72 = arith.addf %70, %71 : vector<8x256xf32>
    %73 = arith.truncf %72 : vector<8x256xf32> to vector<8x256xbf16>
    %c0_30 = arith.constant 0 : index
    %c0_31 = arith.constant 0 : index
    %74 = vector.load %arg9[%c0_30, %c0_31] : memref<256x128xbf16, #tpu.memory_space<vmem>>, vector<256x128xbf16>
    %cst_32 = arith.constant dense<0.000000e+00> : vector<8x128xf32>
    %75 = tpu.matmul %73, %74, %cst_32 {dimension_numbers = #tpu.dot_dimension_numbers<[1], [0], [0], [1], [0, 0, 1, 1], [], []>} : vector<8x256xbf16>, vector<256x128xbf16>, vector<8x128xf32> -> vector<8x128xf32>
    %c0_33 = arith.constant 0 : index
    %c0_34 = arith.constant 0 : index
    %76 = vector.load %arg10[%c0_33, %c0_34] : memref<1x128xf32, #tpu.memory_space<vmem>>, vector<1x128xf32>
    %77 = vector.broadcast %76 : vector<1x128xf32> to vector<8x128xf32>
    %78 = arith.addf %75, %77 : vector<8x128xf32>
    %c0_35 = arith.constant 0 : index
    %c0_36 = arith.constant 0 : index
    %79 = vector.load %arg11[%c0_35, %c0_36] : memref<1x128xf32, #tpu.memory_space<vmem>>, vector<1x128xf32>
    %c0_37 = arith.constant 0 : index
    %c0_38 = arith.constant 0 : index
    %80 = vector.load %arg12[%c0_37, %c0_38] : memref<1x128xf32, #tpu.memory_space<vmem>>, vector<1x128xf32>
    %81 = vector.extract_strided_slice %78 {offsets = [0, 0], sizes = [8, 32], strides = [1, 1]} : vector<8x128xf32> to vector<8x32xf32>
    %82 = vector.extract_strided_slice %79 {offsets = [0, 0], sizes = [1, 32], strides = [1, 1]} : vector<1x128xf32> to vector<1x32xf32>
    %83 = vector.extract_strided_slice %80 {offsets = [0, 0], sizes = [1, 32], strides = [1, 1]} : vector<1x128xf32> to vector<1x32xf32>
    %cst_39 = arith.constant dense<0.000000e+00> : vector<8xf32>
    %84 = vector.multi_reduction <add>, %81, %cst_39 [1] : vector<8x32xf32> to vector<8xf32>
    %85 = vector.shape_cast %84 : vector<8xf32> to vector<8x1xf32>
    %cst_40 = arith.constant 3.200000e+01 : f32
    %86 = vector.broadcast %cst_40 : f32 to vector<8x1xf32>
    %87 = arith.divf %85, %86 : vector<8x1xf32>
    %88 = vector.broadcast %87 : vector<8x1xf32> to vector<8x32xf32>
    %89 = arith.subf %81, %88 : vector<8x32xf32>
    %90 = arith.mulf %89, %89 : vector<8x32xf32>
    %cst_41 = arith.constant dense<0.000000e+00> : vector<8xf32>
    %91 = vector.multi_reduction <add>, %90, %cst_41 [1] : vector<8x32xf32> to vector<8xf32>
    %92 = vector.shape_cast %91 : vector<8xf32> to vector<8x1xf32>
    %cst_42 = arith.constant 3.200000e+01 : f32
    %93 = vector.broadcast %cst_42 : f32 to vector<8x1xf32>
    %94 = arith.divf %92, %93 : vector<8x1xf32>
    %95 = vector.broadcast %87 : vector<8x1xf32> to vector<8x32xf32>
    %96 = arith.subf %81, %95 : vector<8x32xf32>
    %cst_43 = arith.constant 9.99999974E-6 : f32
    %97 = vector.broadcast %cst_43 : f32 to vector<8x1xf32>
    %98 = arith.addf %94, %97 : vector<8x1xf32>
    %99 = math.rsqrt %98 : vector<8x1xf32>
    %100 = vector.broadcast %99 : vector<8x1xf32> to vector<8x32xf32>
    %101 = arith.mulf %96, %100 : vector<8x32xf32>
    %102 = vector.broadcast %82 : vector<1x32xf32> to vector<8x32xf32>
    %103 = arith.mulf %101, %102 : vector<8x32xf32>
    %104 = vector.broadcast %83 : vector<1x32xf32> to vector<8x32xf32>
    %105 = arith.addf %103, %104 : vector<8x32xf32>
    %106 = vector.extract_strided_slice %78 {offsets = [0, 32], sizes = [8, 32], strides = [1, 1]} : vector<8x128xf32> to vector<8x32xf32>
    %cst_44 = arith.constant 0.000000e+00 : f32
    %107 = vector.broadcast %cst_44 : f32 to vector<8x32xf32>
    %108 = arith.cmpf oge, %106, %107 : vector<8x32xf32>
    %cst_45 = arith.constant 3.000000e-01 : f32
    %109 = vector.broadcast %cst_45 : f32 to vector<8x32xf32>
    %110 = arith.mulf %109, %106 : vector<8x32xf32>
    %111 = arith.select %108, %106, %110 : vector<8x32xi1>, vector<8x32xf32>
    %112 = vector.extract_strided_slice %79 {offsets = [0, 32], sizes = [1, 32], strides = [1, 1]} : vector<1x128xf32> to vector<1x32xf32>
    %113 = vector.extract_strided_slice %80 {offsets = [0, 32], sizes = [1, 32], strides = [1, 1]} : vector<1x128xf32> to vector<1x32xf32>
    %cst_46 = arith.constant dense<0.000000e+00> : vector<8xf32>
    %114 = vector.multi_reduction <add>, %111, %cst_46 [1] : vector<8x32xf32> to vector<8xf32>
    %115 = vector.shape_cast %114 : vector<8xf32> to vector<8x1xf32>
    %cst_47 = arith.constant 3.200000e+01 : f32
    %116 = vector.broadcast %cst_47 : f32 to vector<8x1xf32>
    %117 = arith.divf %115, %116 : vector<8x1xf32>
    %118 = vector.broadcast %117 : vector<8x1xf32> to vector<8x32xf32>
    %119 = arith.subf %111, %118 : vector<8x32xf32>
    %120 = arith.mulf %119, %119 : vector<8x32xf32>
    %cst_48 = arith.constant dense<0.000000e+00> : vector<8xf32>
    %121 = vector.multi_reduction <add>, %120, %cst_48 [1] : vector<8x32xf32> to vector<8xf32>
    %122 = vector.shape_cast %121 : vector<8xf32> to vector<8x1xf32>
    %cst_49 = arith.constant 3.200000e+01 : f32
    %123 = vector.broadcast %cst_49 : f32 to vector<8x1xf32>
    %124 = arith.divf %122, %123 : vector<8x1xf32>
    %125 = vector.broadcast %117 : vector<8x1xf32> to vector<8x32xf32>
    %126 = arith.subf %111, %125 : vector<8x32xf32>
    %cst_50 = arith.constant 9.99999974E-6 : f32
    %127 = vector.broadcast %cst_50 : f32 to vector<8x1xf32>
    %128 = arith.addf %124, %127 : vector<8x1xf32>
    %129 = math.rsqrt %128 : vector<8x1xf32>
    %130 = vector.broadcast %129 : vector<8x1xf32> to vector<8x32xf32>
    %131 = arith.mulf %126, %130 : vector<8x32xf32>
    %132 = vector.broadcast %112 : vector<1x32xf32> to vector<8x32xf32>
    %133 = arith.mulf %131, %132 : vector<8x32xf32>
    %134 = vector.broadcast %113 : vector<1x32xf32> to vector<8x32xf32>
    %135 = arith.addf %133, %134 : vector<8x32xf32>
    %136 = vector.extract_strided_slice %78 {offsets = [0, 64], sizes = [8, 32], strides = [1, 1]} : vector<8x128xf32> to vector<8x32xf32>
    %cst_51 = arith.constant 0.000000e+00 : f32
    %137 = vector.broadcast %cst_51 : f32 to vector<8x32xf32>
    %138 = arith.cmpf oge, %136, %137 : vector<8x32xf32>
    %cst_52 = arith.constant 3.000000e-01 : f32
    %139 = vector.broadcast %cst_52 : f32 to vector<8x32xf32>
    %140 = arith.mulf %139, %136 : vector<8x32xf32>
    %141 = arith.select %138, %136, %140 : vector<8x32xi1>, vector<8x32xf32>
    %142 = vector.extract_strided_slice %79 {offsets = [0, 64], sizes = [1, 32], strides = [1, 1]} : vector<1x128xf32> to vector<1x32xf32>
    %143 = vector.extract_strided_slice %80 {offsets = [0, 64], sizes = [1, 32], strides = [1, 1]} : vector<1x128xf32> to vector<1x32xf32>
    %cst_53 = arith.constant dense<0.000000e+00> : vector<8xf32>
    %144 = vector.multi_reduction <add>, %141, %cst_53 [1] : vector<8x32xf32> to vector<8xf32>
    %145 = vector.shape_cast %144 : vector<8xf32> to vector<8x1xf32>
    %cst_54 = arith.constant 3.200000e+01 : f32
    %146 = vector.broadcast %cst_54 : f32 to vector<8x1xf32>
    %147 = arith.divf %145, %146 : vector<8x1xf32>
    %148 = vector.broadcast %147 : vector<8x1xf32> to vector<8x32xf32>
    %149 = arith.subf %141, %148 : vector<8x32xf32>
    %150 = arith.mulf %149, %149 : vector<8x32xf32>
    %cst_55 = arith.constant dense<0.000000e+00> : vector<8xf32>
    %151 = vector.multi_reduction <add>, %150, %cst_55 [1] : vector<8x32xf32> to vector<8xf32>
    %152 = vector.shape_cast %151 : vector<8xf32> to vector<8x1xf32>
    %cst_56 = arith.constant 3.200000e+01 : f32
    %153 = vector.broadcast %cst_56 : f32 to vector<8x1xf32>
    %154 = arith.divf %152, %153 : vector<8x1xf32>
    %155 = vector.broadcast %147 : vector<8x1xf32> to vector<8x32xf32>
    %156 = arith.subf %141, %155 : vector<8x32xf32>
    %cst_57 = arith.constant 9.99999974E-6 : f32
    %157 = vector.broadcast %cst_57 : f32 to vector<8x1xf32>
    %158 = arith.addf %154, %157 : vector<8x1xf32>
    %159 = math.rsqrt %158 : vector<8x1xf32>
    %160 = vector.broadcast %159 : vector<8x1xf32> to vector<8x32xf32>
    %161 = arith.mulf %156, %160 : vector<8x32xf32>
    %162 = vector.broadcast %142 : vector<1x32xf32> to vector<8x32xf32>
    %163 = arith.mulf %161, %162 : vector<8x32xf32>
    %164 = vector.broadcast %143 : vector<1x32xf32> to vector<8x32xf32>
    %165 = arith.addf %163, %164 : vector<8x32xf32>
    %166 = arith.truncf %105 : vector<8x32xf32> to vector<8x32xbf16>
    %c0_58 = arith.constant 0 : index
    %c0_59 = arith.constant 0 : index
    %167 = vector.load %arg13[%c0_58, %c0_59] : memref<32x128xbf16, #tpu.memory_space<vmem>>, vector<32x128xbf16>
    %cst_60 = arith.constant dense<0.000000e+00> : vector<8x128xf32>
    %168 = tpu.matmul %166, %167, %cst_60 {dimension_numbers = #tpu.dot_dimension_numbers<[1], [0], [0], [1], [0, 0, 1, 1], [], []>} : vector<8x32xbf16>, vector<32x128xbf16>, vector<8x128xf32> -> vector<8x128xf32>
    %169 = arith.truncf %135 : vector<8x32xf32> to vector<8x32xbf16>
    %c0_61 = arith.constant 0 : index
    %c0_62 = arith.constant 0 : index
    %170 = vector.load %arg14[%c0_61, %c0_62] : memref<32x128xbf16, #tpu.memory_space<vmem>>, vector<32x128xbf16>
    %cst_63 = arith.constant dense<0.000000e+00> : vector<8x128xf32>
    %171 = tpu.matmul %169, %170, %cst_63 {dimension_numbers = #tpu.dot_dimension_numbers<[1], [0], [0], [1], [0, 0, 1, 1], [], []>} : vector<8x32xbf16>, vector<32x128xbf16>, vector<8x128xf32> -> vector<8x128xf32>
    %172 = arith.addf %168, %171 : vector<8x128xf32>
    %173 = arith.truncf %165 : vector<8x32xf32> to vector<8x32xbf16>
    %c0_64 = arith.constant 0 : index
    %c0_65 = arith.constant 0 : index
    %174 = vector.load %arg15[%c0_64, %c0_65] : memref<32x128xbf16, #tpu.memory_space<vmem>>, vector<32x128xbf16>
    %cst_66 = arith.constant dense<0.000000e+00> : vector<8x128xf32>
    %175 = tpu.matmul %173, %174, %cst_66 {dimension_numbers = #tpu.dot_dimension_numbers<[1], [0], [0], [1], [0, 0, 1, 1], [], []>} : vector<8x32xbf16>, vector<32x128xbf16>, vector<8x128xf32> -> vector<8x128xf32>
    %176 = arith.addf %172, %175 : vector<8x128xf32>
    %c0_67 = arith.constant 0 : index
    %c0_68 = arith.constant 0 : index
    %177 = vector.load %arg16[%c0_67, %c0_68] : memref<1x128xf32, #tpu.memory_space<vmem>>, vector<1x128xf32>
    %178 = vector.broadcast %177 : vector<1x128xf32> to vector<8x128xf32>
    %179 = arith.addf %176, %178 : vector<8x128xf32>
    %cst_69 = arith.constant 0.000000e+00 : f32
    %180 = vector.broadcast %cst_69 : f32 to vector<8x128xf32>
    %181 = arith.subf %180, %179 : vector<8x128xf32>
    %182 = math.exp %181 : vector<8x128xf32>
    %cst_70 = arith.constant 1.000000e+00 : f32
    %183 = vector.broadcast %cst_70 : f32 to vector<8x128xf32>
    %184 = arith.addf %183, %182 : vector<8x128xf32>
    %cst_71 = arith.constant 1.000000e+00 : f32
    %185 = vector.broadcast %cst_71 : f32 to vector<8x128xf32>
    %186 = arith.divf %185, %184 : vector<8x128xf32>
    %c0_72 = arith.constant 0 : index
    %c0_73 = arith.constant 0 : index
    %187 = vector.load %arg17[%c0_72, %c0_73] : memref<8x128xf32, #tpu.memory_space<vmem>>, vector<8x128xf32>
    tpu.vector_store %arg17[%c0_72, %c0_73], %186 {strides = array<i32>} : memref<8x128xf32, #tpu.memory_space<vmem>>, vector<8x128xf32>,
    return
  }
  func.func @transform_0(%arg0: i32) -> (i32, i32, i32) {
    %c0_i32 = arith.constant 0 : i32
    %c0_i32_0 = arith.constant 0 : i32
    %c0_i32_1 = arith.constant 0 : i32
    %c0_i32_2 = arith.constant 0 : i32
    return %c0_i32, %c0_i32_0, %c0_i32_1 : i32, i32, i32
  }
  func.func @transform_1(%arg0: i32) -> (i32, i32) {
    %c0_i32 = arith.constant 0 : i32
    %c0_i32_0 = arith.constant 0 : i32
    %c0_i32_1 = arith.constant 0 : i32
    return %c0_i32, %c0_i32_0 : i32, i32
  }
  func.func @transform_2(%arg0: i32) -> (i32, i32) {
    %c0_i32 = arith.constant 0 : i32
    %c0_i32_0 = arith.constant 0 : i32
    %c0_i32_1 = arith.constant 0 : i32
    return %c0_i32, %c0_i32_0 : i32, i32
  }
  func.func @transform_3(%arg0: i32) -> (i32, i32) {
    %c0_i32 = arith.constant 0 : i32
    %c0_i32_0 = arith.constant 0 : i32
    %c0_i32_1 = arith.constant 0 : i32
    return %c0_i32, %c0_i32_0 : i32, i32
  }
  func.func @transform_4(%arg0: i32) -> (i32, i32) {
    %c0_i32 = arith.constant 0 : i32
    %c0_i32_0 = arith.constant 0 : i32
    %c0_i32_1 = arith.constant 0 : i32
    return %c0_i32, %c0_i32_0 : i32, i32
  }
  func.func @transform_5(%arg0: i32) -> (i32, i32) {
    %c0_i32 = arith.constant 0 : i32
    %c0_i32_0 = arith.constant 0 : i32
    %c0_i32_1 = arith.constant 0 : i32
    return %c0_i32, %c0_i32_0 : i32, i32
  }
  func.func @transform_6(%arg0: i32) -> (i32, i32) {
    %c0_i32 = arith.constant 0 : i32
    %c0_i32_0 = arith.constant 0 : i32
    %c0_i32_1 = arith.constant 0 : i32
    return %c0_i32, %c0_i32_0 : i32, i32
  }
  func.func @transform_7(%arg0: i32) -> (i32, i32) {
    %c0_i32 = arith.constant 0 : i32
    %c0_i32_0 = arith.constant 0 : i32
    %c0_i32_1 = arith.constant 0 : i32
    return %c0_i32, %c0_i32_0 : i32, i32
  }
  func.func @transform_8(%arg0: i32) -> (i32, i32) {
    %c0_i32 = arith.constant 0 : i32
    %c0_i32_0 = arith.constant 0 : i32
    %c0_i32_1 = arith.constant 0 : i32
    return %c0_i32, %c0_i32_0 : i32, i32
  }
  func.func @transform_9(%arg0: i32) -> (i32, i32) {
    %c0_i32 = arith.constant 0 : i32
    %c0_i32_0 = arith.constant 0 : i32
    %c0_i32_1 = arith.constant 0 : i32
    return %c0_i32, %c0_i32_0 : i32, i32
  }
  func.func @transform_10(%arg0: i32) -> (i32, i32) {
    %c0_i32 = arith.constant 0 : i32
    %c0_i32_0 = arith.constant 0 : i32
    %c0_i32_1 = arith.constant 0 : i32
    return %c0_i32, %c0_i32_0 : i32, i32
  }
  func.func @transform_11(%arg0: i32) -> (i32, i32) {
    %c0_i32 = arith.constant 0 : i32
    %c0_i32_0 = arith.constant 0 : i32
    %c0_i32_1 = arith.constant 0 : i32
    return %c0_i32, %c0_i32_0 : i32, i32
  }
  func.func @transform_12(%arg0: i32) -> (i32, i32) {
    %c0_i32 = arith.constant 0 : i32
    %c0_i32_0 = arith.constant 0 : i32
    %c0_i32_1 = arith.constant 0 : i32
    return %c0_i32, %c0_i32_0 : i32, i32
  }
  func.func @transform_13(%arg0: i32) -> (i32, i32) {
    %c0_i32 = arith.constant 0 : i32
    %c0_i32_0 = arith.constant 0 : i32
    %c0_i32_1 = arith.constant 0 : i32
    return %c0_i32, %c0_i32_0 : i32, i32
  }
  func.func @transform_14(%arg0: i32) -> (i32, i32) {
    %c0_i32 = arith.constant 0 : i32
    %c0_i32_0 = arith.constant 0 : i32
    %c0_i32_1 = arith.constant 0 : i32
    return %c0_i32, %c0_i32_0 : i32, i32
  }
  func.func @transform_15(%arg0: i32) -> (i32, i32) {
    %c0_i32 = arith.constant 0 : i32
    %c0_i32_0 = arith.constant 0 : i32
    %c0_i32_1 = arith.constant 0 : i32
    return %c0_i32, %c0_i32_0 : i32, i32
  }
  func.func @transform_16(%arg0: i32) -> (i32, i32) {
    %c0_i32 = arith.constant 0 : i32
    %c0_i32_0 = arith.constant 0 : i32
    %c0_i32_1 = arith.constant 0 : i32
    return %c0_i32, %c0_i32_0 : i32, i32
  }
}

</mosaic_0001>

<bundles_post_ra>
// kernel: forward_pallas.2
= control target key start
LH: loop header
LB: loop body
LE: loop exit
PB: predicated region body
PF: predicated region fallthrough
CT: control target
= control target key end

     0   :  { %s8096_s15 = smov 0   ;;  %s8098_s16 = smov 0   ;;  %s10194_s0 = inlined_call_operand.vmem [shape: bf16[8,512], index: 0, kind: input, shape index: {}]   ;;  %s10195_s1 = inlined_call_operand.vmem [shape: bf16[512,4096], index: 1, kind: input, shape index: {}]   ;;  %s10196_s2 = inlined_call_operand.vmem [shape: f32[1,4096], index: 2, kind: input, shape index: {}]   ;;  %s10197_s3 = inlined_call_operand.vmem [shape: bf16[4096,1024], index: 3, kind: input, shape index: {}]   ;;  %s10198_s4 = inlined_call_operand.vmem [shape: f32[2,8,1024], index: 4, kind: output, shape index: {}]  }
   0x1   :  { %s8100_s17 = smov 0   ;;  %s8102_s18 = smov 0  }
   0x2   :  { %s8104_s19 = smov 0   ;;  %s8106_s20 = smov 0  }
   0x3   :  { %s8108_s21 = smov 0  }
   0x4 LB: > { %s23_s22 = sadd.s32 1, %s8060_s19  ;;  %s26_s23 = sadd.s32 1, %s8064_s20  ;;  %s8068_s21 = sphi %s8108_s21, %s14_s21   ;;  %s8064_s20 = sphi %s8106_s20, %s10204_s20   ;;  %s8060_s19 = sphi %s8104_s19, %s10203_s19   ;;  %s8056_s18 = sphi %s8102_s18, %s10202_s18   ;;  %s8052_s17 = sphi %s8100_s17, %s10201_s17   ;;  %s8048_s16 = sphi %s8098_s16, %s10200_s16   ;;  %s8044_s15 = sphi %s8096_s15, %s10199_s15  }
   0x5   : > { %p24_p0 = scmp.ge.s32.totalorder %s23_s22, 2  ;;  %p61_p1 = scmp.ne.s32.totalorder %s8048_s16, %s8044_s15 }
   0x6   : > { %p62_p2 = scmp.eq.s32.totalorder %s8068_s21, 0  ;;  %s54_s25 = sadd.s32 1, %s8048_s16 }
   0x7   : > { %s10206_s22 = smov (%p24_p0, %s23_s22), 0  ;;  %s10208_s23 = smov (!%p24_p0, %s26_s23), %s8064_s20 }
   0x8   : > { %p63_p3 = por %p62_p2, %p61_p1  ;;  %p28_p4 = scmp.ge.s32.totalorder %s10208_s23, 2 }
   0x9   : > { %p7136_p6 = scmp.ge.s32.totalorder %s8068_s21, 4 }
   0xa   : > { %s10210_s23 = smov (%p28_p4, %s10208_s23), 0 }
   0xb   : > { %s51_s24 = ssub.s32 %s8064_s20, %s10210_s23  ;;  %172 = sbr.rel (%p7136_p6) target bundleno = 278 (0x116), region = 20 }
   0xc   : > { %p52_p5 = scmp.eq.s32.totalorder %s51_s24, 0 }
   0xe   : > { %s8145_s26 = scalar_select %p52_p5, %s8048_s16, %s54_s25  }
  0x12   : > { %175 = sbr.rel (!%p63_p3) target bundleno = 278 (0x116), region = 24  ;;  %s177_s27 = sand.u32 (%p63_p3), 1, %s8048_s16  }
  0x13   : > { %s7926_s28 = sshll.u32 (%p63_p3), %s8064_s20, 6  ;;  %s7137_s29 = sshll.u32 (%p63_p3), %s177_s27, 12 }
  0x14   : > { %s8153_s6 = scalar_lea.vmem (%p63_p3), %s10195_s1, %s7926_s28  ;;  %s8158_s7 = scalar_lea.vmem (%p63_p3), [#allocation2], %s7137_s29 }
  0x15   : > { %v195_v0 = vld [vmem:[%s8153_s6] sm:$0xff] (%p63_p3)  ;;  %v197_v1 = vld [vmem:[%s8153_s6 + $0x8] sm:$0xff] (%p63_p3)  ;;  %v199_v2 = vld [vmem:[%s8153_s6 + $0x10] sm:$0xff] (%p63_p3) }
  0x16   : > { %196 = vst [vmem:[%s8158_s7] sm:$0xff] (%p63_p3), %v195_v0  ;;  %198 = vst [vmem:[%s8158_s7 + $0x8] sm:$0xff] (%p63_p3), %v197_v1  ;;  %v201_v3 = vld [vmem:[%s8153_s6 + $0x18] sm:$0xff] (%p63_p3)  ;;  %v203_v4 = vld [vmem:[%s8153_s6 + $0x20] sm:$0xff] (%p63_p3) }
  0x17   : > { %200 = vst [vmem:[%s8158_s7 + $0x10] sm:$0xff] (%p63_p3), %v199_v2  ;;  %v205_v5 = vld [vmem:[%s8153_s6 + $0x28] sm:$0xff] (%p63_p3)  ;;  %202 = vst [vmem:[%s8158_s7 + $0x18] sm:$0xff] (%p63_p3), %v201_v3  ;;  %v207_v6 = vld [vmem:[%s8153_s6 + $0x30] sm:$0xff] (%p63_p3) }
  0x18   : > { %204 = vst [vmem:[%s8158_s7 + $0x20] sm:$0xff] (%p63_p3), %v203_v4  ;;  %206 = vst [vmem:[%s8158_s7 + $0x28] sm:$0xff] (%p63_p3), %v205_v5  ;;  %v209_v7 = vld [vmem:[%s8153_s6 + $0x38] sm:$0xff] (%p63_p3)  ;;  %v211_v8 = vld [vmem:[%s8153_s6 + $0x80] sm:$0xff] (%p63_p3) }
  0x19   : > { %208 = vst [vmem:[%s8158_s7 + $0x30] sm:$0xff] %v207_v6  ;;  %210 = vst [vmem:[%s8158_s7 + $0x38] sm:$0xff] %v209_v7  ;;  %v213_v9 = vld [vmem:[%s8153_s6 + $0x88] sm:$0xff]  ;;  %v215_v10 = vld [vmem:[%s8153_s6 + $0x90] sm:$0xff] }
  0x1a   : > { %212 = vst [vmem:[%s8158_s7 + $0x40] sm:$0xff] %v211_v8  ;;  %v217_v11 = vld [vmem:[%s8153_s6 + $0x98] sm:$0xff]  ;;  %214 = vst [vmem:[%s8158_s7 + $0x48] sm:$0xff] %v213_v9  ;;  %v219_v12 = vld [vmem:[%s8153_s6 + $0xa0] sm:$0xff] }
  0x1b   : > { %216 = vst [vmem:[%s8158_s7 + $0x50] sm:$0xff] %v215_v10  ;;  %218 = vst [vmem:[%s8158_s7 + $0x58] sm:$0xff] %v217_v11  ;;  %v221_v13 = vld [vmem:[%s8153_s6 + $0xa8] sm:$0xff]  ;;  %v223_v14 = vld [vmem:[%s8153_s6 + $0xb0] sm:$0xff] }
  0x1c   : > { %220 = vst [vmem:[%s8158_s7 + $0x60] sm:$0xff] %v219_v12  ;;  %222 = vst [vmem:[%s8158_s7 + $0x68] sm:$0xff] %v221_v13  ;;  %v225_v15 = vld [vmem:[%s8153_s6 + $0xb8] sm:$0xff]  ;;  %v227_v16 = vld [vmem:[%s8153_s6 + $0x100] sm:$0xff] }
  0x1d   : > { %224 = vst [vmem:[%s8158_s7 + $0x70] sm:$0xff] %v223_v14  ;;  %v229_v17 = vld [vmem:[%s8153_s6 + $0x108] sm:$0xff]  ;;  %226 = vst [vmem:[%s8158_s7 + $0x78] sm:$0xff] %v225_v15  ;;  %v231_v18 = vld [vmem:[%s8153_s6 + $0x110] sm:$0xff] }
  0x1e   : > { %228 = vst [vmem:[%s8158_s7 + $0x80] sm:$0xff] %v227_v16  ;;  %230 = vst [vmem:[%s8158_s7 + $0x88] sm:$0xff] %v229_v17  ;;  %v233_v19 = vld [vmem:[%s8153_s6 + $0x118] sm:$0xff]  ;;  %v235_v20 = vld [vmem:[%s8153_s6 + $0x120] sm:$0xff] }
  0x1f   : > { %232 = vst [vmem:[%s8158_s7 + $0x90] sm:$0xff] %v231_v18  ;;  %234 = vst [vmem:[%s8158_s7 + $0x98] sm:$0xff] %v233_v19  ;;  %v237_v21 = vld [vmem:[%s8153_s6 + $0x128] sm:$0xff]  ;;  %v239_v22 = vld [vmem:[%s8153_s6 + $0x130] sm:$0xff] }
  0x20   : > { %236 = vst [vmem:[%s8158_s7 + $0xa0] sm:$0xff] %v235_v20  ;;  %v241_v23 = vld [vmem:[%s8153_s6 + $0x138] sm:$0xff]  ;;  %238 = vst [vmem:[%s8158_s7 + $0xa8] sm:$0xff] %v237_v21  ;;  %v243_v24 = vld [vmem:[%s8153_s6 + $0x180] sm:$0xff] }
  0x21   : > { %240 = vst [vmem:[%s8158_s7 + $0xb0] sm:$0xff] %v239_v22  ;;  %242 = vst [vmem:[%s8158_s7 + $0xb8] sm:$0xff] %v241_v23  ;;  %v245_v25 = vld [vmem:[%s8153_s6 + $0x188] sm:$0xff]  ;;  %v247_v26 = vld [vmem:[%s8153_s6 + $0x190] sm:$0xff] }
  0x22   : > { %244 = vst [vmem:[%s8158_s7 + $0xc0] sm:$0xff] %v243_v24  ;;  %246 = vst [vmem:[%s8158_s7 + $0xc8] sm:$0xff] %v245_v25  ;;  %v249_v27 = vld [vmem:[%s8153_s6 + $0x198] sm:$0xff]  ;;  %v251_v28 = vld [vmem:[%s8153_s6 + $0x1a0] sm:$0xff] }
  0x23   : > { %248 = vst [vmem:[%s8158_s7 + $0xd0] sm:$0xff] %v247_v26  ;;  %v253_v29 = vld [vmem:[%s8153_s6 + $0x1a8] sm:$0xff]  ;;  %250 = vst [vmem:[%s8158_s7 + $0xd8] sm:$0xff] %v249_v27  ;;  %v255_v30 = vld [vmem:[%s8153_s6 + $0x1b0] sm:$0xff] }
  0x24   : > { %252 = vst [vmem:[%s8158_s7 + $0xe0] sm:$0xff] %v251_v28  ;;  %254 = vst [vmem:[%s8158_s7 + $0xe8] sm:$0xff] %v253_v29  ;;  %v257_v31 = vld [vmem:[%s8153_s6 + $0x1b8] sm:$0xff]  ;;  %v259_v32 = vld [vmem:[%s8153_s6 + $0x200] sm:$0xff] }
  0x25   : > { %256 = vst [vmem:[%s8158_s7 + $0xf0] sm:$0xff] %v255_v30  ;;  %258 = vst [vmem:[%s8158_s7 + $0xf8] sm:$0xff] %v257_v31  ;;  %v261_v33 = vld [vmem:[%s8153_s6 + $0x208] sm:$0xff]  ;;  %v263_v34 = vld [vmem:[%s8153_s6 + $0x210] sm:$0xff] }
  0x26   : > { %260 = vst [vmem:[%s8158_s7 + $0x100] sm:$0xff] %v259_v32  ;;  %v265_v35 = vld [vmem:[%s8153_s6 + $0x218] sm:$0xff]  ;;  %262 = vst [vmem:[%s8158_s7 + $0x108] sm:$0xff] %v261_v33  ;;  %v267_v36 = vld [vmem:[%s8153_s6 + $0x220] sm:$0xff] }
  0x27   : > { %264 = vst [vmem:[%s8158_s7 + $0x110] sm:$0xff] %v263_v34  ;;  %266 = vst [vmem:[%s8158_s7 + $0x118] sm:$0xff] %v265_v35  ;;  %v269_v37 = vld [vmem:[%s8153_s6 + $0x228] sm:$0xff]  ;;  %v271_v38 = vld [vmem:[%s8153_s6 + $0x230] sm:$0xff] }
  0x28   : > { %268 = vst [vmem:[%s8158_s7 + $0x120] sm:$0xff] %v267_v36  ;;  %270 = vst [vmem:[%s8158_s7 + $0x128] sm:$0xff] %v269_v37  ;;  %v273_v39 = vld [vmem:[%s8153_s6 + $0x238] sm:$0xff]  ;;  %v275_v40 = vld [vmem:[%s8153_s6 + $0x280] sm:$0xff] }
  0x29   : > { %272 = vst [vmem:[%s8158_s7 + $0x130] sm:$0xff] %v271_v38  ;;  %v277_v41 = vld [vmem:[%s8153_s6 + $0x288] sm:$0xff]  ;;  %274 = vst [vmem:[%s8158_s7 + $0x138] sm:$0xff] %v273_v39  ;;  %v279_v42 = vld [vmem:[%s8153_s6 + $0x290] sm:$0xff] }
  0x2a   : > { %276 = vst [vmem:[%s8158_s7 + $0x140] sm:$0xff] %v275_v40  ;;  %278 = vst [vmem:[%s8158_s7 + $0x148] sm:$0xff] %v277_v41  ;;  %v281_v43 = vld [vmem:[%s8153_s6 + $0x298] sm:$0xff]  ;;  %v283_v44 = vld [vmem:[%s8153_s6 + $0x2a0] sm:$0xff] }
  0x2b   : > { %280 = vst [vmem:[%s8158_s7 + $0x150] sm:$0xff] %v279_v42  ;;  %282 = vst [vmem:[%s8158_s7 + $0x158] sm:$0xff] %v281_v43  ;;  %v285_v45 = vld [vmem:[%s8153_s6 + $0x2a8] sm:$0xff]  ;;  %v287_v46 = vld [vmem:[%s8153_s6 + $0x2b0] sm:$0xff] }
  0x2c   : > { %284 = vst [vmem:[%s8158_s7 + $0x160] sm:$0xff] %v283_v44  ;;  %v289_v47 = vld [vmem:[%s8153_s6 + $0x2b8] sm:$0xff]  ;;  %286 = vst [vmem:[%s8158_s7 + $0x168] sm:$0xff] %v285_v45  ;;  %v291_v48 = vld [vmem:[%s8153_s6 + $0x300] sm:$0xff] }
  0x2d   : > { %288 = vst [vmem:[%s8158_s7 + $0x170] sm:$0xff] %v287_v46  ;;  %290 = vst [vmem:[%s8158_s7 + $0x178] sm:$0xff] %v289_v47  ;;  %v293_v49 = vld [vmem:[%s8153_s6 + $0x308] sm:$0xff]  ;;  %v295_v50 = vld [vmem:[%s8153_s6 + $0x310] sm:$0xff] }
  0x2e   : > { %292 = vst [vmem:[%s8158_s7 + $0x180] sm:$0xff] %v291_v48  ;;  %294 = vst [vmem:[%s8158_s7 + $0x188] sm:$0xff] %v293_v49  ;;  %v297_v51 = vld [vmem:[%s8153_s6 + $0x318] sm:$0xff]  ;;  %v299_v52 = vld [vmem:[%s8153_s6 + $0x320] sm:$0xff] }
  0x2f   : > { %296 = vst [vmem:[%s8158_s7 + $0x190] sm:$0xff] %v295_v50  ;;  %v301_v53 = vld [vmem:[%s8153_s6 + $0x328] sm:$0xff]  ;;  %298 = vst [vmem:[%s8158_s7 + $0x198] sm:$0xff] %v297_v51  ;;  %v303_v54 = vld [vmem:[%s8153_s6 + $0x330] sm:$0xff] }
  0x30   : > { %300 = vst [vmem:[%s8158_s7 + $0x1a0] sm:$0xff] %v299_v52  ;;  %302 = vst [vmem:[%s8158_s7 + $0x1a8] sm:$0xff] %v301_v53  ;;  %v305_v55 = vld [vmem:[%s8153_s6 + $0x338] sm:$0xff]  ;;  %v307_v56 = vld [vmem:[%s8153_s6 + $0x380] sm:$0xff] }
  0x31   : > { %304 = vst [vmem:[%s8158_s7 + $0x1b0] sm:$0xff] %v303_v54  ;;  %306 = vst [vmem:[%s8158_s7 + $0x1b8] sm:$0xff] %v305_v55  ;;  %v309_v57 = vld [vmem:[%s8153_s6 + $0x388] sm:$0xff]  ;;  %v311_v58 = vld [vmem:[%s8153_s6 + $0x390] sm:$0xff] }
  0x32   : > { %308 = vst [vmem:[%s8158_s7 + $0x1c0] sm:$0xff] %v307_v56  ;;  %v313_v59 = vld [vmem:[%s8153_s6 + $0x398] sm:$0xff]  ;;  %310 = vst [vmem:[%s8158_s7 + $0x1c8] sm:$0xff] %v309_v57  ;;  %v315_v60 = vld [vmem:[%s8153_s6 + $0x3a0] sm:$0xff] }
  0x33   : > { %312 = vst [vmem:[%s8158_s7 + $0x1d0] sm:$0xff] %v311_v58  ;;  %314 = vst [vmem:[%s8158_s7 + $0x1d8] sm:$0xff] %v313_v59  ;;  %v317_v61 = vld [vmem:[%s8153_s6 + $0x3a8] sm:$0xff]  ;;  %v319_v62 = vld [vmem:[%s8153_s6 + $0x3b0] sm:$0xff] }
  0x34   : > { %316 = vst [vmem:[%s8158_s7 + $0x1e0] sm:$0xff] %v315_v60  ;;  %318 = vst [vmem:[%s8158_s7 + $0x1e8] sm:$0xff] %v317_v61  ;;  %v321_v63 = vld [vmem:[%s8153_s6 + $0x3b8] sm:$0xff]  ;;  %v323_v0 = vld [vmem:[%s8153_s6 + $0x400] sm:$0xff] }
  0x35   : > { %320 = vst [vmem:[%s8158_s7 + $0x1f0] sm:$0xff] %v319_v62  ;;  %v325_v1 = vld [vmem:[%s8153_s6 + $0x408] sm:$0xff]  ;;  %322 = vst [vmem:[%s8158_s7 + $0x1f8] sm:$0xff] %v321_v63  ;;  %v327_v2 = vld [vmem:[%s8153_s6 + $0x410] sm:$0xff] }
  0x36   : > { %324 = vst [vmem:[%s8158_s7 + $0x200] sm:$0xff] %v323_v0  ;;  %326 = vst [vmem:[%s8158_s7 + $0x208] sm:$0xff] %v325_v1  ;;  %v329_v3 = vld [vmem:[%s8153_s6 + $0x418] sm:$0xff]  ;;  %v331_v4 = vld [vmem:[%s8153_s6 + $0x420] sm:$0xff] }
  0x37   : > { %328 = vst [vmem:[%s8158_s7 + $0x210] sm:$0xff] %v327_v2  ;;  %330 = vst [vmem:[%s8158_s7 + $0x218] sm:$0xff] %v329_v3  ;;  %v333_v5 = vld [vmem:[%s8153_s6 + $0x428] sm:$0xff]  ;;  %v335_v6 = vld [vmem:[%s8153_s6 + $0x430] sm:$0xff] }
  0x38   : > { %332 = vst [vmem:[%s8158_s7 + $0x220] sm:$0xff] %v331_v4  ;;  %v337_v7 = vld [vmem:[%s8153_s6 + $0x438] sm:$0xff]  ;;  %334 = vst [vmem:[%s8158_s7 + $0x228] sm:$0xff] %v333_v5  ;;  %v339_v8 = vld [vmem:[%s8153_s6 + $0x480] sm:$0xff] }
  0x39   : > { %336 = vst [vmem:[%s8158_s7 + $0x230] sm:$0xff] %v335_v6  ;;  %338 = vst [vmem:[%s8158_s7 + $0x238] sm:$0xff] %v337_v7  ;;  %v341_v9 = vld [vmem:[%s8153_s6 + $0x488] sm:$0xff]  ;;  %v343_v10 = vld [vmem:[%s8153_s6 + $0x490] sm:$0xff] }
  0x3a   : > { %340 = vst [vmem:[%s8158_s7 + $0x240] sm:$0xff] %v339_v8  ;;  %342 = vst [vmem:[%s8158_s7 + $0x248] sm:$0xff] %v341_v9  ;;  %v345_v11 = vld [vmem:[%s8153_s6 + $0x498] sm:$0xff]  ;;  %v347_v12 = vld [vmem:[%s8153_s6 + $0x4a0] sm:$0xff] }
  0x3b   : > { %344 = vst [vmem:[%s8158_s7 + $0x250] sm:$0xff] %v343_v10  ;;  %v349_v13 = vld [vmem:[%s8153_s6 + $0x4a8] sm:$0xff]  ;;  %346 = vst [vmem:[%s8158_s7 + $0x258] sm:$0xff] %v345_v11  ;;  %v351_v14 = vld [vmem:[%s8153_s6 + $0x4b0] sm:$0xff] }
  0x3c   : > { %348 = vst [vmem:[%s8158_s7 + $0x260] sm:$0xff] %v347_v12  ;;  %350 = vst [vmem:[%s8158_s7 + $0x268] sm:$0xff] %v349_v13  ;;  %v353_v15 = vld [vmem:[%s8153_s6 + $0x4b8] sm:$0xff]  ;;  %v355_v16 = vld [vmem:[%s8153_s6 + $0x500] sm:$0xff] }
  0x3d   : > { %352 = vst [vmem:[%s8158_s7 + $0x270] sm:$0xff] %v351_v14  ;;  %354 = vst [vmem:[%s8158_s7 + $0x278] sm:$0xff] %v353_v15  ;;  %v357_v17 = vld [vmem:[%s8153_s6 + $0x508] sm:$0xff]  ;;  %v359_v18 = vld [vmem:[%s8153_s6 + $0x510] sm:$0xff] }
  0x3e   : > { %356 = vst [vmem:[%s8158_s7 + $0x280] sm:$0xff] %v355_v16  ;;  %v361_v19 = vld [vmem:[%s8153_s6 + $0x518] sm:$0xff]  ;;  %358 = vst [vmem:[%s8158_s7 + $0x288] sm:$0xff] %v357_v17  ;;  %v363_v20 = vld [vmem:[%s8153_s6 + $0x520] sm:$0xff] }
  0x3f   : > { %360 = vst [vmem:[%s8158_s7 + $0x290] sm:$0xff] %v359_v18  ;;  %362 = vst [vmem:[%s8158_s7 + $0x298] sm:$0xff] %v361_v19  ;;  %v365_v21 = vld [vmem:[%s8153_s6 + $0x528] sm:$0xff]  ;;  %v367_v22 = vld [vmem:[%s8153_s6 + $0x530] sm:$0xff] }
  0x40   : > { %364 = vst [vmem:[%s8158_s7 + $0x2a0] sm:$0xff] %v363_v20  ;;  %366 = vst [vmem:[%s8158_s7 + $0x2a8] sm:$0xff] %v365_v21  ;;  %v369_v23 = vld [vmem:[%s8153_s6 + $0x538] sm:$0xff]  ;;  %v371_v24 = vld [vmem:[%s8153_s6 + $0x580] sm:$0xff] }
  0x41   : > { %368 = vst [vmem:[%s8158_s7 + $0x2b0] sm:$0xff] %v367_v22  ;;  %v373_v25 = vld [vmem:[%s8153_s6 + $0x588] sm:$0xff]  ;;  %370 = vst [vmem:[%s8158_s7 + $0x2b8] sm:$0xff] %v369_v23  ;;  %v375_v26 = vld [vmem:[%s8153_s6 + $0x590] sm:$0xff] }
  0x42   : > { %372 = vst [vmem:[%s8158_s7 + $0x2c0] sm:$0xff] %v371_v24  ;;  %374 = vst [vmem:[%s8158_s7 + $0x2c8] sm:$0xff] %v373_v25  ;;  %v377_v27 = vld [vmem:[%s8153_s6 + $0x598] sm:$0xff]  ;;  %v379_v28 = vld [vmem:[%s8153_s6 + $0x5a0] sm:$0xff] }
  0x43   : > { %376 = vst [vmem:[%s8158_s7 + $0x2d0] sm:$0xff] %v375_v26  ;;  %378 = vst [vmem:[%s8158_s7 + $0x2d8] sm:$0xff] %v377_v27  ;;  %v381_v29 = vld [vmem:[%s8153_s6 + $0x5a8] sm:$0xff]  ;;  %v383_v30 = vld [vmem:[%s8153_s6 + $0x5b0] sm:$0xff] }
  0x44   : > { %380 = vst [vmem:[%s8158_s7 + $0x2e0] sm:$0xff] %v379_v28  ;;  %v385_v31 = vld [vmem:[%s8153_s6 + $0x5b8] sm:$0xff]  ;;  %382 = vst [vmem:[%s8158_s7 + $0x2e8] sm:$0xff] %v381_v29  ;;  %v387_v32 = vld [vmem:[%s8153_s6 + $0x600] sm:$0xff] }
  0x45   : > { %384 = vst [vmem:[%s8158_s7 + $0x2f0] sm:$0xff] %v383_v30  ;;  %386 = vst [vmem:[%s8158_s7 + $0x2f8] sm:$0xff] %v385_v31  ;;  %v389_v33 = vld [vmem:[%s8153_s6 + $0x608] sm:$0xff]  ;;  %v391_v34 = vld [vmem:[%s8153_s6 + $0x610] sm:$0xff] }
  0x46   : > { %388 = vst [vmem:[%s8158_s7 + $0x300] sm:$0xff] %v387_v32  ;;  %390 = vst [vmem:[%s8158_s7 + $0x308] sm:$0xff] %v389_v33  ;;  %v393_v35 = vld [vmem:[%s8153_s6 + $0x618] sm:$0xff]  ;;  %v395_v36 = vld [vmem:[%s8153_s6 + $0x620] sm:$0xff] }
  0x47   : > { %392 = vst [vmem:[%s8158_s7 + $0x310] sm:$0xff] %v391_v34  ;;  %v397_v37 = vld [vmem:[%s8153_s6 + $0x628] sm:$0xff]  ;;  %394 = vst [vmem:[%s8158_s7 + $0x318] sm:$0xff] %v393_v35  ;;  %v399_v38 = vld [vmem:[%s8153_s6 + $0x630] sm:$0xff] }
  0x48   : > { %396 = vst [vmem:[%s8158_s7 + $0x320] sm:$0xff] %v395_v36  ;;  %398 = vst [vmem:[%s8158_s7 + $0x328] sm:$0xff] %v397_v37  ;;  %v401_v39 = vld [vmem:[%s8153_s6 + $0x638] sm:$0xff]  ;;  %v403_v40 = vld [vmem:[%s8153_s6 + $0x680] sm:$0xff] }
  0x49   : > { %400 = vst [vmem:[%s8158_s7 + $0x330] sm:$0xff] %v399_v38  ;;  %402 = vst [vmem:[%s8158_s7 + $0x338] sm:$0xff] %v401_v39  ;;  %v405_v41 = vld [vmem:[%s8153_s6 + $0x688] sm:$0xff]  ;;  %v407_v42 = vld [vmem:[%s8153_s6 + $0x690] sm:$0xff] }
  0x4a   : > { %404 = vst [vmem:[%s8158_s7 + $0x340] sm:$0xff] %v403_v40  ;;  %v409_v43 = vld [vmem:[%s8153_s6 + $0x698] sm:$0xff]  ;;  %406 = vst [vmem:[%s8158_s7 + $0x348] sm:$0xff] %v405_v41  ;;  %v411_v44 = vld [vmem:[%s8153_s6 + $0x6a0] sm:$0xff] }
  0x4b   : > { %408 = vst [vmem:[%s8158_s7 + $0x350] sm:$0xff] %v407_v42  ;;  %410 = vst [vmem:[%s8158_s7 + $0x358] sm:$0xff] %v409_v43  ;;  %v413_v45 = vld [vmem:[%s8153_s6 + $0x6a8] sm:$0xff]  ;;  %v415_v46 = vld [vmem:[%s8153_s6 + $0x6b0] sm:$0xff] }
  0x4c   : > { %412 = vst [vmem:[%s8158_s7 + $0x360] sm:$0xff] %v411_v44  ;;  %414 = vst [vmem:[%s8158_s7 + $0x368] sm:$0xff] %v413_v45  ;;  %v417_v47 = vld [vmem:[%s8153_s6 + $0x6b8] sm:$0xff]  ;;  %v419_v48 = vld [vmem:[%s8153_s6 + $0x700] sm:$0xff] }
  0x4d   : > { %416 = vst [vmem:[%s8158_s7 + $0x370] sm:$0xff] %v415_v46  ;;  %v421_v49 = vld [vmem:[%s8153_s6 + $0x708] sm:$0xff]  ;;  %418 = vst [vmem:[%s8158_s7 + $0x378] sm:$0xff] %v417_v47  ;;  %v423_v50 = vld [vmem:[%s8153_s6 + $0x710] sm:$0xff] }
  0x4e   : > { %420 = vst [vmem:[%s8158_s7 + $0x380] sm:$0xff] %v419_v48  ;;  %422 = vst [vmem:[%s8158_s7 + $0x388] sm:$0xff] %v421_v49  ;;  %v425_v51 = vld [vmem:[%s8153_s6 + $0x718] sm:$0xff]  ;;  %v427_v52 = vld [vmem:[%s8153_s6 + $0x720] sm:$0xff] }
  0x4f   : > { %424 = vst [vmem:[%s8158_s7 + $0x390] sm:$0xff] %v423_v50  ;;  %426 = vst [vmem:[%s8158_s7 + $0x398] sm:$0xff] %v425_v51  ;;  %v429_v53 = vld [vmem:[%s8153_s6 + $0x728] sm:$0xff]  ;;  %v431_v54 = vld [vmem:[%s8153_s6 + $0x730] sm:$0xff] }
  0x50   : > { %428 = vst [vmem:[%s8158_s7 + $0x3a0] sm:$0xff] %v427_v52  ;;  %v433_v55 = vld [vmem:[%s8153_s6 + $0x738] sm:$0xff]  ;;  %430 = vst [vmem:[%s8158_s7 + $0x3a8] sm:$0xff] %v429_v53  ;;  %v435_v56 = vld [vmem:[%s8153_s6 + $0x780] sm:$0xff] }
  0x51   : > { %432 = vst [vmem:[%s8158_s7 + $0x3b0] sm:$0xff] %v431_v54  ;;  %434 = vst [vmem:[%s8158_s7 + $0x3b8] sm:$0xff] %v433_v55  ;;  %v437_v57 = vld [vmem:[%s8153_s6 + $0x788] sm:$0xff]  ;;  %v439_v58 = vld [vmem:[%s8153_s6 + $0x790] sm:$0xff] }
  0x52   : > { %436 = vst [vmem:[%s8158_s7 + $0x3c0] sm:$0xff] %v435_v56  ;;  %438 = vst [vmem:[%s8158_s7 + $0x3c8] sm:$0xff] %v437_v57  ;;  %v441_v59 = vld [vmem:[%s8153_s6 + $0x798] sm:$0xff]  ;;  %v443_v60 = vld [vmem:[%s8153_s6 + $0x7a0] sm:$0xff] }
  0x53   : > { %440 = vst [vmem:[%s8158_s7 + $0x3d0] sm:$0xff] %v439_v58  ;;  %v445_v61 = vld [vmem:[%s8153_s6 + $0x7a8] sm:$0xff]  ;;  %442 = vst [vmem:[%s8158_s7 + $0x3d8] sm:$0xff] %v441_v59  ;;  %v447_v62 = vld [vmem:[%s8153_s6 + $0x7b0] sm:$0xff] }
  0x54   : > { %444 = vst [vmem:[%s8158_s7 + $0x3e0] sm:$0xff] %v443_v60  ;;  %446 = vst [vmem:[%s8158_s7 + $0x3e8] sm:$0xff] %v445_v61  ;;  %v449_v63 = vld [vmem:[%s8153_s6 + $0x7b8] sm:$0xff]  ;;  %v451_v0 = vld [vmem:[%s8153_s6 + $0x800] sm:$0xff] }
  0x55   : > { %448 = vst [vmem:[%s8158_s7 + $0x3f0] sm:$0xff] %v447_v62  ;;  %450 = vst [vmem:[%s8158_s7 + $0x3f8] sm:$0xff] %v449_v63  ;;  %v453_v1 = vld [vmem:[%s8153_s6 + $0x808] sm:$0xff]  ;;  %v455_v2 = vld [vmem:[%s8153_s6 + $0x810] sm:$0xff] }
  0x56   : > { %452 = vst [vmem:[%s8158_s7 + $0x400] sm:$0xff] %v451_v0  ;;  %v457_v3 = vld [vmem:[%s8153_s6 + $0x818] sm:$0xff]  ;;  %454 = vst [vmem:[%s8158_s7 + $0x408] sm:$0xff] %v453_v1  ;;  %v459_v4 = vld [vmem:[%s8153_s6 + $0x820] sm:$0xff] }
  0x57   : > { %456 = vst [vmem:[%s8158_s7 + $0x410] sm:$0xff] %v455_v2  ;;  %458 = vst [vmem:[%s8158_s7 + $0x418] sm:$0xff] %v457_v3  ;;  %v461_v5 = vld [vmem:[%s8153_s6 + $0x828] sm:$0xff]  ;;  %v463_v6 = vld [vmem:[%s8153_s6 + $0x830] sm:$0xff] }
  0x58   : > { %460 = vst [vmem:[%s8158_s7 + $0x420] sm:$0xff] %v459_v4  ;;  %462 = vst [vmem:[%s8158_s7 + $0x428] sm:$0xff] %v461_v5  ;;  %v465_v7 = vld [vmem:[%s8153_s6 + $0x838] sm:$0xff]  ;;  %v467_v8 = vld [vmem:[%s8153_s6 + $0x880] sm:$0xff] }
  0x59   : > { %464 = vst [vmem:[%s8158_s7 + $0x430] sm:$0xff] %v463_v6  ;;  %v469_v9 = vld [vmem:[%s8153_s6 + $0x888] sm:$0xff]  ;;  %466 = vst [vmem:[%s8158_s7 + $0x438] sm:$0xff] %v465_v7  ;;  %v471_v10 = vld [vmem:[%s8153_s6 + $0x890] sm:$0xff] }
  0x5a   : > { %468 = vst [vmem:[%s8158_s7 + $0x440] sm:$0xff] %v467_v8  ;;  %470 = vst [vmem:[%s8158_s7 + $0x448] sm:$0xff] %v469_v9  ;;  %v473_v11 = vld [vmem:[%s8153_s6 + $0x898] sm:$0xff]  ;;  %v475_v12 = vld [vmem:[%s8153_s6 + $0x8a0] sm:$0xff] }
  0x5b   : > { %472 = vst [vmem:[%s8158_s7 + $0x450] sm:$0xff] %v471_v10  ;;  %474 = vst [vmem:[%s8158_s7 + $0x458] sm:$0xff] %v473_v11  ;;  %v477_v13 = vld [vmem:[%s8153_s6 + $0x8a8] sm:$0xff]  ;;  %v479_v14 = vld [vmem:[%s8153_s6 + $0x8b0] sm:$0xff] }
  0x5c   : > { %476 = vst [vmem:[%s8158_s7 + $0x460] sm:$0xff] %v475_v12  ;;  %v481_v15 = vld [vmem:[%s8153_s6 + $0x8b8] sm:$0xff]  ;;  %478 = vst [vmem:[%s8158_s7 + $0x468] sm:$0xff] %v477_v13  ;;  %v483_v16 = vld [vmem:[%s8153_s6 + $0x900] sm:$0xff] }
  0x5d   : > { %480 = vst [vmem:[%s8158_s7 + $0x470] sm:$0xff] %v479_v14  ;;  %482 = vst [vmem:[%s8158_s7 + $0x478] sm:$0xff] %v481_v15  ;;  %v485_v17 = vld [vmem:[%s8153_s6 + $0x908] sm:$0xff]  ;;  %v487_v18 = vld [vmem:[%s8153_s6 + $0x910] sm:$0xff] }
  0x5e   : > { %484 = vst [vmem:[%s8158_s7 + $0x480] sm:$0xff] %v483_v16  ;;  %486 = vst [vmem:[%s8158_s7 + $0x488] sm:$0xff] %v485_v17  ;;  %v489_v19 = vld [vmem:[%s8153_s6 + $0x918] sm:$0xff]  ;;  %v491_v20 = vld [vmem:[%s8153_s6 + $0x920] sm:$0xff] }
  0x5f   : > { %488 = vst [vmem:[%s8158_s7 + $0x490] sm:$0xff] %v487_v18  ;;  %v493_v21 = vld [vmem:[%s8153_s6 + $0x928] sm:$0xff]  ;;  %490 = vst [vmem:[%s8158_s7 + $0x498] sm:$0xff] %v489_v19  ;;  %v495_v22 = vld [vmem:[%s8153_s6 + $0x930] sm:$0xff] }
  0x60   : > { %492 = vst [vmem:[%s8158_s7 + $0x4a0] sm:$0xff] %v491_v20  ;;  %494 = vst [vmem:[%s8158_s7 + $0x4a8] sm:$0xff] %v493_v21  ;;  %v497_v23 = vld [vmem:[%s8153_s6 + $0x938] sm:$0xff]  ;;  %v499_v24 = vld [vmem:[%s8153_s6 + $0x980] sm:$0xff] }
  0x61   : > { %496 = vst [vmem:[%s8158_s7 + $0x4b0] sm:$0xff] %v495_v22  ;;  %498 = vst [vmem:[%s8158_s7 + $0x4b8] sm:$0xff] %v497_v23  ;;  %v501_v25 = vld [vmem:[%s8153_s6 + $0x988] sm:$0xff]  ;;  %v503_v26 = vld [vmem:[%s8153_s6 + $0x990] sm:$0xff] }
  0x62   : > { %500 = vst [vmem:[%s8158_s7 + $0x4c0] sm:$0xff] %v499_v24  ;;  %v505_v27 = vld [vmem:[%s8153_s6 + $0x998] sm:$0xff]  ;;  %502 = vst [vmem:[%s8158_s7 + $0x4c8] sm:$0xff] %v501_v25  ;;  %v507_v28 = vld [vmem:[%s8153_s6 + $0x9a0] sm:$0xff] }
  0x63   : > { %504 = vst [vmem:[%s8158_s7 + $0x4d0] sm:$0xff] %v503_v26  ;;  %506 = vst [vmem:[%s8158_s7 + $0x4d8] sm:$0xff] %v505_v27  ;;  %v509_v29 = vld [vmem:[%s8153_s6 + $0x9a8] sm:$0xff]  ;;  %v511_v30 = vld [vmem:[%s8153_s6 + $0x9b0] sm:$0xff] }
  0x64   : > { %508 = vst [vmem:[%s8158_s7 + $0x4e0] sm:$0xff] %v507_v28  ;;  %510 = vst [vmem:[%s8158_s7 + $0x4e8] sm:$0xff] %v509_v29  ;;  %v513_v31 = vld [vmem:[%s8153_s6 + $0x9b8] sm:$0xff]  ;;  %v515_v32 = vld [vmem:[%s8153_s6 + $0xa00] sm:$0xff] }
  0x65   : > { %512 = vst [vmem:[%s8158_s7 + $0x4f0] sm:$0xff] %v511_v30  ;;  %v517_v33 = vld [vmem:[%s8153_s6 + $0xa08] sm:$0xff]  ;;  %514 = vst [vmem:[%s8158_s7 + $0x4f8] sm:$0xff] %v513_v31  ;;  %v519_v34 = vld [vmem:[%s8153_s6 + $0xa10] sm:$0xff] }
  0x66   : > { %516 = vst [vmem:[%s8158_s7 + $0x500] sm:$0xff] %v515_v32  ;;  %518 = vst [vmem:[%s8158_s7 + $0x508] sm:$0xff] %v517_v33  ;;  %v521_v35 = vld [vmem:[%s8153_s6 + $0xa18] sm:$0xff]  ;;  %v523_v36 = vld [vmem:[%s8153_s6 + $0xa20] sm:$0xff] }
  0x67   : > { %520 = vst [vmem:[%s8158_s7 + $0x510] sm:$0xff] %v519_v34  ;;  %522 = vst [vmem:[%s8158_s7 + $0x518] sm:$0xff] %v521_v35  ;;  %v525_v37 = vld [vmem:[%s8153_s6 + $0xa28] sm:$0xff]  ;;  %v527_v38 = vld [vmem:[%s8153_s6 + $0xa30] sm:$0xff] }
  0x68   : > { %524 = vst [vmem:[%s8158_s7 + $0x520] sm:$0xff] %v523_v36  ;;  %v529_v39 = vld [vmem:[%s8153_s6 + $0xa38] sm:$0xff]  ;;  %526 = vst [vmem:[%s8158_s7 + $0x528] sm:$0xff] %v525_v37  ;;  %v531_v40 = vld [vmem:[%s8153_s6 + $0xa80] sm:$0xff] }
  0x69   : > { %528 = vst [vmem:[%s8158_s7 + $0x530] sm:$0xff] %v527_v38  ;;  %530 = vst [vmem:[%s8158_s7 + $0x538] sm:$0xff] %v529_v39  ;;  %v533_v41 = vld [vmem:[%s8153_s6 + $0xa88] sm:$0xff]  ;;  %v535_v42 = vld [vmem:[%s8153_s6 + $0xa90] sm:$0xff] }
  0x6a   : > { %532 = vst [vmem:[%s8158_s7 + $0x540] sm:$0xff] %v531_v40  ;;  %534 = vst [vmem:[%s8158_s7 + $0x548] sm:$0xff] %v533_v41  ;;  %v537_v43 = vld [vmem:[%s8153_s6 + $0xa98] sm:$0xff]  ;;  %v539_v44 = vld [vmem:[%s8153_s6 + $0xaa0] sm:$0xff] }
  0x6b   : > { %536 = vst [vmem:[%s8158_s7 + $0x550] sm:$0xff] %v535_v42  ;;  %v541_v45 = vld [vmem:[%s8153_s6 + $0xaa8] sm:$0xff]  ;;  %538 = vst [vmem:[%s8158_s7 + $0x558] sm:$0xff] %v537_v43  ;;  %v543_v46 = vld [vmem:[%s8153_s6 + $0xab0] sm:$0xff] }
  0x6c   : > { %540 = vst [vmem:[%s8158_s7 + $0x560] sm:$0xff] %v539_v44  ;;  %542 = vst [vmem:[%s8158_s7 + $0x568] sm:$0xff] %v541_v45  ;;  %v545_v47 = vld [vmem:[%s8153_s6 + $0xab8] sm:$0xff]  ;;  %v547_v48 = vld [vmem:[%s8153_s6 + $0xb00] sm:$0xff] }
  0x6d   : > { %544 = vst [vmem:[%s8158_s7 + $0x570] sm:$0xff] %v543_v46  ;;  %546 = vst [vmem:[%s8158_s7 + $0x578] sm:$0xff] %v545_v47  ;;  %v549_v49 = vld [vmem:[%s8153_s6 + $0xb08] sm:$0xff]  ;;  %v551_v50 = vld [vmem:[%s8153_s6 + $0xb10] sm:$0xff] }
  0x6e   : > { %548 = vst [vmem:[%s8158_s7 + $0x580] sm:$0xff] %v547_v48  ;;  %v553_v51 = vld [vmem:[%s8153_s6 + $0xb18] sm:$0xff]  ;;  %550 = vst [vmem:[%s8158_s7 + $0x588] sm:$0xff] %v549_v49  ;;  %v555_v52 = vld [vmem:[%s8153_s6 + $0xb20] sm:$0xff] }
  0x6f   : > { %552 = vst [vmem:[%s8158_s7 + $0x590] sm:$0xff] %v551_v50  ;;  %554 = vst [vmem:[%s8158_s7 + $0x598] sm:$0xff] %v553_v51  ;;  %v557_v53 = vld [vmem:[%s8153_s6 + $0xb28] sm:$0xff]  ;;  %v559_v54 = vld [vmem:[%s8153_s6 + $0xb30] sm:$0xff] }
  0x70   : > { %556 = vst [vmem:[%s8158_s7 + $0x5a0] sm:$0xff] %v555_v52  ;;  %558 = vst [vmem:[%s8158_s7 + $0x5a8] sm:$0xff] %v557_v53  ;;  %v561_v55 = vld [vmem:[%s8153_s6 + $0xb38] sm:$0xff]  ;;  %v563_v56 = vld [vmem:[%s8153_s6 + $0xb80] sm:$0xff] }
  0x71   : > { %560 = vst [vmem:[%s8158_s7 + $0x5b0] sm:$0xff] %v559_v54  ;;  %v565_v57 = vld [vmem:[%s8153_s6 + $0xb88] sm:$0xff]  ;;  %562 = vst [vmem:[%s8158_s7 + $0x5b8] sm:$0xff] %v561_v55  ;;  %v567_v58 = vld [vmem:[%s8153_s6 + $0xb90] sm:$0xff] }
  0x72   : > { %564 = vst [vmem:[%s8158_s7 + $0x5c0] sm:$0xff] %v563_v56  ;;  %566 = vst [vmem:[%s8158_s7 + $0x5c8] sm:$0xff] %v565_v57  ;;  %v569_v59 = vld [vmem:[%s8153_s6 + $0xb98] sm:$0xff]  ;;  %v571_v60 = vld [vmem:[%s8153_s6 + $0xba0] sm:$0xff] }
  0x73   : > { %568 = vst [vmem:[%s8158_s7 + $0x5d0] sm:$0xff] %v567_v58  ;;  %570 = vst [vmem:[%s8158_s7 + $0x5d8] sm:$0xff] %v569_v59  ;;  %v573_v61 = vld [vmem:[%s8153_s6 + $0xba8] sm:$0xff]  ;;  %v575_v62 = vld [vmem:[%s8153_s6 + $0xbb0] sm:$0xff] }
  0x74   : > { %572 = vst [vmem:[%s8158_s7 + $0x5e0] sm:$0xff] %v571_v60  ;;  %v577_v63 = vld [vmem:[%s8153_s6 + $0xbb8] sm:$0xff]  ;;  %574 = vst [vmem:[%s8158_s7 + $0x5e8] sm:$0xff] %v573_v61  ;;  %v579_v0 = vld [vmem:[%s8153_s6 + $0xc00] sm:$0xff] }
  0x75   : > { %576 = vst [vmem:[%s8158_s7 + $0x5f0] sm:$0xff] %v575_v62  ;;  %578 = vst [vmem:[%s8158_s7 + $0x5f8] sm:$0xff] %v577_v63  ;;  %v581_v1 = vld [vmem:[%s8153_s6 + $0xc08] sm:$0xff]  ;;  %v583_v2 = vld [vmem:[%s8153_s6 + $0xc10] sm:$0xff] }
  0x76   : > { %580 = vst [vmem:[%s8158_s7 + $0x600] sm:$0xff] %v579_v0  ;;  %582 = vst [vmem:[%s8158_s7 + $0x608] sm:$0xff] %v581_v1  ;;  %v585_v3 = vld [vmem:[%s8153_s6 + $0xc18] sm:$0xff]  ;;  %v587_v4 = vld [vmem:[%s8153_s6 + $0xc20] sm:$0xff] }
  0x77   : > { %584 = vst [vmem:[%s8158_s7 + $0x610] sm:$0xff] %v583_v2  ;;  %v589_v5 = vld [vmem:[%s8153_s6 + $0xc28] sm:$0xff]  ;;  %586 = vst [vmem:[%s8158_s7 + $0x618] sm:$0xff] %v585_v3  ;;  %v591_v6 = vld [vmem:[%s8153_s6 + $0xc30] sm:$0xff] }
  0x78   : > { %588 = vst [vmem:[%s8158_s7 + $0x620] sm:$0xff] %v587_v4  ;;  %590 = vst [vmem:[%s8158_s7 + $0x628] sm:$0xff] %v589_v5  ;;  %v593_v7 = vld [vmem:[%s8153_s6 + $0xc38] sm:$0xff]  ;;  %v595_v8 = vld [vmem:[%s8153_s6 + $0xc80] sm:$0xff] }
  0x79   : > { %592 = vst [vmem:[%s8158_s7 + $0x630] sm:$0xff] %v591_v6  ;;  %594 = vst [vmem:[%s8158_s7 + $0x638] sm:$0xff] %v593_v7  ;;  %v597_v9 = vld [vmem:[%s8153_s6 + $0xc88] sm:$0xff]  ;;  %v599_v10 = vld [vmem:[%s8153_s6 + $0xc90] sm:$0xff] }
  0x7a   : > { %596 = vst [vmem:[%s8158_s7 + $0x640] sm:$0xff] %v595_v8  ;;  %v601_v11 = vld [vmem:[%s8153_s6 + $0xc98] sm:$0xff]  ;;  %598 = vst [vmem:[%s8158_s7 + $0x648] sm:$0xff] %v597_v9  ;;  %v603_v12 = vld [vmem:[%s8153_s6 + $0xca0] sm:$0xff] }
  0x7b   : > { %600 = vst [vmem:[%s8158_s7 + $0x650] sm:$0xff] %v599_v10  ;;  %602 = vst [vmem:[%s8158_s7 + $0x658] sm:$0xff] %v601_v11  ;;  %v605_v13 = vld [vmem:[%s8153_s6 + $0xca8] sm:$0xff]  ;;  %v607_v14 = vld [vmem:[%s8153_s6 + $0xcb0] sm:$0xff] }
  0x7c   : > { %604 = vst [vmem:[%s8158_s7 + $0x660] sm:$0xff] %v603_v12  ;;  %606 = vst [vmem:[%s8158_s7 + $0x668] sm:$0xff] %v605_v13  ;;  %v609_v15 = vld [vmem:[%s8153_s6 + $0xcb8] sm:$0xff]  ;;  %v611_v16 = vld [vmem:[%s8153_s6 + $0xd00] sm:$0xff] }
  0x7d   : > { %608 = vst [vmem:[%s8158_s7 + $0x670] sm:$0xff] %v607_v14  ;;  %v613_v17 = vld [vmem:[%s8153_s6 + $0xd08] sm:$0xff]  ;;  %610 = vst [vmem:[%s8158_s7 + $0x678] sm:$0xff] %v609_v15  ;;  %v615_v18 = vld [vmem:[%s8153_s6 + $0xd10] sm:$0xff] }
  0x7e   : > { %612 = vst [vmem:[%s8158_s7 + $0x680] sm:$0xff] %v611_v16  ;;  %614 = vst [vmem:[%s8158_s7 + $0x688] sm:$0xff] %v613_v17  ;;  %v617_v19 = vld [vmem:[%s8153_s6 + $0xd18] sm:$0xff]  ;;  %v619_v20 = vld [vmem:[%s8153_s6 + $0xd20] sm:$0xff] }
  0x7f   : > { %616 = vst [vmem:[%s8158_s7 + $0x690] sm:$0xff] %v615_v18  ;;  %618 = vst [vmem:[%s8158_s7 + $0x698] sm:$0xff] %v617_v19  ;;  %v621_v21 = vld [vmem:[%s8153_s6 + $0xd28] sm:$0xff]  ;;  %v623_v22 = vld [vmem:[%s8153_s6 + $0xd30] sm:$0xff] }
  0x80   : > { %620 = vst [vmem:[%s8158_s7 + $0x6a0] sm:$0xff] %v619_v20  ;;  %v625_v23 = vld [vmem:[%s8153_s6 + $0xd38] sm:$0xff]  ;;  %622 = vst [vmem:[%s8158_s7 + $0x6a8] sm:$0xff] %v621_v21  ;;  %v627_v24 = vld [vmem:[%s8153_s6 + $0xd80] sm:$0xff] }
  0x81   : > { %624 = vst [vmem:[%s8158_s7 + $0x6b0] sm:$0xff] %v623_v22  ;;  %626 = vst [vmem:[%s8158_s7 + $0x6b8] sm:$0xff] %v625_v23  ;;  %v629_v25 = vld [vmem:[%s8153_s6 + $0xd88] sm:$0xff]  ;;  %v631_v26 = vld [vmem:[%s8153_s6 + $0xd90] sm:$0xff] }
  0x82   : > { %628 = vst [vmem:[%s8158_s7 + $0x6c0] sm:$0xff] %v627_v24  ;;  %630 = vst [vmem:[%s8158_s7 + $0x6c8] sm:$0xff] %v629_v25  ;;  %v633_v27 = vld [vmem:[%s8153_s6 + $0xd98] sm:$0xff]  ;;  %v635_v28 = vld [vmem:[%s8153_s6 + $0xda0] sm:$0xff] }
  0x83   : > { %632 = vst [vmem:[%s8158_s7 + $0x6d0] sm:$0xff] %v631_v26  ;;  %v637_v29 = vld [vmem:[%s8153_s6 + $0xda8] sm:$0xff]  ;;  %634 = vst [vmem:[%s8158_s7 + $0x6d8] sm:$0xff] %v633_v27  ;;  %v639_v30 = vld [vmem:[%s8153_s6 + $0xdb0] sm:$0xff] }
  0x84   : > { %636 = vst [vmem:[%s8158_s7 + $0x6e0] sm:$0xff] %v635_v28  ;;  %638 = vst [vmem:[%s8158_s7 + $0x6e8] sm:$0xff] %v637_v29  ;;  %v641_v31 = vld [vmem:[%s8153_s6 + $0xdb8] sm:$0xff]  ;;  %v643_v32 = vld [vmem:[%s8153_s6 + $0xe00] sm:$0xff] }
  0x85   : > { %640 = vst [vmem:[%s8158_s7 + $0x6f0] sm:$0xff] %v639_v30  ;;  %642 = vst [vmem:[%s8158_s7 + $0x6f8] sm:$0xff] %v641_v31  ;;  %v645_v33 = vld [vmem:[%s8153_s6 + $0xe08] sm:$0xff]  ;;  %v647_v34 = vld [vmem:[%s8153_s6 + $0xe10] sm:$0xff] }
  0x86   : > { %644 = vst [vmem:[%s8158_s7 + $0x700] sm:$0xff] %v643_v32  ;;  %v649_v35 = vld [vmem:[%s8153_s6 + $0xe18] sm:$0xff]  ;;  %646 = vst [vmem:[%s8158_s7 + $0x708] sm:$0xff] %v645_v33  ;;  %v651_v36 = vld [vmem:[%s8153_s6 + $0xe20] sm:$0xff] }
  0x87   : > { %648 = vst [vmem:[%s8158_s7 + $0x710] sm:$0xff] %v647_v34  ;;  %650 = vst [vmem:[%s8158_s7 + $0x718] sm:$0xff] %v649_v35  ;;  %v653_v37 = vld [vmem:[%s8153_s6 + $0xe28] sm:$0xff]  ;;  %v655_v38 = vld [vmem:[%s8153_s6 + $0xe30] sm:$0xff] }
  0x88   : > { %652 = vst [vmem:[%s8158_s7 + $0x720] sm:$0xff] %v651_v36  ;;  %654 = vst [vmem:[%s8158_s7 + $0x728] sm:$0xff] %v653_v37  ;;  %v657_v39 = vld [vmem:[%s8153_s6 + $0xe38] sm:$0xff]  ;;  %v659_v40 = vld [vmem:[%s8153_s6 + $0xe80] sm:$0xff] }
  0x89   : > { %656 = vst [vmem:[%s8158_s7 + $0x730] sm:$0xff] %v655_v38  ;;  %v661_v41 = vld [vmem:[%s8153_s6 + $0xe88] sm:$0xff]  ;;  %658 = vst [vmem:[%s8158_s7 + $0x738] sm:$0xff] %v657_v39  ;;  %v663_v42 = vld [vmem:[%s8153_s6 + $0xe90] sm:$0xff] }
  0x8a   : > { %660 = vst [vmem:[%s8158_s7 + $0x740] sm:$0xff] %v659_v40  ;;  %662 = vst [vmem:[%s8158_s7 + $0x748] sm:$0xff] %v661_v41  ;;  %v665_v43 = vld [vmem:[%s8153_s6 + $0xe98] sm:$0xff]  ;;  %v667_v44 = vld [vmem:[%s8153_s6 + $0xea0] sm:$0xff] }
  0x8b   : > { %664 = vst [vmem:[%s8158_s7 + $0x750] sm:$0xff] %v663_v42  ;;  %666 = vst [vmem:[%s8158_s7 + $0x758] sm:$0xff] %v665_v43  ;;  %v669_v45 = vld [vmem:[%s8153_s6 + $0xea8] sm:$0xff]  ;;  %v671_v46 = vld [vmem:[%s8153_s6 + $0xeb0] sm:$0xff] }
  0x8c   : > { %668 = vst [vmem:[%s8158_s7 + $0x760] sm:$0xff] %v667_v44  ;;  %v673_v47 = vld [vmem:[%s8153_s6 + $0xeb8] sm:$0xff]  ;;  %670 = vst [vmem:[%s8158_s7 + $0x768] sm:$0xff] %v669_v45  ;;  %v675_v48 = vld [vmem:[%s8153_s6 + $0xf00] sm:$0xff] }
  0x8d   : > { %672 = vst [vmem:[%s8158_s7 + $0x770] sm:$0xff] %v671_v46  ;;  %674 = vst [vmem:[%s8158_s7 + $0x778] sm:$0xff] %v673_v47  ;;  %v677_v49 = vld [vmem:[%s8153_s6 + $0xf08] sm:$0xff]  ;;  %v679_v50 = vld [vmem:[%s8153_s6 + $0xf10] sm:$0xff] }
  0x8e   : > { %676 = vst [vmem:[%s8158_s7 + $0x780] sm:$0xff] %v675_v48  ;;  %678 = vst [vmem:[%s8158_s7 + $0x788] sm:$0xff] %v677_v49  ;;  %v681_v51 = vld [vmem:[%s8153_s6 + $0xf18] sm:$0xff]  ;;  %v683_v52 = vld [vmem:[%s8153_s6 + $0xf20] sm:$0xff] }
  0x8f   : > { %680 = vst [vmem:[%s8158_s7 + $0x790] sm:$0xff] %v679_v50  ;;  %v685_v53 = vld [vmem:[%s8153_s6 + $0xf28] sm:$0xff]  ;;  %682 = vst [vmem:[%s8158_s7 + $0x798] sm:$0xff] %v681_v51  ;;  %v687_v54 = vld [vmem:[%s8153_s6 + $0xf30] sm:$0xff] }
  0x90   : > { %684 = vst [vmem:[%s8158_s7 + $0x7a0] sm:$0xff] %v683_v52  ;;  %686 = vst [vmem:[%s8158_s7 + $0x7a8] sm:$0xff] %v685_v53  ;;  %v689_v55 = vld [vmem:[%s8153_s6 + $0xf38] sm:$0xff]  ;;  %v691_v56 = vld [vmem:[%s8153_s6 + $0xf80] sm:$0xff] }
  0x91   : > { %688 = vst [vmem:[%s8158_s7 + $0x7b0] sm:$0xff] %v687_v54  ;;  %690 = vst [vmem:[%s8158_s7 + $0x7b8] sm:$0xff] %v689_v55  ;;  %v693_v57 = vld [vmem:[%s8153_s6 + $0xf88] sm:$0xff]  ;;  %v695_v58 = vld [vmem:[%s8153_s6 + $0xf90] sm:$0xff] }
  0x92   : > { %692 = vst [vmem:[%s8158_s7 + $0x7c0] sm:$0xff] %v691_v56  ;;  %v697_v59 = vld [vmem:[%s8153_s6 + $0xf98] sm:$0xff]  ;;  %694 = vst [vmem:[%s8158_s7 + $0x7c8] sm:$0xff] %v693_v57  ;;  %v699_v60 = vld [vmem:[%s8153_s6 + $0xfa0] sm:$0xff] }
  0x93   : > { %696 = vst [vmem:[%s8158_s7 + $0x7d0] sm:$0xff] %v695_v58  ;;  %698 = vst [vmem:[%s8158_s7 + $0x7d8] sm:$0xff] %v697_v59  ;;  %v701_v61 = vld [vmem:[%s8153_s6 + $0xfa8] sm:$0xff]  ;;  %v703_v62 = vld [vmem:[%s8153_s6 + $0xfb0] sm:$0xff] }
  0x94   : > { %700 = vst [vmem:[%s8158_s7 + $0x7e0] sm:$0xff] %v699_v60  ;;  %702 = vst [vmem:[%s8158_s7 + $0x7e8] sm:$0xff] %v701_v61  ;;  %v705_v63 = vld [vmem:[%s8153_s6 + $0xfb8] sm:$0xff]  ;;  %v707_v0 = vld [vmem:[%s8153_s6 + $0x1000] sm:$0xff] }
  0x95   : > { %704 = vst [vmem:[%s8158_s7 + $0x7f0] sm:$0xff] %v703_v62  ;;  %v709_v1 = vld [vmem:[%s8153_s6 + $0x1008] sm:$0xff]  ;;  %706 = vst [vmem:[%s8158_s7 + $0x7f8] sm:$0xff] %v705_v63  ;;  %v711_v2 = vld [vmem:[%s8153_s6 + $0x1010] sm:$0xff] }
  0x96   : > { %708 = vst [vmem:[%s8158_s7 + $0x800] sm:$0xff] %v707_v0  ;;  %710 = vst [vmem:[%s8158_s7 + $0x808] sm:$0xff] %v709_v1  ;;  %v713_v3 = vld [vmem:[%s8153_s6 + $0x1018] sm:$0xff]  ;;  %v715_v4 = vld [vmem:[%s8153_s6 + $0x1020] sm:$0xff] }
  0x97   : > { %712 = vst [vmem:[%s8158_s7 + $0x810] sm:$0xff] %v711_v2  ;;  %714 = vst [vmem:[%s8158_s7 + $0x818] sm:$0xff] %v713_v3  ;;  %v717_v5 = vld [vmem:[%s8153_s6 + $0x1028] sm:$0xff]  ;;  %v719_v6 = vld [vmem:[%s8153_s6 + $0x1030] sm:$0xff] }
  0x98   : > { %716 = vst [vmem:[%s8158_s7 + $0x820] sm:$0xff] %v715_v4  ;;  %v721_v7 = vld [vmem:[%s8153_s6 + $0x1038] sm:$0xff]  ;;  %718 = vst [vmem:[%s8158_s7 + $0x828] sm:$0xff] %v717_v5  ;;  %v723_v8 = vld [vmem:[%s8153_s6 + $0x1080] sm:$0xff] }
  0x99   : > { %720 = vst [vmem:[%s8158_s7 + $0x830] sm:$0xff] %v719_v6  ;;  %722 = vst [vmem:[%s8158_s7 + $0x838] sm:$0xff] %v721_v7  ;;  %v725_v9 = vld [vmem:[%s8153_s6 + $0x1088] sm:$0xff]  ;;  %v727_v10 = vld [vmem:[%s8153_s6 + $0x1090] sm:$0xff] }
  0x9a   : > { %724 = vst [vmem:[%s8158_s7 + $0x840] sm:$0xff] %v723_v8  ;;  %726 = vst [vmem:[%s8158_s7 + $0x848] sm:$0xff] %v725_v9  ;;  %v729_v11 = vld [vmem:[%s8153_s6 + $0x1098] sm:$0xff]  ;;  %v731_v12 = vld [vmem:[%s8153_s6 + $0x10a0] sm:$0xff] }
  0x9b   : > { %728 = vst [vmem:[%s8158_s7 + $0x850] sm:$0xff] %v727_v10  ;;  %v733_v13 = vld [vmem:[%s8153_s6 + $0x10a8] sm:$0xff]  ;;  %730 = vst [vmem:[%s8158_s7 + $0x858] sm:$0xff] %v729_v11  ;;  %v735_v14 = vld [vmem:[%s8153_s6 + $0x10b0] sm:$0xff] }
  0x9c   : > { %732 = vst [vmem:[%s8158_s7 + $0x860] sm:$0xff] %v731_v12  ;;  %734 = vst [vmem:[%s8158_s7 + $0x868] sm:$0xff] %v733_v13  ;;  %v737_v15 = vld [vmem:[%s8153_s6 + $0x10b8] sm:$0xff]  ;;  %v739_v16 = vld [vmem:[%s8153_s6 + $0x1100] sm:$0xff] }
  0x9d   : > { %736 = vst [vmem:[%s8158_s7 + $0x870] sm:$0xff] %v735_v14  ;;  %738 = vst [vmem:[%s8158_s7 + $0x878] sm:$0xff] %v737_v15  ;;  %v741_v17 = vld [vmem:[%s8153_s6 + $0x1108] sm:$0xff]  ;;  %v743_v18 = vld [vmem:[%s8153_s6 + $0x1110] sm:$0xff] }
  0x9e   : > { %740 = vst [vmem:[%s8158_s7 + $0x880] sm:$0xff] %v739_v16  ;;  %v745_v19 = vld [vmem:[%s8153_s6 + $0x1118] sm:$0xff]  ;;  %742 = vst [vmem:[%s8158_s7 + $0x888] sm:$0xff] %v741_v17  ;;  %v747_v20 = vld [vmem:[%s8153_s6 + $0x1120] sm:$0xff] }
  0x9f   : > { %744 = vst [vmem:[%s8158_s7 + $0x890] sm:$0xff] %v743_v18  ;;  %746 = vst [vmem:[%s8158_s7 + $0x898] sm:$0xff] %v745_v19  ;;  %v749_v21 = vld [vmem:[%s8153_s6 + $0x1128] sm:$0xff]  ;;  %v751_v22 = vld [vmem:[%s8153_s6 + $0x1130] sm:$0xff] }
  0xa0   : > { %748 = vst [vmem:[%s8158_s7 + $0x8a0] sm:$0xff] %v747_v20  ;;  %750 = vst [vmem:[%s8158_s7 + $0x8a8] sm:$0xff] %v749_v21  ;;  %v753_v23 = vld [vmem:[%s8153_s6 + $0x1138] sm:$0xff]  ;;  %v755_v24 = vld [vmem:[%s8153_s6 + $0x1180] sm:$0xff] }
  0xa1   : > { %752 = vst [vmem:[%s8158_s7 + $0x8b0] sm:$0xff] %v751_v22  ;;  %v757_v25 = vld [vmem:[%s8153_s6 + $0x1188] sm:$0xff]  ;;  %754 = vst [vmem:[%s8158_s7 + $0x8b8] sm:$0xff] %v753_v23  ;;  %v759_v26 = vld [vmem:[%s8153_s6 + $0x1190] sm:$0xff] }
  0xa2   : > { %756 = vst [vmem:[%s8158_s7 + $0x8c0] sm:$0xff] %v755_v24  ;;  %758 = vst [vmem:[%s8158_s7 + $0x8c8] sm:$0xff] %v757_v25  ;;  %v761_v27 = vld [vmem:[%s8153_s6 + $0x1198] sm:$0xff]  ;;  %v763_v28 = vld [vmem:[%s8153_s6 + $0x11a0] sm:$0xff] }
  0xa3   : > { %760 = vst [vmem:[%s8158_s7 + $0x8d0] sm:$0xff] %v759_v26  ;;  %762 = vst [vmem:[%s8158_s7 + $0x8d8] sm:$0xff] %v761_v27  ;;  %v765_v29 = vld [vmem:[%s8153_s6 + $0x11a8] sm:$0xff]  ;;  %v767_v30 = vld [vmem:[%s8153_s6 + $0x11b0] sm:$0xff] }
  0xa4   : > { %764 = vst [vmem:[%s8158_s7 + $0x8e0] sm:$0xff] %v763_v28  ;;  %v769_v31 = vld [vmem:[%s8153_s6 + $0x11b8] sm:$0xff]  ;;  %766 = vst [vmem:[%s8158_s7 + $0x8e8] sm:$0xff] %v765_v29  ;;  %v771_v32 = vld [vmem:[%s8153_s6 + $0x1200] sm:$0xff] }
  0xa5   : > { %768 = vst [vmem:[%s8158_s7 + $0x8f0] sm:$0xff] %v767_v30  ;;  %770 = vst [vmem:[%s8158_s7 + $0x8f8] sm:$0xff] %v769_v31  ;;  %v773_v33 = vld [vmem:[%s8153_s6 + $0x1208] sm:$0xff]  ;;  %v775_v34 = vld [vmem:[%s8153_s6 + $0x1210] sm:$0xff] }
  0xa6   : > { %772 = vst [vmem:[%s8158_s7 + $0x900] sm:$0xff] %v771_v32  ;;  %774 = vst [vmem:[%s8158_s7 + $0x908] sm:$0xff] %v773_v33  ;;  %v777_v35 = vld [vmem:[%s8153_s6 + $0x1218] sm:$0xff]  ;;  %v779_v36 = vld [vmem:[%s8153_s6 + $0x1220] sm:$0xff] }
  0xa7   : > { %776 = vst [vmem:[%s8158_s7 + $0x910] sm:$0xff] %v775_v34  ;;  %v781_v37 = vld [vmem:[%s8153_s6 + $0x1228] sm:$0xff]  ;;  %778 = vst [vmem:[%s8158_s7 + $0x918] sm:$0xff] %v777_v35  ;;  %v783_v38 = vld [vmem:[%s8153_s6 + $0x1230] sm:$0xff] }
  0xa8   : > { %780 = vst [vmem:[%s8158_s7 + $0x920] sm:$0xff] %v779_v36  ;;  %782 = vst [vmem:[%s8158_s7 + $0x928] sm:$0xff] %v781_v37  ;;  %v785_v39 = vld [vmem:[%s8153_s6 + $0x1238] sm:$0xff]  ;;  %v787_v40 = vld [vmem:[%s8153_s6 + $0x1280] sm:$0xff] }
  0xa9   : > { %784 = vst [vmem:[%s8158_s7 + $0x930] sm:$0xff] %v783_v38  ;;  %786 = vst [vmem:[%s8158_s7 + $0x938] sm:$0xff] %v785_v39  ;;  %v789_v41 = vld [vmem:[%s8153_s6 + $0x1288] sm:$0xff]  ;;  %v791_v42 = vld [vmem:[%s8153_s6 + $0x1290] sm:$0xff] }
  0xaa   : > { %788 = vst [vmem:[%s8158_s7 + $0x940] sm:$0xff] %v787_v40  ;;  %v793_v43 = vld [vmem:[%s8153_s6 + $0x1298] sm:$0xff]  ;;  %790 = vst [vmem:[%s8158_s7 + $0x948] sm:$0xff] %v789_v41  ;;  %v795_v44 = vld [vmem:[%s8153_s6 + $0x12a0] sm:$0xff] }
  0xab   : > { %792 = vst [vmem:[%s8158_s7 + $0x950] sm:$0xff] %v791_v42  ;;  %794 = vst [vmem:[%s8158_s7 + $0x958] sm:$0xff] %v793_v43  ;;  %v797_v45 = vld [vmem:[%s8153_s6 + $0x12a8] sm:$0xff]  ;;  %v799_v46 = vld [vmem:[%s8153_s6 + $0x12b0] sm:$0xff] }
  0xac   : > { %796 = vst [vmem:[%s8158_s7 + $0x960] sm:$0xff] %v795_v44  ;;  %798 = vst [vmem:[%s8158_s7 + $0x968] sm:$0xff] %v797_v45  ;;  %v801_v47 = vld [vmem:[%s8153_s6 + $0x12b8] sm:$0xff]  ;;  %v803_v48 = vld [vmem:[%s8153_s6 + $0x1300] sm:$0xff] }
  0xad   : > { %800 = vst [vmem:[%s8158_s7 + $0x970] sm:$0xff] %v799_v46  ;;  %v805_v49 = vld [vmem:[%s8153_s6 + $0x1308] sm:$0xff]  ;;  %802 = vst [vmem:[%s8158_s7 + $0x978] sm:$0xff] %v801_v47  ;;  %v807_v50 = vld [vmem:[%s8153_s6 + $0x1310] sm:$0xff] }
  0xae   : > { %804 = vst [vmem:[%s8158_s7 + $0x980] sm:$0xff] %v803_v48  ;;  %806 = vst [vmem:[%s8158_s7 + $0x988] sm:$0xff] %v805_v49  ;;  %v809_v51 = vld [vmem:[%s8153_s6 + $0x1318] sm:$0xff]  ;;  %v811_v52 = vld [vmem:[%s8153_s6 + $0x1320] sm:$0xff] }
  0xaf   : > { %808 = vst [vmem:[%s8158_s7 + $0x990] sm:$0xff] %v807_v50  ;;  %810 = vst [vmem:[%s8158_s7 + $0x998] sm:$0xff] %v809_v51  ;;  %v813_v53 = vld [vmem:[%s8153_s6 + $0x1328] sm:$0xff]  ;;  %v815_v54 = vld [vmem:[%s8153_s6 + $0x1330] sm:$0xff] }
  0xb0   : > { %812 = vst [vmem:[%s8158_s7 + $0x9a0] sm:$0xff] %v811_v52  ;;  %v817_v55 = vld [vmem:[%s8153_s6 + $0x1338] sm:$0xff]  ;;  %814 = vst [vmem:[%s8158_s7 + $0x9a8] sm:$0xff] %v813_v53  ;;  %v819_v56 = vld [vmem:[%s8153_s6 + $0x1380] sm:$0xff] }
  0xb1   : > { %816 = vst [vmem:[%s8158_s7 + $0x9b0] sm:$0xff] %v815_v54  ;;  %818 = vst [vmem:[%s8158_s7 + $0x9b8] sm:$0xff] %v817_v55  ;;  %v821_v57 = vld [vmem:[%s8153_s6 + $0x1388] sm:$0xff]  ;;  %v823_v58 = vld [vmem:[%s8153_s6 + $0x1390] sm:$0xff] }
  0xb2   : > { %820 = vst [vmem:[%s8158_s7 + $0x9c0] sm:$0xff] %v819_v56  ;;  %822 = vst [vmem:[%s8158_s7 + $0x9c8] sm:$0xff] %v821_v57  ;;  %v825_v59 = vld [vmem:[%s8153_s6 + $0x1398] sm:$0xff]  ;;  %v827_v60 = vld [vmem:[%s8153_s6 + $0x13a0] sm:$0xff] }
  0xb3   : > { %824 = vst [vmem:[%s8158_s7 + $0x9d0] sm:$0xff] %v823_v58  ;;  %v829_v61 = vld [vmem:[%s8153_s6 + $0x13a8] sm:$0xff]  ;;  %826 = vst [vmem:[%s8158_s7 + $0x9d8] sm:$0xff] %v825_v59  ;;  %v831_v62 = vld [vmem:[%s8153_s6 + $0x13b0] sm:$0xff] }
  0xb4   : > { %828 = vst [vmem:[%s8158_s7 + $0x9e0] sm:$0xff] %v827_v60  ;;  %830 = vst [vmem:[%s8158_s7 + $0x9e8] sm:$0xff] %v829_v61  ;;  %v833_v63 = vld [vmem:[%s8153_s6 + $0x13b8] sm:$0xff]  ;;  %v835_v0 = vld [vmem:[%s8153_s6 + $0x1400] sm:$0xff] }
  0xb5   : > { %832 = vst [vmem:[%s8158_s7 + $0x9f0] sm:$0xff] %v831_v62  ;;  %834 = vst [vmem:[%s8158_s7 + $0x9f8] sm:$0xff] %v833_v63  ;;  %v837_v1 = vld [vmem:[%s8153_s6 + $0x1408] sm:$0xff]  ;;  %v839_v2 = vld [vmem:[%s8153_s6 + $0x1410] sm:$0xff] }
  0xb6   : > { %836 = vst [vmem:[%s8158_s7 + $0xa00] sm:$0xff] %v835_v0  ;;  %v841_v3 = vld [vmem:[%s8153_s6 + $0x1418] sm:$0xff]  ;;  %838 = vst [vmem:[%s8158_s7 + $0xa08] sm:$0xff] %v837_v1  ;;  %v843_v4 = vld [vmem:[%s8153_s6 + $0x1420] sm:$0xff] }
  0xb7   : > { %840 = vst [vmem:[%s8158_s7 + $0xa10] sm:$0xff] %v839_v2  ;;  %842 = vst [vmem:[%s8158_s7 + $0xa18] sm:$0xff] %v841_v3  ;;  %v845_v5 = vld [vmem:[%s8153_s6 + $0x1428] sm:$0xff]  ;;  %v847_v6 = vld [vmem:[%s8153_s6 + $0x1430] sm:$0xff] }
  0xb8   : > { %844 = vst [vmem:[%s8158_s7 + $0xa20] sm:$0xff] %v843_v4  ;;  %846 = vst [vmem:[%s8158_s7 + $0xa28] sm:$0xff] %v845_v5  ;;  %v849_v7 = vld [vmem:[%s8153_s6 + $0x1438] sm:$0xff]  ;;  %v851_v8 = vld [vmem:[%s8153_s6 + $0x1480] sm:$0xff] }
  0xb9   : > { %848 = vst [vmem:[%s8158_s7 + $0xa30] sm:$0xff] %v847_v6  ;;  %v853_v9 = vld [vmem:[%s8153_s6 + $0x1488] sm:$0xff]  ;;  %850 = vst [vmem:[%s8158_s7 + $0xa38] sm:$0xff] %v849_v7  ;;  %v855_v10 = vld [vmem:[%s8153_s6 + $0x1490] sm:$0xff] }
  0xba   : > { %852 = vst [vmem:[%s8158_s7 + $0xa40] sm:$0xff] %v851_v8  ;;  %854 = vst [vmem:[%s8158_s7 + $0xa48] sm:$0xff] %v853_v9  ;;  %v857_v11 = vld [vmem:[%s8153_s6 + $0x1498] sm:$0xff]  ;;  %v859_v12 = vld [vmem:[%s8153_s6 + $0x14a0] sm:$0xff] }
  0xbb   : > { %856 = vst [vmem:[%s8158_s7 + $0xa50] sm:$0xff] %v855_v10  ;;  %858 = vst [vmem:[%s8158_s7 + $0xa58] sm:$0xff] %v857_v11  ;;  %v861_v13 = vld [vmem:[%s8153_s6 + $0x14a8] sm:$0xff]  ;;  %v863_v14 = vld [vmem:[%s8153_s6 + $0x14b0] sm:$0xff] }
  0xbc   : > { %860 = vst [vmem:[%s8158_s7 + $0xa60] sm:$0xff] %v859_v12  ;;  %v865_v15 = vld [vmem:[%s8153_s6 + $0x14b8] sm:$0xff]  ;;  %862 = vst [vmem:[%s8158_s7 + $0xa68] sm:$0xff] %v861_v13  ;;  %v867_v16 = vld [vmem:[%s8153_s6 + $0x1500] sm:$0xff] }
  0xbd   : > { %864 = vst [vmem:[%s8158_s7 + $0xa70] sm:$0xff] %v863_v14  ;;  %866 = vst [vmem:[%s8158_s7 + $0xa78] sm:$0xff] %v865_v15  ;;  %v869_v17 = vld [vmem:[%s8153_s6 + $0x1508] sm:$0xff]  ;;  %v871_v18 = vld [vmem:[%s8153_s6 + $0x1510] sm:$0xff] }
  0xbe   : > { %868 = vst [vmem:[%s8158_s7 + $0xa80] sm:$0xff] %v867_v16  ;;  %870 = vst [vmem:[%s8158_s7 + $0xa88] sm:$0xff] %v869_v17  ;;  %v873_v19 = vld [vmem:[%s8153_s6 + $0x1518] sm:$0xff]  ;;  %v875_v20 = vld [vmem:[%s8153_s6 + $0x1520] sm:$0xff] }
  0xbf   : > { %872 = vst [vmem:[%s8158_s7 + $0xa90] sm:$0xff] %v871_v18  ;;  %v877_v21 = vld [vmem:[%s8153_s6 + $0x1528] sm:$0xff]  ;;  %874 = vst [vmem:[%s8158_s7 + $0xa98] sm:$0xff] %v873_v19  ;;  %v879_v22 = vld [vmem:[%s8153_s6 + $0x1530] sm:$0xff] }
  0xc0   : > { %876 = vst [vmem:[%s8158_s7 + $0xaa0] sm:$0xff] %v875_v20  ;;  %878 = vst [vmem:[%s8158_s7 + $0xaa8] sm:$0xff] %v877_v21  ;;  %v881_v23 = vld [vmem:[%s8153_s6 + $0x1538] sm:$0xff]  ;;  %v883_v24 = vld [vmem:[%s8153_s6 + $0x1580] sm:$0xff] }
  0xc1   : > { %880 = vst [vmem:[%s8158_s7 + $0xab0] sm:$0xff] %v879_v22  ;;  %882 = vst [vmem:[%s8158_s7 + $0xab8] sm:$0xff] %v881_v23  ;;  %v885_v25 = vld [vmem:[%s8153_s6 + $0x1588] sm:$0xff]  ;;  %v887_v26 = vld [vmem:[%s8153_s6 + $0x1590] sm:$0xff] }
  0xc2   : > { %884 = vst [vmem:[%s8158_s7 + $0xac0] sm:$0xff] %v883_v24  ;;  %v889_v27 = vld [vmem:[%s8153_s6 + $0x1598] sm:$0xff]  ;;  %886 = vst [vmem:[%s8158_s7 + $0xac8] sm:$0xff] %v885_v25  ;;  %v891_v28 = vld [vmem:[%s8153_s6 + $0x15a0] sm:$0xff] }
  0xc3   : > { %888 = vst [vmem:[%s8158_s7 + $0xad0] sm:$0xff] %v887_v26  ;;  %890 = vst [vmem:[%s8158_s7 + $0xad8] sm:$0xff] %v889_v27  ;;  %v893_v29 = vld [vmem:[%s8153_s6 + $0x15a8] sm:$0xff]  ;;  %v895_v30 = vld [vmem:[%s8153_s6 + $0x15b0] sm:$0xff] }
  0xc4   : > { %892 = vst [vmem:[%s8158_s7 + $0xae0] sm:$0xff] %v891_v28  ;;  %894 = vst [vmem:[%s8158_s7 + $0xae8] sm:$0xff] %v893_v29  ;;  %v897_v31 = vld [vmem:[%s8153_s6 + $0x15b8] sm:$0xff]  ;;  %v899_v32 = vld [vmem:[%s8153_s6 + $0x1600] sm:$0xff] }
  0xc5   : > { %896 = vst [vmem:[%s8158_s7 + $0xaf0] sm:$0xff] %v895_v30  ;;  %v901_v33 = vld [vmem:[%s8153_s6 + $0x1608] sm:$0xff]  ;;  %898 = vst [vmem:[%s8158_s7 + $0xaf8] sm:$0xff] %v897_v31  ;;  %v903_v34 = vld [vmem:[%s8153_s6 + $0x1610] sm:$0xff] }
  0xc6   : > { %900 = vst [vmem:[%s8158_s7 + $0xb00] sm:$0xff] %v899_v32  ;;  %902 = vst [vmem:[%s8158_s7 + $0xb08] sm:$0xff] %v901_v33  ;;  %v905_v35 = vld [vmem:[%s8153_s6 + $0x1618] sm:$0xff]  ;;  %v907_v36 = vld [vmem:[%s8153_s6 + $0x1620] sm:$0xff] }
  0xc7   : > { %904 = vst [vmem:[%s8158_s7 + $0xb10] sm:$0xff] %v903_v34  ;;  %906 = vst [vmem:[%s8158_s7 + $0xb18] sm:$0xff] %v905_v35  ;;  %v909_v37 = vld [vmem:[%s8153_s6 + $0x1628] sm:$0xff]  ;;  %v911_v38 = vld [vmem:[%s8153_s6 + $0x1630] sm:$0xff] }
  0xc8   : > { %908 = vst [vmem:[%s8158_s7 + $0xb20] sm:$0xff] %v907_v36  ;;  %v913_v39 = vld [vmem:[%s8153_s6 + $0x1638] sm:$0xff]  ;;  %910 = vst [vmem:[%s8158_s7 + $0xb28] sm:$0xff] %v909_v37  ;;  %v915_v40 = vld [vmem:[%s8153_s6 + $0x1680] sm:$0xff] }
  0xc9   : > { %912 = vst [vmem:[%s8158_s7 + $0xb30] sm:$0xff] %v911_v38  ;;  %914 = vst [vmem:[%s8158_s7 + $0xb38] sm:$0xff] %v913_v39  ;;  %v917_v41 = vld [vmem:[%s8153_s6 + $0x1688] sm:$0xff]  ;;  %v919_v42 = vld [vmem:[%s8153_s6 + $0x1690] sm:$0xff] }
  0xca   : > { %916 = vst [vmem:[%s8158_s7 + $0xb40] sm:$0xff] %v915_v40  ;;  %918 = vst [vmem:[%s8158_s7 + $0xb48] sm:$0xff] %v917_v41  ;;  %v921_v43 = vld [vmem:[%s8153_s6 + $0x1698] sm:$0xff]  ;;  %v923_v44 = vld [vmem:[%s8153_s6 + $0x16a0] sm:$0xff] }
  0xcb   : > { %920 = vst [vmem:[%s8158_s7 + $0xb50] sm:$0xff] %v919_v42  ;;  %v925_v45 = vld [vmem:[%s8153_s6 + $0x16a8] sm:$0xff]  ;;  %922 = vst [vmem:[%s8158_s7 + $0xb58] sm:$0xff] %v921_v43  ;;  %v927_v46 = vld [vmem:[%s8153_s6 + $0x16b0] sm:$0xff] }
  0xcc   : > { %924 = vst [vmem:[%s8158_s7 + $0xb60] sm:$0xff] %v923_v44  ;;  %926 = vst [vmem:[%s8158_s7 + $0xb68] sm:$0xff] %v925_v45  ;;  %v929_v47 = vld [vmem:[%s8153_s6 + $0x16b8] sm:$0xff]  ;;  %v931_v48 = vld [vmem:[%s8153_s6 + $0x1700] sm:$0xff] }
  0xcd   : > { %928 = vst [vmem:[%s8158_s7 + $0xb70] sm:$0xff] %v927_v46  ;;  %930 = vst [vmem:[%s8158_s7 + $0xb78] sm:$0xff] %v929_v47  ;;  %v933_v49 = vld [vmem:[%s8153_s6 + $0x1708] sm:$0xff]  ;;  %v935_v50 = vld [vmem:[%s8153_s6 + $0x1710] sm:$0xff] }
  0xce   : > { %932 = vst [vmem:[%s8158_s7 + $0xb80] sm:$0xff] %v931_v48  ;;  %v937_v51 = vld [vmem:[%s8153_s6 + $0x1718] sm:$0xff]  ;;  %934 = vst [vmem:[%s8158_s7 + $0xb88] sm:$0xff] %v933_v49  ;;  %v939_v52 = vld [vmem:[%s8153_s6 + $0x1720] sm:$0xff] }
  0xcf   : > { %936 = vst [vmem:[%s8158_s7 + $0xb90] sm:$0xff] %v935_v50  ;;  %938 = vst [vmem:[%s8158_s7 + $0xb98] sm:$0xff] %v937_v51  ;;  %v941_v53 = vld [vmem:[%s8153_s6 + $0x1728] sm:$0xff]  ;;  %v943_v54 = vld [vmem:[%s8153_s6 + $0x1730] sm:$0xff] }
  0xd0   : > { %940 = vst [vmem:[%s8158_s7 + $0xba0] sm:$0xff] %v939_v52  ;;  %942 = vst [vmem:[%s8158_s7 + $0xba8] sm:$0xff] %v941_v53  ;;  %v945_v55 = vld [vmem:[%s8153_s6 + $0x1738] sm:$0xff]  ;;  %v947_v56 = vld [vmem:[%s8153_s6 + $0x1780] sm:$0xff] }
  0xd1   : > { %944 = vst [vmem:[%s8158_s7 + $0xbb0] sm:$0xff] %v943_v54  ;;  %v949_v57 = vld [vmem:[%s8153_s6 + $0x1788] sm:$0xff]  ;;  %946 = vst [vmem:[%s8158_s7 + $0xbb8] sm:$0xff] %v945_v55  ;;  %v951_v58 = vld [vmem:[%s8153_s6 + $0x1790] sm:$0xff] }
  0xd2   : > { %948 = vst [vmem:[%s8158_s7 + $0xbc0] sm:$0xff] %v947_v56  ;;  %950 = vst [vmem:[%s8158_s7 + $0xbc8] sm:$0xff] %v949_v57  ;;  %v953_v59 = vld [vmem:[%s8153_s6 + $0x1798] sm:$0xff]  ;;  %v955_v60 = vld [vmem:[%s8153_s6 + $0x17a0] sm:$0xff] }
  0xd3   : > { %952 = vst [vmem:[%s8158_s7 + $0xbd0] sm:$0xff] %v951_v58  ;;  %954 = vst [vmem:[%s8158_s7 + $0xbd8] sm:$0xff] %v953_v59  ;;  %v957_v61 = vld [vmem:[%s8153_s6 + $0x17a8] sm:$0xff]  ;;  %v959_v62 = vld [vmem:[%s8153_s6 + $0x17b0] sm:$0xff] }
  0xd4   : > { %956 = vst [vmem:[%s8158_s7 + $0xbe0] sm:$0xff] %v955_v60  ;;  %v961_v63 = vld [vmem:[%s8153_s6 + $0x17b8] sm:$0xff]  ;;  %958 = vst [vmem:[%s8158_s7 + $0xbe8] sm:$0xff] %v957_v61  ;;  %v963_v0 = vld [vmem:[%s8153_s6 + $0x1800] sm:$0xff] }
  0xd5   : > { %960 = vst [vmem:[%s8158_s7 + $0xbf0] sm:$0xff] %v959_v62  ;;  %962 = vst [vmem:[%s8158_s7 + $0xbf8] sm:$0xff] %v961_v63  ;;  %v965_v1 = vld [vmem:[%s8153_s6 + $0x1808] sm:$0xff]  ;;  %v967_v2 = vld [vmem:[%s8153_s6 + $0x1810] sm:$0xff] }
  0xd6   : > { %964 = vst [vmem:[%s8158_s7 + $0xc00] sm:$0xff] %v963_v0  ;;  %966 = vst [vmem:[%s8158_s7 + $0xc08] sm:$0xff] %v965_v1  ;;  %v969_v3 = vld [vmem:[%s8153_s6 + $0x1818] sm:$0xff]  ;;  %v971_v4 = vld [vmem:[%s8153_s6 + $0x1820] sm:$0xff] }
  0xd7   : > { %968 = vst [vmem:[%s8158_s7 + $0xc10] sm:$0xff] %v967_v2  ;;  %v973_v5 = vld [vmem:[%s8153_s6 + $0x1828] sm:$0xff]  ;;  %970 = vst [vmem:[%s8158_s7 + $0xc18] sm:$0xff] %v969_v3  ;;  %v975_v6 = vld [vmem:[%s8153_s6 + $0x1830] sm:$0xff] }
  0xd8   : > { %972 = vst [vmem:[%s8158_s7 + $0xc20] sm:$0xff] %v971_v4  ;;  %974 = vst [vmem:[%s8158_s7 + $0xc28] sm:$0xff] %v973_v5  ;;  %v977_v7 = vld [vmem:[%s8153_s6 + $0x1838] sm:$0xff]  ;;  %v979_v8 = vld [vmem:[%s8153_s6 + $0x1880] sm:$0xff] }
  0xd9   : > { %976 = vst [vmem:[%s8158_s7 + $0xc30] sm:$0xff] %v975_v6  ;;  %978 = vst [vmem:[%s8158_s7 + $0xc38] sm:$0xff] %v977_v7  ;;  %v981_v9 = vld [vmem:[%s8153_s6 + $0x1888] sm:$0xff]  ;;  %v983_v10 = vld [vmem:[%s8153_s6 + $0x1890] sm:$0xff] }
  0xda   : > { %980 = vst [vmem:[%s8158_s7 + $0xc40] sm:$0xff] %v979_v8  ;;  %v985_v11 = vld [vmem:[%s8153_s6 + $0x1898] sm:$0xff]  ;;  %982 = vst [vmem:[%s8158_s7 + $0xc48] sm:$0xff] %v981_v9  ;;  %v987_v12 = vld [vmem:[%s8153_s6 + $0x18a0] sm:$0xff] }
  0xdb   : > { %984 = vst [vmem:[%s8158_s7 + $0xc50] sm:$0xff] %v983_v10  ;;  %986 = vst [vmem:[%s8158_s7 + $0xc58] sm:$0xff] %v985_v11  ;;  %v989_v13 = vld [vmem:[%s8153_s6 + $0x18a8] sm:$0xff]  ;;  %v991_v14 = vld [vmem:[%s8153_s6 + $0x18b0] sm:$0xff] }
  0xdc   : > { %988 = vst [vmem:[%s8158_s7 + $0xc60] sm:$0xff] %v987_v12  ;;  %990 = vst [vmem:[%s8158_s7 + $0xc68] sm:$0xff] %v989_v13  ;;  %v993_v15 = vld [vmem:[%s8153_s6 + $0x18b8] sm:$0xff]  ;;  %v995_v16 = vld [vmem:[%s8153_s6 + $0x1900] sm:$0xff] }
  0xdd   : > { %992 = vst [vmem:[%s8158_s7 + $0xc70] sm:$0xff] %v991_v14  ;;  %v997_v17 = vld [vmem:[%s8153_s6 + $0x1908] sm:$0xff]  ;;  %994 = vst [vmem:[%s8158_s7 + $0xc78] sm:$0xff] %v993_v15  ;;  %v999_v18 = vld [vmem:[%s8153_s6 + $0x1910] sm:$0xff] }
  0xde   : > { %996 = vst [vmem:[%s8158_s7 + $0xc80] sm:$0xff] %v995_v16  ;;  %998 = vst [vmem:[%s8158_s7 + $0xc88] sm:$0xff] %v997_v17  ;;  %v1001_v19 = vld [vmem:[%s8153_s6 + $0x1918] sm:$0xff]  ;;  %v1003_v20 = vld [vmem:[%s8153_s6 + $0x1920] sm:$0xff] }
  0xdf   : > { %1000 = vst [vmem:[%s8158_s7 + $0xc90] sm:$0xff] %v999_v18  ;;  %1002 = vst [vmem:[%s8158_s7 + $0xc98] sm:$0xff] %v1001_v19  ;;  %v1005_v21 = vld [vmem:[%s8153_s6 + $0x1928] sm:$0xff]  ;;  %v1007_v22 = vld [vmem:[%s8153_s6 + $0x1930] sm:$0xff] }
  0xe0   : > { %1004 = vst [vmem:[%s8158_s7 + $0xca0] sm:$0xff] %v1003_v20  ;;  %v1009_v23 = vld [vmem:[%s8153_s6 + $0x1938] sm:$0xff]  ;;  %1006 = vst [vmem:[%s8158_s7 + $0xca8] sm:$0xff] %v1005_v21  ;;  %v1011_v24 = vld [vmem:[%s8153_s6 + $0x1980] sm:$0xff] }
  0xe1   : > { %1008 = vst [vmem:[%s8158_s7 + $0xcb0] sm:$0xff] %v1007_v22  ;;  %1010 = vst [vmem:[%s8158_s7 + $0xcb8] sm:$0xff] %v1009_v23  ;;  %v1013_v25 = vld [vmem:[%s8153_s6 + $0x1988] sm:$0xff]  ;;  %v1015_v26 = vld [vmem:[%s8153_s6 + $0x1990] sm:$0xff] }
  0xe2   : > { %1012 = vst [vmem:[%s8158_s7 + $0xcc0] sm:$0xff] %v1011_v24  ;;  %1014 = vst [vmem:[%s8158_s7 + $0xcc8] sm:$0xff] %v1013_v25  ;;  %v1017_v27 = vld [vmem:[%s8153_s6 + $0x1998] sm:$0xff]  ;;  %v1019_v28 = vld [vmem:[%s8153_s6 + $0x19a0] sm:$0xff] }
  0xe3   : > { %1016 = vst [vmem:[%s8158_s7 + $0xcd0] sm:$0xff] %v1015_v26  ;;  %v1021_v29 = vld [vmem:[%s8153_s6 + $0x19a8] sm:$0xff]  ;;  %1018 = vst [vmem:[%s8158_s7 + $0xcd8] sm:$0xff] %v1017_v27  ;;  %v1023_v30 = vld [vmem:[%s8153_s6 + $0x19b0] sm:$0xff] }
  0xe4   : > { %1020 = vst [vmem:[%s8158_s7 + $0xce0] sm:$0xff] %v1019_v28  ;;  %1022 = vst [vmem:[%s8158_s7 + $0xce8] sm:$0xff] %v1021_v29  ;;  %v1025_v31 = vld [vmem:[%s8153_s6 + $0x19b8] sm:$0xff]  ;;  %v1027_v32 = vld [vmem:[%s8153_s6 + $0x1a00] sm:$0xff] }
  0xe5   : > { %1024 = vst [vmem:[%s8158_s7 + $0xcf0] sm:$0xff] %v1023_v30  ;;  %1026 = vst [vmem:[%s8158_s7 + $0xcf8] sm:$0xff] %v1025_v31  ;;  %v1029_v33 = vld [vmem:[%s8153_s6 + $0x1a08] sm:$0xff]  ;;  %v1031_v34 = vld [vmem:[%s8153_s6 + $0x1a10] sm:$0xff] }
  0xe6   : > { %1028 = vst [vmem:[%s8158_s7 + $0xd00] sm:$0xff] %v1027_v32  ;;  %v1033_v35 = vld [vmem:[%s8153_s6 + $0x1a18] sm:$0xff]  ;;  %1030 = vst [vmem:[%s8158_s7 + $0xd08] sm:$0xff] %v1029_v33  ;;  %v1035_v36 = vld [vmem:[%s8153_s6 + $0x1a20] sm:$0xff] }
  0xe7   : > { %1032 = vst [vmem:[%s8158_s7 + $0xd10] sm:$0xff] %v1031_v34  ;;  %1034 = vst [vmem:[%s8158_s7 + $0xd18] sm:$0xff] %v1033_v35  ;;  %v1037_v37 = vld [vmem:[%s8153_s6 + $0x1a28] sm:$0xff]  ;;  %v1039_v38 = vld [vmem:[%s8153_s6 + $0x1a30] sm:$0xff] }
  0xe8   : > { %1036 = vst [vmem:[%s8158_s7 + $0xd20] sm:$0xff] %v1035_v36  ;;  %1038 = vst [vmem:[%s8158_s7 + $0xd28] sm:$0xff] %v1037_v37  ;;  %v1041_v39 = vld [vmem:[%s8153_s6 + $0x1a38] sm:$0xff]  ;;  %v1043_v40 = vld [vmem:[%s8153_s6 + $0x1a80] sm:$0xff] }
  0xe9   : > { %1040 = vst [vmem:[%s8158_s7 + $0xd30] sm:$0xff] %v1039_v38  ;;  %v1045_v41 = vld [vmem:[%s8153_s6 + $0x1a88] sm:$0xff]  ;;  %1042 = vst [vmem:[%s8158_s7 + $0xd38] sm:$0xff] %v1041_v39  ;;  %v1047_v42 = vld [vmem:[%s8153_s6 + $0x1a90] sm:$0xff] }
  0xea   : > { %1044 = vst [vmem:[%s8158_s7 + $0xd40] sm:$0xff] %v1043_v40  ;;  %1046 = vst [vmem:[%s8158_s7 + $0xd48] sm:$0xff] %v1045_v41  ;;  %v1049_v43 = vld [vmem:[%s8153_s6 + $0x1a98] sm:$0xff]  ;;  %v1051_v44 = vld [vmem:[%s8153_s6 + $0x1aa0] sm:$0xff] }
  0xeb   : > { %1048 = vst [vmem:[%s8158_s7 + $0xd50] sm:$0xff] %v1047_v42  ;;  %1050 = vst [vmem:[%s8158_s7 + $0xd58] sm:$0xff] %v1049_v43  ;;  %v1053_v45 = vld [vmem:[%s8153_s6 + $0x1aa8] sm:$0xff]  ;;  %v1055_v46 = vld [vmem:[%s8153_s6 + $0x1ab0] sm:$0xff] }
  0xec   : > { %1052 = vst [vmem:[%s8158_s7 + $0xd60] sm:$0xff] %v1051_v44  ;;  %v1057_v47 = vld [vmem:[%s8153_s6 + $0x1ab8] sm:$0xff]  ;;  %1054 = vst [vmem:[%s8158_s7 + $0xd68] sm:$0xff] %v1053_v45  ;;  %v1059_v48 = vld [vmem:[%s8153_s6 + $0x1b00] sm:$0xff] }
  0xed   : > { %1056 = vst [vmem:[%s8158_s7 + $0xd70] sm:$0xff] %v1055_v46  ;;  %1058 = vst [vmem:[%s8158_s7 + $0xd78] sm:$0xff] %v1057_v47  ;;  %v1061_v49 = vld [vmem:[%s8153_s6 + $0x1b08] sm:$0xff]  ;;  %v1063_v50 = vld [vmem:[%s8153_s6 + $0x1b10] sm:$0xff] }
  0xee   : > { %1060 = vst [vmem:[%s8158_s7 + $0xd80] sm:$0xff] %v1059_v48  ;;  %1062 = vst [vmem:[%s8158_s7 + $0xd88] sm:$0xff] %v1061_v49  ;;  %v1065_v51 = vld [vmem:[%s8153_s6 + $0x1b18] sm:$0xff]  ;;  %v1067_v52 = vld [vmem:[%s8153_s6 + $0x1b20] sm:$0xff] }
  0xef   : > { %1064 = vst [vmem:[%s8158_s7 + $0xd90] sm:$0xff] %v1063_v50  ;;  %v1069_v53 = vld [vmem:[%s8153_s6 + $0x1b28] sm:$0xff]  ;;  %1066 = vst [vmem:[%s8158_s7 + $0xd98] sm:$0xff] %v1065_v51  ;;  %v1071_v54 = vld [vmem:[%s8153_s6 + $0x1b30] sm:$0xff] }
  0xf0   : > { %1068 = vst [vmem:[%s8158_s7 + $0xda0] sm:$0xff] %v1067_v52  ;;  %1070 = vst [vmem:[%s8158_s7 + $0xda8] sm:$0xff] %v1069_v53  ;;  %v1073_v55 = vld [vmem:[%s8153_s6 + $0x1b38] sm:$0xff]  ;;  %v1075_v56 = vld [vmem:[%s8153_s6 + $0x1b80] sm:$0xff] }
  0xf1   : > { %1072 = vst [vmem:[%s8158_s7 + $0xdb0] sm:$0xff] %v1071_v54  ;;  %1074 = vst [vmem:[%s8158_s7 + $0xdb8] sm:$0xff] %v1073_v55  ;;  %v1077_v57 = vld [vmem:[%s8153_s6 + $0x1b88] sm:$0xff]  ;;  %v1079_v58 = vld [vmem:[%s8153_s6 + $0x1b90] sm:$0xff] }
  0xf2   : > { %1076 = vst [vmem:[%s8158_s7 + $0xdc0] sm:$0xff] %v1075_v56  ;;  %v1081_v59 = vld [vmem:[%s8153_s6 + $0x1b98] sm:$0xff]  ;;  %1078 = vst [vmem:[%s8158_s7 + $0xdc8] sm:$0xff] %v1077_v57  ;;  %v1083_v60 = vld [vmem:[%s8153_s6 + $0x1ba0] sm:$0xff] }
  0xf3   : > { %1080 = vst [vmem:[%s8158_s7 + $0xdd0] sm:$0xff] %v1079_v58  ;;  %1082 = vst [vmem:[%s8158_s7 + $0xdd8] sm:$0xff] %v1081_v59  ;;  %v1085_v61 = vld [vmem:[%s8153_s6 + $0x1ba8] sm:$0xff]  ;;  %v1087_v62 = vld [vmem:[%s8153_s6 + $0x1bb0] sm:$0xff] }
  0xf4   : > { %1084 = vst [vmem:[%s8158_s7 + $0xde0] sm:$0xff] %v1083_v60  ;;  %1086 = vst [vmem:[%s8158_s7 + $0xde8] sm:$0xff] %v1085_v61  ;;  %v1089_v63 = vld [vmem:[%s8153_s6 + $0x1bb8] sm:$0xff]  ;;  %v1091_v0 = vld [vmem:[%s8153_s6 + $0x1c00] sm:$0xff] }
  0xf5   : > { %1088 = vst [vmem:[%s8158_s7 + $0xdf0] sm:$0xff] %v1087_v62  ;;  %v1093_v1 = vld [vmem:[%s8153_s6 + $0x1c08] sm:$0xff]  ;;  %1090 = vst [vmem:[%s8158_s7 + $0xdf8] sm:$0xff] %v1089_v63  ;;  %v1095_v2 = vld [vmem:[%s8153_s6 + $0x1c10] sm:$0xff] }
  0xf6   : > { %1092 = vst [vmem:[%s8158_s7 + $0xe00] sm:$0xff] %v1091_v0  ;;  %1094 = vst [vmem:[%s8158_s7 + $0xe08] sm:$0xff] %v1093_v1  ;;  %v1097_v3 = vld [vmem:[%s8153_s6 + $0x1c18] sm:$0xff]  ;;  %v1099_v4 = vld [vmem:[%s8153_s6 + $0x1c20] sm:$0xff] }
  0xf7   : > { %1096 = vst [vmem:[%s8158_s7 + $0xe10] sm:$0xff] %v1095_v2  ;;  %1098 = vst [vmem:[%s8158_s7 + $0xe18] sm:$0xff] %v1097_v3  ;;  %v1101_v5 = vld [vmem:[%s8153_s6 + $0x1c28] sm:$0xff]  ;;  %v1103_v6 = vld [vmem:[%s8153_s6 + $0x1c30] sm:$0xff] }
  0xf8   : > { %1100 = vst [vmem:[%s8158_s7 + $0xe20] sm:$0xff] %v1099_v4  ;;  %v1105_v7 = vld [vmem:[%s8153_s6 + $0x1c38] sm:$0xff]  ;;  %1102 = vst [vmem:[%s8158_s7 + $0xe28] sm:$0xff] %v1101_v5  ;;  %v1107_v8 = vld [vmem:[%s8153_s6 + $0x1c80] sm:$0xff] }
  0xf9   : > { %1104 = vst [vmem:[%s8158_s7 + $0xe30] sm:$0xff] %v1103_v6  ;;  %1106 = vst [vmem:[%s8158_s7 + $0xe38] sm:$0xff] %v1105_v7  ;;  %v1109_v9 = vld [vmem:[%s8153_s6 + $0x1c88] sm:$0xff]  ;;  %v1111_v10 = vld [vmem:[%s8153_s6 + $0x1c90] sm:$0xff] }
  0xfa   : > { %1108 = vst [vmem:[%s8158_s7 + $0xe40] sm:$0xff] %v1107_v8  ;;  %1110 = vst [vmem:[%s8158_s7 + $0xe48] sm:$0xff] %v1109_v9  ;;  %v1113_v11 = vld [vmem:[%s8153_s6 + $0x1c98] sm:$0xff]  ;;  %v1115_v12 = vld [vmem:[%s8153_s6 + $0x1ca0] sm:$0xff] }
  0xfb   : > { %1112 = vst [vmem:[%s8158_s7 + $0xe50] sm:$0xff] %v1111_v10  ;;  %v1117_v13 = vld [vmem:[%s8153_s6 + $0x1ca8] sm:$0xff]  ;;  %1114 = vst [vmem:[%s8158_s7 + $0xe58] sm:$0xff] %v1113_v11  ;;  %v1119_v14 = vld [vmem:[%s8153_s6 + $0x1cb0] sm:$0xff] }
  0xfc   : > { %1116 = vst [vmem:[%s8158_s7 + $0xe60] sm:$0xff] %v1115_v12  ;;  %1118 = vst [vmem:[%s8158_s7 + $0xe68] sm:$0xff] %v1117_v13  ;;  %v1121_v15 = vld [vmem:[%s8153_s6 + $0x1cb8] sm:$0xff]  ;;  %v1123_v16 = vld [vmem:[%s8153_s6 + $0x1d00] sm:$0xff] }
  0xfd   : > { %1120 = vst [vmem:[%s8158_s7 + $0xe70] sm:$0xff] %v1119_v14  ;;  %1122 = vst [vmem:[%s8158_s7 + $0xe78] sm:$0xff] %v1121_v15  ;;  %v1125_v17 = vld [vmem:[%s8153_s6 + $0x1d08] sm:$0xff]  ;;  %v1127_v18 = vld [vmem:[%s8153_s6 + $0x1d10] sm:$0xff] }
  0xfe   : > { %1124 = vst [vmem:[%s8158_s7 + $0xe80] sm:$0xff] %v1123_v16  ;;  %v1129_v19 = vld [vmem:[%s8153_s6 + $0x1d18] sm:$0xff]  ;;  %1126 = vst [vmem:[%s8158_s7 + $0xe88] sm:$0xff] %v1125_v17  ;;  %v1131_v20 = vld [vmem:[%s8153_s6 + $0x1d20] sm:$0xff] }
  0xff   : > { %1128 = vst [vmem:[%s8158_s7 + $0xe90] sm:$0xff] %v1127_v18  ;;  %1130 = vst [vmem:[%s8158_s7 + $0xe98] sm:$0xff] %v1129_v19  ;;  %v1133_v21 = vld [vmem:[%s8153_s6 + $0x1d28] sm:$0xff]  ;;  %v1135_v22 = vld [vmem:[%s8153_s6 + $0x1d30] sm:$0xff] }
 0x100   : > { %1132 = vst [vmem:[%s8158_s7 + $0xea0] sm:$0xff] %v1131_v20  ;;  %1134 = vst [vmem:[%s8158_s7 + $0xea8] sm:$0xff] %v1133_v21  ;;  %v1137_v23 = vld [vmem:[%s8153_s6 + $0x1d38] sm:$0xff]  ;;  %v1139_v24 = vld [vmem:[%s8153_s6 + $0x1d80] sm:$0xff] }
 0x101   : > { %1136 = vst [vmem:[%s8158_s7 + $0xeb0] sm:$0xff] %v1135_v22  ;;  %v1141_v25 = vld [vmem:[%s8153_s6 + $0x1d88] sm:$0xff]  ;;  %1138 = vst [vmem:[%s8158_s7 + $0xeb8] sm:$0xff] %v1137_v23  ;;  %v1143_v26 = vld [vmem:[%s8153_s6 + $0x1d90] sm:$0xff] }
 0x102   : > { %1140 = vst [vmem:[%s8158_s7 + $0xec0] sm:$0xff] %v1139_v24  ;;  %1142 = vst [vmem:[%s8158_s7 + $0xec8] sm:$0xff] %v1141_v25  ;;  %v1145_v27 = vld [vmem:[%s8153_s6 + $0x1d98] sm:$0xff]  ;;  %v1147_v28 = vld [vmem:[%s8153_s6 + $0x1da0] sm:$0xff] }
 0x103   : > { %1144 = vst [vmem:[%s8158_s7 + $0xed0] sm:$0xff] %v1143_v26  ;;  %1146 = vst [vmem:[%s8158_s7 + $0xed8] sm:$0xff] %v1145_v27  ;;  %v1149_v29 = vld [vmem:[%s8153_s6 + $0x1da8] sm:$0xff]  ;;  %v1151_v30 = vld [vmem:[%s8153_s6 + $0x1db0] sm:$0xff] }
 0x104   : > { %1148 = vst [vmem:[%s8158_s7 + $0xee0] sm:$0xff] %v1147_v28  ;;  %v1153_v31 = vld [vmem:[%s8153_s6 + $0x1db8] sm:$0xff]  ;;  %1150 = vst [vmem:[%s8158_s7 + $0xee8] sm:$0xff] %v1149_v29  ;;  %v1155_v32 = vld [vmem:[%s8153_s6 + $0x1e00] sm:$0xff] }
 0x105   : > { %1152 = vst [vmem:[%s8158_s7 + $0xef0] sm:$0xff] %v1151_v30  ;;  %1154 = vst [vmem:[%s8158_s7 + $0xef8] sm:$0xff] %v1153_v31  ;;  %v1157_v33 = vld [vmem:[%s8153_s6 + $0x1e08] sm:$0xff]  ;;  %v1159_v34 = vld [vmem:[%s8153_s6 + $0x1e10] sm:$0xff] }
 0x106   : > { %1156 = vst [vmem:[%s8158_s7 + $0xf00] sm:$0xff] %v1155_v32  ;;  %1158 = vst [vmem:[%s8158_s7 + $0xf08] sm:$0xff] %v1157_v33  ;;  %v1161_v35 = vld [vmem:[%s8153_s6 + $0x1e18] sm:$0xff]  ;;  %v1163_v36 = vld [vmem:[%s8153_s6 + $0x1e20] sm:$0xff] }
 0x107   : > { %1160 = vst [vmem:[%s8158_s7 + $0xf10] sm:$0xff] %v1159_v34  ;;  %v1165_v37 = vld [vmem:[%s8153_s6 + $0x1e28] sm:$0xff]  ;;  %1162 = vst [vmem:[%s8158_s7 + $0xf18] sm:$0xff] %v1161_v35  ;;  %v1167_v38 = vld [vmem:[%s8153_s6 + $0x1e30] sm:$0xff] }
 0x108   : > { %1164 = vst [vmem:[%s8158_s7 + $0xf20] sm:$0xff] %v1163_v36  ;;  %1166 = vst [vmem:[%s8158_s7 + $0xf28] sm:$0xff] %v1165_v37  ;;  %v1169_v39 = vld [vmem:[%s8153_s6 + $0x1e38] sm:$0xff]  ;;  %v1171_v40 = vld [vmem:[%s8153_s6 + $0x1e80] sm:$0xff] }
 0x109   : > { %1168 = vst [vmem:[%s8158_s7 + $0xf30] sm:$0xff] %v1167_v38  ;;  %1170 = vst [vmem:[%s8158_s7 + $0xf38] sm:$0xff] %v1169_v39  ;;  %v1173_v41 = vld [vmem:[%s8153_s6 + $0x1e88] sm:$0xff]  ;;  %v1175_v42 = vld [vmem:[%s8153_s6 + $0x1e90] sm:$0xff] }
 0x10a   : > { %1172 = vst [vmem:[%s8158_s7 + $0xf40] sm:$0xff] %v1171_v40  ;;  %v1177_v43 = vld [vmem:[%s8153_s6 + $0x1e98] sm:$0xff]  ;;  %1174 = vst [vmem:[%s8158_s7 + $0xf48] sm:$0xff] %v1173_v41  ;;  %v1179_v44 = vld [vmem:[%s8153_s6 + $0x1ea0] sm:$0xff] }
 0x10b   : > { %1176 = vst [vmem:[%s8158_s7 + $0xf50] sm:$0xff] %v1175_v42  ;;  %1178 = vst [vmem:[%s8158_s7 + $0xf58] sm:$0xff] %v1177_v43  ;;  %v1181_v45 = vld [vmem:[%s8153_s6 + $0x1ea8] sm:$0xff]  ;;  %v1183_v46 = vld [vmem:[%s8153_s6 + $0x1eb0] sm:$0xff] }
 0x10c   : > { %1180 = vst [vmem:[%s8158_s7 + $0xf60] sm:$0xff] %v1179_v44  ;;  %1182 = vst [vmem:[%s8158_s7 + $0xf68] sm:$0xff] %v1181_v45  ;;  %v1185_v47 = vld [vmem:[%s8153_s6 + $0x1eb8] sm:$0xff]  ;;  %v1187_v48 = vld [vmem:[%s8153_s6 + $0x1f00] sm:$0xff] }
 0x10d   : > { %1184 = vst [vmem:[%s8158_s7 + $0xf70] sm:$0xff] %v1183_v46  ;;  %v1189_v49 = vld [vmem:[%s8153_s6 + $0x1f08] sm:$0xff]  ;;  %1186 = vst [vmem:[%s8158_s7 + $0xf78] sm:$0xff] %v1185_v47  ;;  %v1191_v50 = vld [vmem:[%s8153_s6 + $0x1f10] sm:$0xff] }
 0x10e   : > { %1188 = vst [vmem:[%s8158_s7 + $0xf80] sm:$0xff] %v1187_v48  ;;  %1190 = vst [vmem:[%s8158_s7 + $0xf88] sm:$0xff] %v1189_v49  ;;  %v1193_v51 = vld [vmem:[%s8153_s6 + $0x1f18] sm:$0xff]  ;;  %v1195_v52 = vld [vmem:[%s8153_s6 + $0x1f20] sm:$0xff] }
 0x10f   : > { %1192 = vst [vmem:[%s8158_s7 + $0xf90] sm:$0xff] %v1191_v50  ;;  %1194 = vst [vmem:[%s8158_s7 + $0xf98] sm:$0xff] %v1193_v51  ;;  %v1197_v53 = vld [vmem:[%s8153_s6 + $0x1f28] sm:$0xff]  ;;  %v1199_v54 = vld [vmem:[%s8153_s6 + $0x1f30] sm:$0xff] }
 0x110   : > { %1196 = vst [vmem:[%s8158_s7 + $0xfa0] sm:$0xff] %v1195_v52  ;;  %v1201_v55 = vld [vmem:[%s8153_s6 + $0x1f38] sm:$0xff]  ;;  %1198 = vst [vmem:[%s8158_s7 + $0xfa8] sm:$0xff] %v1197_v53  ;;  %v1203_v56 = vld [vmem:[%s8153_s6 + $0x1f80] sm:$0xff] }
 0x111   : > { %1200 = vst [vmem:[%s8158_s7 + $0xfb0] sm:$0xff] %v1199_v54  ;;  %1202 = vst [vmem:[%s8158_s7 + $0xfb8] sm:$0xff] %v1201_v55  ;;  %v1205_v57 = vld [vmem:[%s8153_s6 + $0x1f88] sm:$0xff]  ;;  %v1207_v58 = vld [vmem:[%s8153_s6 + $0x1f90] sm:$0xff] }
 0x112   : > { %1204 = vst [vmem:[%s8158_s7 + $0xfc0] sm:$0xff] %v1203_v56  ;;  %1206 = vst [vmem:[%s8158_s7 + $0xfc8] sm:$0xff] %v1205_v57  ;;  %v1209_v59 = vld [vmem:[%s8153_s6 + $0x1f98] sm:$0xff]  ;;  %v1211_v60 = vld [vmem:[%s8153_s6 + $0x1fa0] sm:$0xff] }
 0x113   : > { %1208 = vst [vmem:[%s8158_s7 + $0xfd0] sm:$0xff] %v1207_v58  ;;  %v1213_v61 = vld [vmem:[%s8153_s6 + $0x1fa8] sm:$0xff]  ;;  %1210 = vst [vmem:[%s8158_s7 + $0xfd8] sm:$0xff] %v1209_v59  ;;  %v1215_v62 = vld [vmem:[%s8153_s6 + $0x1fb0] sm:$0xff] }
 0x114   : > { %1212 = vst [vmem:[%s8158_s7 + $0xfe0] sm:$0xff] %v1211_v60  ;;  %1214 = vst [vmem:[%s8158_s7 + $0xfe8] sm:$0xff] %v1213_v61  ;;  %v1217_v63 = vld [vmem:[%s8153_s6 + $0x1fb8] sm:$0xff] }
 0x115   : > { %1216 = vst [vmem:[%s8158_s7 + $0xff0] sm:$0xff] %v1215_v62  ;;  %1218 = vst [vmem:[%s8158_s7 + $0xff8] sm:$0xff] %v1217_v63 }
 0x116 PF: > { %p7140_p7 = scmp.ge.s32.totalorder %s8068_s21, 1  ;;  %p1245_p8 = scmp.lt.s32.totalorder %s8068_s21, 5 }
 0x118   : > { %p1246_p9 = pnand %p7140_p7, %p1245_p8 }
 0x119   : > { %s1252_s8 = sand.u32 (!%p1246_p9), 1, %s8044_s15   ;;  %s7142_s9 = sshll.u32 (!%p1246_p9), %s8056_s18, 4 }
 0x11a   : > { %1249 = sbr.rel (%p1246_p9) target bundleno = 1389 (0x56d), region = 55  ;;  %s9185_s10 = sshll.u32 (!%p1246_p9), %s1252_s8, 12 }
 0x11b   : > { %p1291_p10 = scmp.lt.s32.totalorder (!%p1246_p9), %s7142_s9, 31  ;;  %s7143_s11 = sshll.u32 (!%p1246_p9), %s8056_s18, 1 }
 0x11c   : > { %s1296_s12 = sadd.s32 (!%p1246_p9), %s8052_s17, %s7143_s11  ;;  %p1306_p11 = scmp.lt.s32.totalorder (!%p1246_p9), %s8056_s18, 1 }
 0x11d   : > { %s7144_s25 = sshll.u32 (!%p1246_p9), %s1296_s12, 7  ;;  %s1254_s8 = scalar_lea.vmem (!%p1246_p9), [#allocation2], %s9185_s10 }
 0x11e   : > { %p1298_p12 = scmp.lt.s32.totalorder (!%p1246_p9), %s7144_s25, 511  ;;  %p7149_p13 = scmp.ne.s32.totalorder (!%p1246_p9), %s8052_s17, 0 }
 0x121   : > { %s10212_s9 = smov (!%p1291_p10, %s7142_s9), 31  ;;  %s10214_s18 = smov (!%p1306_p11, %s8056_s18), 1 }
 0x122   : > { %s1293_s24 = scalar_lea.vmem %s10196_s2, %s10212_s9  ;;  %s10216_s25 = smov (!%p1298_p12, %s7144_s25), 511  ;;  %v8070_v0 = vmov (!%p7149_p13), 0.0  }
 0x123   : > { %s7928_s15 = sshll.u32 %s10214_s18, 6  ;;  %s7927_s27 = sshll.u32 %s10216_s25, 5 }
 0x124   : > { %s9200_s30 = scalar_lea.vmem %s10198_s4, %s7928_s15  ;;  %s9205_s7 = scalar_lea.vmem %s10197_s3, %s7927_s27 }
 0x125   : > { %1314 = sbr.rel (%p7149_p13) target bundleno = 300 (0x12c), region = 63  ;;  %1315 = vst [vmem:[%s9200_s30] sm:$0xff] (!%p7149_p13), %v8070_v0  ;;  %1316 = vst [vmem:[%s9200_s30 + $0x8] sm:$0xff] (!%p7149_p13), %v8070_v0 }
 0x126   : > { %1317 = vst [vmem:[%s9200_s30 + $0x10] sm:$0xff] (!%p7149_p13), %v8070_v0  ;;  %1318 = vst [vmem:[%s9200_s30 + $0x18] sm:$0xff] (!%p7149_p13), %v8070_v0 }
 0x127   : > { %1319 = vst [vmem:[%s9200_s30 + $0x20] sm:$0xff] (!%p7149_p13), %v8070_v0  ;;  %1320 = vst [vmem:[%s9200_s30 + $0x28] sm:$0xff] (!%p7149_p13), %v8070_v0 }
 0x128   : > { %1321 = vst [vmem:[%s9200_s30 + $0x30] sm:$0xff] (!%p7149_p13), %v8070_v0  ;;  %1322 = vst [vmem:[%s9200_s30 + $0x38] sm:$0xff] (!%p7149_p13), %v8070_v0 }
 0x12c PF: > { %s7150_s18 = sshll.u32 %s8052_s17, 10  ;;  %v9221_v1 = vld [vmem:[%s10194_s0] sm:$0xff] }
 0x12d   : > { %s9223_s12 = sshra.s32 %s7150_s18, 7  ;;  %v9227_v2 = vcombine.high %v9221_v1, %v9221_v1 }
 0x12e   : > { %s7151_s13 = sshll.u32 %s9223_s12, 2  ;;  %s1584_s28 = scalar_lea.vmem %s1293_s24, %s9223_s12 }
 0x12f   : > { %s9230_s14 = scalar_lea.vmem %s1254_s8, %s7151_s13 [#allocation2]  ;;  %2955 = vmatprep.mubr.bf16.mxu0 %v9227_v2  ;;  %3037 = vmatprep.mubr.bf16.mxu1 %v9227_v2 }
 0x130   : > { %v1328_v3 = vld [vmem:[%s9230_s14] sm:$0xff]  ;;  %v1329_v5 = vld [vmem:[%s9230_s14 + $0x8] sm:$0xff] }
 0x131   : > { %v1332_v4 = vld [vmem:[%s9230_s14 + $0x40] sm:$0xff]  ;;  %v1333_v7 = vld [vmem:[%s9230_s14 + $0x48] sm:$0xff] }
 0x132   : > { %v7157_v6 = vcombine.high %v1328_v3, %v1332_v4  ;;  %v7156_v8 = vcombine.low %v1328_v3, %v1332_v4  ;;  %v1336_v9 = vld [vmem:[%s9230_s14 + $0x80] sm:$0xff]  ;;  %v7159_v11 = vcombine.high %v1329_v5, %v1333_v7  ;;  %v7158_v12 = vcombine.low %v1329_v5, %v1333_v7  ;;  %v1337_v14 = vld [vmem:[%s9230_s14 + $0x88] sm:$0xff] }
 0x133   : > { %v1340_v10 = vld [vmem:[%s9230_s14 + $0xc0] sm:$0xff]  ;;  %v1341_v15 = vld [vmem:[%s9230_s14 + $0xc8] sm:$0xff] }
 0x134   : > { %v7165_v13 = vcombine.high %v1336_v9, %v1340_v10  ;;  %v1344_v16 = vld [vmem:[%s9230_s14 + $0x100] sm:$0xff]  ;;  %2923 = vmatprep.subr.bf16.mxu0 %v7157_v6  ;;  %v7167_v17 = vcombine.high %v1337_v14, %v1341_v15  ;;  %v1345_v19 = vld [vmem:[%s9230_s14 + $0x108] sm:$0xff]  ;;  %3005 = vmatprep.subr.bf16.mxu1 %v7159_v11  ;;  %v7164_v21 = vcombine.low %v1336_v9, %v1340_v10 }
 0x135   : > { %v1348_v18 = vld [vmem:[%s9230_s14 + $0x140] sm:$0xff]  ;;  %v1349_v20 = vld [vmem:[%s9230_s14 + $0x148] sm:$0xff]  ;;  %2924 = vmatpush1.bf16.msra.mxu0 %v7156_v8  ;;  %3006 = vmatpush1.bf16.msra.mxu1 %v7158_v12  ;;  %v7166_v22 = vcombine.low %v1337_v14, %v1341_v15 }
 0x136   : > { %2925 = vmatprep.subr.bf16.mxu0 %v7165_v13  ;;  %v7173_v23 = vcombine.high %v1344_v16, %v1348_v18  ;;  %3007 = vmatprep.subr.bf16.mxu1 %v7167_v17  ;;  %v7175_v24 = vcombine.high %v1345_v19, %v1349_v20  ;;  %v1352_v25 = vld [vmem:[%s9230_s14 + $0x180] sm:$0xff]  ;;  %v1353_v27 = vld [vmem:[%s9230_s14 + $0x188] sm:$0xff]  ;;  %v7172_v29 = vcombine.low %v1344_v16, %v1348_v18 }
 0x137   : > { %v1356_v26 = vld [vmem:[%s9230_s14 + $0x1c0] sm:$0xff]  ;;  %v1357_v28 = vld [vmem:[%s9230_s14 + $0x1c8] sm:$0xff]  ;;  %v7174_v30 = vcombine.low %v1345_v19, %v1349_v20 }
 0x138   : > { %v7181_v31 = vcombine.high %v1352_v25, %v1356_v26  ;;  %v7183_v32 = vcombine.high %v1353_v27, %v1357_v28  ;;  %v1360_v33 = vld [vmem:[%s9230_s14 + $0x200] sm:$0xff]  ;;  %v1361_v35 = vld [vmem:[%s9230_s14 + $0x208] sm:$0xff]  ;;  %v7180_v37 = vcombine.low %v1352_v25, %v1356_v26  ;;  %v7182_v38 = vcombine.low %v1353_v27, %v1357_v28 }
 0x139   : > { %2926 = vmatpush1.bf16.msra.mxu0 %v7164_v21  ;;  %3008 = vmatpush1.bf16.msra.mxu1 %v7166_v22  ;;  %v1364_v34 = vld [vmem:[%s9230_s14 + $0x240] sm:$0xff]  ;;  %v1365_v36 = vld [vmem:[%s9230_s14 + $0x248] sm:$0xff] }
 0x13a   : > { %2927 = vmatprep.subr.bf16.mxu0 %v7173_v23  ;;  %3009 = vmatprep.subr.bf16.mxu1 %v7175_v24  ;;  %v7189_v39 = vcombine.high %v1360_v33, %v1364_v34  ;;  %v7191_v40 = vcombine.high %v1361_v35, %v1365_v36  ;;  %v1368_v41 = vld [vmem:[%s9230_s14 + $0x280] sm:$0xff]  ;;  %v1369_v43 = vld [vmem:[%s9230_s14 + $0x288] sm:$0xff]  ;;  %v7188_v45 = vcombine.low %v1360_v33, %v1364_v34 }
 0x13b   : > { %v1372_v42 = vld [vmem:[%s9230_s14 + $0x2c0] sm:$0xff]  ;;  %v1373_v44 = vld [vmem:[%s9230_s14 + $0x2c8] sm:$0xff]  ;;  %v7190_v46 = vcombine.low %v1361_v35, %v1365_v36 }
 0x13c   : > { %v7197_v47 = vcombine.high %v1368_v41, %v1372_v42  ;;  %v7199_v48 = vcombine.high %v1369_v43, %v1373_v44  ;;  %v1376_v49 = vld [vmem:[%s9230_s14 + $0x300] sm:$0xff]  ;;  %v1377_v51 = vld [vmem:[%s9230_s14 + $0x308] sm:$0xff]  ;;  %v7196_v53 = vcombine.low %v1368_v41, %v1372_v42  ;;  %v7198_v54 = vcombine.low %v1369_v43, %v1373_v44 }
 0x13d   : > { %2928 = vmatpush1.bf16.msra.mxu0 %v7172_v29  ;;  %3010 = vmatpush1.bf16.msra.mxu1 %v7174_v30  ;;  %v1380_v50 = vld [vmem:[%s9230_s14 + $0x340] sm:$0xff]  ;;  %v1381_v52 = vld [vmem:[%s9230_s14 + $0x348] sm:$0xff] }
 0x13e   : > { %2929 = vmatprep.subr.bf16.mxu0 %v7181_v31  ;;  %3011 = vmatprep.subr.bf16.mxu1 %v7183_v32  ;;  %v7205_v55 = vcombine.high %v1376_v49, %v1380_v50  ;;  %v7207_v56 = vcombine.high %v1377_v51, %v1381_v52  ;;  %v1384_v57 = vld [vmem:[%s9230_s14 + $0x380] sm:$0xff]  ;;  %v1385_v59 = vld [vmem:[%s9230_s14 + $0x388] sm:$0xff]  ;;  %v7204_v61 = vcombine.low %v1376_v49, %v1380_v50 }
 0x13f   : > { %v1388_v58 = vld [vmem:[%s9230_s14 + $0x3c0] sm:$0xff]  ;;  %v1389_v60 = vld [vmem:[%s9230_s14 + $0x3c8] sm:$0xff]  ;;  %v7206_v62 = vcombine.low %v1377_v51, %v1381_v52 }
 0x140   : > { %v7213_v63 = vcombine.high %v1384_v57, %v1388_v58  ;;  %v7215_v0 = vcombine.high %v1385_v59, %v1389_v60  ;;  %v1392_v3 = vld [vmem:[%s9230_s14 + $0x400] sm:$0xff]  ;;  %v1393_v5 = vld [vmem:[%s9230_s14 + $0x408] sm:$0xff]  ;;  %v7212_v7 = vcombine.low %v1384_v57, %v1388_v58  ;;  %v7214_v8 = vcombine.low %v1385_v59, %v1389_v60 }
 0x141   : > { %2930 = vmatpush1.bf16.msra.mxu0 %v7180_v37  ;;  %3012 = vmatpush1.bf16.msra.mxu1 %v7182_v38  ;;  %v1396_v4 = vld [vmem:[%s9230_s14 + $0x440] sm:$0xff]  ;;  %v1397_v6 = vld [vmem:[%s9230_s14 + $0x448] sm:$0xff] }
 0x142   : > { %2931 = vmatprep.subr.bf16.mxu0 %v7189_v39  ;;  %3013 = vmatprep.subr.bf16.mxu1 %v7191_v40  ;;  %v7221_v9 = vcombine.high %v1392_v3, %v1396_v4  ;;  %v7223_v10 = vcombine.high %v1393_v5, %v1397_v6  ;;  %v1400_v11 = vld [vmem:[%s9230_s14 + $0x480] sm:$0xff]  ;;  %v1401_v13 = vld [vmem:[%s9230_s14 + $0x488] sm:$0xff]  ;;  %v7220_v15 = vcombine.low %v1392_v3, %v1396_v4 }
 0x143   : > { %v1404_v12 = vld [vmem:[%s9230_s14 + $0x4c0] sm:$0xff]  ;;  %v1405_v14 = vld [vmem:[%s9230_s14 + $0x4c8] sm:$0xff]  ;;  %v7222_v16 = vcombine.low %v1393_v5, %v1397_v6 }
 0x144   : > { %v7229_v17 = vcombine.high %v1400_v11, %v1404_v12  ;;  %v7231_v18 = vcombine.high %v1401_v13, %v1405_v14  ;;  %v1408_v19 = vld [vmem:[%s9230_s14 + $0x500] sm:$0xff]  ;;  %v1409_v21 = vld [vmem:[%s9230_s14 + $0x508] sm:$0xff]  ;;  %v7228_v23 = vcombine.low %v1400_v11, %v1404_v12  ;;  %v7230_v24 = vcombine.low %v1401_v13, %v1405_v14 }
 0x145   : > { %2932 = vmatpush1.bf16.msra.mxu0 %v7188_v45  ;;  %3014 = vmatpush1.bf16.msra.mxu1 %v7190_v46  ;;  %v1412_v20 = vld [vmem:[%s9230_s14 + $0x540] sm:$0xff]  ;;  %v1413_v22 = vld [vmem:[%s9230_s14 + $0x548] sm:$0xff] }
 0x146   : > { %2933 = vmatprep.subr.bf16.mxu0 %v7197_v47  ;;  %3015 = vmatprep.subr.bf16.mxu1 %v7199_v48  ;;  %v7237_v25 = vcombine.high %v1408_v19, %v1412_v20  ;;  %v7239_v26 = vcombine.high %v1409_v21, %v1413_v22  ;;  %v1416_v27 = vld [vmem:[%s9230_s14 + $0x580] sm:$0xff]  ;;  %v1417_v29 = vld [vmem:[%s9230_s14 + $0x588] sm:$0xff]  ;;  %v7236_v31 = vcombine.low %v1408_v19, %v1412_v20 }
 0x147   : > { %v1420_v28 = vld [vmem:[%s9230_s14 + $0x5c0] sm:$0xff]  ;;  %v1421_v30 = vld [vmem:[%s9230_s14 + $0x5c8] sm:$0xff]  ;;  %v7238_v32 = vcombine.low %v1409_v21, %v1413_v22 }
 0x148   : > { %v7245_v33 = vcombine.high %v1416_v27, %v1420_v28  ;;  %v7247_v34 = vcombine.high %v1417_v29, %v1421_v30  ;;  %v1424_v35 = vld [vmem:[%s9230_s14 + $0x600] sm:$0xff]  ;;  %v1425_v37 = vld [vmem:[%s9230_s14 + $0x608] sm:$0xff]  ;;  %v7244_v39 = vcombine.low %v1416_v27, %v1420_v28  ;;  %v7246_v40 = vcombine.low %v1417_v29, %v1421_v30 }
 0x149   : > { %2934 = vmatpush1.bf16.msra.mxu0 %v7196_v53  ;;  %3016 = vmatpush1.bf16.msra.mxu1 %v7198_v54  ;;  %v1428_v36 = vld [vmem:[%s9230_s14 + $0x640] sm:$0xff]  ;;  %v1429_v38 = vld [vmem:[%s9230_s14 + $0x648] sm:$0xff] }
 0x14a   : > { %2935 = vmatprep.subr.bf16.mxu0 %v7205_v55  ;;  %3017 = vmatprep.subr.bf16.mxu1 %v7207_v56  ;;  %v7253_v41 = vcombine.high %v1424_v35, %v1428_v36  ;;  %v7255_v42 = vcombine.high %v1425_v37, %v1429_v38  ;;  %v1432_v43 = vld [vmem:[%s9230_s14 + $0x680] sm:$0xff]  ;;  %v1433_v45 = vld [vmem:[%s9230_s14 + $0x688] sm:$0xff]  ;;  %v7252_v47 = vcombine.low %v1424_v35, %v1428_v36 }
 0x14b   : > { %v1436_v44 = vld [vmem:[%s9230_s14 + $0x6c0] sm:$0xff]  ;;  %v1437_v46 = vld [vmem:[%s9230_s14 + $0x6c8] sm:$0xff]  ;;  %v7254_v48 = vcombine.low %v1425_v37, %v1429_v38 }
 0x14c   : > { %v7261_v49 = vcombine.high %v1432_v43, %v1436_v44  ;;  %v7263_v50 = vcombine.high %v1433_v45, %v1437_v46  ;;  %v1440_v51 = vld [vmem:[%s9230_s14 + $0x700] sm:$0xff]  ;;  %v1441_v53 = vld [vmem:[%s9230_s14 + $0x708] sm:$0xff]  ;;  %v7260_v55 = vcombine.low %v1432_v43, %v1436_v44  ;;  %v7262_v56 = vcombine.low %v1433_v45, %v1437_v46 }
 0x14d   : > { %2936 = vmatpush1.bf16.msra.mxu0 %v7204_v61  ;;  %3018 = vmatpush1.bf16.msra.mxu1 %v7206_v62  ;;  %v1444_v52 = vld [vmem:[%s9230_s14 + $0x740] sm:$0xff]  ;;  %v1445_v54 = vld [vmem:[%s9230_s14 + $0x748] sm:$0xff] }
 0x14e   : > { %2937 = vmatprep.subr.bf16.mxu0 %v7213_v63  ;;  %3019 = vmatprep.subr.bf16.mxu1 %v7215_v0  ;;  %v7269_v57 = vcombine.high %v1440_v51, %v1444_v52  ;;  %v7271_v58 = vcombine.high %v1441_v53, %v1445_v54  ;;  %v1448_v59 = vld [vmem:[%s9230_s14 + $0x780] sm:$0xff]  ;;  %v1449_v61 = vld [vmem:[%s9230_s14 + $0x788] sm:$0xff]  ;;  %v7268_v63 = vcombine.low %v1440_v51, %v1444_v52 }
 0x14f   : > { %v1452_v60 = vld [vmem:[%s9230_s14 + $0x7c0] sm:$0xff]  ;;  %v1453_v62 = vld [vmem:[%s9230_s14 + $0x7c8] sm:$0xff]  ;;  %v7270_v0 = vcombine.low %v1441_v53, %v1445_v54 }
 0x150   : > { %v7277_v3 = vcombine.high %v1448_v59, %v1452_v60  ;;  %v7279_v4 = vcombine.high %v1449_v61, %v1453_v62  ;;  %v1456_v5 = vld [vmem:[%s9230_s14 + $0x800] sm:$0xff] }
 0x151   : > { %2938 = vmatpush1.bf16.msra.mxu0 %v7212_v7  ;;  %3020 = vmatpush1.bf16.msra.mxu1 %v7214_v8  ;;  %v1460_v6 = vld [vmem:[%s9230_s14 + $0x840] sm:$0xff]  ;;  %v1457_v7 = vld [vmem:[%s9230_s14 + $0x808] sm:$0xff] }
 0x152   : > { %2939 = vmatprep.subr.bf16.mxu0 %v7221_v9  ;;  %3021 = vmatprep.subr.bf16.mxu1 %v7223_v10  ;;  %v1461_v8 = vld [vmem:[%s9230_s14 + $0x848] sm:$0xff]  ;;  %v7276_v9 = vcombine.low %v1448_v59, %v1452_v60  ;;  %v7278_v10 = vcombine.low %v1449_v61, %v1453_v62  ;;  %v7285_v11 = vcombine.high %v1456_v5, %v1460_v6  ;;  %v1464_v13 = vld [vmem:[%s9230_s14 + $0x880] sm:$0xff] }
 0x153   : > { %v7287_v12 = vcombine.high %v1457_v7, %v1461_v8  ;;  %v1468_v14 = vld [vmem:[%s9230_s14 + $0x8c0] sm:$0xff]  ;;  %v7284_v19 = vcombine.low %v1456_v5, %v1460_v6  ;;  %v7286_v20 = vcombine.low %v1457_v7, %v1461_v8 }
 0x154   : > { %v7293_v21 = vcombine.high %v1464_v13, %v1468_v14  ;;  %v7292_v27 = vcombine.low %v1464_v13, %v1468_v14 }
 0x155   : > { %2940 = vmatpush1.bf16.msra.mxu0 %v7220_v15  ;;  %3022 = vmatpush1.bf16.msra.mxu1 %v7222_v16  ;;  %v9306_v15 = vcombine.low %v9221_v1, %v9221_v1  ;;  %v1465_v16 = vld [vmem:[%s9230_s14 + $0x888] sm:$0xff]  ;;  %v1472_v1 = vld [vmem:[%s9230_s14 + $0x900] sm:$0xff] }
 0x156   : > { %2941 = vmatprep.subr.bf16.mxu0 %v7229_v17  ;;  %3023 = vmatprep.subr.bf16.mxu1 %v7231_v18  ;;  %v1469_v17 = vld [vmem:[%s9230_s14 + $0x8c8] sm:$0xff] }
 0x157   : > { %v9313_v18 = vld [vmem:[%s10194_s0 + $0x8] sm:$0xff]  ;;  %v7295_v22 = vcombine.high %v1465_v16, %v1469_v17  ;;  %v7294_v28 = vcombine.low %v1465_v16, %v1469_v17 }
 0x159   : > { %2942 = vmatpush1.bf16.msra.mxu0 %v7228_v23  ;;  %3024 = vmatpush1.bf16.msra.mxu1 %v7230_v24  ;;  %v1476_v23 = vld [vmem:[%s9230_s14 + $0x940] sm:$0xff]  ;;  %v9319_v24 = vcombine.high %v9313_v18, %v9313_v18 }
 0x15a   : > { %2943 = vmatprep.subr.bf16.mxu0 %v7237_v25  ;;  %3025 = vmatprep.subr.bf16.mxu1 %v7239_v26  ;;  %v1473_v25 = vld [vmem:[%s9230_s14 + $0x908] sm:$0xff]  ;;  %v7301_v29 = vcombine.high %v1472_v1, %v1476_v23  ;;  %v7300_v35 = vcombine.low %v1472_v1, %v1476_v23 }
 0x15b   : > { %v1477_v26 = vld [vmem:[%s9230_s14 + $0x948] sm:$0xff] }
 0x15c   : > { %v7303_v30 = vcombine.high %v1473_v25, %v1477_v26  ;;  %v7302_v36 = vcombine.low %v1473_v25, %v1477_v26 }
 0x15d   : > { %2944 = vmatpush1.bf16.msra.mxu0 %v7236_v31  ;;  %3026 = vmatpush1.bf16.msra.mxu1 %v7238_v32  ;;  %v1480_v31 = vld [vmem:[%s9230_s14 + $0x980] sm:$0xff] }
 0x15e   : > { %2945 = vmatprep.subr.bf16.mxu0 %v7245_v33  ;;  %3027 = vmatprep.subr.bf16.mxu1 %v7247_v34  ;;  %v1484_v32 = vld [vmem:[%s9230_s14 + $0x9c0] sm:$0xff]  ;;  %v1481_v33 = vld [vmem:[%s9230_s14 + $0x988] sm:$0xff] }
 0x15f   : > { %v1485_v34 = vld [vmem:[%s9230_s14 + $0x9c8] sm:$0xff]  ;;  %v7309_v37 = vcombine.high %v1480_v31, %v1484_v32  ;;  %v7308_v43 = vcombine.low %v1480_v31, %v1484_v32 }
 0x160   : > { %v7311_v38 = vcombine.high %v1481_v33, %v1485_v34  ;;  %v7310_v44 = vcombine.low %v1481_v33, %v1485_v34 }
 0x161   : > { %2946 = vmatpush1.bf16.msra.mxu0 %v7244_v39  ;;  %3028 = vmatpush1.bf16.msra.mxu1 %v7246_v40  ;;  %v1488_v39 = vld [vmem:[%s9230_s14 + $0xa00] sm:$0xff] }
 0x162   : > { %2947 = vmatprep.subr.bf16.mxu0 %v7253_v41  ;;  %3029 = vmatprep.subr.bf16.mxu1 %v7255_v42  ;;  %v1492_v40 = vld [vmem:[%s9230_s14 + $0xa40] sm:$0xff]  ;;  %v1489_v41 = vld [vmem:[%s9230_s14 + $0xa08] sm:$0xff] }
 0x163   : > { %v1493_v42 = vld [vmem:[%s9230_s14 + $0xa48] sm:$0xff]  ;;  %v7317_v45 = vcombine.high %v1488_v39, %v1492_v40  ;;  %v7316_v51 = vcombine.low %v1488_v39, %v1492_v40 }
 0x164   : > { %v7319_v46 = vcombine.high %v1489_v41, %v1493_v42  ;;  %v7318_v52 = vcombine.low %v1489_v41, %v1493_v42 }
 0x165   : > { %2948 = vmatpush1.bf16.msra.mxu0 %v7252_v47  ;;  %3030 = vmatpush1.bf16.msra.mxu1 %v7254_v48  ;;  %v1496_v47 = vld [vmem:[%s9230_s14 + $0xa80] sm:$0xff] }
 0x166   : > { %2949 = vmatprep.subr.bf16.mxu0 %v7261_v49  ;;  %3031 = vmatprep.subr.bf16.mxu1 %v7263_v50  ;;  %v1500_v48 = vld [vmem:[%s9230_s14 + $0xac0] sm:$0xff]  ;;  %v1497_v49 = vld [vmem:[%s9230_s14 + $0xa88] sm:$0xff] }
 0x167   : > { %v1501_v50 = vld [vmem:[%s9230_s14 + $0xac8] sm:$0xff]  ;;  %v7325_v53 = vcombine.high %v1496_v47, %v1500_v48  ;;  %v7324_v59 = vcombine.low %v1496_v47, %v1500_v48 }
 0x168   : > { %v7327_v54 = vcombine.high %v1497_v49, %v1501_v50  ;;  %v7326_v60 = vcombine.low %v1497_v49, %v1501_v50 }
 0x169   : > { %2950 = vmatpush1.bf16.msra.mxu0 %v7260_v55  ;;  %3032 = vmatpush1.bf16.msra.mxu1 %v7262_v56  ;;  %v1504_v55 = vld [vmem:[%s9230_s14 + $0xb00] sm:$0xff] }
 0x16a   : > { %2951 = vmatprep.subr.bf16.mxu0 %v7269_v57  ;;  %3033 = vmatprep.subr.bf16.mxu1 %v7271_v58  ;;  %v1508_v56 = vld [vmem:[%s9230_s14 + $0xb40] sm:$0xff]  ;;  %v1505_v57 = vld [vmem:[%s9230_s14 + $0xb08] sm:$0xff] }
 0x16b   : > { %v1509_v58 = vld [vmem:[%s9230_s14 + $0xb48] sm:$0xff]  ;;  %v7333_v61 = vcombine.high %v1504_v55, %v1508_v56  ;;  %v7332_v5 = vcombine.low %v1504_v55, %v1508_v56 }
 0x16c   : > { %v7335_v62 = vcombine.high %v1505_v57, %v1509_v58  ;;  %v7334_v6 = vcombine.low %v1505_v57, %v1509_v58 }
 0x16d   : > { %2952 = vmatpush1.bf16.msra.mxu0 %v7268_v63  ;;  %3034 = vmatpush1.bf16.msra.mxu1 %v7270_v0  ;;  %v1512_v63 = vld [vmem:[%s9230_s14 + $0xb80] sm:$0xff] }
 0x16e   : > { %2953 = vmatprep.subr.bf16.mxu0 %v7277_v3  ;;  %3035 = vmatprep.subr.bf16.mxu1 %v7279_v4  ;;  %v1516_v0 = vld [vmem:[%s9230_s14 + $0xbc0] sm:$0xff]  ;;  %v1513_v3 = vld [vmem:[%s9230_s14 + $0xb88] sm:$0xff] }
 0x16f   : > { %v1517_v4 = vld [vmem:[%s9230_s14 + $0xbc8] sm:$0xff]  ;;  %v7341_v7 = vcombine.high %v1512_v63, %v1516_v0  ;;  %v7340_v13 = vcombine.low %v1512_v63, %v1516_v0 }
 0x170   : > { %v7343_v8 = vcombine.high %v1513_v3, %v1517_v4  ;;  %v7342_v14 = vcombine.low %v1513_v3, %v1517_v4 }
 0x171   : > { %2954 = vmatpush1.bf16.msra.mxu0 %v7276_v9  ;;  %3036 = vmatpush1.bf16.msra.mxu1 %v7278_v10  ;;  %v1520_v9 = vld [vmem:[%s9230_s14 + $0xc00] sm:$0xff] }
 0x172   : > { %2964 = vmatprep.subr.bf16.mxu0 %v7285_v11  ;;  %3046 = vmatprep.subr.bf16.mxu1 %v7287_v12  ;;  %v1524_v10 = vld [vmem:[%s9230_s14 + $0xc40] sm:$0xff]  ;;  %v1521_v11 = vld [vmem:[%s9230_s14 + $0xc08] sm:$0xff] }
 0x173   : > { %v1525_v12 = vld [vmem:[%s9230_s14 + $0xc48] sm:$0xff]  ;;  %v7349_v16 = vcombine.high %v1520_v9, %v1524_v10  ;;  %v7348_v1 = vcombine.low %v1520_v9, %v1524_v10 }
 0x174   : > { %2956 = vmatmul.mubr.bf16.vlgmr.msra.gmra.mrb[0].mxu0 %v9306_v15  ;;  %3038 = vmatmul.mubr.bf16.vlgmr.msra.gmra.mrb[0].mxu1 %v9306_v15  ;;  %v7351_v17 = vcombine.high %v1521_v11, %v1525_v12  ;;  %v7350_v23 = vcombine.low %v1521_v11, %v1525_v12 }
 0x175   : > { %2965 = vmatpush1.bf16.msra.mxu0 %v7284_v19  ;;  %3047 = vmatpush1.bf16.msra.mxu1 %v7286_v20  ;;  %v1528_v19 = vld [vmem:[%s9230_s14 + $0xc80] sm:$0xff] }
 0x176   : > { %2966 = vmatprep.subr.bf16.mxu0 %v7293_v21  ;;  %3048 = vmatprep.subr.bf16.mxu1 %v7295_v22  ;;  %v1532_v20 = vld [vmem:[%s9230_s14 + $0xcc0] sm:$0xff]  ;;  %v1529_v21 = vld [vmem:[%s9230_s14 + $0xc88] sm:$0xff] }
 0x177   : > { %2996 = vmatprep.mubr.bf16.mxu0 %v9319_v24  ;;  %3078 = vmatprep.mubr.bf16.mxu1 %v9319_v24  ;;  %v1533_v22 = vld [vmem:[%s9230_s14 + $0xcc8] sm:$0xff]  ;;  %v7357_v25 = vcombine.high %v1528_v19, %v1532_v20  ;;  %v7356_v31 = vcombine.low %v1528_v19, %v1532_v20 }
 0x178   : > { %v7359_v26 = vcombine.high %v1529_v21, %v1533_v22  ;;  %v7358_v32 = vcombine.low %v1529_v21, %v1533_v22 }
 0x179   : > { %2967 = vmatpush1.bf16.msra.mxu0 %v7292_v27  ;;  %3049 = vmatpush1.bf16.msra.mxu1 %v7294_v28  ;;  %v1536_v27 = vld [vmem:[%s9230_s14 + $0xd00] sm:$0xff] }
 0x17a   : > { %2968 = vmatprep.subr.bf16.mxu0 %v7301_v29  ;;  %3050 = vmatprep.subr.bf16.mxu1 %v7303_v30  ;;  %v1540_v28 = vld [vmem:[%s9230_s14 + $0xd40] sm:$0xff]  ;;  %v1537_v29 = vld [vmem:[%s9230_s14 + $0xd08] sm:$0xff] }
 0x17b   : > { %v1541_v30 = vld [vmem:[%s9230_s14 + $0xd48] sm:$0xff]  ;;  %v7365_v33 = vcombine.high %v1536_v27, %v1540_v28  ;;  %v7364_v39 = vcombine.low %v1536_v27, %v1540_v28  ;;  %v1343_v27 = vld [vmem:[%s9230_s14 + $0xd8] sm:$0xff] }
 0x17c   : > { %v7367_v34 = vcombine.high %v1537_v29, %v1541_v30  ;;  %v7366_v40 = vcombine.low %v1537_v29, %v1541_v30 }
 0x17d   : > { %2969 = vmatpush1.bf16.msra.mxu0 %v7300_v35  ;;  %3051 = vmatpush1.bf16.msra.mxu1 %v7302_v36  ;;  %v1544_v35 = vld [vmem:[%s9230_s14 + $0xd80] sm:$0xff] }
 0x17e   : > { %2970 = vmatprep.subr.bf16.mxu0 %v7309_v37  ;;  %3052 = vmatprep.subr.bf16.mxu1 %v7311_v38  ;;  %v1548_v36 = vld [vmem:[%s9230_s14 + $0xdc0] sm:$0xff]  ;;  %v1545_v37 = vld [vmem:[%s9230_s14 + $0xd88] sm:$0xff] }
 0x17f   : > { %v1549_v38 = vld [vmem:[%s9230_s14 + $0xdc8] sm:$0xff]  ;;  %v7373_v41 = vcombine.high %v1544_v35, %v1548_v36  ;;  %v7372_v47 = vcombine.low %v1544_v35, %v1548_v36 }
 0x180   : > { %v7375_v42 = vcombine.high %v1545_v37, %v1549_v38  ;;  %v7374_v48 = vcombine.low %v1545_v37, %v1549_v38 }
 0x181   : > { %2971 = vmatpush1.bf16.msra.mxu0 %v7308_v43  ;;  %3053 = vmatpush1.bf16.msra.mxu1 %v7310_v44  ;;  %v1552_v43 = vld [vmem:[%s9230_s14 + $0xe00] sm:$0xff] }
 0x182   : > { %2972 = vmatprep.subr.bf16.mxu0 %v7317_v45  ;;  %3054 = vmatprep.subr.bf16.mxu1 %v7319_v46  ;;  %v1556_v44 = vld [vmem:[%s9230_s14 + $0xe40] sm:$0xff]  ;;  %v1553_v45 = vld [vmem:[%s9230_s14 + $0xe08] sm:$0xff] }
 0x183   : > { %v1557_v46 = vld [vmem:[%s9230_s14 + $0xe48] sm:$0xff]  ;;  %v7381_v49 = vcombine.high %v1552_v43, %v1556_v44  ;;  %v7380_v55 = vcombine.low %v1552_v43, %v1556_v44 }
 0x184   : > { %v7383_v50 = vcombine.high %v1553_v45, %v1557_v46  ;;  %v7382_v56 = vcombine.low %v1553_v45, %v1557_v46 }
 0x185   : > { %2973 = vmatpush1.bf16.msra.mxu0 %v7316_v51  ;;  %3055 = vmatpush1.bf16.msra.mxu1 %v7318_v52  ;;  %v1560_v51 = vld [vmem:[%s9230_s14 + $0xe80] sm:$0xff] }
 0x186   : > { %2974 = vmatprep.subr.bf16.mxu0 %v7325_v53  ;;  %3056 = vmatprep.subr.bf16.mxu1 %v7327_v54  ;;  %v1564_v52 = vld [vmem:[%s9230_s14 + $0xec0] sm:$0xff]  ;;  %v1561_v53 = vld [vmem:[%s9230_s14 + $0xe88] sm:$0xff] }
 0x187   : > { %v1565_v54 = vld [vmem:[%s9230_s14 + $0xec8] sm:$0xff]  ;;  %v7389_v57 = vcombine.high %v1560_v51, %v1564_v52  ;;  %v7388_v63 = vcombine.low %v1560_v51, %v1564_v52 }
 0x188   : > { %v7391_v58 = vcombine.high %v1561_v53, %v1565_v54  ;;  %v7390_v0 = vcombine.low %v1561_v53, %v1565_v54  ;;  %v1370_v54 = vld [vmem:[%s9230_s14 + $0x290] sm:$0xff] }
 0x189   : > { %2975 = vmatpush1.bf16.msra.mxu0 %v7324_v59  ;;  %3057 = vmatpush1.bf16.msra.mxu1 %v7326_v60  ;;  %v1568_v59 = vld [vmem:[%s9230_s14 + $0xf00] sm:$0xff] }
 0x18a   : > { %2976 = vmatprep.subr.bf16.mxu0 %v7333_v61  ;;  %3058 = vmatprep.subr.bf16.mxu1 %v7335_v62  ;;  %v1572_v60 = vld [vmem:[%s9230_s14 + $0xf40] sm:$0xff]  ;;  %v1569_v61 = vld [vmem:[%s9230_s14 + $0xf08] sm:$0xff] }
 0x18b   : > { %v1573_v62 = vld [vmem:[%s9230_s14 + $0xf48] sm:$0xff]  ;;  %v7397_v3 = vcombine.high %v1568_v59, %v1572_v60  ;;  %v7396_v9 = vcombine.low %v1568_v59, %v1572_v60 }
 0x18c   : > { %v7399_v4 = vcombine.high %v1569_v61, %v1573_v62  ;;  %v7398_v10 = vcombine.low %v1569_v61, %v1573_v62  ;;  %v1378_v62 = vld [vmem:[%s9230_s14 + $0x310] sm:$0xff] }
 0x18d   : > { %2977 = vmatpush1.bf16.msra.mxu0 %v7332_v5  ;;  %3059 = vmatpush1.bf16.msra.mxu1 %v7334_v6  ;;  %v1576_v5 = vld [vmem:[%s9230_s14 + $0xf80] sm:$0xff] }
 0x18e   : > { %2978 = vmatprep.subr.bf16.mxu0 %v7341_v7  ;;  %3060 = vmatprep.subr.bf16.mxu1 %v7343_v8  ;;  %v1580_v6 = vld [vmem:[%s9230_s14 + $0xfc0] sm:$0xff]  ;;  %v1577_v7 = vld [vmem:[%s9230_s14 + $0xf88] sm:$0xff] }
 0x18f   : > { %v1581_v8 = vld [vmem:[%s9230_s14 + $0xfc8] sm:$0xff]  ;;  %v7405_v11 = vcombine.high %v1576_v5, %v1580_v6  ;;  %v7404_v19 = vcombine.low %v1576_v5, %v1580_v6 }
 0x190   : > { %v7407_v12 = vcombine.high %v1577_v7, %v1581_v8  ;;  %v7406_v20 = vcombine.low %v1577_v7, %v1581_v8  ;;  %v1386_v8 = vld [vmem:[%s9230_s14 + $0x390] sm:$0xff] }
 0x191   : > { %2979 = vmatpush1.bf16.msra.mxu0 %v7340_v13  ;;  %3061 = vmatpush1.bf16.msra.mxu1 %v7342_v14  ;;  %v1330_v13 = vld [vmem:[%s9230_s14 + $0x10] sm:$0xff] }
 0x192   : > { %2980 = vmatprep.subr.bf16.mxu0 %v7349_v16  ;;  %3062 = vmatprep.subr.bf16.mxu1 %v7351_v17  ;;  %v1334_v14 = vld [vmem:[%s9230_s14 + $0x50] sm:$0xff]  ;;  %v1331_v16 = vld [vmem:[%s9230_s14 + $0x18] sm:$0xff] }
 0x193   : > { %v1335_v17 = vld [vmem:[%s9230_s14 + $0x58] sm:$0xff]  ;;  %v7161_v21 = vcombine.high %v1330_v13, %v1334_v14  ;;  %v7160_v28 = vcombine.low %v1330_v13, %v1334_v14 }
 0x194   : > { %v7163_v22 = vcombine.high %v1331_v16, %v1335_v17  ;;  %v7162_v29 = vcombine.low %v1331_v16, %v1335_v17  ;;  %v1394_v17 = vld [vmem:[%s9230_s14 + $0x410] sm:$0xff] }
 0x195   : > { %2981 = vmatpush1.bf16.msra.mxu0 %v7348_v1  ;;  %3063 = vmatpush1.bf16.msra.mxu1 %v7350_v23  ;;  %v1338_v1 = vld [vmem:[%s9230_s14 + $0x90] sm:$0xff] }
 0x196   : > { %2982 = vmatprep.subr.bf16.mxu0 %v7357_v25  ;;  %3064 = vmatprep.subr.bf16.mxu1 %v7359_v26  ;;  %v1342_v23 = vld [vmem:[%s9230_s14 + $0xd0] sm:$0xff]  ;;  %v9387_v25 = vcombine.low %v9313_v18, %v9313_v18  ;;  %v1339_v26 = vld [vmem:[%s9230_s14 + $0x98] sm:$0xff] }
 0x197   : > { %v7169_v30 = vcombine.high %v1338_v1, %v1342_v23  ;;  %v1347_v18 = vld [vmem:[%s9230_s14 + $0x118] sm:$0xff]  ;;  %v7168_v35 = vcombine.low %v1338_v1, %v1342_v23  ;;  %v7170_v36 = vcombine.low %v1339_v26, %v1343_v27 }
 0x199   : > { %2983 = vmatpush1.bf16.msra.mxu0 %v7356_v31  ;;  %3065 = vmatpush1.bf16.msra.mxu1 %v7358_v32  ;;  %v7171_v31 = vcombine.high %v1339_v26, %v1343_v27  ;;  %v1346_v32 = vld [vmem:[%s9230_s14 + $0x110] sm:$0xff] }
 0x19a   : > { %2984 = vmatprep.subr.bf16.mxu0 %v7365_v33  ;;  %3066 = vmatprep.subr.bf16.mxu1 %v7367_v34  ;;  %v1350_v33 = vld [vmem:[%s9230_s14 + $0x150] sm:$0xff]  ;;  %v1351_v34 = vld [vmem:[%s9230_s14 + $0x158] sm:$0xff] }
 0x19b   : > { %v7177_v37 = vcombine.high %v1346_v32, %v1350_v33  ;;  %v7179_v38 = vcombine.high %v1347_v18, %v1351_v34  ;;  %v7176_v43 = vcombine.low %v1346_v32, %v1350_v33  ;;  %v7178_v44 = vcombine.low %v1347_v18, %v1351_v34  ;;  %v1402_v27 = vld [vmem:[%s9230_s14 + $0x490] sm:$0xff] }
 0x19c   : > { %v1410_v34 = vld [vmem:[%s9230_s14 + $0x510] sm:$0xff] }
 0x19d   : > { %2985 = vmatpush1.bf16.msra.mxu0 %v7364_v39  ;;  %3067 = vmatpush1.bf16.msra.mxu1 %v7366_v40  ;;  %v1354_v39 = vld [vmem:[%s9230_s14 + $0x190] sm:$0xff] }
 0x19e   : > { %2986 = vmatprep.subr.bf16.mxu0 %v7373_v41  ;;  %3068 = vmatprep.subr.bf16.mxu1 %v7375_v42  ;;  %v1358_v40 = vld [vmem:[%s9230_s14 + $0x1d0] sm:$0xff]  ;;  %v1355_v41 = vld [vmem:[%s9230_s14 + $0x198] sm:$0xff] }
 0x19f   : > { %v1359_v42 = vld [vmem:[%s9230_s14 + $0x1d8] sm:$0xff]  ;;  %v7185_v45 = vcombine.high %v1354_v39, %v1358_v40  ;;  %v7184_v51 = vcombine.low %v1354_v39, %v1358_v40 }
 0x1a0   : > { %v7187_v46 = vcombine.high %v1355_v41, %v1359_v42 }
 0x1a1   : > { %2987 = vmatpush1.bf16.msra.mxu0 %v7372_v47  ;;  %3069 = vmatpush1.bf16.msra.mxu1 %v7374_v48  ;;  %v1362_v47 = vld [vmem:[%s9230_s14 + $0x210] sm:$0xff] }
 0x1a2   : > { %2988 = vmatprep.subr.bf16.mxu0 %v7381_v49  ;;  %3070 = vmatprep.subr.bf16.mxu1 %v7383_v50  ;;  %v1366_v48 = vld [vmem:[%s9230_s14 + $0x250] sm:$0xff]  ;;  %v1363_v49 = vld [vmem:[%s9230_s14 + $0x218] sm:$0xff] }
 0x1a3   : > { %v1367_v50 = vld [vmem:[%s9230_s14 + $0x258] sm:$0xff]  ;;  %v7193_v52 = vcombine.high %v1362_v47, %v1366_v48 }
 0x1a4   : > { %v7195_v53 = vcombine.high %v1363_v49, %v1367_v50  ;;  %v7194_v59 = vcombine.low %v1363_v49, %v1367_v50  ;;  %v1426_v50 = vld [vmem:[%s9230_s14 + $0x610] sm:$0xff] }
 0x1a5   : > { %2989 = vmatpush1.bf16.msra.mxu0 %v7380_v55  ;;  %3071 = vmatpush1.bf16.msra.mxu1 %v7382_v56  ;;  %v1374_v55 = vld [vmem:[%s9230_s14 + $0x2d0] sm:$0xff]  ;;  %v1371_v56 = vld [vmem:[%s9230_s14 + $0x298] sm:$0xff] }
 0x1a6   : > { %2990 = vmatprep.subr.bf16.mxu0 %v7389_v57  ;;  %3072 = vmatprep.subr.bf16.mxu1 %v7391_v58  ;;  %v1375_v57 = vld [vmem:[%s9230_s14 + $0x2d8] sm:$0xff]  ;;  %v7192_v58 = vcombine.low %v1362_v47, %v1366_v48  ;;  %v7201_v60 = vcombine.high %v1370_v54, %v1374_v55 }
 0x1a7   : > { %v7203_v61 = vcombine.high %v1371_v56, %v1375_v57  ;;  %v7202_v5 = vcombine.low %v1371_v56, %v1375_v57  ;;  %v1434_v57 = vld [vmem:[%s9230_s14 + $0x690] sm:$0xff] }
 0x1a9   : > { %2991 = vmatpush1.bf16.msra.mxu0 %v7388_v63  ;;  %3073 = vmatpush1.bf16.msra.mxu1 %v7390_v0  ;;  %v1382_v63 = vld [vmem:[%s9230_s14 + $0x350] sm:$0xff]  ;;  %v1379_v0 = vld [vmem:[%s9230_s14 + $0x318] sm:$0xff] }
 0x1aa   : > { %2992 = vmatprep.subr.bf16.mxu0 %v7397_v3  ;;  %3074 = vmatprep.subr.bf16.mxu1 %v7399_v4  ;;  %v1383_v3 = vld [vmem:[%s9230_s14 + $0x358] sm:$0xff]  ;;  %v7200_v4 = vcombine.low %v1370_v54, %v1374_v55  ;;  %v7209_v6 = vcombine.high %v1378_v62, %v1382_v63 }
 0x1ab   : > { %v7211_v7 = vcombine.high %v1379_v0, %v1383_v3  ;;  %v7210_v13 = vcombine.low %v1379_v0, %v1383_v3  ;;  %v1442_v3 = vld [vmem:[%s9230_s14 + $0x710] sm:$0xff] }
 0x1ad   : > { %2993 = vmatpush1.bf16.msra.mxu0 %v7396_v9  ;;  %3075 = vmatpush1.bf16.msra.mxu1 %v7398_v10  ;;  %v1390_v9 = vld [vmem:[%s9230_s14 + $0x3d0] sm:$0xff]  ;;  %v1387_v10 = vld [vmem:[%s9230_s14 + $0x398] sm:$0xff] }
 0x1ae   : > { %2994 = vmatprep.subr.bf16.mxu0 %v7405_v11  ;;  %3076 = vmatprep.subr.bf16.mxu1 %v7407_v12  ;;  %v1391_v11 = vld [vmem:[%s9230_s14 + $0x3d8] sm:$0xff]  ;;  %v7208_v12 = vcombine.low %v1378_v62, %v1382_v63  ;;  %v7217_v14 = vcombine.high %v1386_v8, %v1390_v9 }
 0x1af   : > { %v7219_v16 = vcombine.high %v1387_v10, %v1391_v11  ;;  %v7218_v1 = vcombine.low %v1387_v10, %v1391_v11  ;;  %v1450_v11 = vld [vmem:[%s9230_s14 + $0x790] sm:$0xff] }
 0x1b1   : > { %2995 = vmatpush1.bf16.msra.mxu0 %v7404_v19  ;;  %3077 = vmatpush1.bf16.msra.mxu1 %v7406_v20  ;;  %v1398_v19 = vld [vmem:[%s9230_s14 + $0x450] sm:$0xff]  ;;  %v1395_v20 = vld [vmem:[%s9230_s14 + $0x418] sm:$0xff] }
 0x1b2   : > { %3087 = vmatprep.subr.bf16.mxu0 %v7161_v21  ;;  %3169 = vmatprep.subr.bf16.mxu1 %v7163_v22  ;;  %v1399_v21 = vld [vmem:[%s9230_s14 + $0x458] sm:$0xff]  ;;  %v7216_v22 = vcombine.low %v1386_v8, %v1390_v9  ;;  %v7225_v23 = vcombine.high %v1394_v17, %v1398_v19 }
 0x1b3   : > { %v7227_v26 = vcombine.high %v1395_v20, %v1399_v21  ;;  %v7226_v32 = vcombine.low %v1395_v20, %v1399_v21  ;;  %v1458_v21 = vld [vmem:[%s9230_s14 + $0x810] sm:$0xff] }
 0x1b4   : > { %2997 = vmatmul.mubr.bf16.vlgmr.msra.gmra.mrb[0].mxu0 %v9387_v25  ;;  %3079 = vmatmul.mubr.bf16.vlgmr.msra.gmra.mrb[0].mxu1 %v9387_v25 }
 0x1b5   : > { %3088 = vmatpush1.bf16.msra.mxu0 %v7160_v28  ;;  %3170 = vmatpush1.bf16.msra.mxu1 %v7162_v29  ;;  %v1406_v28 = vld [vmem:[%s9230_s14 + $0x4d0] sm:$0xff]  ;;  %v1403_v29 = vld [vmem:[%s9230_s14 + $0x498] sm:$0xff] }
 0x1b6   : > { %3089 = vmatprep.subr.bf16.mxu0 %v7169_v30  ;;  %3171 = vmatprep.subr.bf16.mxu1 %v7171_v31  ;;  %v1407_v30 = vld [vmem:[%s9230_s14 + $0x4d8] sm:$0xff]  ;;  %v7224_v31 = vcombine.low %v1394_v17, %v1398_v19  ;;  %v7233_v33 = vcombine.high %v1402_v27, %v1406_v28 }
 0x1b7   : > { %3119 = vmatprep.mubr.bf16.mxu0 %v9227_v2  ;;  %3201 = vmatprep.mubr.bf16.mxu1 %v9227_v2  ;;  %v7186_v2 = vcombine.low %v1355_v41, %v1359_v42  ;;  %v7235_v18 = vcombine.high %v1403_v29, %v1407_v30  ;;  %v7234_v39 = vcombine.low %v1403_v29, %v1407_v30  ;;  %v1418_v42 = vld [vmem:[%s9230_s14 + $0x590] sm:$0xff] }
 0x1b8   : > { %v1466_v30 = vld [vmem:[%s9230_s14 + $0x890] sm:$0xff] }
 0x1b9   : > { %3090 = vmatpush1.bf16.msra.mxu0 %v7168_v35  ;;  %3172 = vmatpush1.bf16.msra.mxu1 %v7170_v36  ;;  %v1414_v35 = vld [vmem:[%s9230_s14 + $0x550] sm:$0xff]  ;;  %v1411_v36 = vld [vmem:[%s9230_s14 + $0x518] sm:$0xff] }
 0x1ba   : > { %3091 = vmatprep.subr.bf16.mxu0 %v7177_v37  ;;  %3173 = vmatprep.subr.bf16.mxu1 %v7179_v38  ;;  %v1415_v37 = vld [vmem:[%s9230_s14 + $0x558] sm:$0xff]  ;;  %v7232_v38 = vcombine.low %v1402_v27, %v1406_v28  ;;  %v7241_v40 = vcombine.high %v1410_v34, %v1414_v35 }
 0x1bb   : > { %v7243_v41 = vcombine.high %v1411_v36, %v1415_v37  ;;  %v7242_v47 = vcombine.low %v1411_v36, %v1415_v37  ;;  %v1474_v37 = vld [vmem:[%s9230_s14 + $0x910] sm:$0xff] }
 0x1bd   : > { %3092 = vmatpush1.bf16.msra.mxu0 %v7176_v43  ;;  %3174 = vmatpush1.bf16.msra.mxu1 %v7178_v44  ;;  %v1422_v43 = vld [vmem:[%s9230_s14 + $0x5d0] sm:$0xff]  ;;  %v1419_v44 = vld [vmem:[%s9230_s14 + $0x598] sm:$0xff] }
 0x1be   : > { %3093 = vmatprep.subr.bf16.mxu0 %v7185_v45  ;;  %3175 = vmatprep.subr.bf16.mxu1 %v7187_v46  ;;  %v1423_v45 = vld [vmem:[%s9230_s14 + $0x5d8] sm:$0xff]  ;;  %v7240_v46 = vcombine.low %v1410_v34, %v1414_v35  ;;  %v7249_v48 = vcombine.high %v1418_v42, %v1422_v43 }
 0x1bf   : > { %v7251_v49 = vcombine.high %v1419_v44, %v1423_v45  ;;  %v7250_v54 = vcombine.low %v1419_v44, %v1423_v45  ;;  %v1482_v45 = vld [vmem:[%s9230_s14 + $0x990] sm:$0xff] }
 0x1c1   : > { %3094 = vmatpush1.bf16.msra.mxu0 %v7184_v51  ;;  %3176 = vmatpush1.bf16.msra.mxu1 %v7186_v2  ;;  %v1430_v51 = vld [vmem:[%s9230_s14 + $0x650] sm:$0xff]  ;;  %v1427_v2 = vld [vmem:[%s9230_s14 + $0x618] sm:$0xff] }
 0x1c2   : > { %3095 = vmatprep.subr.bf16.mxu0 %v7193_v52  ;;  %3177 = vmatprep.subr.bf16.mxu1 %v7195_v53  ;;  %v1431_v52 = vld [vmem:[%s9230_s14 + $0x658] sm:$0xff]  ;;  %v7248_v53 = vcombine.low %v1418_v42, %v1422_v43  ;;  %v7257_v55 = vcombine.high %v1426_v50, %v1430_v51 }
 0x1c3   : > { %v7259_v56 = vcombine.high %v1427_v2, %v1431_v52  ;;  %v7258_v62 = vcombine.low %v1427_v2, %v1431_v52  ;;  %v1490_v2 = vld [vmem:[%s9230_s14 + $0xa10] sm:$0xff] }
 0x1c4   : > { %v1494_v52 = vld [vmem:[%s9230_s14 + $0xa50] sm:$0xff] }
 0x1c5   : > { %3096 = vmatpush1.bf16.msra.mxu0 %v7192_v58  ;;  %3178 = vmatpush1.bf16.msra.mxu1 %v7194_v59  ;;  %v1438_v58 = vld [vmem:[%s9230_s14 + $0x6d0] sm:$0xff]  ;;  %v1435_v59 = vld [vmem:[%s9230_s14 + $0x698] sm:$0xff] }
 0x1c6   : > { %3097 = vmatprep.subr.bf16.mxu0 %v7201_v60  ;;  %3179 = vmatprep.subr.bf16.mxu1 %v7203_v61  ;;  %v1439_v60 = vld [vmem:[%s9230_s14 + $0x6d8] sm:$0xff]  ;;  %v7256_v61 = vcombine.low %v1426_v50, %v1430_v51  ;;  %v7265_v63 = vcombine.high %v1434_v57, %v1438_v58 }
 0x1c7   : > { %v7267_v0 = vcombine.high %v1435_v59, %v1439_v60  ;;  %v7266_v8 = vcombine.low %v1435_v59, %v1439_v60  ;;  %v1502_v59 = vld [vmem:[%s9230_s14 + $0xad0] sm:$0xff]  ;;  %v1499_v60 = vld [vmem:[%s9230_s14 + $0xa98] sm:$0xff] }
 0x1c9   : > { %3098 = vmatpush1.bf16.msra.mxu0 %v7200_v4  ;;  %3180 = vmatpush1.bf16.msra.mxu1 %v7202_v5  ;;  %v1446_v4 = vld [vmem:[%s9230_s14 + $0x750] sm:$0xff]  ;;  %v1443_v5 = vld [vmem:[%s9230_s14 + $0x718] sm:$0xff] }
 0x1ca   : > { %3099 = vmatprep.subr.bf16.mxu0 %v7209_v6  ;;  %3181 = vmatprep.subr.bf16.mxu1 %v7211_v7  ;;  %v1447_v6 = vld [vmem:[%s9230_s14 + $0x758] sm:$0xff]  ;;  %v7264_v7 = vcombine.low %v1434_v57, %v1438_v58  ;;  %v7273_v9 = vcombine.high %v1442_v3, %v1446_v4  ;;  %v1498_v58 = vld [vmem:[%s9230_s14 + $0xa90] sm:$0xff] }
 0x1cb   : > { %v7275_v10 = vcombine.high %v1443_v5, %v1447_v6  ;;  %v7274_v17 = vcombine.low %v1443_v5, %v1447_v6  ;;  %v1510_v5 = vld [vmem:[%s9230_s14 + $0xb50] sm:$0xff]  ;;  %v1507_v6 = vld [vmem:[%s9230_s14 + $0xb18] sm:$0xff] }
 0x1cd   : > { %3100 = vmatpush1.bf16.msra.mxu0 %v7208_v12  ;;  %3182 = vmatpush1.bf16.msra.mxu1 %v7210_v13  ;;  %v1454_v12 = vld [vmem:[%s9230_s14 + $0x7d0] sm:$0xff]  ;;  %v1451_v13 = vld [vmem:[%s9230_s14 + $0x798] sm:$0xff] }
 0x1ce   : > { %3101 = vmatprep.subr.bf16.mxu0 %v7217_v14  ;;  %3183 = vmatprep.subr.bf16.mxu1 %v7219_v16  ;;  %v1455_v14 = vld [vmem:[%s9230_s14 + $0x7d8] sm:$0xff]  ;;  %v7272_v16 = vcombine.low %v1442_v3, %v1446_v4  ;;  %v7281_v19 = vcombine.high %v1450_v11, %v1454_v12  ;;  %v1506_v4 = vld [vmem:[%s9230_s14 + $0xb10] sm:$0xff] }
 0x1cf   : > { %v7283_v20 = vcombine.high %v1451_v13, %v1455_v14  ;;  %v7282_v27 = vcombine.low %v1451_v13, %v1455_v14  ;;  %v1518_v13 = vld [vmem:[%s9230_s14 + $0xbd0] sm:$0xff]  ;;  %v1515_v14 = vld [vmem:[%s9230_s14 + $0xb98] sm:$0xff] }
 0x1d1   : > { %3102 = vmatpush1.bf16.msra.mxu0 %v7216_v22  ;;  %3184 = vmatpush1.bf16.msra.mxu1 %v7218_v1  ;;  %v1462_v22 = vld [vmem:[%s9230_s14 + $0x850] sm:$0xff]  ;;  %v1459_v1 = vld [vmem:[%s9230_s14 + $0x818] sm:$0xff] }
 0x1d2   : > { %3103 = vmatprep.subr.bf16.mxu0 %v7225_v23  ;;  %3185 = vmatprep.subr.bf16.mxu1 %v7227_v26  ;;  %v1463_v23 = vld [vmem:[%s9230_s14 + $0x858] sm:$0xff]  ;;  %v7280_v26 = vcombine.low %v1450_v11, %v1454_v12  ;;  %v7289_v28 = vcombine.high %v1458_v21, %v1462_v22  ;;  %v1514_v12 = vld [vmem:[%s9230_s14 + $0xb90] sm:$0xff] }
 0x1d3   : > { %v7291_v29 = vcombine.high %v1459_v1, %v1463_v23  ;;  %v7290_v34 = vcombine.low %v1459_v1, %v1463_v23  ;;  %v1526_v1 = vld [vmem:[%s9230_s14 + $0xc50] sm:$0xff]  ;;  %v1523_v23 = vld [vmem:[%s9230_s14 + $0xc18] sm:$0xff] }
 0x1d5   : > { %3104 = vmatpush1.bf16.msra.mxu0 %v7224_v31  ;;  %3186 = vmatpush1.bf16.msra.mxu1 %v7226_v32  ;;  %v1470_v31 = vld [vmem:[%s9230_s14 + $0x8d0] sm:$0xff]  ;;  %v1467_v32 = vld [vmem:[%s9230_s14 + $0x898] sm:$0xff] }
 0x1d6   : > { %3105 = vmatprep.subr.bf16.mxu0 %v7233_v33  ;;  %3187 = vmatprep.subr.bf16.mxu1 %v7235_v18  ;;  %v1471_v33 = vld [vmem:[%s9230_s14 + $0x8d8] sm:$0xff]  ;;  %v7288_v18 = vcombine.low %v1458_v21, %v1462_v22  ;;  %v7297_v35 = vcombine.high %v1466_v30, %v1470_v31  ;;  %v1522_v22 = vld [vmem:[%s9230_s14 + $0xc10] sm:$0xff] }
 0x1d7   : > { %v7299_v36 = vcombine.high %v1467_v32, %v1471_v33  ;;  %v7298_v42 = vcombine.low %v1467_v32, %v1471_v33  ;;  %v1534_v32 = vld [vmem:[%s9230_s14 + $0xcd0] sm:$0xff]  ;;  %v1531_v33 = vld [vmem:[%s9230_s14 + $0xc98] sm:$0xff] }
 0x1d9   : > { %3106 = vmatpush1.bf16.msra.mxu0 %v7232_v38  ;;  %3188 = vmatpush1.bf16.msra.mxu1 %v7234_v39  ;;  %v1478_v38 = vld [vmem:[%s9230_s14 + $0x950] sm:$0xff]  ;;  %v1475_v39 = vld [vmem:[%s9230_s14 + $0x918] sm:$0xff] }
 0x1da   : > { %3107 = vmatprep.subr.bf16.mxu0 %v7241_v40  ;;  %3189 = vmatprep.subr.bf16.mxu1 %v7243_v41  ;;  %v1479_v40 = vld [vmem:[%s9230_s14 + $0x958] sm:$0xff]  ;;  %v7296_v41 = vcombine.low %v1466_v30, %v1470_v31  ;;  %v7305_v43 = vcombine.high %v1474_v37, %v1478_v38  ;;  %v1530_v31 = vld [vmem:[%s9230_s14 + $0xc90] sm:$0xff] }
 0x1db   : > { %v7307_v44 = vcombine.high %v1475_v39, %v1479_v40 }
 0x1dd   : > { %3108 = vmatpush1.bf16.msra.mxu0 %v7240_v46  ;;  %3190 = vmatpush1.bf16.msra.mxu1 %v7242_v47  ;;  %v1486_v46 = vld [vmem:[%s9230_s14 + $0x9d0] sm:$0xff]  ;;  %v1483_v47 = vld [vmem:[%s9230_s14 + $0x998] sm:$0xff] }
 0x1de   : > { %3109 = vmatprep.subr.bf16.mxu0 %v7249_v48  ;;  %3191 = vmatprep.subr.bf16.mxu1 %v7251_v49  ;;  %v1487_v48 = vld [vmem:[%s9230_s14 + $0x9d8] sm:$0xff]  ;;  %v7306_v49 = vcombine.low %v1475_v39, %v1479_v40  ;;  %v7313_v50 = vcombine.high %v1482_v45, %v1486_v46  ;;  %v1542_v39 = vld [vmem:[%s9230_s14 + $0xd50] sm:$0xff] }
 0x1df   : > { %v7315_v51 = vcombine.high %v1483_v47, %v1487_v48  ;;  %v1539_v40 = vld [vmem:[%s9230_s14 + $0xd18] sm:$0xff] }
 0x1e1   : > { %3110 = vmatpush1.bf16.msra.mxu0 %v7248_v53  ;;  %3192 = vmatpush1.bf16.msra.mxu1 %v7250_v54  ;;  %v1491_v53 = vld [vmem:[%s9230_s14 + $0xa18] sm:$0xff] }
 0x1e2   : > { %3111 = vmatprep.subr.bf16.mxu0 %v7257_v55  ;;  %3193 = vmatprep.subr.bf16.mxu1 %v7259_v56  ;;  %v1495_v54 = vld [vmem:[%s9230_s14 + $0xa58] sm:$0xff]  ;;  %v7312_v55 = vcombine.low %v1482_v45, %v1486_v46  ;;  %v7321_v56 = vcombine.high %v1490_v2, %v1494_v52  ;;  %v1546_v46 = vld [vmem:[%s9230_s14 + $0xd90] sm:$0xff] }
 0x1e3   : > { %v7323_v57 = vcombine.high %v1491_v53, %v1495_v54 }
 0x1e5   : > { %3112 = vmatpush1.bf16.msra.mxu0 %v7256_v61  ;;  %3194 = vmatpush1.bf16.msra.mxu1 %v7258_v62  ;;  %v1503_v61 = vld [vmem:[%s9230_s14 + $0xad8] sm:$0xff]  ;;  %v7320_v62 = vcombine.low %v1490_v2, %v1494_v52  ;;  %v1554_v52 = vld [vmem:[%s9230_s14 + $0xe10] sm:$0xff] }
 0x1e6   : > { %3113 = vmatprep.subr.bf16.mxu0 %v7265_v63  ;;  %3195 = vmatprep.subr.bf16.mxu1 %v7267_v0  ;;  %v7322_v63 = vcombine.low %v1491_v53, %v1495_v54  ;;  %v7329_v0 = vcombine.high %v1498_v58, %v1502_v59  ;;  %v7331_v3 = vcombine.high %v1499_v60, %v1503_v61  ;;  %v1558_v53 = vld [vmem:[%s9230_s14 + $0xe50] sm:$0xff]  ;;  %v1555_v54 = vld [vmem:[%s9230_s14 + $0xe18] sm:$0xff] }
 0x1e9   : > { %3114 = vmatpush1.bf16.msra.mxu0 %v7264_v7  ;;  %3196 = vmatpush1.bf16.msra.mxu1 %v7266_v8  ;;  %v1511_v7 = vld [vmem:[%s9230_s14 + $0xb58] sm:$0xff]  ;;  %v7328_v8 = vcombine.low %v1498_v58, %v1502_v59  ;;  %v1562_v59 = vld [vmem:[%s9230_s14 + $0xe90] sm:$0xff] }
 0x1ea   : > { %3115 = vmatprep.subr.bf16.mxu0 %v7273_v9  ;;  %3197 = vmatprep.subr.bf16.mxu1 %v7275_v10  ;;  %v7330_v9 = vcombine.low %v1499_v60, %v1503_v61  ;;  %v7337_v10 = vcombine.high %v1506_v4, %v1510_v5  ;;  %v7339_v11 = vcombine.high %v1507_v6, %v1511_v7  ;;  %v1566_v60 = vld [vmem:[%s9230_s14 + $0xed0] sm:$0xff]  ;;  %v1563_v61 = vld [vmem:[%s9230_s14 + $0xe98] sm:$0xff] }
 0x1ed   : > { %3116 = vmatpush1.bf16.msra.mxu0 %v7272_v16  ;;  %3198 = vmatpush1.bf16.msra.mxu1 %v7274_v17  ;;  %v1519_v16 = vld [vmem:[%s9230_s14 + $0xbd8] sm:$0xff]  ;;  %v7336_v17 = vcombine.low %v1506_v4, %v1510_v5  ;;  %v1570_v5 = vld [vmem:[%s9230_s14 + $0xf10] sm:$0xff] }
 0x1ee   : > { %3117 = vmatprep.subr.bf16.mxu0 %v7281_v19  ;;  %3199 = vmatprep.subr.bf16.mxu1 %v7283_v20  ;;  %v7338_v19 = vcombine.low %v1507_v6, %v1511_v7  ;;  %v7345_v20 = vcombine.high %v1514_v12, %v1518_v13  ;;  %v7347_v21 = vcombine.high %v1515_v14, %v1519_v16  ;;  %v1574_v6 = vld [vmem:[%s9230_s14 + $0xf50] sm:$0xff]  ;;  %v1571_v7 = vld [vmem:[%s9230_s14 + $0xf18] sm:$0xff] }
 0x1f1   : > { %3118 = vmatpush1.bf16.msra.mxu0 %v7280_v26  ;;  %3200 = vmatpush1.bf16.msra.mxu1 %v7282_v27  ;;  %v1527_v26 = vld [vmem:[%s9230_s14 + $0xc58] sm:$0xff]  ;;  %v7344_v27 = vcombine.low %v1514_v12, %v1518_v13  ;;  %v1578_v13 = vld [vmem:[%s9230_s14 + $0xf90] sm:$0xff] }
 0x1f2   : > { %3128 = vmatprep.subr.bf16.mxu0 %v7289_v28  ;;  %3210 = vmatprep.subr.bf16.mxu1 %v7291_v29  ;;  %v7346_v28 = vcombine.low %v1515_v14, %v1519_v16  ;;  %v7353_v29 = vcombine.high %v1522_v22, %v1526_v1  ;;  %v7355_v30 = vcombine.high %v1523_v23, %v1527_v26  ;;  %v1582_v14 = vld [vmem:[%s9230_s14 + $0xfd0] sm:$0xff]  ;;  %v1579_v16 = vld [vmem:[%s9230_s14 + $0xf98] sm:$0xff] }
 0x1f4   : > { %3120 = vmatmul.mubr.bf16.vlgmr.msra.gmra.mrb[4].mxu0 %v9306_v15  ;;  %3202 = vmatmul.mubr.bf16.vlgmr.msra.gmra.mrb[4].mxu1 %v9306_v15  ;;  %v7304_v15 = vcombine.low %v1474_v37, %v1478_v38  ;;  %v1538_v38 = vld [vmem:[%s9230_s14 + $0xd10] sm:$0xff] }
 0x1f5   : > { %3129 = vmatpush1.bf16.msra.mxu0 %v7288_v18  ;;  %3211 = vmatpush1.bf16.msra.mxu1 %v7290_v34  ;;  %v1535_v18 = vld [vmem:[%s9230_s14 + $0xcd8] sm:$0xff]  ;;  %v7352_v34 = vcombine.low %v1522_v22, %v1526_v1  ;;  %v3291_v1 = vld [vmem:[%s9205_s7] sm:$0xff] }
 0x1f6   : > { %3130 = vmatprep.subr.bf16.mxu0 %v7297_v35  ;;  %3212 = vmatprep.subr.bf16.mxu1 %v7299_v36  ;;  %v7354_v35 = vcombine.low %v1523_v23, %v1527_v26  ;;  %v7361_v36 = vcombine.high %v1530_v31, %v1534_v32  ;;  %v7363_v37 = vcombine.high %v1531_v33, %v1535_v18  ;;  %v3295_v23 = vld [vmem:[%s9205_s7 + $0x20] sm:$0xff] }
 0x1f7   : > { %3160 = vmatprep.mubr.bf16.mxu0 %v9319_v24  ;;  %3242 = vmatprep.mubr.bf16.mxu1 %v9319_v24  ;;  %v7314_v24 = vcombine.low %v1483_v47, %v1487_v48  ;;  %v1550_v47 = vld [vmem:[%s9230_s14 + $0xdd0] sm:$0xff]  ;;  %v1547_v48 = vld [vmem:[%s9230_s14 + $0xd98] sm:$0xff]  ;;  %v3419_v26 = vld [vmem:[%s9205_s7 + $0x400] sm:$0xff] }
 0x1f9   : > { %3131 = vmatpush1.bf16.msra.mxu0 %v7296_v41  ;;  %3213 = vmatpush1.bf16.msra.mxu1 %v7298_v42  ;;  %v1543_v41 = vld [vmem:[%s9230_s14 + $0xd58] sm:$0xff]  ;;  %v7360_v42 = vcombine.low %v1530_v31, %v1534_v32  ;;  %v3299_v32 = vld [vmem:[%s9205_s7 + $0x40] sm:$0xff] }
 0x1fa   : > { %3132 = vmatprep.subr.bf16.mxu0 %v7305_v43  ;;  %3214 = vmatprep.subr.bf16.mxu1 %v7307_v44  ;;  %v7362_v43 = vcombine.low %v1531_v33, %v1535_v18  ;;  %v7369_v44 = vcombine.high %v1538_v38, %v1542_v39  ;;  %v7371_v45 = vcombine.high %v1539_v40, %v1543_v41  ;;  %v3303_v33 = vld [vmem:[%s9205_s7 + $0x60] sm:$0xff] }
 0x1fb   : > { %v3427_v18 = vld [vmem:[%s9205_s7 + $0x440] sm:$0xff] }
 0x1fd   : > { %3133 = vmatpush1.bf16.msra.mxu0 %v7304_v15  ;;  %3215 = vmatpush1.bf16.msra.mxu1 %v7306_v49  ;;  %v1551_v15 = vld [vmem:[%s9230_s14 + $0xdd8] sm:$0xff]  ;;  %v7368_v49 = vcombine.low %v1538_v38, %v1542_v39  ;;  %v3307_v39 = vld [vmem:[%s9205_s7 + $0x80] sm:$0xff] }
 0x1fe   : > { %3134 = vmatprep.subr.bf16.mxu0 %v7313_v50  ;;  %3216 = vmatprep.subr.bf16.mxu1 %v7315_v51  ;;  %v7370_v50 = vcombine.low %v1539_v40, %v1543_v41  ;;  %v7377_v51 = vcombine.high %v1546_v46, %v1550_v47  ;;  %v7379_v2 = vcombine.high %v1547_v48, %v1551_v15  ;;  %v3311_v40 = vld [vmem:[%s9205_s7 + $0xa0] sm:$0xff] }
 0x1ff   : > { %v3435_v41 = vld [vmem:[%s9205_s7 + $0x480] sm:$0xff] }
 0x201   : > { %3135 = vmatpush1.bf16.msra.mxu0 %v7312_v55  ;;  %3217 = vmatpush1.bf16.msra.mxu1 %v7314_v24  ;;  %v1559_v55 = vld [vmem:[%s9230_s14 + $0xe58] sm:$0xff]  ;;  %v7376_v24 = vcombine.low %v1546_v46, %v1550_v47  ;;  %v3315_v47 = vld [vmem:[%s9205_s7 + $0xc0] sm:$0xff] }
 0x202   : > { %3136 = vmatprep.subr.bf16.mxu0 %v7321_v56  ;;  %3218 = vmatprep.subr.bf16.mxu1 %v7323_v57  ;;  %v7378_v56 = vcombine.low %v1547_v48, %v1551_v15  ;;  %v7385_v57 = vcombine.high %v1554_v52, %v1558_v53  ;;  %v7387_v58 = vcombine.high %v1555_v54, %v1559_v55  ;;  %v3319_v48 = vld [vmem:[%s9205_s7 + $0xe0] sm:$0xff] }
 0x203   : > { %v3443_v15 = vld [vmem:[%s9205_s7 + $0x4c0] sm:$0xff] }
 0x205   : > { %3137 = vmatpush1.bf16.msra.mxu0 %v7320_v62  ;;  %3219 = vmatpush1.bf16.msra.mxu1 %v7322_v63  ;;  %v1567_v62 = vld [vmem:[%s9230_s14 + $0xed8] sm:$0xff]  ;;  %v7384_v63 = vcombine.low %v1554_v52, %v1558_v53  ;;  %v3323_v52 = vld [vmem:[%s9205_s7 + $0x100] sm:$0xff] }
 0x206   : > { %3138 = vmatprep.subr.bf16.mxu0 %v7329_v0  ;;  %3220 = vmatprep.subr.bf16.mxu1 %v7331_v3  ;;  %v7386_v0 = vcombine.low %v1555_v54, %v1559_v55  ;;  %v7393_v3 = vcombine.high %v1562_v59, %v1566_v60  ;;  %v7395_v4 = vcombine.high %v1563_v61, %v1567_v62  ;;  %v3327_v53 = vld [vmem:[%s9205_s7 + $0x120] sm:$0xff] }
 0x207   : > { %v3451_v54 = vld [vmem:[%s9205_s7 + $0x500] sm:$0xff] }
 0x208   : > { %v3455_v55 = vld [vmem:[%s9205_s7 + $0x520] sm:$0xff] }
 0x209   : > { %3139 = vmatpush1.bf16.msra.mxu0 %v7328_v8  ;;  %3221 = vmatpush1.bf16.msra.mxu1 %v7330_v9  ;;  %v1575_v8 = vld [vmem:[%s9230_s14 + $0xf58] sm:$0xff]  ;;  %v7392_v9 = vcombine.low %v1562_v59, %v1566_v60  ;;  %v3331_v59 = vld [vmem:[%s9205_s7 + $0x140] sm:$0xff] }
 0x20a   : > { %3140 = vmatprep.subr.bf16.mxu0 %v7337_v10  ;;  %3222 = vmatprep.subr.bf16.mxu1 %v7339_v11  ;;  %v7394_v10 = vcombine.low %v1563_v61, %v1567_v62  ;;  %v7401_v11 = vcombine.high %v1570_v5, %v1574_v6  ;;  %v7403_v12 = vcombine.high %v1571_v7, %v1575_v8  ;;  %v3335_v60 = vld [vmem:[%s9205_s7 + $0x160] sm:$0xff] }
 0x20b   : > { %v3459_v61 = vld [vmem:[%s9205_s7 + $0x540] sm:$0xff] }
 0x20c   : > { %v3463_v62 = vld [vmem:[%s9205_s7 + $0x560] sm:$0xff] }
 0x20d   : > { %3141 = vmatpush1.bf16.msra.mxu0 %v7336_v17  ;;  %3223 = vmatpush1.bf16.msra.mxu1 %v7338_v19  ;;  %v1583_v17 = vld [vmem:[%s9230_s14 + $0xfd8] sm:$0xff]  ;;  %v7400_v19 = vcombine.low %v1570_v5, %v1574_v6  ;;  %v3339_v5 = vld [vmem:[%s9205_s7 + $0x180] sm:$0xff] }
 0x20e   : > { %3142 = vmatprep.subr.bf16.mxu0 %v7345_v20  ;;  %3224 = vmatprep.subr.bf16.mxu1 %v7347_v21  ;;  %v7402_v20 = vcombine.low %v1571_v7, %v1575_v8  ;;  %v7409_v21 = vcombine.high %v1578_v13, %v1582_v14  ;;  %v7411_v22 = vcombine.high %v1579_v16, %v1583_v17  ;;  %v3343_v6 = vld [vmem:[%s9205_s7 + $0x1a0] sm:$0xff] }
 0x20f   : > { %v3467_v7 = vld [vmem:[%s9205_s7 + $0x580] sm:$0xff] }
 0x210   : > { %v3471_v8 = vld [vmem:[%s9205_s7 + $0x5a0] sm:$0xff] }
 0x211   : > { %3143 = vmatpush1.bf16.msra.mxu0 %v7344_v27  ;;  %3225 = vmatpush1.bf16.msra.mxu1 %v7346_v28  ;;  %v3423_v27 = vld [vmem:[%s9205_s7 + $0x420] sm:$0xff]  ;;  %v7408_v28 = vcombine.low %v1578_v13, %v1582_v14 }
 0x212   : > { %3144 = vmatprep.subr.bf16.mxu0 %v7353_v29  ;;  %3226 = vmatprep.subr.bf16.mxu1 %v7355_v30  ;;  %v7410_v29 = vcombine.low %v1579_v16, %v1583_v17  ;;  %v7413_v30 = vcombine.high %v3291_v1, %v3295_v23  ;;  %v7541_v31 = vcombine.high %v3419_v26, %v3423_v27  ;;  %v3347_v13 = vld [vmem:[%s9205_s7 + $0x1c0] sm:$0xff] }
 0x213   : > { %v3351_v14 = vld [vmem:[%s9205_s7 + $0x1e0] sm:$0xff] }
 0x214   : > { %v3475_v16 = vld [vmem:[%s9205_s7 + $0x5c0] sm:$0xff] }
 0x215   : > { %3145 = vmatpush1.bf16.msra.mxu0 %v7352_v34  ;;  %3227 = vmatpush1.bf16.msra.mxu1 %v7354_v35  ;;  %v3431_v34 = vld [vmem:[%s9205_s7 + $0x460] sm:$0xff]  ;;  %v7412_v35 = vcombine.low %v3291_v1, %v3295_v23 }
 0x216   : > { %3146 = vmatprep.subr.bf16.mxu0 %v7361_v36  ;;  %3228 = vmatprep.subr.bf16.mxu1 %v7363_v37  ;;  %v7540_v36 = vcombine.low %v3419_v26, %v3423_v27  ;;  %v7421_v37 = vcombine.high %v3299_v32, %v3303_v33  ;;  %v7549_v38 = vcombine.high %v3427_v18, %v3431_v34  ;;  %v3479_v17 = vld [vmem:[%s9205_s7 + $0x5e0] sm:$0xff] }
 0x217   : > { %v3355_v1 = vld [vmem:[%s9205_s7 + $0x200] sm:$0xff] }
 0x218   : > { %v3359_v23 = vld [vmem:[%s9205_s7 + $0x220] sm:$0xff] }
 0x219   : > { %3147 = vmatpush1.bf16.msra.mxu0 %v7360_v42  ;;  %3229 = vmatpush1.bf16.msra.mxu1 %v7362_v43  ;;  %v3439_v42 = vld [vmem:[%s9205_s7 + $0x4a0] sm:$0xff]  ;;  %v7420_v43 = vcombine.low %v3299_v32, %v3303_v33 }
 0x21a   : > { %3148 = vmatprep.subr.bf16.mxu0 %v7369_v44  ;;  %3230 = vmatprep.subr.bf16.mxu1 %v7371_v45  ;;  %v7548_v44 = vcombine.low %v3427_v18, %v3431_v34  ;;  %v7429_v45 = vcombine.high %v3307_v39, %v3311_v40  ;;  %v7557_v46 = vcombine.high %v3435_v41, %v3439_v42  ;;  %v3483_v26 = vld [vmem:[%s9205_s7 + $0x600] sm:$0xff] }
 0x21b   : > { %v3487_v27 = vld [vmem:[%s9205_s7 + $0x620] sm:$0xff] }
 0x21c   : > { %v3363_v32 = vld [vmem:[%s9205_s7 + $0x240] sm:$0xff] }
 0x21d   : > { %3149 = vmatpush1.bf16.msra.mxu0 %v7368_v49  ;;  %3231 = vmatpush1.bf16.msra.mxu1 %v7370_v50  ;;  %v3447_v49 = vld [vmem:[%s9205_s7 + $0x4e0] sm:$0xff]  ;;  %v7428_v50 = vcombine.low %v3307_v39, %v3311_v40 }
 0x21e   : > { %3150 = vmatprep.subr.bf16.mxu0 %v7377_v51  ;;  %3232 = vmatprep.subr.bf16.mxu1 %v7379_v2  ;;  %v7437_v51 = vcombine.high %v3315_v47, %v3319_v48  ;;  %v7565_v2 = vcombine.high %v3443_v15, %v3447_v49  ;;  %v3367_v33 = vld [vmem:[%s9205_s7 + $0x260] sm:$0xff] }
 0x21f   : > { %v3491_v18 = vld [vmem:[%s9205_s7 + $0x640] sm:$0xff] }
 0x220   : > { %v3495_v34 = vld [vmem:[%s9205_s7 + $0x660] sm:$0xff] }
 0x221   : > { %3151 = vmatpush1.bf16.msra.mxu0 %v7376_v24  ;;  %3233 = vmatpush1.bf16.msra.mxu1 %v7378_v56  ;;  %v7436_v24 = vcombine.low %v3315_v47, %v3319_v48  ;;  %v7564_v56 = vcombine.low %v3443_v15, %v3447_v49  ;;  %v3371_v39 = vld [vmem:[%s9205_s7 + $0x280] sm:$0xff] }
 0x222   : > { %3152 = vmatprep.subr.bf16.mxu0 %v7385_v57  ;;  %3234 = vmatprep.subr.bf16.mxu1 %v7387_v58  ;;  %v7445_v57 = vcombine.high %v3323_v52, %v3327_v53  ;;  %v7573_v58 = vcombine.high %v3451_v54, %v3455_v55  ;;  %v3375_v40 = vld [vmem:[%s9205_s7 + $0x2a0] sm:$0xff] }
 0x223   : > { %v3379_v47 = vld [vmem:[%s9205_s7 + $0x2c0] sm:$0xff] }
 0x224   : > { %v3383_v48 = vld [vmem:[%s9205_s7 + $0x2e0] sm:$0xff] }
 0x225   : > { %3153 = vmatpush1.bf16.msra.mxu0 %v7384_v63  ;;  %3235 = vmatpush1.bf16.msra.mxu1 %v7386_v0  ;;  %v7444_v63 = vcombine.low %v3323_v52, %v3327_v53  ;;  %v7572_v0 = vcombine.low %v3451_v54, %v3455_v55  ;;  %v3507_v15 = vld [vmem:[%s9205_s7 + $0x6c0] sm:$0xff] }
 0x226   : > { %3154 = vmatprep.subr.bf16.mxu0 %v7393_v3  ;;  %3236 = vmatprep.subr.bf16.mxu1 %v7395_v4  ;;  %v7453_v3 = vcombine.high %v3331_v59, %v3335_v60  ;;  %v7581_v4 = vcombine.high %v3459_v61, %v3463_v62  ;;  %v3511_v49 = vld [vmem:[%s9205_s7 + $0x6e0] sm:$0xff] }
 0x227   : > { %v3387_v52 = vld [vmem:[%s9205_s7 + $0x300] sm:$0xff] }
 0x228   : > { %v3391_v53 = vld [vmem:[%s9205_s7 + $0x320] sm:$0xff] }
 0x229   : > { %3155 = vmatpush1.bf16.msra.mxu0 %v7392_v9  ;;  %3237 = vmatpush1.bf16.msra.mxu1 %v7394_v10  ;;  %v7452_v9 = vcombine.low %v3331_v59, %v3335_v60  ;;  %v7580_v10 = vcombine.low %v3459_v61, %v3463_v62  ;;  %v3515_v54 = vld [vmem:[%s9205_s7 + $0x700] sm:$0xff] }
 0x22a   : > { %3156 = vmatprep.subr.bf16.mxu0 %v7401_v11  ;;  %3238 = vmatprep.subr.bf16.mxu1 %v7403_v12  ;;  %v7461_v11 = vcombine.high %v3339_v5, %v3343_v6  ;;  %v7589_v12 = vcombine.high %v3467_v7, %v3471_v8  ;;  %v3519_v55 = vld [vmem:[%s9205_s7 + $0x720] sm:$0xff] }
 0x22b   : > { %v3395_v59 = vld [vmem:[%s9205_s7 + $0x340] sm:$0xff] }
 0x22c   : > { %v3399_v60 = vld [vmem:[%s9205_s7 + $0x360] sm:$0xff] }
 0x22d   : > { %3157 = vmatpush1.bf16.msra.mxu0 %v7400_v19  ;;  %3239 = vmatpush1.bf16.msra.mxu1 %v7402_v20  ;;  %v7460_v19 = vcombine.low %v3339_v5, %v3343_v6  ;;  %v7588_v20 = vcombine.low %v3467_v7, %v3471_v8  ;;  %v3523_v61 = vld [vmem:[%s9205_s7 + $0x740] sm:$0xff] }
 0x22e   : > { %3158 = vmatprep.subr.bf16.mxu0 %v7409_v21  ;;  %3240 = vmatprep.subr.bf16.mxu1 %v7411_v22  ;;  %v7469_v21 = vcombine.high %v3347_v13, %v3351_v14  ;;  %v7597_v22 = vcombine.high %v3475_v16, %v3479_v17  ;;  %v3527_v62 = vld [vmem:[%s9205_s7 + $0x760] sm:$0xff] }
 0x22f   : > { %v3403_v5 = vld [vmem:[%s9205_s7 + $0x380] sm:$0xff] }
 0x230   : > { %v3407_v6 = vld [vmem:[%s9205_s7 + $0x3a0] sm:$0xff] }
 0x231   : > { %3159 = vmatpush1.bf16.msra.mxu0 %v7408_v28  ;;  %3241 = vmatpush1.bf16.msra.mxu1 %v7410_v29  ;;  %v7468_v28 = vcombine.low %v3347_v13, %v3351_v14  ;;  %v7596_v29 = vcombine.low %v3475_v16, %v3479_v17  ;;  %v3531_v7 = vld [vmem:[%s9205_s7 + $0x780] sm:$0xff] }
 0x232   : > { %6363 = vmatprep.subr.bf16.mxu0 %v7413_v30  ;;  %6404 = vmatprep.subr.bf16.mxu1 %v7541_v31  ;;  %v7477_v30 = vcombine.high %v3355_v1, %v3359_v23  ;;  %v7605_v31 = vcombine.high %v3483_v26, %v3487_v27  ;;  %v3535_v8 = vld [vmem:[%s9205_s7 + $0x7a0] sm:$0xff] }
 0x233   : > { %v3411_v13 = vld [vmem:[%s9205_s7 + $0x3c0] sm:$0xff] }
 0x234   : > { %3161 = vmatmul.mubr.bf16.vlgmr.msra.gmra.mrb[4].mxu0 %v9387_v25  ;;  %3243 = vmatmul.mubr.bf16.vlgmr.msra.gmra.mrb[4].mxu1 %v9387_v25  ;;  %v7556_v25 = vcombine.low %v3435_v41, %v3439_v42  ;;  %v3499_v41 = vld [vmem:[%s9205_s7 + $0x680] sm:$0xff] }
 0x235   : > { %6364 = vmatpush1.bf16.msra.mxu0 %v7412_v35  ;;  %6405 = vmatpush1.bf16.msra.mxu1 %v7540_v36  ;;  %v7476_v35 = vcombine.low %v3355_v1, %v3359_v23  ;;  %v7604_v36 = vcombine.low %v3483_v26, %v3487_v27  ;;  %v3503_v42 = vld [vmem:[%s9205_s7 + $0x6a0] sm:$0xff] }
 0x236   : > { %6365 = vmatprep.subr.bf16.mxu0 %v7421_v37  ;;  %6406 = vmatprep.subr.bf16.mxu1 %v7549_v38  ;;  %v7485_v37 = vcombine.high %v3363_v32, %v3367_v33  ;;  %v7613_v38 = vcombine.high %v3491_v18, %v3495_v34  ;;  %v3415_v14 = vld [vmem:[%s9205_s7 + $0x3e0] sm:$0xff] }
 0x237   : > { %v3539_v16 = vld [vmem:[%s9205_s7 + $0x7c0] sm:$0xff] }
 0x238   : > { %v3543_v17 = vld [vmem:[%s9205_s7 + $0x7e0] sm:$0xff] }
 0x239   : > { %6366 = vmatpush1.bf16.msra.mxu0 %v7420_v43  ;;  %6407 = vmatpush1.bf16.msra.mxu1 %v7548_v44  ;;  %v7484_v43 = vcombine.low %v3363_v32, %v3367_v33  ;;  %v7612_v44 = vcombine.low %v3491_v18, %v3495_v34  ;;  %v9586_v1 = vld [vmem:[%s9205_s7 + $0x800] sm:$0xff]  ;;  %v1589_v32 = vlaneseq }
 0x23a   : > { %6367 = vmatprep.subr.bf16.mxu0 %v7429_v45  ;;  %6408 = vmatprep.subr.bf16.mxu1 %v7557_v46  ;;  %v7493_v45 = vcombine.high %v3371_v39, %v3375_v40  ;;  %v7621_v46 = vcombine.high %v3499_v41, %v3503_v42  ;;  %v9589_v23 = vld [vmem:[%s9205_s7 + $0x820] sm:$0xff] }
 0x23b   : > { %v9592_v26 = vld [vmem:[%s9205_s7 + $0xc00] sm:$0xff]  ;;  %v9601_v33 = vshrl.u32 %v1589_v32, 7 }
 0x23c   : > { %v9595_v27 = vld [vmem:[%s9205_s7 + $0xc20] sm:$0xff] }
 0x23d   : > { %6368 = vmatpush1.bf16.msra.mxu0 %v7428_v50  ;;  %6409 = vmatpush1.bf16.msra.mxu1 %v7556_v25  ;;  %v7492_v50 = vcombine.low %v3371_v39, %v3375_v40  ;;  %v7620_v25 = vcombine.low %v3499_v41, %v3503_v42  ;;  %v1591_v18 = vsub.s32 0, %v9601_v33  ;;  %v9610_v34 = vld [vmem:[%s1584_s28] sm:$0xff] }
 0x23e   : > { %6369 = vmatprep.subr.bf16.mxu0 %v7437_v51  ;;  %6410 = vmatprep.subr.bf16.mxu1 %v7565_v2  ;;  %v7501_v51 = vcombine.high %v3379_v47, %v3383_v48  ;;  %v7629_v2 = vcombine.high %v3507_v15, %v3511_v49 }
 0x241   : > { %6370 = vmatpush1.bf16.msra.mxu0 %v7436_v24  ;;  %6411 = vmatpush1.bf16.msra.mxu1 %v7564_v56  ;;  %v7500_v24 = vcombine.low %v3379_v47, %v3383_v48  ;;  %v7628_v56 = vcombine.low %v3507_v15, %v3511_v49 }
 0x242   : > { %6371 = vmatprep.subr.bf16.mxu0 %v7445_v57  ;;  %6412 = vmatprep.subr.bf16.mxu1 %v7573_v58  ;;  %v7509_v57 = vcombine.high %v3387_v52, %v3391_v53  ;;  %v7637_v58 = vcombine.high %v3515_v54, %v3519_v55 }
 0x245   : > { %6372 = vmatpush1.bf16.msra.mxu0 %v7444_v63  ;;  %6413 = vmatpush1.bf16.msra.mxu1 %v7572_v0  ;;  %v7508_v63 = vcombine.low %v3387_v52, %v3391_v53  ;;  %v7636_v0 = vcombine.low %v3515_v54, %v3519_v55 }
 0x246   : > { %6373 = vmatprep.subr.bf16.mxu0 %v7453_v3  ;;  %6414 = vmatprep.subr.bf16.mxu1 %v7581_v4  ;;  %v7517_v3 = vcombine.high %v3395_v59, %v3399_v60  ;;  %v7645_v4 = vcombine.high %v3523_v61, %v3527_v62 }
 0x249   : > { %6374 = vmatpush1.bf16.msra.mxu0 %v7452_v9  ;;  %6415 = vmatpush1.bf16.msra.mxu1 %v7580_v10  ;;  %v7516_v9 = vcombine.low %v3395_v59, %v3399_v60  ;;  %v7644_v10 = vcombine.low %v3523_v61, %v3527_v62  ;;  %v3683_v59 = vld [vmem:[%s9205_s7 + $0xc40] sm:$0xff] }
 0x24a   : > { %6375 = vmatprep.subr.bf16.mxu0 %v7461_v11  ;;  %6416 = vmatprep.subr.bf16.mxu1 %v7589_v12  ;;  %v7525_v11 = vcombine.high %v3403_v5, %v3407_v6  ;;  %v7653_v12 = vcombine.high %v3531_v7, %v3535_v8  ;;  %v3687_v60 = vld [vmem:[%s9205_s7 + $0xc60] sm:$0xff] }
 0x24d   : > { %6376 = vmatpush1.bf16.msra.mxu0 %v7460_v19  ;;  %6417 = vmatpush1.bf16.msra.mxu1 %v7588_v20  ;;  %v7524_v19 = vcombine.low %v3403_v5, %v3407_v6  ;;  %v7652_v20 = vcombine.low %v3531_v7, %v3535_v8  ;;  %v9634_v6 = vld [vmem:[%s9205_s7 + $0x8] sm:$0xff] }
 0x24e   : > { %6377 = vmatprep.subr.bf16.mxu0 %v7469_v21  ;;  %6418 = vmatprep.subr.bf16.mxu1 %v7597_v22  ;;  %v7533_v21 = vcombine.high %v3411_v13, %v3415_v14  ;;  %v7661_v22 = vcombine.high %v3539_v16, %v3543_v17  ;;  %v9637_v7 = vld [vmem:[%s9205_s7 + $0x28] sm:$0xff] }
 0x24f   : > { %v9640_v8 = vld [vmem:[%s9205_s7 + $0x408] sm:$0xff] }
 0x251   : > { %6378 = vmatpush1.bf16.msra.mxu0 %v7468_v28  ;;  %6419 = vmatpush1.bf16.msra.mxu1 %v7596_v29  ;;  %v7532_v28 = vcombine.low %v3411_v13, %v3415_v14  ;;  %v7660_v29 = vcombine.low %v3539_v16, %v3543_v17  ;;  %v9648_v13 = vld [vmem:[%s9205_s7 + $0x428] sm:$0xff]  ;;  %v3691_v14 = vld [vmem:[%s9205_s7 + $0xc80] sm:$0xff]  ;;  %v7414_v17 = vcombine.low %v9634_v6, %v9637_v7 }
 0x252   : > { %6379 = vmatprep.subr.bf16.mxu0 %v7477_v30  ;;  %6420 = vmatprep.subr.bf16.mxu1 %v7605_v31  ;;  %v7669_v30 = vcombine.high %v9586_v1, %v9589_v23  ;;  %v7797_v31 = vcombine.high %v9592_v26, %v9595_v27  ;;  %v3695_v16 = vld [vmem:[%s9205_s7 + $0xca0] sm:$0xff] }
 0x255   : > { %6380 = vmatpush1.bf16.msra.mxu0 %v7476_v35  ;;  %6421 = vmatpush1.bf16.msra.mxu1 %v7604_v36  ;;  %v1599_v35 = vsub.s32 2, %v9601_v33  ;;  %v1595_v36 = vsub.s32 1, %v9601_v33 }
 0x256   : > { %6381 = vmatprep.subr.bf16.mxu0 %v7485_v37  ;;  %6422 = vmatprep.subr.bf16.mxu1 %v7613_v38  ;;  %v1603_v37 = vsub.s32 3, %v9601_v33  ;;  %v1592_v38 = vrot.slane %v9610_v34, %v1591_v18  ;;  %v3579_v18 = vld [vmem:[%s9205_s7 + $0x900] sm:$0xff] }
 0x257   : > { %v1600_v39 = vrot.slane %v9610_v34, %v1599_v35  ;;  %v1596_v40 = vrot.slane %v9610_v34, %v1595_v36  ;;  %v3583_v35 = vld [vmem:[%s9205_s7 + $0x920] sm:$0xff] }
 0x258   : > { %v1604_v41 = vrot.slane %v9610_v34, %v1603_v37  ;;  %v3707_v36 = vld [vmem:[%s9205_s7 + $0xd00] sm:$0xff] }
 0x259   : > { %6382 = vmatpush1.bf16.msra.mxu0 %v7484_v43  ;;  %6423 = vmatpush1.bf16.msra.mxu1 %v7612_v44  ;;  %v3711_v37 = vld [vmem:[%s9205_s7 + $0xd20] sm:$0xff] }
 0x25a   : > { %6383 = vmatprep.subr.bf16.mxu0 %v7493_v45  ;;  %6424 = vmatprep.subr.bf16.mxu1 %v7621_v46 }
 0x25d   : > { %6384 = vmatpush1.bf16.msra.mxu0 %v7492_v50  ;;  %6425 = vmatpush1.bf16.msra.mxu1 %v7620_v25 }
 0x25e   : > { %6385 = vmatprep.subr.bf16.mxu0 %v7501_v51  ;;  %6426 = vmatprep.subr.bf16.mxu1 %v7629_v2 }
 0x261   : > { %6386 = vmatpush1.bf16.msra.mxu0 %v7500_v24  ;;  %6427 = vmatpush1.bf16.msra.mxu1 %v7628_v56  ;;  %v3555_v24 = vld [vmem:[%s9205_s7 + $0x840] sm:$0xff] }
 0x262   : > { %6387 = vmatprep.subr.bf16.mxu0 %v7509_v57  ;;  %6428 = vmatprep.subr.bf16.mxu1 %v7637_v58  ;;  %v3559_v56 = vld [vmem:[%s9205_s7 + $0x860] sm:$0xff] }
 0x263   : > { %v7677_v5 = vcombine.high %v3555_v24, %v3559_v56 }
 0x265   : > { %6388 = vmatpush1.bf16.msra.mxu0 %v7508_v63  ;;  %6429 = vmatpush1.bf16.msra.mxu1 %v7636_v0  ;;  %v7668_v63 = vcombine.low %v9586_v1, %v9589_v23  ;;  %v7813_v1 = vcombine.high %v3691_v14, %v3695_v16  ;;  %v3571_v23 = vld [vmem:[%s9205_s7 + $0x8c0] sm:$0xff] }
 0x266   : > { %6389 = vmatprep.subr.bf16.mxu0 %v7517_v3  ;;  %6430 = vmatprep.subr.bf16.mxu1 %v7645_v4  ;;  %v7796_v4 = vcombine.low %v9592_v26, %v9595_v27  ;;  %v3575_v26 = vld [vmem:[%s9205_s7 + $0x8e0] sm:$0xff] }
 0x267   : > { %v3699_v27 = vld [vmem:[%s9205_s7 + $0xcc0] sm:$0xff] }
 0x269   : > { %6390 = vmatpush1.bf16.msra.mxu0 %v7516_v9  ;;  %6431 = vmatpush1.bf16.msra.mxu1 %v7644_v10  ;;  %v7805_v10 = vcombine.high %v3683_v59, %v3687_v60 }
 0x26a   : > { %6391 = vmatprep.subr.bf16.mxu0 %v7525_v11  ;;  %6432 = vmatprep.subr.bf16.mxu1 %v7653_v12  ;;  %v3563_v11 = vld [vmem:[%s9205_s7 + $0x880] sm:$0xff] }
 0x26b   : > { %v3567_v12 = vld [vmem:[%s9205_s7 + $0x8a0] sm:$0xff] }
 0x26d   : > { %6392 = vmatpush1.bf16.msra.mxu0 %v7524_v19  ;;  %6433 = vmatpush1.bf16.msra.mxu1 %v7652_v20  ;;  %v7542_v19 = vcombine.low %v9640_v8, %v9648_v13  ;;  %v7676_v20 = vcombine.low %v3555_v24, %v3559_v56  ;;  %v3607_v24 = vld [vmem:[%s9205_s7 + $0x9e0] sm:$0xff] }
 0x26e   : > { %6393 = vmatprep.subr.bf16.mxu0 %v7533_v21  ;;  %6434 = vmatprep.subr.bf16.mxu1 %v7661_v22  ;;  %v7804_v21 = vcombine.low %v3683_v59, %v3687_v60  ;;  %v7685_v22 = vcombine.high %v3563_v11, %v3567_v12  ;;  %v3731_v56 = vld [vmem:[%s9205_s7 + $0xdc0] sm:$0xff] }
 0x271   : > { %6394 = vmatpush1.bf16.msra.mxu0 %v7532_v28  ;;  %6435 = vmatpush1.bf16.msra.mxu1 %v7660_v29  ;;  %v3703_v28 = vld [vmem:[%s9205_s7 + $0xce0] sm:$0xff]  ;;  %v7684_v29 = vcombine.low %v3563_v11, %v3567_v12 }
 0x272   : > { %6445 = vmatprep.subr.bf16.mxu0 %v7669_v30  ;;  %6486 = vmatprep.subr.bf16.mxu1 %v7797_v31  ;;  %v7812_v30 = vcombine.low %v3691_v14, %v3695_v16  ;;  %v7693_v31 = vcombine.high %v3571_v23, %v3575_v26  ;;  %v7821_v32 = vcombine.high %v3699_v27, %v3703_v28 }
 0x287   : > { %v2998_v42 = vpop.f32.mrb[0].mxu0  ;;  %v3080_v44 = vpop.f32.mrb[0].mxu1 }
 0x288   : > { %v7929_v43 = vadd.f32 %v2998_v42, %v1592_v38  ;;  %v3000_v45 = vpop.f32.mrb[1].mxu0  ;;  %v7931_v46 = vadd.f32 %v3080_v44, %v1600_v39  ;;  %v3082_v48 = vpop.f32.mrb[1].mxu1  ;;  %v7692_v38 = vcombine.low %v3571_v23, %v3575_v26  ;;  %v7820_v39 = vcombine.low %v3699_v27, %v3703_v28  ;;  %v3587_v42 = vld [vmem:[%s9205_s7 + $0x940] sm:$0xff] }
 0x289   : > { %v7930_v47 = vadd.f32 %v3000_v45, %v1596_v40  ;;  %v3002_v15 = vpop.f32.mrb[2].mxu0  ;;  %v7932_v50 = vadd.f32 %v3082_v48, %v1604_v41  ;;  %v3084_v25 = vpop.f32.mrb[2].mxu1  ;;  %v7701_v40 = vcombine.high %v3579_v18, %v3583_v35  ;;  %v7829_v41 = vcombine.high %v3707_v36, %v3711_v37  ;;  %v3715_v44 = vld [vmem:[%s9205_s7 + $0xd40] sm:$0xff] }
 0x28a   : > { %vm3251_vm0 = vcmp.ge.f32.partialorder %v7929_v43, 0.0  ;;  %v3259_v49 = vmul.f32 0.3, %v7929_v43  ;;  %v3003_v51 = vpop.f32.mrb[3].mxu0  ;;  %vm3253_vm1 = vcmp.ge.f32.partialorder %v7931_v46, 0.0  ;;  %v3085_v55 = vpop.f32.mrb[3].mxu1 }
 0x28b   : > { %v3261_v2 = vmul.f32 0.3, %v7931_v46  ;;  %vm3252_vm2 = vcmp.ge.f32.partialorder %v7930_v47, 0.0  ;;  %v3260_v52 = vmul.f32 0.3, %v7930_v47  ;;  %vm3254_vm3 = vcmp.ge.f32.partialorder %v7932_v50, 0.0 }
 0x28c   : > { %v3267_v53 = vsel %vm3251_vm0, %v7929_v43, %v3259_v49  ;;  %v3262_v54 = vmul.f32 0.3, %v7932_v50  ;;  %v3591_v43 = vld [vmem:[%s9205_s7 + $0x960] sm:$0xff] }
 0x28d   : > { %v3269_v57 = vsel %vm3253_vm1, %v7931_v46, %v3261_v2  ;;  %v3268_v58 = vsel %vm3252_vm2, %v7930_v47, %v3260_v52  ;;  %v9627_v0 = vpack.c.bf16 %v3267_v53, %v3267_v53  ;;  %v3719_v45 = vld [vmem:[%s9205_s7 + $0xd60] sm:$0xff]  ;;  %v7700_v46 = vcombine.low %v3579_v18, %v3583_v35 }
 0x28e   : > { %v9623_v61 = vpack.c.bf16 %v3268_v58, %v3268_v58  ;;  %v3270_v62 = vsel %vm3254_vm3, %v7932_v50, %v3262_v54  ;;  %v9642_v9 = vpack.c.bf16 %v3269_v57, %v3269_v57  ;;  %v7828_v47 = vcombine.low %v3707_v36, %v3711_v37  ;;  %v3595_v49 = vld [vmem:[%s9205_s7 + $0x980] sm:$0xff] }
 0x28f   : > { %v9629_v3 = vpack.c.bf16 %v3270_v62, %v3270_v62  ;;  %v7709_v48 = vcombine.high %v3587_v42, %v3591_v43  ;;  %v7837_v15 = vcombine.high %v3715_v44, %v3719_v45  ;;  %v3599_v50 = vld [vmem:[%s9205_s7 + $0x9a0] sm:$0xff]  ;;  %v7708_v2 = vcombine.low %v3587_v42, %v3591_v43 }
 0x290   : > { %6395 = vmatprep.mubr.bf16.mxu0 %v9623_v61  ;;  %v3723_v25 = vld [vmem:[%s9205_s7 + $0xd80] sm:$0xff]  ;;  %v7836_v52 = vcombine.low %v3715_v44, %v3719_v45  ;;  %v7717_v53 = vcombine.high %v3595_v49, %v3599_v50  ;;  %v7716_v58 = vcombine.low %v3595_v49, %v3599_v50 }
 0x291   : > { %6436 = vmatprep.mubr.bf16.mxu1 %v9629_v3  ;;  %6396 = vmatmul.mubr.bf16.vlgmr.msra.gmra.mrb[8].mxu0 %v9627_v0  ;;  %v3727_v51 = vld [vmem:[%s9205_s7 + $0xda0] sm:$0xff] }
 0x292   : > { %6437 = vmatmul.mubr.bf16.vlgmr.msra.gmra.mrb[8].mxu1 %v9642_v9  ;;  %6446 = vmatpush1.bf16.msra.mxu0 %v7668_v63  ;;  %v7845_v54 = vcombine.high %v3723_v25, %v3727_v51  ;;  %v3603_v55 = vld [vmem:[%s9205_s7 + $0x9c0] sm:$0xff]  ;;  %v7844_v59 = vcombine.low %v3723_v25, %v3727_v51 }
 0x293   : > { %6487 = vmatpush1.bf16.msra.mxu1 %v7796_v4  ;;  %6447 = vmatprep.subr.bf16.mxu0 %v7677_v5  ;;  %v3735_v57 = vld [vmem:[%s9205_s7 + $0xde0] sm:$0xff]  ;;  %v7725_v60 = vcombine.high %v3603_v55, %v3607_v24  ;;  %v7724_v11 = vcombine.low %v3603_v55, %v3607_v24 }
 0x294   : > { %6488 = vmatprep.subr.bf16.mxu1 %v7805_v10  ;;  %v7853_v62 = vcombine.high %v3731_v56, %v3735_v57  ;;  %v3611_v63 = vld [vmem:[%s9205_s7 + $0xa00] sm:$0xff]  ;;  %v7852_v12 = vcombine.low %v3731_v56, %v3735_v57 }
 0x295   : > { %v3615_v4 = vld [vmem:[%s9205_s7 + $0xa20] sm:$0xff] }
 0x296   : > { %6448 = vmatpush1.bf16.msra.mxu0 %v7676_v20  ;;  %v3739_v5 = vld [vmem:[%s9205_s7 + $0xe00] sm:$0xff]  ;;  %v7733_v14 = vcombine.high %v3611_v63, %v3615_v4  ;;  %v7732_v23 = vcombine.low %v3611_v63, %v3615_v4 }
 0x297   : > { %6489 = vmatpush1.bf16.msra.mxu1 %v7804_v21  ;;  %6449 = vmatprep.subr.bf16.mxu0 %v7685_v22  ;;  %v3743_v10 = vld [vmem:[%s9205_s7 + $0xe20] sm:$0xff] }
 0x298   : > { %6490 = vmatprep.subr.bf16.mxu1 %v7813_v1  ;;  %v7861_v16 = vcombine.high %v3739_v5, %v3743_v10  ;;  %v3619_v20 = vld [vmem:[%s9205_s7 + $0xa40] sm:$0xff]  ;;  %v7860_v26 = vcombine.low %v3739_v5, %v3743_v10 }
 0x299   : > { %v3623_v21 = vld [vmem:[%s9205_s7 + $0xa60] sm:$0xff] }
 0x29a   : > { %6450 = vmatpush1.bf16.msra.mxu0 %v7684_v29  ;;  %v3747_v22 = vld [vmem:[%s9205_s7 + $0xe40] sm:$0xff]  ;;  %v7741_v27 = vcombine.high %v3619_v20, %v3623_v21  ;;  %v7740_v18 = vcombine.low %v3619_v20, %v3623_v21 }
 0x29b   : > { %6491 = vmatpush1.bf16.msra.mxu1 %v7812_v30  ;;  %6451 = vmatprep.subr.bf16.mxu0 %v7693_v31  ;;  %v3751_v1 = vld [vmem:[%s9205_s7 + $0xe60] sm:$0xff] }
 0x29c   : > { %6492 = vmatprep.subr.bf16.mxu1 %v7821_v32  ;;  %v7869_v28 = vcombine.high %v3747_v22, %v3751_v1  ;;  %v3627_v29 = vld [vmem:[%s9205_s7 + $0xa80] sm:$0xff]  ;;  %v7868_v35 = vcombine.low %v3747_v22, %v3751_v1 }
 0x29d   : > { %v3631_v30 = vld [vmem:[%s9205_s7 + $0xaa0] sm:$0xff] }
 0x29e   : > { %6452 = vmatpush1.bf16.msra.mxu0 %v7692_v38  ;;  %v3755_v31 = vld [vmem:[%s9205_s7 + $0xe80] sm:$0xff]  ;;  %v7749_v36 = vcombine.high %v3627_v29, %v3631_v30  ;;  %v7748_v42 = vcombine.low %v3627_v29, %v3631_v30  ;;  %v1607_v29 = vsub.s32 4, %v9601_v33  ;;  %v1615_v30 = vsub.s32 6, %v9601_v33 }
 0x29f   : > { %6493 = vmatpush1.bf16.msra.mxu1 %v7820_v39  ;;  %6453 = vmatprep.subr.bf16.mxu0 %v7701_v40  ;;  %v3759_v32 = vld [vmem:[%s9205_s7 + $0xea0] sm:$0xff] }
 0x2a0   : > { %6494 = vmatprep.subr.bf16.mxu1 %v7829_v41  ;;  %v7877_v37 = vcombine.high %v3755_v31, %v3759_v32  ;;  %v3635_v38 = vld [vmem:[%s9205_s7 + $0xac0] sm:$0xff]  ;;  %v7876_v43 = vcombine.low %v3755_v31, %v3759_v32  ;;  %v1611_v31 = vsub.s32 5, %v9601_v33  ;;  %v1619_v32 = vsub.s32 7, %v9601_v33 }
 0x2a1   : > { %v3639_v39 = vld [vmem:[%s9205_s7 + $0xae0] sm:$0xff] }
 0x2a2   : > { %6454 = vmatpush1.bf16.msra.mxu0 %v7700_v46  ;;  %v3763_v40 = vld [vmem:[%s9205_s7 + $0xec0] sm:$0xff]  ;;  %v7757_v44 = vcombine.high %v3635_v38, %v3639_v39  ;;  %v7756_v49 = vcombine.low %v3635_v38, %v3639_v39 }
 0x2a3   : > { %6495 = vmatpush1.bf16.msra.mxu1 %v7828_v47  ;;  %6455 = vmatprep.subr.bf16.mxu0 %v7709_v48  ;;  %v3767_v41 = vld [vmem:[%s9205_s7 + $0xee0] sm:$0xff] }
 0x2a4   : > { %6496 = vmatprep.subr.bf16.mxu1 %v7837_v15  ;;  %v7885_v45 = vcombine.high %v3763_v40, %v3767_v41  ;;  %v3643_v46 = vld [vmem:[%s9205_s7 + $0xb00] sm:$0xff]  ;;  %v7884_v50 = vcombine.low %v3763_v40, %v3767_v41 }
 0x2a5   : > { %v3647_v47 = vld [vmem:[%s9205_s7 + $0xb20] sm:$0xff] }
 0x2a6   : > { %6456 = vmatpush1.bf16.msra.mxu0 %v7708_v2  ;;  %v3771_v48 = vld [vmem:[%s9205_s7 + $0xf00] sm:$0xff]  ;;  %v7765_v25 = vcombine.high %v3643_v46, %v3647_v47  ;;  %v7764_v55 = vcombine.low %v3643_v46, %v3647_v47 }
 0x2a7   : > { %6497 = vmatpush1.bf16.msra.mxu1 %v7836_v52  ;;  %6457 = vmatprep.subr.bf16.mxu0 %v7717_v53  ;;  %v3775_v15 = vld [vmem:[%s9205_s7 + $0xf20] sm:$0xff] }
 0x2a8   : > { %6498 = vmatprep.subr.bf16.mxu1 %v7845_v54  ;;  %v7893_v51 = vcombine.high %v3771_v48, %v3775_v15  ;;  %v3651_v2 = vld [vmem:[%s9205_s7 + $0xb40] sm:$0xff]  ;;  %v7892_v24 = vcombine.low %v3771_v48, %v3775_v15 }
 0x2a9   : > { %v3655_v52 = vld [vmem:[%s9205_s7 + $0xb60] sm:$0xff] }
 0x2aa   : > { %6458 = vmatpush1.bf16.msra.mxu0 %v7716_v58  ;;  %v3779_v53 = vld [vmem:[%s9205_s7 + $0xf40] sm:$0xff]  ;;  %v7773_v56 = vcombine.high %v3651_v2, %v3655_v52  ;;  %v7772_v63 = vcombine.low %v3651_v2, %v3655_v52  ;;  %v3300_v52 = vld [vmem:[%s9205_s7 + $0x48] sm:$0xff] }
 0x2ab   : > { %6499 = vmatpush1.bf16.msra.mxu1 %v7844_v59  ;;  %6459 = vmatprep.subr.bf16.mxu0 %v7725_v60  ;;  %v3783_v54 = vld [vmem:[%s9205_s7 + $0xf60] sm:$0xff] }
 0x2ac   : > { %6500 = vmatprep.subr.bf16.mxu1 %v7853_v62  ;;  %v7901_v57 = vcombine.high %v3779_v53, %v3783_v54  ;;  %v3659_v58 = vld [vmem:[%s9205_s7 + $0xb80] sm:$0xff]  ;;  %v7900_v4 = vcombine.low %v3779_v53, %v3783_v54  ;;  %v3304_v53 = vld [vmem:[%s9205_s7 + $0x68] sm:$0xff] }
 0x2ad   : > { %v3663_v59 = vld [vmem:[%s9205_s7 + $0xba0] sm:$0xff] }
 0x2ae   : > { %6460 = vmatpush1.bf16.msra.mxu0 %v7724_v11  ;;  %v3787_v60 = vld [vmem:[%s9205_s7 + $0xf80] sm:$0xff]  ;;  %v7781_v5 = vcombine.high %v3659_v58, %v3663_v59  ;;  %v7780_v20 = vcombine.low %v3659_v58, %v3663_v59 }
 0x2af   : > { %6501 = vmatpush1.bf16.msra.mxu1 %v7852_v12  ;;  %6461 = vmatprep.subr.bf16.mxu0 %v7733_v14  ;;  %v3791_v62 = vld [vmem:[%s9205_s7 + $0xfa0] sm:$0xff] }
 0x2b0   : > { %6502 = vmatprep.subr.bf16.mxu1 %v7861_v16  ;;  %v7909_v10 = vcombine.high %v3787_v60, %v3791_v62  ;;  %v3667_v11 = vld [vmem:[%s9205_s7 + $0xbc0] sm:$0xff]  ;;  %v7908_v21 = vcombine.low %v3787_v60, %v3791_v62  ;;  %v7423_v60 = vcombine.high %v3300_v52, %v3304_v53  ;;  %v3308_v62 = vld [vmem:[%s9205_s7 + $0x88] sm:$0xff] }
 0x2b1   : > { %v3671_v12 = vld [vmem:[%s9205_s7 + $0xbe0] sm:$0xff] }
 0x2b2   : > { %6462 = vmatpush1.bf16.msra.mxu0 %v7732_v23  ;;  %v3795_v14 = vld [vmem:[%s9205_s7 + $0xfc0] sm:$0xff]  ;;  %v7789_v22 = vcombine.high %v3667_v11, %v3671_v12  ;;  %v7788_v23 = vcombine.low %v3667_v11, %v3671_v12  ;;  %v7422_v11 = vcombine.low %v3300_v52, %v3304_v53  ;;  %v3360_v52 = vld [vmem:[%s9205_s7 + $0x228] sm:$0xff] }
 0x2b3   : > { %6503 = vmatpush1.bf16.msra.mxu1 %v7860_v26  ;;  %6463 = vmatprep.subr.bf16.mxu0 %v7741_v27  ;;  %v3799_v16 = vld [vmem:[%s9205_s7 + $0xfe0] sm:$0xff]  ;;  %v7415_v27 = vcombine.high %v9634_v6, %v9637_v7  ;;  %v3320_v6 = vld [vmem:[%s9205_s7 + $0xe8] sm:$0xff] }
 0x2b4   : > { %6504 = vmatprep.subr.bf16.mxu1 %v7869_v28  ;;  %v7917_v1 = vcombine.high %v3795_v14, %v3799_v16  ;;  %v7916_v26 = vcombine.low %v3795_v14, %v3799_v16  ;;  %v7543_v28 = vcombine.high %v9640_v8, %v9648_v13  ;;  %v3444_v7 = vld [vmem:[%s9205_s7 + $0x4c8] sm:$0xff] }
 0x2b5   : > { %v3484_v53 = vld [vmem:[%s9205_s7 + $0x608] sm:$0xff] }
 0x2b6   : > { %6464 = vmatpush1.bf16.msra.mxu0 %v7740_v18  ;;  %v1608_v18 = vrot.slane %v9610_v34, %v1607_v29 }
 0x2b7   : > { %6505 = vmatpush1.bf16.msra.mxu1 %v7868_v35  ;;  %6465 = vmatprep.subr.bf16.mxu0 %v7749_v36  ;;  %v1616_v35 = vrot.slane %v9610_v34, %v1615_v30  ;;  %v1612_v36 = vrot.slane %v9610_v34, %v1611_v31  ;;  %v3332_v31 = vld [vmem:[%s9205_s7 + $0x148] sm:$0xff] }
 0x2b8   : > { %6506 = vmatprep.subr.bf16.mxu1 %v7877_v37  ;;  %v1620_v37 = vrot.slane %v9610_v34, %v1619_v32  ;;  %v3336_v32 = vld [vmem:[%s9205_s7 + $0x168] sm:$0xff] }
 0x2ba   : > { %6466 = vmatpush1.bf16.msra.mxu0 %v7748_v42 }
 0x2bb   : > { %6507 = vmatpush1.bf16.msra.mxu1 %v7876_v43  ;;  %6467 = vmatprep.subr.bf16.mxu0 %v7757_v44 }
 0x2bc   : > { %6508 = vmatprep.subr.bf16.mxu1 %v7885_v45 }
 0x2be   : > { %6468 = vmatpush1.bf16.msra.mxu0 %v7756_v49 }
 0x2bf   : > { %6509 = vmatpush1.bf16.msra.mxu1 %v7884_v50  ;;  %6469 = vmatprep.subr.bf16.mxu0 %v7765_v25 }
 0x2c0   : > { %6510 = vmatprep.subr.bf16.mxu1 %v7893_v51 }
 0x2c2   : > { %6470 = vmatpush1.bf16.msra.mxu0 %v7764_v55 }
 0x2c3   : > { %6511 = vmatpush1.bf16.msra.mxu1 %v7892_v24  ;;  %6471 = vmatprep.subr.bf16.mxu0 %v7773_v56  ;;  %v3428_v24 = vld [vmem:[%s9205_s7 + $0x448] sm:$0xff] }
 0x2c4   : > { %6512 = vmatprep.subr.bf16.mxu1 %v7901_v57  ;;  %v3432_v56 = vld [vmem:[%s9205_s7 + $0x468] sm:$0xff] }
 0x2c5   : > { %v7550_v12 = vcombine.low %v3428_v24, %v3432_v56 }
 0x2c6   : > { %6472 = vmatpush1.bf16.msra.mxu0 %v7772_v63  ;;  %v3312_v63 = vld [vmem:[%s9205_s7 + $0xa8] sm:$0xff] }
 0x2c7   : > { %6513 = vmatpush1.bf16.msra.mxu1 %v7900_v4  ;;  %6473 = vmatprep.subr.bf16.mxu0 %v7781_v5  ;;  %v7551_v4 = vcombine.high %v3428_v24, %v3432_v56  ;;  %v3436_v5 = vld [vmem:[%s9205_s7 + $0x488] sm:$0xff]  ;;  %v7431_v14 = vcombine.high %v3308_v62, %v3312_v63  ;;  %v7430_v8 = vcombine.low %v3308_v62, %v3312_v63 }
 0x2c8   : > { %6514 = vmatprep.subr.bf16.mxu1 %v7909_v10  ;;  %v3440_v10 = vld [vmem:[%s9205_s7 + $0x4a8] sm:$0xff] }
 0x2c9   : > { %v7559_v16 = vcombine.high %v3436_v5, %v3440_v10  ;;  %v7558_v13 = vcombine.low %v3436_v5, %v3440_v10  ;;  %v3364_v63 = vld [vmem:[%s9205_s7 + $0x248] sm:$0xff] }
 0x2ca   : > { %6474 = vmatpush1.bf16.msra.mxu0 %v7780_v20  ;;  %v3316_v20 = vld [vmem:[%s9205_s7 + $0xc8] sm:$0xff] }
 0x2cb   : > { %6515 = vmatpush1.bf16.msra.mxu1 %v7908_v21  ;;  %6475 = vmatprep.subr.bf16.mxu0 %v7789_v22  ;;  %v3324_v22 = vld [vmem:[%s9205_s7 + $0x108] sm:$0xff] }
 0x2cc   : > { %6516 = vmatprep.subr.bf16.mxu1 %v7917_v1  ;;  %v3328_v1 = vld [vmem:[%s9205_s7 + $0x128] sm:$0xff] }
 0x2cd   : > { %v7447_v29 = vcombine.high %v3324_v22, %v3328_v1  ;;  %v3492_v5 = vld [vmem:[%s9205_s7 + $0x648] sm:$0xff] }
 0x2ce   : > { %6476 = vmatpush1.bf16.msra.mxu0 %v7788_v23  ;;  %v3452_v23 = vld [vmem:[%s9205_s7 + $0x508] sm:$0xff] }
 0x2cf   : > { %6517 = vmatpush1.bf16.msra.mxu1 %v7916_v26  ;;  %6527 = vmatprep.subr.bf16.mxu0 %v7415_v27  ;;  %v3456_v26 = vld [vmem:[%s9205_s7 + $0x528] sm:$0xff]  ;;  %v7438_v27 = vcombine.low %v3316_v20, %v3320_v6 }
 0x2d0   : > { %6568 = vmatprep.subr.bf16.mxu1 %v7543_v28  ;;  %v7575_v30 = vcombine.high %v3452_v23, %v3456_v26  ;;  %v3496_v10 = vld [vmem:[%s9205_s7 + $0x668] sm:$0xff] }
 0x307   : > { %v3162_v38 = vpop.f32.mrb[4].mxu0  ;;  %v3244_v40 = vpop.f32.mrb[4].mxu1 }
 0x308   : > { %v7933_v39 = vadd.f32 %v3162_v38, %v1608_v18  ;;  %v3164_v41 = vpop.f32.mrb[5].mxu0  ;;  %v7935_v42 = vadd.f32 %v3244_v40, %v1616_v35  ;;  %v3246_v44 = vpop.f32.mrb[5].mxu1  ;;  %v3460_v18 = vld [vmem:[%s9205_s7 + $0x548] sm:$0xff]  ;;  %v7455_v38 = vcombine.high %v3332_v31, %v3336_v32 }
 0x309   : > { %v7934_v43 = vadd.f32 %v3164_v41, %v1612_v36  ;;  %v3166_v45 = vpop.f32.mrb[6].mxu0  ;;  %v7936_v46 = vadd.f32 %v3246_v44, %v1620_v37  ;;  %v3248_v47 = vpop.f32.mrb[6].mxu1  ;;  %v3464_v35 = vld [vmem:[%s9205_s7 + $0x568] sm:$0xff]  ;;  %v7446_v36 = vcombine.low %v3324_v22, %v3328_v1  ;;  %v7574_v37 = vcombine.low %v3452_v23, %v3456_v26 }
 0x30a   : > { %vm3255_vm4 = vcmp.ge.f32.partialorder %v7933_v39, 0.0  ;;  %v3263_v33 = vmul.f32 0.3, %v7933_v39  ;;  %v3167_v48 = vpop.f32.mrb[7].mxu0  ;;  %vm3257_vm5 = vcmp.ge.f32.partialorder %v7935_v42, 0.0  ;;  %v3249_v25 = vpop.f32.mrb[7].mxu1  ;;  %v7454_v44 = vcombine.low %v3332_v31, %v3336_v32 }
 0x30b   : > { %v3265_v15 = vmul.f32 0.3, %v7935_v42  ;;  %vm3256_vm6 = vcmp.ge.f32.partialorder %v7934_v43, 0.0  ;;  %v3264_v34 = vmul.f32 0.3, %v7934_v43  ;;  %vm3258_vm7 = vcmp.ge.f32.partialorder %v7936_v46, 0.0 }
 0x30c   : > { %v3271_v49 = vsel %vm3255_vm4, %v7933_v39, %v3263_v33  ;;  %v3266_v50 = vmul.f32 0.3, %v7936_v46  ;;  %v7583_v39 = vcombine.high %v3460_v18, %v3464_v35  ;;  %v3340_v40 = vld [vmem:[%s9205_s7 + $0x188] sm:$0xff]  ;;  %v7582_v45 = vcombine.low %v3460_v18, %v3464_v35 }
 0x30d   : > { %v3273_v51 = vsel %vm3257_vm5, %v7935_v42, %v3265_v15  ;;  %v3272_v2 = vsel %vm3256_vm6, %v7934_v43, %v3264_v34  ;;  %v9729_v57 = vpack.c.bf16 %v3271_v49, %v3271_v49  ;;  %v3344_v41 = vld [vmem:[%s9205_s7 + $0x1a8] sm:$0xff] }
 0x30e   : > { %v9725_v54 = vpack.c.bf16 %v3272_v2, %v3272_v2  ;;  %v3274_v55 = vsel %vm3258_vm7, %v7936_v46, %v3266_v50  ;;  %v9733_v59 = vpack.c.bf16 %v3273_v51, %v3273_v51  ;;  %v3468_v42 = vld [vmem:[%s9205_s7 + $0x588] sm:$0xff]  ;;  %v7463_v33 = vcombine.high %v3340_v40, %v3344_v41 }
 0x30f   : > { %v9731_v58 = vpack.c.bf16 %v3274_v55, %v3274_v55  ;;  %v3472_v43 = vld [vmem:[%s9205_s7 + $0x5a8] sm:$0xff]  ;;  %v7462_v49 = vcombine.low %v3340_v40, %v3344_v41 }
 0x310   : > { %6477 = vmatprep.mubr.bf16.mxu0 %v9725_v54  ;;  %v7591_v46 = vcombine.high %v3468_v42, %v3472_v43  ;;  %v3348_v47 = vld [vmem:[%s9205_s7 + $0x1c8] sm:$0xff]  ;;  %v7590_v50 = vcombine.low %v3468_v42, %v3472_v43 }
 0x311   : > { %6518 = vmatprep.mubr.bf16.mxu1 %v9731_v58  ;;  %6478 = vmatmul.mubr.bf16.vlgmr.msra.gmra.mrb[12].mxu0 %v9729_v57  ;;  %v3352_v48 = vld [vmem:[%s9205_s7 + $0x1e8] sm:$0xff] }
 0x312   : > { %6519 = vmatmul.mubr.bf16.vlgmr.msra.gmra.mrb[12].mxu1 %v9733_v59  ;;  %6528 = vmatpush1.bf16.msra.mxu0 %v7414_v17  ;;  %v3448_v17 = vld [vmem:[%s9205_s7 + $0x4e8] sm:$0xff]  ;;  %v7471_v25 = vcombine.high %v3348_v47, %v3352_v48  ;;  %v7470_v24 = vcombine.low %v3348_v47, %v3352_v48 }
 0x313   : > { %6569 = vmatpush1.bf16.msra.mxu1 %v7542_v19  ;;  %6559 = vmatprep.mubr.bf16.mxu0 %v9623_v61  ;;  %v7439_v19 = vcombine.high %v3316_v20, %v3320_v6  ;;  %v7567_v21 = vcombine.high %v3444_v7, %v3448_v17  ;;  %v7566_v28 = vcombine.low %v3444_v7, %v3448_v17  ;;  %v3476_v15 = vld [vmem:[%s9205_s7 + $0x5c8] sm:$0xff] }
 0x314   : > { %6600 = vmatprep.mubr.bf16.mxu1 %v9629_v3  ;;  %6529 = vmatprep.subr.bf16.mxu0 %v7423_v60  ;;  %v3480_v34 = vld [vmem:[%s9205_s7 + $0x5e8] sm:$0xff] }
 0x315   : > { %6570 = vmatprep.subr.bf16.mxu1 %v7551_v4  ;;  %v7599_v51 = vcombine.high %v3476_v15, %v3480_v34  ;;  %v3356_v2 = vld [vmem:[%s9205_s7 + $0x208] sm:$0xff]  ;;  %v7598_v56 = vcombine.low %v3476_v15, %v3480_v34 }
 0x316   : > { %6530 = vmatpush1.bf16.msra.mxu0 %v7422_v11  ;;  %v3488_v55 = vld [vmem:[%s9205_s7 + $0x628] sm:$0xff]  ;;  %v7479_v60 = vcombine.high %v3356_v2, %v3360_v52  ;;  %v7478_v11 = vcombine.low %v3356_v2, %v3360_v52 }
 0x317   : > { %6571 = vmatpush1.bf16.msra.mxu1 %v7550_v12  ;;  %6531 = vmatprep.subr.bf16.mxu0 %v7431_v14  ;;  %v7607_v62 = vcombine.high %v3484_v53, %v3488_v55  ;;  %v3368_v4 = vld [vmem:[%s9205_s7 + $0x268] sm:$0xff]  ;;  %v7606_v12 = vcombine.low %v3484_v53, %v3488_v55 }
 0x318   : > { %6572 = vmatprep.subr.bf16.mxu1 %v7559_v16  ;;  %v7487_v14 = vcombine.high %v3364_v63, %v3368_v4  ;;  %v7615_v16 = vcombine.high %v3492_v5, %v3496_v10  ;;  %v3372_v20 = vld [vmem:[%s9205_s7 + $0x288] sm:$0xff] }
 0x319   : > { %v3376_v6 = vld [vmem:[%s9205_s7 + $0x2a8] sm:$0xff] }
 0x31a   : > { %6532 = vmatpush1.bf16.msra.mxu0 %v7430_v8  ;;  %v3500_v7 = vld [vmem:[%s9205_s7 + $0x688] sm:$0xff]  ;;  %v7486_v8 = vcombine.low %v3364_v63, %v3368_v4 }
 0x31b   : > { %6573 = vmatpush1.bf16.msra.mxu1 %v7558_v13  ;;  %6533 = vmatprep.subr.bf16.mxu0 %v7439_v19  ;;  %v3504_v17 = vld [vmem:[%s9205_s7 + $0x6a8] sm:$0xff]  ;;  %v7614_v13 = vcombine.low %v3492_v5, %v3496_v10  ;;  %v7495_v19 = vcombine.high %v3372_v20, %v3376_v6 }
 0x31c   : > { %6574 = vmatprep.subr.bf16.mxu1 %v7567_v21  ;;  %v7623_v21 = vcombine.high %v3500_v7, %v3504_v17  ;;  %v3380_v22 = vld [vmem:[%s9205_s7 + $0x2c8] sm:$0xff] }
 0x31d   : > { %v3384_v1 = vld [vmem:[%s9205_s7 + $0x2e8] sm:$0xff] }
 0x31e   : > { %6534 = vmatpush1.bf16.msra.mxu0 %v7438_v27  ;;  %v3508_v23 = vld [vmem:[%s9205_s7 + $0x6c8] sm:$0xff]  ;;  %v7494_v27 = vcombine.low %v3372_v20, %v3376_v6 }
 0x31f   : > { %6575 = vmatpush1.bf16.msra.mxu1 %v7566_v28  ;;  %6535 = vmatprep.subr.bf16.mxu0 %v7447_v29  ;;  %v3512_v26 = vld [vmem:[%s9205_s7 + $0x6e8] sm:$0xff]  ;;  %v7622_v28 = vcombine.low %v3500_v7, %v3504_v17  ;;  %v7503_v29 = vcombine.high %v3380_v22, %v3384_v1 }
 0x320   : > { %6576 = vmatprep.subr.bf16.mxu1 %v7575_v30  ;;  %v7631_v30 = vcombine.high %v3508_v23, %v3512_v26  ;;  %v3388_v31 = vld [vmem:[%s9205_s7 + $0x308] sm:$0xff] }
 0x321   : > { %v3392_v32 = vld [vmem:[%s9205_s7 + $0x328] sm:$0xff] }
 0x322   : > { %6536 = vmatpush1.bf16.msra.mxu0 %v7446_v36  ;;  %v3516_v18 = vld [vmem:[%s9205_s7 + $0x708] sm:$0xff]  ;;  %v7502_v36 = vcombine.low %v3380_v22, %v3384_v1 }
 0x323   : > { %6577 = vmatpush1.bf16.msra.mxu1 %v7574_v37  ;;  %6537 = vmatprep.subr.bf16.mxu0 %v7455_v38  ;;  %v3520_v35 = vld [vmem:[%s9205_s7 + $0x728] sm:$0xff]  ;;  %v7630_v37 = vcombine.low %v3508_v23, %v3512_v26  ;;  %v7511_v38 = vcombine.high %v3388_v31, %v3392_v32 }
 0x324   : > { %6578 = vmatprep.subr.bf16.mxu1 %v7583_v39  ;;  %v7639_v39 = vcombine.high %v3516_v18, %v3520_v35  ;;  %v3396_v40 = vld [vmem:[%s9205_s7 + $0x348] sm:$0xff] }
 0x325   : > { %v3400_v41 = vld [vmem:[%s9205_s7 + $0x368] sm:$0xff] }
 0x326   : > { %6538 = vmatpush1.bf16.msra.mxu0 %v7454_v44  ;;  %v3524_v42 = vld [vmem:[%s9205_s7 + $0x748] sm:$0xff]  ;;  %v7510_v44 = vcombine.low %v3388_v31, %v3392_v32 }
 0x327   : > { %6579 = vmatpush1.bf16.msra.mxu1 %v7582_v45  ;;  %6539 = vmatprep.subr.bf16.mxu0 %v7463_v33  ;;  %v3528_v43 = vld [vmem:[%s9205_s7 + $0x768] sm:$0xff]  ;;  %v7638_v45 = vcombine.low %v3516_v18, %v3520_v35  ;;  %v7519_v33 = vcombine.high %v3396_v40, %v3400_v41 }
 0x328   : > { %6580 = vmatprep.subr.bf16.mxu1 %v7591_v46  ;;  %v7647_v46 = vcombine.high %v3524_v42, %v3528_v43  ;;  %v3404_v47 = vld [vmem:[%s9205_s7 + $0x388] sm:$0xff] }
 0x329   : > { %v3408_v48 = vld [vmem:[%s9205_s7 + $0x3a8] sm:$0xff] }
 0x32a   : > { %6540 = vmatpush1.bf16.msra.mxu0 %v7462_v49  ;;  %v3532_v15 = vld [vmem:[%s9205_s7 + $0x788] sm:$0xff]  ;;  %v7518_v49 = vcombine.low %v3396_v40, %v3400_v41 }
 0x32b   : > { %6581 = vmatpush1.bf16.msra.mxu1 %v7590_v50  ;;  %6541 = vmatprep.subr.bf16.mxu0 %v7471_v25  ;;  %v3536_v34 = vld [vmem:[%s9205_s7 + $0x7a8] sm:$0xff]  ;;  %v7646_v50 = vcombine.low %v3524_v42, %v3528_v43  ;;  %v7527_v25 = vcombine.high %v3404_v47, %v3408_v48 }
 0x32c   : > { %6582 = vmatprep.subr.bf16.mxu1 %v7599_v51  ;;  %v7655_v51 = vcombine.high %v3532_v15, %v3536_v34  ;;  %v3412_v2 = vld [vmem:[%s9205_s7 + $0x3c8] sm:$0xff] }
 0x32d   : > { %v3416_v52 = vld [vmem:[%s9205_s7 + $0x3e8] sm:$0xff] }
 0x32e   : > { %6542 = vmatpush1.bf16.msra.mxu0 %v7470_v24  ;;  %v3540_v53 = vld [vmem:[%s9205_s7 + $0x7c8] sm:$0xff]  ;;  %v7526_v24 = vcombine.low %v3404_v47, %v3408_v48 }
 0x32f   : > { %6583 = vmatpush1.bf16.msra.mxu1 %v7598_v56  ;;  %6543 = vmatprep.subr.bf16.mxu0 %v7479_v60  ;;  %v3544_v55 = vld [vmem:[%s9205_s7 + $0x7e8] sm:$0xff]  ;;  %v7654_v56 = vcombine.low %v3532_v15, %v3536_v34  ;;  %v7535_v60 = vcombine.high %v3412_v2, %v3416_v52 }
 0x330   : > { %6584 = vmatprep.subr.bf16.mxu1 %v7607_v62  ;;  %v7663_v62 = vcombine.high %v3540_v53, %v3544_v55  ;;  %v3548_v63 = vld [vmem:[%s9205_s7 + $0x808] sm:$0xff] }
 0x331   : > { %v3552_v4 = vld [vmem:[%s9205_s7 + $0x828] sm:$0xff] }
 0x332   : > { %6544 = vmatpush1.bf16.msra.mxu0 %v7478_v11  ;;  %v3676_v5 = vld [vmem:[%s9205_s7 + $0xc08] sm:$0xff]  ;;  %v7534_v11 = vcombine.low %v3412_v2, %v3416_v52  ;;  %v7670_v7 = vcombine.low %v3548_v63, %v3552_v4 }
 0x333   : > { %6585 = vmatpush1.bf16.msra.mxu1 %v7606_v12  ;;  %6545 = vmatprep.subr.bf16.mxu0 %v7487_v14  ;;  %v3680_v10 = vld [vmem:[%s9205_s7 + $0xc28] sm:$0xff]  ;;  %v7662_v12 = vcombine.low %v3540_v53, %v3544_v55  ;;  %v7671_v14 = vcombine.high %v3548_v63, %v3552_v4 }
 0x334   : > { %6586 = vmatprep.subr.bf16.mxu1 %v7615_v16  ;;  %v7799_v16 = vcombine.high %v3676_v5, %v3680_v10  ;;  %v3556_v20 = vld [vmem:[%s9205_s7 + $0x848] sm:$0xff] }
 0x335   : > { %v3560_v6 = vld [vmem:[%s9205_s7 + $0x868] sm:$0xff] }
 0x336   : > { %6546 = vmatpush1.bf16.msra.mxu0 %v7486_v8  ;;  %v3684_v17 = vld [vmem:[%s9205_s7 + $0xc48] sm:$0xff] }
 0x337   : > { %6587 = vmatpush1.bf16.msra.mxu1 %v7614_v13  ;;  %6547 = vmatprep.subr.bf16.mxu0 %v7495_v19  ;;  %v3688_v8 = vld [vmem:[%s9205_s7 + $0xc68] sm:$0xff]  ;;  %v7798_v13 = vcombine.low %v3676_v5, %v3680_v10  ;;  %v7679_v19 = vcombine.high %v3556_v20, %v3560_v6 }
 0x338   : > { %6588 = vmatprep.subr.bf16.mxu1 %v7623_v21  ;;  %v3564_v21 = vld [vmem:[%s9205_s7 + $0x888] sm:$0xff]  ;;  %v7807_v1 = vcombine.high %v3684_v17, %v3688_v8 }
 0x339   : > { %v3568_v22 = vld [vmem:[%s9205_s7 + $0x8a8] sm:$0xff] }
 0x33a   : > { %6548 = vmatpush1.bf16.msra.mxu0 %v7494_v27  ;;  %v3692_v23 = vld [vmem:[%s9205_s7 + $0xc88] sm:$0xff]  ;;  %v7678_v27 = vcombine.low %v3556_v20, %v3560_v6 }
 0x33b   : > { %6589 = vmatpush1.bf16.msra.mxu1 %v7622_v28  ;;  %6549 = vmatprep.subr.bf16.mxu0 %v7503_v29  ;;  %v3696_v26 = vld [vmem:[%s9205_s7 + $0xca8] sm:$0xff]  ;;  %v7806_v28 = vcombine.low %v3684_v17, %v3688_v8  ;;  %v7687_v29 = vcombine.high %v3564_v21, %v3568_v22 }
 0x33c   : > { %6590 = vmatprep.subr.bf16.mxu1 %v7631_v30  ;;  %v7815_v30 = vcombine.high %v3692_v23, %v3696_v26  ;;  %v3572_v31 = vld [vmem:[%s9205_s7 + $0x8c8] sm:$0xff] }
 0x33d   : > { %v3576_v32 = vld [vmem:[%s9205_s7 + $0x8e8] sm:$0xff] }
 0x33e   : > { %6550 = vmatpush1.bf16.msra.mxu0 %v7502_v36  ;;  %v3700_v18 = vld [vmem:[%s9205_s7 + $0xcc8] sm:$0xff]  ;;  %v7686_v36 = vcombine.low %v3564_v21, %v3568_v22 }
 0x33f   : > { %6591 = vmatpush1.bf16.msra.mxu1 %v7630_v37  ;;  %6551 = vmatprep.subr.bf16.mxu0 %v7511_v38  ;;  %v3704_v35 = vld [vmem:[%s9205_s7 + $0xce8] sm:$0xff]  ;;  %v7814_v37 = vcombine.low %v3692_v23, %v3696_v26  ;;  %v7695_v38 = vcombine.high %v3572_v31, %v3576_v32 }
 0x340   : > { %6592 = vmatprep.subr.bf16.mxu1 %v7639_v39  ;;  %v7823_v39 = vcombine.high %v3700_v18, %v3704_v35  ;;  %v3580_v40 = vld [vmem:[%s9205_s7 + $0x908] sm:$0xff] }
 0x341   : > { %v3584_v41 = vld [vmem:[%s9205_s7 + $0x928] sm:$0xff] }
 0x342   : > { %6552 = vmatpush1.bf16.msra.mxu0 %v7510_v44  ;;  %v3708_v42 = vld [vmem:[%s9205_s7 + $0xd08] sm:$0xff]  ;;  %v7694_v44 = vcombine.low %v3572_v31, %v3576_v32 }
 0x343   : > { %6593 = vmatpush1.bf16.msra.mxu1 %v7638_v45  ;;  %6553 = vmatprep.subr.bf16.mxu0 %v7519_v33  ;;  %v3712_v43 = vld [vmem:[%s9205_s7 + $0xd28] sm:$0xff]  ;;  %v7822_v45 = vcombine.low %v3700_v18, %v3704_v35  ;;  %v7703_v33 = vcombine.high %v3580_v40, %v3584_v41 }
 0x344   : > { %6594 = vmatprep.subr.bf16.mxu1 %v7647_v46  ;;  %v7831_v46 = vcombine.high %v3708_v42, %v3712_v43  ;;  %v3588_v47 = vld [vmem:[%s9205_s7 + $0x948] sm:$0xff] }
 0x345   : > { %v3592_v48 = vld [vmem:[%s9205_s7 + $0x968] sm:$0xff] }
 0x346   : > { %6554 = vmatpush1.bf16.msra.mxu0 %v7518_v49  ;;  %v3716_v15 = vld [vmem:[%s9205_s7 + $0xd48] sm:$0xff]  ;;  %v7702_v49 = vcombine.low %v3580_v40, %v3584_v41 }
 0x347   : > { %6595 = vmatpush1.bf16.msra.mxu1 %v7646_v50  ;;  %6555 = vmatprep.subr.bf16.mxu0 %v7527_v25  ;;  %v3720_v34 = vld [vmem:[%s9205_s7 + $0xd68] sm:$0xff]  ;;  %v7830_v50 = vcombine.low %v3708_v42, %v3712_v43  ;;  %v7711_v25 = vcombine.high %v3588_v47, %v3592_v48 }
 0x348   : > { %6596 = vmatprep.subr.bf16.mxu1 %v7655_v51  ;;  %v7839_v51 = vcombine.high %v3716_v15, %v3720_v34  ;;  %v3596_v2 = vld [vmem:[%s9205_s7 + $0x988] sm:$0xff] }
 0x349   : > { %v3600_v52 = vld [vmem:[%s9205_s7 + $0x9a8] sm:$0xff] }
 0x34a   : > { %6556 = vmatpush1.bf16.msra.mxu0 %v7526_v24  ;;  %v3724_v53 = vld [vmem:[%s9205_s7 + $0xd88] sm:$0xff]  ;;  %v7710_v24 = vcombine.low %v3588_v47, %v3592_v48 }
 0x34b   : > { %6597 = vmatpush1.bf16.msra.mxu1 %v7654_v56  ;;  %6557 = vmatprep.subr.bf16.mxu0 %v7535_v60  ;;  %v3728_v55 = vld [vmem:[%s9205_s7 + $0xda8] sm:$0xff]  ;;  %v7838_v56 = vcombine.low %v3716_v15, %v3720_v34  ;;  %v7719_v60 = vcombine.high %v3596_v2, %v3600_v52 }
 0x34c   : > { %6598 = vmatprep.subr.bf16.mxu1 %v7663_v62  ;;  %v7847_v63 = vcombine.high %v3724_v53, %v3728_v55  ;;  %v3604_v4 = vld [vmem:[%s9205_s7 + $0x9c8] sm:$0xff] }
 0x34d   : > { %v3608_v5 = vld [vmem:[%s9205_s7 + $0x9e8] sm:$0xff] }
 0x34e   : > { %6558 = vmatpush1.bf16.msra.mxu0 %v7534_v11  ;;  %v7727_v21 = vcombine.high %v3604_v4, %v3608_v5  ;;  %v3612_v23 = vld [vmem:[%s9205_s7 + $0xa08] sm:$0xff] }
 0x34f   : > { %6599 = vmatpush1.bf16.msra.mxu1 %v7662_v12  ;;  %6609 = vmatprep.subr.bf16.mxu0 %v7671_v14  ;;  %v3732_v12 = vld [vmem:[%s9205_s7 + $0xdc8] sm:$0xff] }
 0x350   : > { %6650 = vmatprep.subr.bf16.mxu1 %v7799_v16  ;;  %v3736_v14 = vld [vmem:[%s9205_s7 + $0xde8] sm:$0xff] }
 0x351   : > { %6560 = vmatmul.mubr.bf16.vlgmr.msra.gmra.mrb[16].mxu0 %v9627_v0  ;;  %v3616_v26 = vld [vmem:[%s9205_s7 + $0xa28] sm:$0xff] }
 0x352   : > { %6601 = vmatmul.mubr.bf16.vlgmr.msra.gmra.mrb[16].mxu1 %v9642_v9  ;;  %6610 = vmatpush1.bf16.msra.mxu0 %v7670_v7  ;;  %v7718_v7 = vcombine.low %v3596_v2, %v3600_v52  ;;  %v7735_v31 = vcombine.high %v3612_v23, %v3616_v26  ;;  %v3620_v18 = vld [vmem:[%s9205_s7 + $0xa48] sm:$0xff] }
 0x353   : > { %6641 = vmatprep.mubr.bf16.mxu0 %v9725_v54  ;;  %6651 = vmatpush1.bf16.msra.mxu1 %v7798_v13  ;;  %v3624_v35 = vld [vmem:[%s9205_s7 + $0xa68] sm:$0xff] }
 0x354   : > { %6682 = vmatprep.mubr.bf16.mxu1 %v9731_v58  ;;  %6611 = vmatprep.subr.bf16.mxu0 %v7679_v19  ;;  %v7846_v19 = vcombine.low %v3724_v53, %v3728_v55  ;;  %v7743_v40 = vcombine.high %v3620_v18, %v3624_v35  ;;  %v3628_v42 = vld [vmem:[%s9205_s7 + $0xa88] sm:$0xff] }
 0x355   : > { %6652 = vmatprep.subr.bf16.mxu1 %v7807_v1  ;;  %v7855_v1 = vcombine.high %v3732_v12, %v3736_v14  ;;  %v3632_v43 = vld [vmem:[%s9205_s7 + $0xaa8] sm:$0xff] }
 0x356   : > { %6612 = vmatpush1.bf16.msra.mxu0 %v7678_v27  ;;  %v3740_v27 = vld [vmem:[%s9205_s7 + $0xe08] sm:$0xff]  ;;  %v7751_v47 = vcombine.high %v3628_v42, %v3632_v43 }
 0x357   : > { %6653 = vmatpush1.bf16.msra.mxu1 %v7806_v28  ;;  %6613 = vmatprep.subr.bf16.mxu0 %v7687_v29  ;;  %v3744_v28 = vld [vmem:[%s9205_s7 + $0xe28] sm:$0xff]  ;;  %v7726_v29 = vcombine.low %v3604_v4, %v3608_v5 }
 0x358   : > { %6654 = vmatprep.subr.bf16.mxu1 %v7815_v30  ;;  %v7854_v30 = vcombine.low %v3732_v12, %v3736_v14  ;;  %v7863_v32 = vcombine.high %v3740_v27, %v3744_v28  ;;  %v3636_v15 = vld [vmem:[%s9205_s7 + $0xac8] sm:$0xff] }
 0x359   : > { %v3640_v34 = vld [vmem:[%s9205_s7 + $0xae8] sm:$0xff] }
 0x35a   : > { %6614 = vmatpush1.bf16.msra.mxu0 %v7686_v36  ;;  %v3748_v36 = vld [vmem:[%s9205_s7 + $0xe48] sm:$0xff]  ;;  %v7759_v2 = vcombine.high %v3636_v15, %v3640_v34 }
 0x35b   : > { %6655 = vmatpush1.bf16.msra.mxu1 %v7814_v37  ;;  %6615 = vmatprep.subr.bf16.mxu0 %v7695_v38  ;;  %v3752_v37 = vld [vmem:[%s9205_s7 + $0xe68] sm:$0xff]  ;;  %v7734_v38 = vcombine.low %v3612_v23, %v3616_v26 }
 0x35c   : > { %6656 = vmatprep.subr.bf16.mxu1 %v7823_v39  ;;  %v7862_v39 = vcombine.low %v3740_v27, %v3744_v28  ;;  %v7871_v41 = vcombine.high %v3748_v36, %v3752_v37  ;;  %v3644_v53 = vld [vmem:[%s9205_s7 + $0xb08] sm:$0xff] }
 0x35d   : > { %v3648_v55 = vld [vmem:[%s9205_s7 + $0xb28] sm:$0xff] }
 0x35e   : > { %6616 = vmatpush1.bf16.msra.mxu0 %v7694_v44  ;;  %v3756_v44 = vld [vmem:[%s9205_s7 + $0xe88] sm:$0xff]  ;;  %v7766_v14 = vcombine.low %v3644_v53, %v3648_v55 }
 0x35f   : > { %6657 = vmatpush1.bf16.msra.mxu1 %v7822_v45  ;;  %6617 = vmatprep.subr.bf16.mxu0 %v7703_v33  ;;  %v3760_v45 = vld [vmem:[%s9205_s7 + $0xea8] sm:$0xff]  ;;  %v7742_v33 = vcombine.low %v3620_v18, %v3624_v35 }
 0x360   : > { %6658 = vmatprep.subr.bf16.mxu1 %v7831_v46  ;;  %v7870_v46 = vcombine.low %v3748_v36, %v3752_v37  ;;  %v7879_v48 = vcombine.high %v3756_v44, %v3760_v45  ;;  %v3652_v5 = vld [vmem:[%s9205_s7 + $0xb48] sm:$0xff]  ;;  %v3293_v36 = vld [vmem:[%s9205_s7 + $0x10] sm:$0xff] }
 0x361   : > { %v3784_v12 = vld [vmem:[%s9205_s7 + $0xf68] sm:$0xff]  ;;  %v3297_v37 = vld [vmem:[%s9205_s7 + $0x30] sm:$0xff] }
 0x362   : > { %6618 = vmatpush1.bf16.msra.mxu0 %v7702_v49  ;;  %v3764_v49 = vld [vmem:[%s9205_s7 + $0xec8] sm:$0xff] }
 0x363   : > { %6659 = vmatpush1.bf16.msra.mxu1 %v7830_v50  ;;  %6619 = vmatprep.subr.bf16.mxu0 %v7711_v25  ;;  %v3768_v50 = vld [vmem:[%s9205_s7 + $0xee8] sm:$0xff]  ;;  %v7750_v25 = vcombine.low %v3628_v42, %v3632_v43  ;;  %v7417_v42 = vcombine.high %v3293_v36, %v3297_v37 }
 0x364   : > { %v6397_v62 = vpop.f32.mrb[8].mxu0  ;;  %6660 = vmatprep.subr.bf16.mxu1 %v7839_v51  ;;  %v7878_v51 = vcombine.low %v3756_v44, %v3760_v45  ;;  %v7887_v52 = vcombine.high %v3764_v49, %v3768_v50  ;;  %v3668_v27 = vld [vmem:[%s9205_s7 + $0xbc8] sm:$0xff]  ;;  %v3301_v44 = vld [vmem:[%s9205_s7 + $0x50] sm:$0xff] }
 0x365   : > { %v6438_v10 = vpop.f32.mrb[8].mxu1  ;;  %v6399_v11 = vpop.f32.mrb[9].mxu0  ;;  %v3672_v28 = vld [vmem:[%s9205_s7 + $0xbe8] sm:$0xff]  ;;  %v3305_v45 = vld [vmem:[%s9205_s7 + $0x70] sm:$0xff] }
 0x366   : > { %v9839_v16 = vadd.f32 %v6438_v10, %v6397_v62  ;;  %v6440_v20 = vpop.f32.mrb[9].mxu1  ;;  %6620 = vmatpush1.bf16.msra.mxu0 %v7710_v24  ;;  %v6401_v6 = vpop.f32.mrb[10].mxu0  ;;  %v3772_v24 = vld [vmem:[%s9205_s7 + $0xf08] sm:$0xff]  ;;  %v7886_v62 = vcombine.low %v3764_v49, %v3768_v50  ;;  %v7791_v18 = vcombine.high %v3668_v27, %v3672_v28  ;;  %v3313_v49 = vld [vmem:[%s9205_s7 + $0xb0] sm:$0xff] }
 0x367   : > { %v9841_v17 = vadd.f32 %v6440_v20, %v6399_v11  ;;  %6661 = vmatpush1.bf16.msra.mxu1 %v7838_v56  ;;  %v6442_v8 = vpop.f32.mrb[10].mxu1  ;;  %v6402_v13 = vpop.f32.mrb[11].mxu0  ;;  %6621 = vmatprep.subr.bf16.mxu0 %v7719_v60  ;;  %v3776_v56 = vld [vmem:[%s9205_s7 + $0xf28] sm:$0xff]  ;;  %v7758_v60 = vcombine.low %v3636_v15, %v3640_v34  ;;  %v7425_v15 = vcombine.high %v3301_v44, %v3305_v45  ;;  %v3309_v34 = vld [vmem:[%s9205_s7 + $0x90] sm:$0xff] }
 0x368   : > { %v6443_v22 = vpop.f32.mrb[11].mxu1  ;;  %6662 = vmatprep.subr.bf16.mxu1 %v7847_v63  ;;  %v7767_v63 = vcombine.high %v3644_v53, %v3648_v55  ;;  %v7895_v4 = vcombine.high %v3772_v24, %v3776_v56  ;;  %v3656_v10 = vld [vmem:[%s9205_s7 + $0xb68] sm:$0xff]  ;;  %v7894_v20 = vcombine.low %v3772_v24, %v3776_v56  ;;  %v7433_v53 = vcombine.high %v3309_v34, %v3313_v49  ;;  %v3317_v24 = vld [vmem:[%s9205_s7 + $0xd0] sm:$0xff] }
 0x369   : > { %v3780_v11 = vld [vmem:[%s9205_s7 + $0xf48] sm:$0xff]  ;;  %v7775_v6 = vcombine.high %v3652_v5, %v3656_v10  ;;  %v7774_v22 = vcombine.low %v3652_v5, %v3656_v10  ;;  %v3321_v56 = vld [vmem:[%s9205_s7 + $0xf0] sm:$0xff] }
 0x36a   : > { %6622 = vmatpush1.bf16.msra.mxu0 %v7718_v7  ;;  %v7903_v7 = vcombine.high %v3780_v11, %v3784_v12  ;;  %v3660_v8 = vld [vmem:[%s9205_s7 + $0xb88] sm:$0xff]  ;;  %v7441_v5 = vcombine.high %v3317_v24, %v3321_v56 }
 0x36b   : > { %6663 = vmatpush1.bf16.msra.mxu1 %v7846_v19  ;;  %6623 = vmatprep.subr.bf16.mxu0 %v7727_v21  ;;  %v3664_v13 = vld [vmem:[%s9205_s7 + $0xba8] sm:$0xff] }
 0x36c   : > { %6664 = vmatprep.subr.bf16.mxu1 %v7855_v1  ;;  %v3788_v19 = vld [vmem:[%s9205_s7 + $0xf88] sm:$0xff]  ;;  %v7902_v1 = vcombine.low %v3780_v11, %v3784_v12  ;;  %v7783_v23 = vcombine.high %v3660_v8, %v3664_v13  ;;  %v3325_v11 = vld [vmem:[%s9205_s7 + $0x110] sm:$0xff] }
 0x36d   : > { %v3792_v21 = vld [vmem:[%s9205_s7 + $0xfa8] sm:$0xff]  ;;  %v3329_v12 = vld [vmem:[%s9205_s7 + $0x130] sm:$0xff] }
 0x36e   : > { %6624 = vmatpush1.bf16.msra.mxu0 %v7726_v29  ;;  %v7911_v26 = vcombine.high %v3788_v19, %v3792_v21  ;;  %v3796_v29 = vld [vmem:[%s9205_s7 + $0xfc8] sm:$0xff] }
 0x36f   : > { %6665 = vmatpush1.bf16.msra.mxu1 %v7854_v30  ;;  %6625 = vmatprep.subr.bf16.mxu0 %v7735_v31  ;;  %v3800_v30 = vld [vmem:[%s9205_s7 + $0xfe8] sm:$0xff]  ;;  %v7782_v31 = vcombine.low %v3660_v8, %v3664_v13  ;;  %v7449_v8 = vcombine.high %v3325_v11, %v3329_v12 }
 0x370   : > { %6666 = vmatprep.subr.bf16.mxu1 %v7863_v32  ;;  %v7910_v32 = vcombine.low %v3788_v19, %v3792_v21  ;;  %v7919_v35 = vcombine.high %v3796_v29, %v3800_v30  ;;  %v3333_v19 = vld [vmem:[%s9205_s7 + $0x150] sm:$0xff] }
 0x371   : > { %v3337_v21 = vld [vmem:[%s9205_s7 + $0x170] sm:$0xff] }
 0x372   : > { %6626 = vmatpush1.bf16.msra.mxu0 %v7734_v38  ;;  %v3421_v38 = vld [vmem:[%s9205_s7 + $0x410] sm:$0xff] }
 0x373   : > { %6667 = vmatpush1.bf16.msra.mxu1 %v7862_v39  ;;  %6627 = vmatprep.subr.bf16.mxu0 %v7743_v40  ;;  %v3425_v39 = vld [vmem:[%s9205_s7 + $0x430] sm:$0xff]  ;;  %v7790_v40 = vcombine.low %v3668_v27, %v3672_v28  ;;  %v7457_v27 = vcombine.high %v3333_v19, %v3337_v21 }
 0x374   : > { %6668 = vmatprep.subr.bf16.mxu1 %v7871_v41  ;;  %v7918_v41 = vcombine.low %v3796_v29, %v3800_v30  ;;  %v7545_v43 = vcombine.high %v3421_v38, %v3425_v39  ;;  %v3341_v29 = vld [vmem:[%s9205_s7 + $0x190] sm:$0xff] }
 0x375   : > { %v3345_v30 = vld [vmem:[%s9205_s7 + $0x1b0] sm:$0xff] }
 0x376   : > { %6628 = vmatpush1.bf16.msra.mxu0 %v7742_v33  ;;  %v7416_v33 = vcombine.low %v3293_v36, %v3297_v37  ;;  %v7465_v36 = vcombine.high %v3341_v29, %v3345_v30 }
 0x377   : > { %6669 = vmatpush1.bf16.msra.mxu1 %v7870_v46  ;;  %6629 = vmatprep.subr.bf16.mxu0 %v7751_v47  ;;  %v3429_v46 = vld [vmem:[%s9205_s7 + $0x450] sm:$0xff] }
 0x378   : > { %6670 = vmatprep.subr.bf16.mxu1 %v7879_v48  ;;  %v3433_v47 = vld [vmem:[%s9205_s7 + $0x470] sm:$0xff]  ;;  %v7544_v48 = vcombine.low %v3421_v38, %v3425_v39 }
 0x379   : > { %v7553_v50 = vcombine.high %v3429_v46, %v3433_v47  ;;  %v3349_v38 = vld [vmem:[%s9205_s7 + $0x1d0] sm:$0xff] }
 0x37a   : > { %6630 = vmatpush1.bf16.msra.mxu0 %v7750_v25  ;;  %v3437_v25 = vld [vmem:[%s9205_s7 + $0x490] sm:$0xff] }
 0x37b   : > { %6671 = vmatpush1.bf16.msra.mxu1 %v7878_v51  ;;  %6631 = vmatprep.subr.bf16.mxu0 %v7759_v2  ;;  %v3441_v51 = vld [vmem:[%s9205_s7 + $0x4b0] sm:$0xff]  ;;  %v7424_v2 = vcombine.low %v3301_v44, %v3305_v45 }
 0x37c   : > { %6672 = vmatprep.subr.bf16.mxu1 %v7887_v52  ;;  %v7552_v52 = vcombine.low %v3429_v46, %v3433_v47  ;;  %v7561_v55 = vcombine.high %v3437_v25, %v3441_v51  ;;  %v3353_v39 = vld [vmem:[%s9205_s7 + $0x1f0] sm:$0xff] }
 0x37d   : > { %v7473_v44 = vcombine.high %v3349_v38, %v3353_v39  ;;  %v3361_v46 = vld [vmem:[%s9205_s7 + $0x230] sm:$0xff] }
 0x37e   : > { %6632 = vmatpush1.bf16.msra.mxu0 %v7758_v60  ;;  %v3445_v60 = vld [vmem:[%s9205_s7 + $0x4d0] sm:$0xff] }
 0x37f   : > { %6673 = vmatpush1.bf16.msra.mxu1 %v7886_v62  ;;  %6633 = vmatprep.subr.bf16.mxu0 %v7767_v63  ;;  %v3449_v62 = vld [vmem:[%s9205_s7 + $0x4f0] sm:$0xff]  ;;  %v7432_v63 = vcombine.low %v3309_v34, %v3313_v49 }
 0x380   : > { %6674 = vmatprep.subr.bf16.mxu1 %v7895_v4  ;;  %v7560_v4 = vcombine.low %v3437_v25, %v3441_v51  ;;  %v7569_v10 = vcombine.high %v3445_v60, %v3449_v62  ;;  %v3485_v47 = vld [vmem:[%s9205_s7 + $0x610] sm:$0xff] }
 0x381   : > { %v3365_v25 = vld [vmem:[%s9205_s7 + $0x250] sm:$0xff] }
 0x382   : > { %6634 = vmatpush1.bf16.msra.mxu0 %v7766_v14  ;;  %v3453_v14 = vld [vmem:[%s9205_s7 + $0x510] sm:$0xff] }
 0x383   : > { %6675 = vmatpush1.bf16.msra.mxu1 %v7894_v20  ;;  %6635 = vmatprep.subr.bf16.mxu0 %v7775_v6  ;;  %v3457_v20 = vld [vmem:[%s9205_s7 + $0x530] sm:$0xff]  ;;  %v7440_v6 = vcombine.low %v3317_v24, %v3321_v56 }
 0x384   : > { %6676 = vmatprep.subr.bf16.mxu1 %v7903_v7  ;;  %v7568_v7 = vcombine.low %v3445_v60, %v3449_v62  ;;  %v7577_v13 = vcombine.high %v3453_v14, %v3457_v20  ;;  %v3369_v51 = vld [vmem:[%s9205_s7 + $0x270] sm:$0xff] }
 0x385   : > { %v7489_v24 = vcombine.high %v3365_v25, %v3369_v51  ;;  %v3373_v60 = vld [vmem:[%s9205_s7 + $0x290] sm:$0xff] }
 0x386   : > { %6636 = vmatpush1.bf16.msra.mxu0 %v7774_v22  ;;  %v3461_v22 = vld [vmem:[%s9205_s7 + $0x550] sm:$0xff] }
 0x387   : > { %6677 = vmatpush1.bf16.msra.mxu1 %v7902_v1  ;;  %6637 = vmatprep.subr.bf16.mxu0 %v7783_v23  ;;  %v3465_v1 = vld [vmem:[%s9205_s7 + $0x570] sm:$0xff]  ;;  %v7448_v23 = vcombine.low %v3325_v11, %v3329_v12 }
 0x388   : > { %6678 = vmatprep.subr.bf16.mxu1 %v7911_v26  ;;  %v7576_v26 = vcombine.low %v3453_v14, %v3457_v20  ;;  %v7585_v28 = vcombine.high %v3461_v22, %v3465_v1  ;;  %v3377_v62 = vld [vmem:[%s9205_s7 + $0x2b0] sm:$0xff] }
 0x389   : > { %v7497_v11 = vcombine.high %v3373_v60, %v3377_v62  ;;  %v3381_v14 = vld [vmem:[%s9205_s7 + $0x2d0] sm:$0xff] }
 0x38a   : > { %6638 = vmatpush1.bf16.msra.mxu0 %v7782_v31  ;;  %v3469_v31 = vld [vmem:[%s9205_s7 + $0x590] sm:$0xff] }
 0x38b   : > { %6679 = vmatpush1.bf16.msra.mxu1 %v7910_v32  ;;  %6639 = vmatprep.subr.bf16.mxu0 %v7791_v18  ;;  %v3473_v32 = vld [vmem:[%s9205_s7 + $0x5b0] sm:$0xff]  ;;  %v7456_v18 = vcombine.low %v3333_v19, %v3337_v21 }
 0x38c   : > { %6680 = vmatprep.subr.bf16.mxu1 %v7919_v35  ;;  %v7584_v35 = vcombine.low %v3461_v22, %v3465_v1  ;;  %v7593_v37 = vcombine.high %v3469_v31, %v3473_v32  ;;  %v3385_v20 = vld [vmem:[%s9205_s7 + $0x2f0] sm:$0xff] }
 0x38d   : > { %v7505_v19 = vcombine.high %v3381_v14, %v3385_v20  ;;  %v3389_v22 = vld [vmem:[%s9205_s7 + $0x310] sm:$0xff] }
 0x38e   : > { %6640 = vmatpush1.bf16.msra.mxu0 %v7790_v40  ;;  %v3477_v40 = vld [vmem:[%s9205_s7 + $0x5d0] sm:$0xff] }
 0x38f   : > { %6681 = vmatpush1.bf16.msra.mxu1 %v7918_v41  ;;  %6691 = vmatprep.subr.bf16.mxu0 %v7417_v42  ;;  %v3481_v41 = vld [vmem:[%s9205_s7 + $0x5f0] sm:$0xff]  ;;  %v7464_v42 = vcombine.low %v3341_v29, %v3345_v30 }
 0x390   : > { %6732 = vmatprep.subr.bf16.mxu1 %v7545_v43  ;;  %v7592_v43 = vcombine.low %v3469_v31, %v3473_v32  ;;  %v7601_v45 = vcombine.high %v3477_v40, %v3481_v41  ;;  %v7600_v34 = vcombine.low %v3477_v40, %v3481_v41  ;;  %v3393_v1 = vld [vmem:[%s9205_s7 + $0x330] sm:$0xff] }
 0x391   : > { %6642 = vmatmul.mubr.bf16.vlgmr.msra.gmra.mrb[20].mxu0 %v9729_v57  ;;  %v7513_v29 = vcombine.high %v3389_v22, %v3393_v1  ;;  %v3397_v31 = vld [vmem:[%s9205_s7 + $0x350] sm:$0xff] }
 0x392   : > { %6683 = vmatmul.mubr.bf16.vlgmr.msra.gmra.mrb[20].mxu1 %v9733_v59  ;;  %6692 = vmatpush1.bf16.msra.mxu0 %v7416_v33  ;;  %v3357_v33 = vld [vmem:[%s9205_s7 + $0x210] sm:$0xff] }
 0x393   : > { %6723 = vmatprep.mubr.bf16.mxu0 %v9623_v61  ;;  %6733 = vmatpush1.bf16.msra.mxu1 %v7544_v48  ;;  %v3489_v48 = vld [vmem:[%s9205_s7 + $0x630] sm:$0xff]  ;;  %v7481_v49 = vcombine.high %v3357_v33, %v3361_v46 }
 0x394   : > { %6764 = vmatprep.mubr.bf16.mxu1 %v9629_v3  ;;  %6693 = vmatprep.subr.bf16.mxu0 %v7425_v15  ;;  %v7472_v15 = vcombine.low %v3349_v38, %v3353_v39  ;;  %v3401_v32 = vld [vmem:[%s9205_s7 + $0x370] sm:$0xff] }
 0x395   : > { %6734 = vmatprep.subr.bf16.mxu1 %v7553_v50  ;;  %v7609_v50 = vcombine.high %v3485_v47, %v3489_v48  ;;  %v7521_v38 = vcombine.high %v3397_v31, %v3401_v32  ;;  %v3405_v40 = vld [vmem:[%s9205_s7 + $0x390] sm:$0xff] }
 0x396   : > { %6694 = vmatpush1.bf16.msra.mxu0 %v7424_v2  ;;  %v3493_v2 = vld [vmem:[%s9205_s7 + $0x650] sm:$0xff] }
 0x397   : > { %6735 = vmatpush1.bf16.msra.mxu1 %v7552_v52  ;;  %6695 = vmatprep.subr.bf16.mxu0 %v7433_v53  ;;  %v3497_v52 = vld [vmem:[%s9205_s7 + $0x670] sm:$0xff]  ;;  %v7480_v53 = vcombine.low %v3357_v33, %v3361_v46 }
 0x398   : > { %6736 = vmatprep.subr.bf16.mxu1 %v7561_v55  ;;  %v7608_v55 = vcombine.low %v3485_v47, %v3489_v48  ;;  %v7617_v56 = vcombine.high %v3493_v2, %v3497_v52  ;;  %v3409_v41 = vld [vmem:[%s9205_s7 + $0x3b0] sm:$0xff] }
 0x399   : > { %v7529_v33 = vcombine.high %v3405_v40, %v3409_v41  ;;  %v3413_v47 = vld [vmem:[%s9205_s7 + $0x3d0] sm:$0xff] }
 0x39a   : > { %6696 = vmatpush1.bf16.msra.mxu0 %v7432_v63  ;;  %v3501_v63 = vld [vmem:[%s9205_s7 + $0x690] sm:$0xff] }
 0x39b   : > { %6737 = vmatpush1.bf16.msra.mxu1 %v7560_v4  ;;  %6697 = vmatprep.subr.bf16.mxu0 %v7441_v5  ;;  %v3505_v4 = vld [vmem:[%s9205_s7 + $0x6b0] sm:$0xff]  ;;  %v7488_v5 = vcombine.low %v3365_v25, %v3369_v51 }
 0x39c   : > { %6738 = vmatprep.subr.bf16.mxu1 %v7569_v10  ;;  %v7616_v10 = vcombine.low %v3493_v2, %v3497_v52  ;;  %v7625_v12 = vcombine.high %v3501_v63, %v3505_v4  ;;  %v3417_v48 = vld [vmem:[%s9205_s7 + $0x3f0] sm:$0xff] }
 0x39d   : > { %v7537_v25 = vcombine.high %v3413_v47, %v3417_v48  ;;  %v3549_v2 = vld [vmem:[%s9205_s7 + $0x810] sm:$0xff] }
 0x39e   : > { %6698 = vmatpush1.bf16.msra.mxu0 %v7440_v6  ;;  %v3509_v6 = vld [vmem:[%s9205_s7 + $0x6d0] sm:$0xff] }
 0x39f   : > { %6739 = vmatpush1.bf16.msra.mxu1 %v7568_v7  ;;  %6699 = vmatprep.subr.bf16.mxu0 %v7449_v8  ;;  %v3513_v7 = vld [vmem:[%s9205_s7 + $0x6f0] sm:$0xff]  ;;  %v7496_v8 = vcombine.low %v3373_v60, %v3377_v62 }
 0x3a0   : > { %6740 = vmatprep.subr.bf16.mxu1 %v7577_v13  ;;  %v7624_v13 = vcombine.low %v3501_v63, %v3505_v4  ;;  %v7633_v21 = vcombine.high %v3509_v6, %v3513_v7  ;;  %v3553_v52 = vld [vmem:[%s9205_s7 + $0x830] sm:$0xff] }
 0x3a1   : > { %v7673_v60 = vcombine.high %v3549_v2, %v3553_v52  ;;  %v3557_v63 = vld [vmem:[%s9205_s7 + $0x850] sm:$0xff] }
 0x3a2   : > { %6700 = vmatpush1.bf16.msra.mxu0 %v7448_v23  ;;  %v3517_v23 = vld [vmem:[%s9205_s7 + $0x710] sm:$0xff] }
 0x3a3   : > { %6741 = vmatpush1.bf16.msra.mxu1 %v7576_v26  ;;  %6701 = vmatprep.subr.bf16.mxu0 %v7457_v27  ;;  %v3521_v26 = vld [vmem:[%s9205_s7 + $0x730] sm:$0xff]  ;;  %v7504_v27 = vcombine.low %v3381_v14, %v3385_v20 }
 0x3a4   : > { %6742 = vmatprep.subr.bf16.mxu1 %v7585_v28  ;;  %v7632_v28 = vcombine.low %v3509_v6, %v3513_v7  ;;  %v7641_v30 = vcombine.high %v3517_v23, %v3521_v26  ;;  %v3561_v4 = vld [vmem:[%s9205_s7 + $0x870] sm:$0xff] }
 0x3a5   : > { %v7681_v14 = vcombine.high %v3557_v63, %v3561_v4  ;;  %v3565_v20 = vld [vmem:[%s9205_s7 + $0x890] sm:$0xff] }
 0x3a6   : > { %6702 = vmatpush1.bf16.msra.mxu0 %v7456_v18  ;;  %v3525_v18 = vld [vmem:[%s9205_s7 + $0x750] sm:$0xff] }
 0x3a7   : > { %6743 = vmatpush1.bf16.msra.mxu1 %v7584_v35  ;;  %6703 = vmatprep.subr.bf16.mxu0 %v7465_v36  ;;  %v3529_v35 = vld [vmem:[%s9205_s7 + $0x770] sm:$0xff]  ;;  %v7512_v36 = vcombine.low %v3389_v22, %v3393_v1 }
 0x3a8   : > { %6744 = vmatprep.subr.bf16.mxu1 %v7593_v37  ;;  %v7640_v37 = vcombine.low %v3517_v23, %v3521_v26  ;;  %v7649_v39 = vcombine.high %v3525_v18, %v3529_v35  ;;  %v3569_v6 = vld [vmem:[%s9205_s7 + $0x8b0] sm:$0xff] }
 0x3a9   : > { %v7689_v22 = vcombine.high %v3565_v20, %v3569_v6  ;;  %v3573_v23 = vld [vmem:[%s9205_s7 + $0x8d0] sm:$0xff] }
 0x3aa   : > { %6704 = vmatpush1.bf16.msra.mxu0 %v7464_v42  ;;  %v3533_v42 = vld [vmem:[%s9205_s7 + $0x790] sm:$0xff] }
 0x3ab   : > { %6745 = vmatpush1.bf16.msra.mxu1 %v7592_v43  ;;  %6705 = vmatprep.subr.bf16.mxu0 %v7473_v44  ;;  %v3537_v43 = vld [vmem:[%s9205_s7 + $0x7b0] sm:$0xff]  ;;  %v7520_v44 = vcombine.low %v3397_v31, %v3401_v32 }
 0x3ac   : > { %6746 = vmatprep.subr.bf16.mxu1 %v7601_v45  ;;  %v7648_v45 = vcombine.low %v3525_v18, %v3529_v35  ;;  %v7657_v46 = vcombine.high %v3533_v42, %v3537_v43  ;;  %v3577_v26 = vld [vmem:[%s9205_s7 + $0x8f0] sm:$0xff] }
 0x3ad   : > { %v7697_v31 = vcombine.high %v3573_v23, %v3577_v26  ;;  %v3581_v18 = vld [vmem:[%s9205_s7 + $0x910] sm:$0xff] }
 0x3ae   : > { %6706 = vmatpush1.bf16.msra.mxu0 %v7472_v15  ;;  %v3541_v15 = vld [vmem:[%s9205_s7 + $0x7d0] sm:$0xff] }
 0x3af   : > { %6747 = vmatpush1.bf16.msra.mxu1 %v7600_v34  ;;  %6707 = vmatprep.subr.bf16.mxu0 %v7481_v49  ;;  %v3545_v34 = vld [vmem:[%s9205_s7 + $0x7f0] sm:$0xff]  ;;  %v7528_v49 = vcombine.low %v3405_v40, %v3409_v41 }
 0x3b0   : > { %6748 = vmatprep.subr.bf16.mxu1 %v7609_v50  ;;  %v7656_v50 = vcombine.low %v3533_v42, %v3537_v43  ;;  %v7665_v51 = vcombine.high %v3541_v15, %v3545_v34  ;;  %v3585_v35 = vld [vmem:[%s9205_s7 + $0x930] sm:$0xff] }
 0x3b1   : > { %v7705_v40 = vcombine.high %v3581_v18, %v3585_v35  ;;  %v3589_v42 = vld [vmem:[%s9205_s7 + $0x950] sm:$0xff] }
 0x3b2   : > { %6708 = vmatpush1.bf16.msra.mxu0 %v7480_v53  ;;  %v3677_v53 = vld [vmem:[%s9205_s7 + $0xc10] sm:$0xff] }
 0x3b3   : > { %6749 = vmatpush1.bf16.msra.mxu1 %v7608_v55  ;;  %6709 = vmatprep.subr.bf16.mxu0 %v7489_v24  ;;  %v3681_v55 = vld [vmem:[%s9205_s7 + $0xc30] sm:$0xff]  ;;  %v7536_v24 = vcombine.low %v3413_v47, %v3417_v48 }
 0x3b4   : > { %6750 = vmatprep.subr.bf16.mxu1 %v7617_v56  ;;  %v7664_v56 = vcombine.low %v3541_v15, %v3545_v34  ;;  %v7801_v62 = vcombine.high %v3677_v53, %v3681_v55  ;;  %v3593_v43 = vld [vmem:[%s9205_s7 + $0x970] sm:$0xff] }
 0x3b5   : > { %v7713_v47 = vcombine.high %v3589_v42, %v3593_v43  ;;  %v3597_v15 = vld [vmem:[%s9205_s7 + $0x990] sm:$0xff] }
 0x3b6   : > { %6710 = vmatpush1.bf16.msra.mxu0 %v7488_v5  ;;  %v7672_v5 = vcombine.low %v3549_v2, %v3553_v52  ;;  %v3601_v34 = vld [vmem:[%s9205_s7 + $0x9b0] sm:$0xff] }
 0x3b7   : > { %6751 = vmatpush1.bf16.msra.mxu1 %v7616_v10  ;;  %6711 = vmatprep.subr.bf16.mxu0 %v7497_v11  ;;  %v3685_v10 = vld [vmem:[%s9205_s7 + $0xc50] sm:$0xff]  ;;  %v7721_v2 = vcombine.high %v3597_v15, %v3601_v34 }
 0x3b8   : > { %6752 = vmatprep.subr.bf16.mxu1 %v7625_v12  ;;  %v3689_v11 = vld [vmem:[%s9205_s7 + $0xc70] sm:$0xff]  ;;  %v7800_v12 = vcombine.low %v3677_v53, %v3681_v55 }
 0x3b9   : > { %v7809_v7 = vcombine.high %v3685_v10, %v3689_v11  ;;  %v3605_v55 = vld [vmem:[%s9205_s7 + $0x9d0] sm:$0xff] }
 0x3ba   : > { %6712 = vmatpush1.bf16.msra.mxu0 %v7496_v8  ;;  %v3693_v8 = vld [vmem:[%s9205_s7 + $0xc90] sm:$0xff] }
 0x3bb   : > { %6753 = vmatpush1.bf16.msra.mxu1 %v7624_v13  ;;  %6713 = vmatprep.subr.bf16.mxu0 %v7505_v19  ;;  %v3697_v13 = vld [vmem:[%s9205_s7 + $0xcb0] sm:$0xff]  ;;  %v7680_v19 = vcombine.low %v3557_v63, %v3561_v4 }
 0x3bc   : > { %6754 = vmatprep.subr.bf16.mxu1 %v7633_v21  ;;  %v7808_v21 = vcombine.low %v3685_v10, %v3689_v11  ;;  %v7817_v1 = vcombine.high %v3693_v8, %v3697_v13  ;;  %v3733_v63 = vld [vmem:[%s9205_s7 + $0xdd0] sm:$0xff] }
 0x3bd   : > { %v3737_v4 = vld [vmem:[%s9205_s7 + $0xdf0] sm:$0xff] }
 0x3be   : > { %6714 = vmatpush1.bf16.msra.mxu0 %v7504_v27  ;;  %v3701_v27 = vld [vmem:[%s9205_s7 + $0xcd0] sm:$0xff] }
 0x3bf   : > { %6755 = vmatpush1.bf16.msra.mxu1 %v7632_v28  ;;  %6715 = vmatprep.subr.bf16.mxu0 %v7513_v29  ;;  %v3705_v28 = vld [vmem:[%s9205_s7 + $0xcf0] sm:$0xff]  ;;  %v7688_v29 = vcombine.low %v3565_v20, %v3569_v6  ;;  %v3276_v6 = vld [vmem:[%s9200_s30 + $0x8] sm:$0xff] }
 0x3c0   : > { %6756 = vmatprep.subr.bf16.mxu1 %v7641_v30  ;;  %v7816_v30 = vcombine.low %v3693_v8, %v3697_v13  ;;  %v7825_v32 = vcombine.high %v3701_v27, %v3705_v28 }
 0x3c2   : > { %6716 = vmatpush1.bf16.msra.mxu0 %v7512_v36  ;;  %v3709_v36 = vld [vmem:[%s9205_s7 + $0xd10] sm:$0xff] }
 0x3c3   : > { %6757 = vmatpush1.bf16.msra.mxu1 %v7640_v37  ;;  %6717 = vmatprep.subr.bf16.mxu0 %v7521_v38  ;;  %v3713_v37 = vld [vmem:[%s9205_s7 + $0xd30] sm:$0xff]  ;;  %v7696_v38 = vcombine.low %v3573_v23, %v3577_v26 }
 0x3c4   : > { %6758 = vmatprep.subr.bf16.mxu1 %v7649_v39  ;;  %v7824_v39 = vcombine.low %v3701_v27, %v3705_v28  ;;  %v7833_v41 = vcombine.high %v3709_v36, %v3713_v37  ;;  %v3741_v26 = vld [vmem:[%s9205_s7 + $0xe10] sm:$0xff] }
 0x3c5   : > { %v3745_v27 = vld [vmem:[%s9205_s7 + $0xe30] sm:$0xff] }
 0x3c6   : > { %6718 = vmatpush1.bf16.msra.mxu0 %v7520_v44  ;;  %v3717_v44 = vld [vmem:[%s9205_s7 + $0xd50] sm:$0xff] }
 0x3c7   : > { %6759 = vmatpush1.bf16.msra.mxu1 %v7648_v45  ;;  %6719 = vmatprep.subr.bf16.mxu0 %v7529_v33  ;;  %v3721_v45 = vld [vmem:[%s9205_s7 + $0xd70] sm:$0xff]  ;;  %v7704_v33 = vcombine.low %v3581_v18, %v3585_v35 }
 0x3c8   : > { %6760 = vmatprep.subr.bf16.mxu1 %v7657_v46  ;;  %v7832_v46 = vcombine.low %v3709_v36, %v3713_v37  ;;  %v7841_v48 = vcombine.high %v3717_v44, %v3721_v45  ;;  %v3621_v18 = vld [vmem:[%s9205_s7 + $0xa50] sm:$0xff] }
 0x3c9   : > { %v3625_v35 = vld [vmem:[%s9205_s7 + $0xa70] sm:$0xff] }
 0x3ca   : > { %6720 = vmatpush1.bf16.msra.mxu0 %v7528_v49  ;;  %v3725_v49 = vld [vmem:[%s9205_s7 + $0xd90] sm:$0xff] }
 0x3cb   : > { %6761 = vmatpush1.bf16.msra.mxu1 %v7656_v50  ;;  %6721 = vmatprep.subr.bf16.mxu0 %v7537_v25  ;;  %v3729_v50 = vld [vmem:[%s9205_s7 + $0xdb0] sm:$0xff]  ;;  %v7712_v25 = vcombine.low %v3589_v42, %v3593_v43 }
 0x3cc   : > { %6762 = vmatprep.subr.bf16.mxu1 %v7665_v51  ;;  %v7840_v51 = vcombine.low %v3717_v44, %v3721_v45  ;;  %v7849_v53 = vcombine.high %v3725_v49, %v3729_v50  ;;  %v7848_v8 = vcombine.low %v3725_v49, %v3729_v50  ;;  %v3749_v36 = vld [vmem:[%s9205_s7 + $0xe50] sm:$0xff] }
 0x3cd   : > { %v3753_v37 = vld [vmem:[%s9205_s7 + $0xe70] sm:$0xff] }
 0x3ce   : > { %6722 = vmatpush1.bf16.msra.mxu0 %v7536_v24  ;;  %v3609_v24 = vld [vmem:[%s9205_s7 + $0x9f0] sm:$0xff] }
 0x3cf   : > { %6763 = vmatpush1.bf16.msra.mxu1 %v7664_v56  ;;  %6773 = vmatprep.subr.bf16.mxu0 %v7673_v60  ;;  %v7729_v13 = vcombine.high %v3605_v55, %v3609_v24  ;;  %v3629_v42 = vld [vmem:[%s9205_s7 + $0xa90] sm:$0xff] }
 0x3d0   : > { %6814 = vmatprep.subr.bf16.mxu1 %v7801_v62  ;;  %v3633_v43 = vld [vmem:[%s9205_s7 + $0xab0] sm:$0xff] }
 0x3d1   : > { %6724 = vmatmul.mubr.bf16.vlgmr.msra.gmra.mrb[24].mxu0 %v9627_v0  ;;  %v3757_v44 = vld [vmem:[%s9205_s7 + $0xe90] sm:$0xff] }
 0x3d2   : > { %6765 = vmatmul.mubr.bf16.vlgmr.msra.gmra.mrb[24].mxu1 %v9642_v9  ;;  %6774 = vmatpush1.bf16.msra.mxu0 %v7672_v5  ;;  %v3275_v5 = vld [vmem:[%s9200_s30] sm:$0xff]  ;;  %v3761_v45 = vld [vmem:[%s9205_s7 + $0xeb0] sm:$0xff] }
 0x3d3   : > { %6805 = vmatprep.mubr.bf16.mxu0 %v9725_v54  ;;  %6815 = vmatpush1.bf16.msra.mxu1 %v7800_v12  ;;  %v3765_v49 = vld [vmem:[%s9205_s7 + $0xed0] sm:$0xff] }
 0x3d4   : > { %6846 = vmatprep.mubr.bf16.mxu1 %v9731_v58  ;;  %6775 = vmatprep.subr.bf16.mxu0 %v7681_v14  ;;  %v7720_v14 = vcombine.low %v3597_v15, %v3601_v34  ;;  %v3637_v15 = vld [vmem:[%s9205_s7 + $0xad0] sm:$0xff] }
 0x3d5   : > { %6816 = vmatprep.subr.bf16.mxu1 %v7809_v7  ;;  %v3641_v34 = vld [vmem:[%s9205_s7 + $0xaf0] sm:$0xff] }
 0x3d6   : > { %6776 = vmatpush1.bf16.msra.mxu0 %v7680_v19  ;;  %v3769_v50 = vld [vmem:[%s9205_s7 + $0xef0] sm:$0xff] }
 0x3d7   : > { %6817 = vmatpush1.bf16.msra.mxu1 %v7808_v21  ;;  %6777 = vmatprep.subr.bf16.mxu0 %v7689_v22  ;;  %v3613_v22 = vld [vmem:[%s9205_s7 + $0xa10] sm:$0xff] }
 0x3d8   : > { %6818 = vmatprep.subr.bf16.mxu1 %v7817_v1  ;;  %v3617_v1 = vld [vmem:[%s9205_s7 + $0xa30] sm:$0xff] }
 0x3da   : > { %6778 = vmatpush1.bf16.msra.mxu0 %v7688_v29  ;;  %v7728_v29 = vcombine.low %v3605_v55, %v3609_v24  ;;  %v3649_v55 = vld [vmem:[%s9205_s7 + $0xb30] sm:$0xff] }
 0x3db   : > { %6819 = vmatpush1.bf16.msra.mxu1 %v7816_v30  ;;  %6779 = vmatprep.subr.bf16.mxu0 %v7697_v31  ;;  %v7856_v30 = vcombine.low %v3733_v63, %v3737_v4  ;;  %v7737_v31 = vcombine.high %v3613_v22, %v3617_v1  ;;  %v3773_v24 = vld [vmem:[%s9205_s7 + $0xf10] sm:$0xff] }
 0x3dc   : > { %6820 = vmatprep.subr.bf16.mxu1 %v7825_v32  ;;  %v7865_v32 = vcombine.high %v3741_v26, %v3745_v27 }
 0x3de   : > { %6780 = vmatpush1.bf16.msra.mxu0 %v7696_v38  ;;  %v7736_v38 = vcombine.low %v3613_v22, %v3617_v1 }
 0x3df   : > { %6821 = vmatpush1.bf16.msra.mxu1 %v7824_v39  ;;  %6781 = vmatprep.subr.bf16.mxu0 %v7705_v40  ;;  %v7864_v39 = vcombine.low %v3741_v26, %v3745_v27  ;;  %v7745_v40 = vcombine.high %v3621_v18, %v3625_v35  ;;  %v3673_v26 = vld [vmem:[%s9205_s7 + $0xbf0] sm:$0xff] }
 0x3e0   : > { %6822 = vmatprep.subr.bf16.mxu1 %v7833_v41  ;;  %v7873_v41 = vcombine.high %v3749_v36, %v3753_v37  ;;  %v3797_v27 = vld [vmem:[%s9205_s7 + $0xfd0] sm:$0xff] }
 0x3e2   : > { %6782 = vmatpush1.bf16.msra.mxu0 %v7704_v33  ;;  %v7744_v33 = vcombine.low %v3621_v18, %v3625_v35  ;;  %v3294_v18 = vld [vmem:[%s9205_s7 + $0x18] sm:$0xff] }
 0x3e3   : > { %6823 = vmatpush1.bf16.msra.mxu1 %v7832_v46  ;;  %6783 = vmatprep.subr.bf16.mxu0 %v7713_v47  ;;  %v7872_v46 = vcombine.low %v3749_v36, %v3753_v37  ;;  %v7753_v47 = vcombine.high %v3629_v42, %v3633_v43  ;;  %v3298_v35 = vld [vmem:[%s9205_s7 + $0x38] sm:$0xff] }
 0x3e4   : > { %v6479_v52 = vpop.f32.mrb[12].mxu0  ;;  %6824 = vmatprep.subr.bf16.mxu1 %v7841_v48  ;;  %v7881_v48 = vcombine.high %v3757_v44, %v3761_v45  ;;  %v3422_v36 = vld [vmem:[%s9205_s7 + $0x418] sm:$0xff] }
 0x3e5   : > { %v6480_v56 = vadd.f32 %v6479_v52, %v9839_v16  ;;  %v6520_v60 = vpop.f32.mrb[12].mxu1  ;;  %v6481_v62 = vpop.f32.mrb[13].mxu0  ;;  %v7889_v52 = vcombine.high %v3765_v49, %v3769_v50  ;;  %v3426_v37 = vld [vmem:[%s9205_s7 + $0x438] sm:$0xff] }
 0x3e6   : > { %v6482_v10 = vadd.f32 %v6481_v62, %v9841_v17  ;;  %v6522_v11 = vpop.f32.mrb[13].mxu1  ;;  %6784 = vmatpush1.bf16.msra.mxu0 %v7712_v25  ;;  %v6483_v12 = vpop.f32.mrb[14].mxu0  ;;  %v7857_v17 = vcombine.high %v3733_v63, %v3737_v4  ;;  %v7752_v25 = vcombine.low %v3629_v42, %v3633_v43  ;;  %v7888_v62 = vcombine.low %v3765_v49, %v3769_v50  ;;  %v3302_v42 = vld [vmem:[%s9205_s7 + $0x58] sm:$0xff] }
 0x3e7   : > { %v6521_v20 = vadd.f32 %v6520_v60, %v6480_v56  ;;  %6825 = vmatpush1.bf16.msra.mxu1 %v7840_v51  ;;  %v6524_v7 = vpop.f32.mrb[14].mxu1  ;;  %v6484_v16 = vpop.f32.mrb[15].mxu0  ;;  %6785 = vmatprep.subr.bf16.mxu0 %v7721_v2  ;;  %v7880_v51 = vcombine.low %v3757_v44, %v3761_v45  ;;  %v7761_v2 = vcombine.high %v3637_v15, %v3641_v34  ;;  %v3777_v56 = vld [vmem:[%s9205_s7 + $0xf30] sm:$0xff]  ;;  %v3306_v43 = vld [vmem:[%s9205_s7 + $0x78] sm:$0xff] }
 0x3e8   : > { %v6523_v19 = vadd.f32 %v6522_v11, %v6482_v10  ;;  %v6525_v21 = vpop.f32.mrb[15].mxu1  ;;  %6826 = vmatprep.subr.bf16.mxu1 %v7849_v53  ;;  %v3645_v53 = vld [vmem:[%s9205_s7 + $0xb10] sm:$0xff]  ;;  %v7760_v60 = vcombine.low %v3637_v15, %v3641_v34  ;;  %v7897_v4 = vcombine.high %v3773_v24, %v3777_v56  ;;  %v7418_v44 = vcombine.low %v3294_v18, %v3298_v35  ;;  %v3430_v45 = vld [vmem:[%s9205_s7 + $0x458] sm:$0xff] }
 0x3e9   : > { %v7019_v23 = vadd.f32 %v6521_v20, %v3275_v5  ;;  %v7769_v63 = vcombine.high %v3645_v53, %v3649_v55  ;;  %v3653_v5 = vld [vmem:[%s9205_s7 + $0xb50] sm:$0xff]  ;;  %v7896_v20 = vcombine.low %v3773_v24, %v3777_v56  ;;  %v3314_v15 = vld [vmem:[%s9205_s7 + $0xb8] sm:$0xff] }
 0x3ea   : > { %v7020_v28 = vadd.f32 %v6523_v19, %v3276_v6  ;;  %6786 = vmatpush1.bf16.msra.mxu0 %v7720_v14  ;;  %v3657_v10 = vld [vmem:[%s9205_s7 + $0xb70] sm:$0xff]  ;;  %v7768_v14 = vcombine.low %v3645_v53, %v3649_v55  ;;  %v3438_v49 = vld [vmem:[%s9205_s7 + $0x498] sm:$0xff] }
 0x3eb   : > { %7027 = vst [vmem:[%s9200_s30] sm:$0xff] %v7019_v23  ;;  %6827 = vmatpush1.bf16.msra.mxu1 %v7848_v8  ;;  %6787 = vmatprep.subr.bf16.mxu0 %v7729_v13  ;;  %v3781_v11 = vld [vmem:[%s9205_s7 + $0xf50] sm:$0xff]  ;;  %v7777_v6 = vcombine.high %v3653_v5, %v3657_v10  ;;  %v7776_v21 = vcombine.low %v3653_v5, %v3657_v10  ;;  %v3442_v50 = vld [vmem:[%s9205_s7 + $0x4b8] sm:$0xff] }
 0x3ec   : > { %7028 = vst [vmem:[%s9200_s30 + $0x8] sm:$0xff] %v7020_v28  ;;  %6828 = vmatprep.subr.bf16.mxu1 %v7857_v17  ;;  %v3785_v12 = vld [vmem:[%s9205_s7 + $0xf70] sm:$0xff]  ;;  %v3318_v53 = vld [vmem:[%s9205_s7 + $0xd8] sm:$0xff] }
 0x3ed   : > { %v7905_v7 = vcombine.high %v3781_v11, %v3785_v12  ;;  %v3661_v16 = vld [vmem:[%s9205_s7 + $0xb90] sm:$0xff]  ;;  %v7904_v17 = vcombine.low %v3781_v11, %v3785_v12  ;;  %v3322_v55 = vld [vmem:[%s9205_s7 + $0xf8] sm:$0xff] }
 0x3ee   : > { %6788 = vmatpush1.bf16.msra.mxu0 %v7728_v29  ;;  %v3665_v8 = vld [vmem:[%s9205_s7 + $0xbb0] sm:$0xff]  ;;  %v3446_v24 = vld [vmem:[%s9205_s7 + $0x4d8] sm:$0xff]  ;;  %v7442_v11 = vcombine.low %v3318_v53, %v3322_v55 }
 0x3ef   : > { %6829 = vmatpush1.bf16.msra.mxu1 %v7856_v30  ;;  %6789 = vmatprep.subr.bf16.mxu0 %v7737_v31  ;;  %v3789_v13 = vld [vmem:[%s9205_s7 + $0xf90] sm:$0xff]  ;;  %v7785_v22 = vcombine.high %v3661_v16, %v3665_v8  ;;  %v7784_v29 = vcombine.low %v3661_v16, %v3665_v8  ;;  %v3450_v56 = vld [vmem:[%s9205_s7 + $0x4f8] sm:$0xff] }
 0x3f0   : > { %6830 = vmatprep.subr.bf16.mxu1 %v7865_v32  ;;  %v3793_v19 = vld [vmem:[%s9205_s7 + $0xfb0] sm:$0xff]  ;;  %v3454_v5 = vld [vmem:[%s9205_s7 + $0x518] sm:$0xff]  ;;  %v7570_v12 = vcombine.low %v3446_v24, %v3450_v56 }
 0x3f1   : > { %v7913_v1 = vcombine.high %v3789_v13, %v3793_v19  ;;  %v3669_v23 = vld [vmem:[%s9205_s7 + $0xbd0] sm:$0xff]  ;;  %v7912_v30 = vcombine.low %v3789_v13, %v3793_v19  ;;  %v3458_v10 = vld [vmem:[%s9205_s7 + $0x538] sm:$0xff] }
 0x3f2   : > { %6790 = vmatpush1.bf16.msra.mxu0 %v7736_v38  ;;  %v3801_v28 = vld [vmem:[%s9205_s7 + $0xff0] sm:$0xff]  ;;  %v7793_v31 = vcombine.high %v3669_v23, %v3673_v26  ;;  %v7792_v38 = vcombine.low %v3669_v23, %v3673_v26  ;;  %v3462_v16 = vld [vmem:[%s9205_s7 + $0x558] sm:$0xff]  ;;  %v7578_v19 = vcombine.low %v3454_v5, %v3458_v10 }
 0x3f3   : > { %6831 = vmatpush1.bf16.msra.mxu1 %v7864_v39  ;;  %6791 = vmatprep.subr.bf16.mxu0 %v7745_v40  ;;  %v7921_v32 = vcombine.high %v3797_v27, %v3801_v28  ;;  %v7920_v39 = vcombine.low %v3797_v27, %v3801_v28  ;;  %v7419_v40 = vcombine.high %v3294_v18, %v3298_v35  ;;  %v3466_v8 = vld [vmem:[%s9205_s7 + $0x578] sm:$0xff] }
 0x3f4   : > { %6832 = vmatprep.subr.bf16.mxu1 %v7873_v41  ;;  %v7547_v41 = vcombine.high %v3422_v36, %v3426_v37  ;;  %v3470_v23 = vld [vmem:[%s9205_s7 + $0x598] sm:$0xff]  ;;  %v7586_v28 = vcombine.low %v3462_v16, %v3466_v8 }
 0x3f5   : > { %v3474_v26 = vld [vmem:[%s9205_s7 + $0x5b8] sm:$0xff] }
 0x3f6   : > { %6792 = vmatpush1.bf16.msra.mxu0 %v7744_v33  ;;  %v3434_v33 = vld [vmem:[%s9205_s7 + $0x478] sm:$0xff] }
 0x3f7   : > { %6833 = vmatpush1.bf16.msra.mxu1 %v7872_v46  ;;  %6793 = vmatprep.subr.bf16.mxu0 %v7753_v47  ;;  %v7546_v46 = vcombine.low %v3422_v36, %v3426_v37  ;;  %v7427_v47 = vcombine.high %v3302_v42, %v3306_v43  ;;  %v7555_v34 = vcombine.high %v3430_v45, %v3434_v33  ;;  %v3354_v18 = vld [vmem:[%s9205_s7 + $0x1f8] sm:$0xff] }
 0x3f8   : > { %6834 = vmatprep.subr.bf16.mxu1 %v7881_v48  ;;  %v3310_v48 = vld [vmem:[%s9205_s7 + $0x98] sm:$0xff] }
 0x3f9   : > { %v3478_v37 = vld [vmem:[%s9205_s7 + $0x5d8] sm:$0xff] }
 0x3fa   : > { %6794 = vmatpush1.bf16.msra.mxu0 %v7752_v25  ;;  %v7426_v25 = vcombine.low %v3302_v42, %v3306_v43 }
 0x3fb   : > { %6835 = vmatpush1.bf16.msra.mxu1 %v7880_v51  ;;  %6795 = vmatprep.subr.bf16.mxu0 %v7761_v2  ;;  %v7554_v51 = vcombine.low %v3430_v45, %v3434_v33  ;;  %v7435_v2 = vcombine.high %v3310_v48, %v3314_v15  ;;  %v7594_v33 = vcombine.low %v3470_v23, %v3474_v26 }
 0x3fc   : > { %6836 = vmatprep.subr.bf16.mxu1 %v7889_v52  ;;  %v7563_v52 = vcombine.high %v3438_v49, %v3442_v50 }
 0x3fe   : > { %6796 = vmatpush1.bf16.msra.mxu0 %v7760_v60  ;;  %v7434_v60 = vcombine.low %v3310_v48, %v3314_v15  ;;  %v3358_v15 = vld [vmem:[%s9205_s7 + $0x218] sm:$0xff] }
 0x3ff   : > { %6837 = vmatpush1.bf16.msra.mxu1 %v7888_v62  ;;  %6797 = vmatprep.subr.bf16.mxu0 %v7769_v63  ;;  %v7443_v62 = vcombine.high %v3318_v53, %v3322_v55  ;;  %v3326_v63 = vld [vmem:[%s9205_s7 + $0x118] sm:$0xff] }
 0x400   : > { %6838 = vmatprep.subr.bf16.mxu1 %v7897_v4  ;;  %v3330_v4 = vld [vmem:[%s9205_s7 + $0x138] sm:$0xff] }
 0x401   : > { %v7450_v13 = vcombine.low %v3326_v63, %v3330_v4  ;;  %v3366_v53 = vld [vmem:[%s9205_s7 + $0x258] sm:$0xff] }
 0x402   : > { %6798 = vmatpush1.bf16.msra.mxu0 %v7768_v14  ;;  %v7451_v14 = vcombine.high %v3326_v63, %v3330_v4  ;;  %v3370_v55 = vld [vmem:[%s9205_s7 + $0x278] sm:$0xff] }
 0x403   : > { %6839 = vmatpush1.bf16.msra.mxu1 %v7896_v20  ;;  %6799 = vmatprep.subr.bf16.mxu0 %v7777_v6  ;;  %v7579_v20 = vcombine.high %v3454_v5, %v3458_v10  ;;  %v3334_v6 = vld [vmem:[%s9205_s7 + $0x158] sm:$0xff] }
 0x404   : > { %6840 = vmatprep.subr.bf16.mxu1 %v7905_v7  ;;  %v3338_v7 = vld [vmem:[%s9205_s7 + $0x178] sm:$0xff] }
 0x405   : > { %v7458_v27 = vcombine.low %v3334_v6, %v3338_v7  ;;  %v3374_v63 = vld [vmem:[%s9205_s7 + $0x298] sm:$0xff] }
 0x406   : > { %6800 = vmatpush1.bf16.msra.mxu0 %v7776_v21  ;;  %v7459_v21 = vcombine.high %v3334_v6, %v3338_v7  ;;  %v3378_v4 = vld [vmem:[%s9205_s7 + $0x2b8] sm:$0xff] }
 0x407   : > { %6841 = vmatpush1.bf16.msra.mxu1 %v7904_v17  ;;  %6801 = vmatprep.subr.bf16.mxu0 %v7785_v22  ;;  %v7587_v17 = vcombine.high %v3462_v16, %v3466_v8  ;;  %v3342_v22 = vld [vmem:[%s9205_s7 + $0x198] sm:$0xff] }
 0x408   : > { %6842 = vmatprep.subr.bf16.mxu1 %v7913_v1  ;;  %v3346_v1 = vld [vmem:[%s9205_s7 + $0x1b8] sm:$0xff] }
 0x409   : > { %v7466_v42 = vcombine.low %v3342_v22, %v3346_v1  ;;  %v3502_v5 = vld [vmem:[%s9205_s7 + $0x698] sm:$0xff] }
 0x40a   : > { %6802 = vmatpush1.bf16.msra.mxu0 %v7784_v29  ;;  %v7467_v29 = vcombine.high %v3342_v22, %v3346_v1  ;;  %v3506_v10 = vld [vmem:[%s9205_s7 + $0x6b8] sm:$0xff] }
 0x40b   : > { %6843 = vmatpush1.bf16.msra.mxu1 %v7912_v30  ;;  %6803 = vmatprep.subr.bf16.mxu0 %v7793_v31  ;;  %v7595_v31 = vcombine.high %v3470_v23, %v3474_v26  ;;  %v3382_v6 = vld [vmem:[%s9205_s7 + $0x2d8] sm:$0xff] }
 0x40c   : > { %6844 = vmatprep.subr.bf16.mxu1 %v7921_v32  ;;  %v3350_v32 = vld [vmem:[%s9205_s7 + $0x1d8] sm:$0xff] }
 0x40d   : > { %v3386_v7 = vld [vmem:[%s9205_s7 + $0x2f8] sm:$0xff] }
 0x40e   : > { %6804 = vmatpush1.bf16.msra.mxu0 %v7792_v38  ;;  %v3482_v38 = vld [vmem:[%s9205_s7 + $0x5f8] sm:$0xff] }
 0x40f   : > { %6845 = vmatpush1.bf16.msra.mxu1 %v7920_v39  ;;  %6855 = vmatprep.subr.bf16.mxu0 %v7419_v40  ;;  %v7603_v48 = vcombine.high %v3478_v37, %v3482_v38  ;;  %v3510_v16 = vld [vmem:[%s9205_s7 + $0x6d8] sm:$0xff] }
 0x410   : > { %6896 = vmatprep.subr.bf16.mxu1 %v7547_v41  ;;  %v3514_v8 = vld [vmem:[%s9205_s7 + $0x6f8] sm:$0xff] }
 0x411   : > { %6806 = vmatmul.mubr.bf16.vlgmr.msra.gmra.mrb[28].mxu0 %v9729_v57  ;;  %v3390_v22 = vld [vmem:[%s9205_s7 + $0x318] sm:$0xff] }
 0x412   : > { %6847 = vmatmul.mubr.bf16.vlgmr.msra.gmra.mrb[28].mxu1 %v9733_v59  ;;  %6856 = vmatpush1.bf16.msra.mxu0 %v7418_v44  ;;  %v3394_v1 = vld [vmem:[%s9205_s7 + $0x338] sm:$0xff] }
 0x413   : > { %6887 = vmatprep.mubr.bf16.mxu0 %v9623_v61  ;;  %6897 = vmatpush1.bf16.msra.mxu1 %v7546_v46  ;;  %v7562_v61 = vcombine.low %v3438_v49, %v3442_v50  ;;  %v7475_v46 = vcombine.high %v3350_v32, %v3354_v18  ;;  %v3486_v49 = vld [vmem:[%s9205_s7 + $0x618] sm:$0xff] }
 0x414   : > { %6928 = vmatprep.mubr.bf16.mxu1 %v9629_v3  ;;  %6857 = vmatprep.subr.bf16.mxu0 %v7427_v47  ;;  %v7571_v3 = vcombine.high %v3446_v24, %v3450_v56  ;;  %v3490_v50 = vld [vmem:[%s9205_s7 + $0x638] sm:$0xff] }
 0x415   : > { %6898 = vmatprep.subr.bf16.mxu1 %v7555_v34  ;;  %v3362_v34 = vld [vmem:[%s9205_s7 + $0x238] sm:$0xff] }
 0x416   : > { %6858 = vmatpush1.bf16.msra.mxu0 %v7426_v25  ;;  %v7474_v25 = vcombine.low %v3350_v32, %v3354_v18  ;;  %v3494_v24 = vld [vmem:[%s9205_s7 + $0x658] sm:$0xff] }
 0x417   : > { %6899 = vmatpush1.bf16.msra.mxu1 %v7554_v51  ;;  %6859 = vmatprep.subr.bf16.mxu0 %v7435_v2  ;;  %v7602_v51 = vcombine.low %v3478_v37, %v3482_v38  ;;  %v7483_v2 = vcombine.high %v3358_v15, %v3362_v34  ;;  %v3498_v56 = vld [vmem:[%s9205_s7 + $0x678] sm:$0xff] }
 0x418   : > { %6900 = vmatprep.subr.bf16.mxu1 %v7563_v52  ;;  %v7611_v52 = vcombine.high %v3486_v49, %v3490_v50  ;;  %v3518_v23 = vld [vmem:[%s9205_s7 + $0x718] sm:$0xff] }
 0x419   : > { %v3522_v26 = vld [vmem:[%s9205_s7 + $0x738] sm:$0xff] }
 0x41a   : > { %6860 = vmatpush1.bf16.msra.mxu0 %v7434_v60  ;;  %v7482_v60 = vcombine.low %v3358_v15, %v3362_v34  ;;  %v3402_v32 = vld [vmem:[%s9205_s7 + $0x378] sm:$0xff]  ;;  %v7642_v37 = vcombine.low %v3518_v23, %v3522_v26 }
 0x41b   : > { %6901 = vmatpush1.bf16.msra.mxu1 %v7562_v61  ;;  %6861 = vmatprep.subr.bf16.mxu0 %v7443_v62  ;;  %v7610_v61 = vcombine.low %v3486_v49, %v3490_v50  ;;  %v7491_v62 = vcombine.high %v3366_v53, %v3370_v55  ;;  %v3526_v18 = vld [vmem:[%s9205_s7 + $0x758] sm:$0xff] }
 0x41c   : > { %6902 = vmatprep.subr.bf16.mxu1 %v7571_v3  ;;  %v7619_v3 = vcombine.high %v3494_v24, %v3498_v56  ;;  %v3414_v15 = vld [vmem:[%s9205_s7 + $0x3d8] sm:$0xff] }
 0x41d   : > { %v3418_v34 = vld [vmem:[%s9205_s7 + $0x3f8] sm:$0xff] }
 0x41e   : > { %6862 = vmatpush1.bf16.msra.mxu0 %v7442_v11  ;;  %v7490_v11 = vcombine.low %v3366_v53, %v3370_v55  ;;  %v3542_v49 = vld [vmem:[%s9205_s7 + $0x7d8] sm:$0xff] }
 0x41f   : > { %6903 = vmatpush1.bf16.msra.mxu1 %v7570_v12  ;;  %6863 = vmatprep.subr.bf16.mxu0 %v7451_v14  ;;  %v7618_v12 = vcombine.low %v3494_v24, %v3498_v56  ;;  %v7499_v14 = vcombine.high %v3374_v63, %v3378_v4  ;;  %v3546_v50 = vld [vmem:[%s9205_s7 + $0x7f8] sm:$0xff] }
 0x420   : > { %6904 = vmatprep.subr.bf16.mxu1 %v7579_v20  ;;  %v7627_v20 = vcombine.high %v3502_v5, %v3506_v10  ;;  %v3550_v53 = vld [vmem:[%s9205_s7 + $0x818] sm:$0xff] }
 0x421   : > { %v3554_v55 = vld [vmem:[%s9205_s7 + $0x838] sm:$0xff] }
 0x422   : > { %6864 = vmatpush1.bf16.msra.mxu0 %v7450_v13  ;;  %v7498_v13 = vcombine.low %v3374_v63, %v3378_v4  ;;  %v3678_v24 = vld [vmem:[%s9205_s7 + $0xc18] sm:$0xff] }
 0x423   : > { %6905 = vmatpush1.bf16.msra.mxu1 %v7578_v19  ;;  %6865 = vmatprep.subr.bf16.mxu0 %v7459_v21  ;;  %v7626_v19 = vcombine.low %v3502_v5, %v3506_v10  ;;  %v7507_v21 = vcombine.high %v3382_v6, %v3386_v7  ;;  %v3682_v56 = vld [vmem:[%s9205_s7 + $0xc38] sm:$0xff]  ;;  %v7674_v5 = vcombine.low %v3550_v53, %v3554_v55 }
 0x424   : > { %v6561_v30 = vpop.f32.mrb[16].mxu0  ;;  %6906 = vmatprep.subr.bf16.mxu1 %v7587_v17  ;;  %v7635_v17 = vcombine.high %v3510_v16, %v3514_v8  ;;  %v3558_v63 = vld [vmem:[%s9205_s7 + $0x858] sm:$0xff] }
 0x425   : > { %v6602_v35 = vpop.f32.mrb[16].mxu1  ;;  %v6563_v36 = vpop.f32.mrb[17].mxu0  ;;  %v3562_v4 = vld [vmem:[%s9205_s7 + $0x878] sm:$0xff] }
 0x426   : > { %v10053_v39 = vadd.f32 %v6602_v35, %v6561_v30  ;;  %v6604_v40 = vpop.f32.mrb[17].mxu1  ;;  %v6565_v41 = vpop.f32.mrb[18].mxu0  ;;  %6866 = vmatpush1.bf16.msra.mxu0 %v7458_v27  ;;  %v7506_v27 = vcombine.low %v3382_v6, %v3386_v7  ;;  %v7643_v30 = vcombine.high %v3518_v23, %v3522_v26  ;;  %v3530_v35 = vld [vmem:[%s9205_s7 + $0x778] sm:$0xff] }
 0x427   : > { %v10055_v43 = vadd.f32 %v6604_v40, %v6563_v36  ;;  %v6606_v44 = vpop.f32.mrb[18].mxu1  ;;  %6907 = vmatpush1.bf16.msra.mxu1 %v7586_v28  ;;  %v6566_v45 = vpop.f32.mrb[19].mxu0  ;;  %6867 = vmatprep.subr.bf16.mxu0 %v7467_v29  ;;  %v7634_v28 = vcombine.low %v3510_v16, %v3514_v8  ;;  %v7515_v29 = vcombine.high %v3390_v22, %v3394_v1  ;;  %v3406_v41 = vld [vmem:[%s9205_s7 + $0x398] sm:$0xff] }
 0x428   : > { %v6607_v47 = vpop.f32.mrb[19].mxu1  ;;  %6908 = vmatprep.subr.bf16.mxu1 %v7595_v31  ;;  %v3398_v31 = vld [vmem:[%s9205_s7 + $0x358] sm:$0xff]  ;;  %v7514_v36 = vcombine.low %v3390_v22, %v3394_v1  ;;  %v7651_v40 = vcombine.high %v3526_v18, %v3530_v35 }
 0x429   : > { %v7523_v38 = vcombine.high %v3398_v31, %v3402_v32  ;;  %v3534_v44 = vld [vmem:[%s9205_s7 + $0x798] sm:$0xff] }
 0x42a   : > { %6868 = vmatpush1.bf16.msra.mxu0 %v7466_v42  ;;  %v3410_v42 = vld [vmem:[%s9205_s7 + $0x3b8] sm:$0xff] }
 0x42b   : > { %6909 = vmatpush1.bf16.msra.mxu1 %v7594_v33  ;;  %6869 = vmatprep.subr.bf16.mxu0 %v7475_v46  ;;  %v3538_v45 = vld [vmem:[%s9205_s7 + $0x7b8] sm:$0xff]  ;;  %v7522_v33 = vcombine.low %v3398_v31, %v3402_v32  ;;  %v7650_v46 = vcombine.low %v3526_v18, %v3530_v35  ;;  %v7531_v47 = vcombine.high %v3406_v41, %v3410_v42 }
 0x42c   : > { %6910 = vmatprep.subr.bf16.mxu1 %v7603_v48  ;;  %v7659_v48 = vcombine.high %v3534_v44, %v3538_v45  ;;  %v3686_v10 = vld [vmem:[%s9205_s7 + $0xc58] sm:$0xff] }
 0x42d   : > { %v3570_v6 = vld [vmem:[%s9205_s7 + $0x8b8] sm:$0xff] }
 0x42e   : > { %6870 = vmatpush1.bf16.msra.mxu0 %v7474_v25  ;;  %v7530_v25 = vcombine.low %v3406_v41, %v3410_v42  ;;  %v3694_v16 = vld [vmem:[%s9205_s7 + $0xc98] sm:$0xff] }
 0x42f   : > { %6911 = vmatpush1.bf16.msra.mxu1 %v7602_v51  ;;  %6871 = vmatprep.subr.bf16.mxu0 %v7483_v2  ;;  %v7658_v51 = vcombine.low %v3534_v44, %v3538_v45  ;;  %v7539_v2 = vcombine.high %v3414_v15, %v3418_v34  ;;  %v3698_v8 = vld [vmem:[%s9205_s7 + $0xcb8] sm:$0xff] }
 0x430   : > { %6912 = vmatprep.subr.bf16.mxu1 %v7611_v52  ;;  %v7667_v52 = vcombine.high %v3542_v49, %v3546_v50  ;;  %v3578_v22 = vld [vmem:[%s9205_s7 + $0x8f8] sm:$0xff] }
 0x431   : > { %v3702_v1 = vld [vmem:[%s9205_s7 + $0xcd8] sm:$0xff] }
 0x432   : > { %6872 = vmatpush1.bf16.msra.mxu0 %v7482_v60  ;;  %v7538_v60 = vcombine.low %v3414_v15, %v3418_v34 }
 0x433   : > { %6913 = vmatpush1.bf16.msra.mxu1 %v7610_v61  ;;  %6873 = vmatprep.subr.bf16.mxu0 %v7491_v62  ;;  %v7666_v61 = vcombine.low %v3542_v49, %v3546_v50  ;;  %v7675_v62 = vcombine.high %v3550_v53, %v3554_v55 }
 0x434   : > { %6914 = vmatprep.subr.bf16.mxu1 %v7619_v3  ;;  %v7803_v3 = vcombine.high %v3678_v24, %v3682_v56 }
 0x436   : > { %6874 = vmatpush1.bf16.msra.mxu0 %v7490_v11  ;;  %v3690_v11 = vld [vmem:[%s9205_s7 + $0xc78] sm:$0xff] }
 0x437   : > { %6915 = vmatpush1.bf16.msra.mxu1 %v7618_v12  ;;  %6875 = vmatprep.subr.bf16.mxu0 %v7499_v14  ;;  %v7802_v12 = vcombine.low %v3678_v24, %v3682_v56  ;;  %v7683_v14 = vcombine.high %v3558_v63, %v3562_v4  ;;  %v7811_v7 = vcombine.high %v3686_v10, %v3690_v11  ;;  %v3734_v24 = vld [vmem:[%s9205_s7 + $0xdd8] sm:$0xff] }
 0x438   : > { %6916 = vmatprep.subr.bf16.mxu1 %v7627_v20  ;;  %v3566_v20 = vld [vmem:[%s9205_s7 + $0x898] sm:$0xff] }
 0x439   : > { %v7690_v23 = vcombine.low %v3566_v20, %v3570_v6  ;;  %v3738_v56 = vld [vmem:[%s9205_s7 + $0xdf8] sm:$0xff] }
 0x43a   : > { %6876 = vmatpush1.bf16.msra.mxu0 %v7498_v13  ;;  %v7682_v13 = vcombine.low %v3558_v63, %v3562_v4 }
 0x43b   : > { %6917 = vmatpush1.bf16.msra.mxu1 %v7626_v19  ;;  %6877 = vmatprep.subr.bf16.mxu0 %v7507_v21  ;;  %v7810_v19 = vcombine.low %v3686_v10, %v3690_v11  ;;  %v7691_v21 = vcombine.high %v3566_v20, %v3570_v6  ;;  %v3614_v6 = vld [vmem:[%s9205_s7 + $0xa18] sm:$0xff] }
 0x43c   : > { %6918 = vmatprep.subr.bf16.mxu1 %v7635_v17  ;;  %v3574_v17 = vld [vmem:[%s9205_s7 + $0x8d8] sm:$0xff] }
 0x43d   : > { %v7699_v26 = vcombine.high %v3574_v17, %v3578_v22  ;;  %v7698_v31 = vcombine.low %v3574_v17, %v3578_v22 }
 0x43e   : > { %6878 = vmatpush1.bf16.msra.mxu0 %v7506_v27  ;;  %v3582_v27 = vld [vmem:[%s9205_s7 + $0x918] sm:$0xff] }
 0x43f   : > { %6919 = vmatpush1.bf16.msra.mxu1 %v7634_v28  ;;  %6879 = vmatprep.subr.bf16.mxu0 %v7515_v29  ;;  %v3586_v28 = vld [vmem:[%s9205_s7 + $0x938] sm:$0xff] }
 0x440   : > { %6920 = vmatprep.subr.bf16.mxu1 %v7643_v30  ;;  %v3710_v29 = vld [vmem:[%s9205_s7 + $0xd18] sm:$0xff]  ;;  %v7707_v18 = vcombine.high %v3582_v27, %v3586_v28  ;;  %v7706_v41 = vcombine.low %v3582_v27, %v3586_v28 }
 0x441   : > { %v3714_v30 = vld [vmem:[%s9205_s7 + $0xd38] sm:$0xff] }
 0x442   : > { %6880 = vmatpush1.bf16.msra.mxu0 %v7514_v36  ;;  %v7835_v35 = vcombine.high %v3710_v29, %v3714_v30  ;;  %v3590_v36 = vld [vmem:[%s9205_s7 + $0x958] sm:$0xff]  ;;  %v7834_v42 = vcombine.low %v3710_v29, %v3714_v30 }
 0x443   : > { %6921 = vmatpush1.bf16.msra.mxu1 %v7642_v37  ;;  %6881 = vmatprep.subr.bf16.mxu0 %v7523_v38  ;;  %v3594_v37 = vld [vmem:[%s9205_s7 + $0x978] sm:$0xff] }
 0x444   : > { %6922 = vmatprep.subr.bf16.mxu1 %v7651_v40  ;;  %v3718_v38 = vld [vmem:[%s9205_s7 + $0xd58] sm:$0xff]  ;;  %v7715_v44 = vcombine.high %v3590_v36, %v3594_v37  ;;  %v7714_v15 = vcombine.low %v3590_v36, %v3594_v37 }
 0x445   : > { %v3722_v40 = vld [vmem:[%s9205_s7 + $0xd78] sm:$0xff] }
 0x446   : > { %6882 = vmatpush1.bf16.msra.mxu0 %v7522_v33  ;;  %v7843_v45 = vcombine.high %v3718_v38, %v3722_v40  ;;  %v3598_v33 = vld [vmem:[%s9205_s7 + $0x998] sm:$0xff]  ;;  %v7842_v34 = vcombine.low %v3718_v38, %v3722_v40 }
 0x447   : > { %6923 = vmatpush1.bf16.msra.mxu1 %v7650_v46  ;;  %6883 = vmatprep.subr.bf16.mxu0 %v7531_v47  ;;  %v3602_v46 = vld [vmem:[%s9205_s7 + $0x9b8] sm:$0xff] }
 0x448   : > { %6924 = vmatprep.subr.bf16.mxu1 %v7659_v48  ;;  %v3726_v47 = vld [vmem:[%s9205_s7 + $0xd98] sm:$0xff]  ;;  %v7723_v49 = vcombine.high %v3598_v33, %v3602_v46  ;;  %v7722_v63 = vcombine.low %v3598_v33, %v3602_v46 }
 0x449   : > { %v3730_v48 = vld [vmem:[%s9205_s7 + $0xdb8] sm:$0xff] }
 0x44a   : > { %6884 = vmatpush1.bf16.msra.mxu0 %v7530_v25  ;;  %v7851_v25 = vcombine.high %v3726_v47, %v3730_v48  ;;  %v7850_v11 = vcombine.low %v3726_v47, %v3730_v48  ;;  %v3630_v29 = vld [vmem:[%s9205_s7 + $0xa98] sm:$0xff] }
 0x44b   : > { %6925 = vmatpush1.bf16.msra.mxu1 %v7658_v51  ;;  %6885 = vmatprep.subr.bf16.mxu0 %v7539_v2  ;;  %v3606_v51 = vld [vmem:[%s9205_s7 + $0x9d8] sm:$0xff] }
 0x44c   : > { %6926 = vmatprep.subr.bf16.mxu1 %v7667_v52  ;;  %v3610_v2 = vld [vmem:[%s9205_s7 + $0x9f8] sm:$0xff] }
 0x44d   : > { %v3634_v30 = vld [vmem:[%s9205_s7 + $0xab8] sm:$0xff] }
 0x44e   : > { %6886 = vmatpush1.bf16.msra.mxu0 %v7538_v60  ;;  %v3277_v60 = vld [vmem:[%s9200_s30 + $0x10] sm:$0xff]  ;;  %v7755_v36 = vcombine.high %v3630_v29, %v3634_v30  ;;  %v3638_v38 = vld [vmem:[%s9205_s7 + $0xad8] sm:$0xff] }
 0x44f   : > { %6927 = vmatpush1.bf16.msra.mxu1 %v7666_v61  ;;  %6937 = vmatprep.subr.bf16.mxu0 %v7675_v62  ;;  %v3642_v40 = vld [vmem:[%s9205_s7 + $0xaf8] sm:$0xff] }
 0x450   : > { %6978 = vmatprep.subr.bf16.mxu1 %v7803_v3  ;;  %v7763_v33 = vcombine.high %v3638_v38, %v3642_v40  ;;  %v3646_v47 = vld [vmem:[%s9205_s7 + $0xb18] sm:$0xff] }
 0x451   : > { %6888 = vmatmul.mubr.bf16.vlgmr.msra.gmra.mrb[32].mxu0 %v9627_v0  ;;  %v7819_v0 = vcombine.high %v3694_v16, %v3698_v8  ;;  %v3650_v48 = vld [vmem:[%s9205_s7 + $0xb38] sm:$0xff] }
 0x452   : > { %6929 = vmatmul.mubr.bf16.vlgmr.msra.gmra.mrb[32].mxu1 %v9642_v9  ;;  %6938 = vmatpush1.bf16.msra.mxu0 %v7674_v5  ;;  %v3706_v9 = vld [vmem:[%s9205_s7 + $0xcf8] sm:$0xff] }
 0x453   : > { %6969 = vmatprep.mubr.bf16.mxu0 %v9725_v54  ;;  %6979 = vmatpush1.bf16.msra.mxu1 %v7802_v12  ;;  %v7818_v54 = vcombine.low %v3694_v16, %v3698_v8  ;;  %v7826_v32 = vcombine.low %v3702_v1, %v3706_v9  ;;  %v3278_v5 = vld [vmem:[%s9200_s30 + $0x18] sm:$0xff]  ;;  %v7731_v12 = vcombine.high %v3606_v51, %v3610_v2 }
 0x454   : > { %7010 = vmatprep.mubr.bf16.mxu1 %v9731_v58  ;;  %6939 = vmatprep.subr.bf16.mxu0 %v7683_v14  ;;  %v7827_v58 = vcombine.high %v3702_v1, %v3706_v9  ;;  %v3742_v8 = vld [vmem:[%s9205_s7 + $0xe18] sm:$0xff] }
 0x455   : > { %6980 = vmatprep.subr.bf16.mxu1 %v7811_v7  ;;  %v3618_v7 = vld [vmem:[%s9205_s7 + $0xa38] sm:$0xff] }
 0x456   : > { %6940 = vmatpush1.bf16.msra.mxu0 %v7682_v13  ;;  %v3746_v13 = vld [vmem:[%s9205_s7 + $0xe38] sm:$0xff]  ;;  %v7739_v17 = vcombine.high %v3614_v6, %v3618_v7 }
 0x457   : > { %6981 = vmatpush1.bf16.msra.mxu1 %v7810_v19  ;;  %6941 = vmatprep.subr.bf16.mxu0 %v7691_v21  ;;  %v7730_v21 = vcombine.low %v3606_v51, %v3610_v2  ;;  %v7867_v22 = vcombine.high %v3742_v8, %v3746_v13  ;;  %v3622_v1 = vld [vmem:[%s9205_s7 + $0xa58] sm:$0xff] }
 0x458   : > { %6982 = vmatprep.subr.bf16.mxu1 %v7819_v0  ;;  %v7858_v0 = vcombine.low %v3734_v24, %v3738_v56  ;;  %v3626_v9 = vld [vmem:[%s9205_s7 + $0xa78] sm:$0xff] }
 0x459   : > { %v7747_v27 = vcombine.high %v3622_v1, %v3626_v9  ;;  %v3654_v2 = vld [vmem:[%s9205_s7 + $0xb58] sm:$0xff] }
 0x45a   : > { %6942 = vmatpush1.bf16.msra.mxu0 %v7690_v23  ;;  %v3750_v23 = vld [vmem:[%s9205_s7 + $0xe58] sm:$0xff] }
 0x45b   : > { %6983 = vmatpush1.bf16.msra.mxu1 %v7818_v54  ;;  %6943 = vmatprep.subr.bf16.mxu0 %v7699_v26  ;;  %v3754_v54 = vld [vmem:[%s9205_s7 + $0xe78] sm:$0xff]  ;;  %v7738_v26 = vcombine.low %v3614_v6, %v3618_v7 }
 0x45c   : > { %6984 = vmatprep.subr.bf16.mxu1 %v7827_v58  ;;  %v7866_v58 = vcombine.low %v3742_v8, %v3746_v13  ;;  %v7875_v28 = vcombine.high %v3750_v23, %v3754_v54 }
 0x45e   : > { %6944 = vmatpush1.bf16.msra.mxu0 %v7698_v31  ;;  %v3758_v31 = vld [vmem:[%s9205_s7 + $0xe98] sm:$0xff] }
 0x45f   : > { %6985 = vmatpush1.bf16.msra.mxu1 %v7826_v32  ;;  %6945 = vmatprep.subr.bf16.mxu0 %v7707_v18  ;;  %v3762_v32 = vld [vmem:[%s9205_s7 + $0xeb8] sm:$0xff]  ;;  %v7746_v18 = vcombine.low %v3622_v1, %v3626_v9 }
 0x460   : > { %6986 = vmatprep.subr.bf16.mxu1 %v7835_v35  ;;  %v7874_v35 = vcombine.low %v3750_v23, %v3754_v54  ;;  %v7883_v37 = vcombine.high %v3758_v31, %v3762_v32 }
 0x462   : > { %6946 = vmatpush1.bf16.msra.mxu0 %v7706_v41  ;;  %v3766_v41 = vld [vmem:[%s9205_s7 + $0xed8] sm:$0xff] }
 0x463   : > { %6987 = vmatpush1.bf16.msra.mxu1 %v7834_v42  ;;  %6947 = vmatprep.subr.bf16.mxu0 %v7715_v44  ;;  %v3770_v42 = vld [vmem:[%s9205_s7 + $0xef8] sm:$0xff]  ;;  %v7754_v44 = vcombine.low %v3630_v29, %v3634_v30  ;;  %v3279_v30 = vld [vmem:[%s9200_s30 + $0x20] sm:$0xff] }
 0x464   : > { %v6643_v50 = vpop.f32.mrb[20].mxu0  ;;  %6988 = vmatprep.subr.bf16.mxu1 %v7843_v45  ;;  %v7882_v45 = vcombine.low %v3758_v31, %v3762_v32  ;;  %v7891_v46 = vcombine.high %v3766_v41, %v3770_v42 }
 0x465   : > { %v6644_v52 = vadd.f32 %v6643_v50, %v10053_v39  ;;  %v6684_v53 = vpop.f32.mrb[20].mxu1  ;;  %v6645_v55 = vpop.f32.mrb[21].mxu0  ;;  %v7890_v50 = vcombine.low %v3766_v41, %v3770_v42 }
 0x466   : > { %v6646_v61 = vadd.f32 %v6645_v55, %v10055_v43  ;;  %v6686_v62 = vpop.f32.mrb[21].mxu1  ;;  %v6647_v3 = vpop.f32.mrb[22].mxu0  ;;  %6948 = vmatpush1.bf16.msra.mxu0 %v7714_v15  ;;  %v7859_v43 = vcombine.high %v3734_v24, %v3738_v56  ;;  %v3774_v15 = vld [vmem:[%s9205_s7 + $0xf18] sm:$0xff]  ;;  %v7770_v24 = vcombine.low %v3646_v47, %v3650_v48 }
 0x467   : > { %v6685_v4 = vadd.f32 %v6684_v53, %v6644_v52  ;;  %v6688_v10 = vpop.f32.mrb[22].mxu1  ;;  %6989 = vmatpush1.bf16.msra.mxu1 %v7842_v34  ;;  %v6648_v39 = vpop.f32.mrb[23].mxu0  ;;  %6949 = vmatprep.subr.bf16.mxu0 %v7723_v49  ;;  %v3778_v34 = vld [vmem:[%s9205_s7 + $0xf38] sm:$0xff]  ;;  %v7762_v49 = vcombine.low %v3638_v38, %v3642_v40 }
 0x468   : > { %v6687_v14 = vadd.f32 %v6686_v62, %v6646_v61  ;;  %v6689_v20 = vpop.f32.mrb[23].mxu1  ;;  %6990 = vmatprep.subr.bf16.mxu1 %v7851_v25  ;;  %v7771_v25 = vcombine.high %v3646_v47, %v3650_v48  ;;  %v7899_v51 = vcombine.high %v3774_v15, %v3778_v34  ;;  %v3658_v52 = vld [vmem:[%s9205_s7 + $0xb78] sm:$0xff]  ;;  %v7898_v56 = vcombine.low %v3774_v15, %v3778_v34 }
 0x469   : > { %v7021_v16 = vadd.f32 %v6685_v4, %v3277_v60  ;;  %v3782_v53 = vld [vmem:[%s9205_s7 + $0xf58] sm:$0xff]  ;;  %v7779_v60 = vcombine.high %v3654_v2, %v3658_v52 }
 0x46a   : > { %v7022_v19 = vadd.f32 %v6687_v14, %v3278_v5  ;;  %6950 = vmatpush1.bf16.msra.mxu0 %v7722_v63  ;;  %v3786_v55 = vld [vmem:[%s9205_s7 + $0xf78] sm:$0xff]  ;;  %v7778_v5 = vcombine.low %v3654_v2, %v3658_v52 }
 0x46b   : > { %7029 = vst [vmem:[%s9200_s30 + $0x10] sm:$0xff] %v7021_v16  ;;  %6991 = vmatpush1.bf16.msra.mxu1 %v7850_v11  ;;  %6951 = vmatprep.subr.bf16.mxu0 %v7731_v12  ;;  %v7907_v61 = vcombine.high %v3782_v53, %v3786_v55  ;;  %v3662_v62 = vld [vmem:[%s9205_s7 + $0xb98] sm:$0xff]  ;;  %v7906_v10 = vcombine.low %v3782_v53, %v3786_v55  ;;  %v3281_v53 = vld [vmem:[%s9200_s30 + $0x30] sm:$0xff] }
 0x46c   : > { %7030 = vst [vmem:[%s9200_s30 + $0x18] sm:$0xff] %v7022_v19  ;;  %6992 = vmatprep.subr.bf16.mxu1 %v7859_v43  ;;  %v3666_v3 = vld [vmem:[%s9205_s7 + $0xbb8] sm:$0xff] }
 0x46d   : > { %v3790_v63 = vld [vmem:[%s9205_s7 + $0xf98] sm:$0xff]  ;;  %v7787_v39 = vcombine.high %v3662_v62, %v3666_v3  ;;  %v7786_v6 = vcombine.low %v3662_v62, %v3666_v3 }
 0x46e   : > { %6952 = vmatpush1.bf16.msra.mxu0 %v7730_v21  ;;  %v3794_v4 = vld [vmem:[%s9205_s7 + $0xfb8] sm:$0xff] }
 0x46f   : > { %6993 = vmatpush1.bf16.msra.mxu1 %v7858_v0  ;;  %6953 = vmatprep.subr.bf16.mxu0 %v7739_v17  ;;  %v7915_v11 = vcombine.high %v3790_v63, %v3794_v4  ;;  %v3670_v12 = vld [vmem:[%s9205_s7 + $0xbd8] sm:$0xff]  ;;  %v7914_v7 = vcombine.low %v3790_v63, %v3794_v4 }
 0x470   : > { %6994 = vmatprep.subr.bf16.mxu1 %v7867_v22  ;;  %v3674_v14 = vld [vmem:[%s9205_s7 + $0xbf8] sm:$0xff] }
 0x471   : > { %v3798_v20 = vld [vmem:[%s9205_s7 + $0xfd8] sm:$0xff]  ;;  %v7795_v16 = vcombine.high %v3670_v12, %v3674_v14  ;;  %v7794_v13 = vcombine.low %v3670_v12, %v3674_v14 }
 0x472   : > { %6954 = vmatpush1.bf16.msra.mxu0 %v7738_v26  ;;  %v3802_v43 = vld [vmem:[%s9205_s7 + $0xff8] sm:$0xff] }
 0x473   : > { %6995 = vmatpush1.bf16.msra.mxu1 %v7866_v58  ;;  %6955 = vmatprep.subr.bf16.mxu0 %v7747_v27  ;;  %v7923_v8 = vcombine.high %v3798_v20, %v3802_v43  ;;  %v7922_v19 = vcombine.low %v3798_v20, %v3802_v43 }
 0x474   : > { %6996 = vmatprep.subr.bf16.mxu1 %v7875_v28 }
 0x476   : > { %6956 = vmatpush1.bf16.msra.mxu0 %v7746_v18 }
 0x477   : > { %6997 = vmatpush1.bf16.msra.mxu1 %v7874_v35  ;;  %6957 = vmatprep.subr.bf16.mxu0 %v7755_v36  ;;  %v3280_v35 = vld [vmem:[%s9200_s30 + $0x28] sm:$0xff] }
 0x478   : > { %6998 = vmatprep.subr.bf16.mxu1 %v7883_v37 }
 0x47a   : > { %6958 = vmatpush1.bf16.msra.mxu0 %v7754_v44 }
 0x47b   : > { %6999 = vmatpush1.bf16.msra.mxu1 %v7882_v45  ;;  %6959 = vmatprep.subr.bf16.mxu0 %v7763_v33 }
 0x47c   : > { %7000 = vmatprep.subr.bf16.mxu1 %v7891_v46 }
 0x47e   : > { %6960 = vmatpush1.bf16.msra.mxu0 %v7762_v49 }
 0x47f   : > { %7001 = vmatpush1.bf16.msra.mxu1 %v7890_v50  ;;  %6961 = vmatprep.subr.bf16.mxu0 %v7771_v25 }
 0x480   : > { %7002 = vmatprep.subr.bf16.mxu1 %v7899_v51 }
 0x482   : > { %6962 = vmatpush1.bf16.msra.mxu0 %v7770_v24 }
 0x483   : > { %7003 = vmatpush1.bf16.msra.mxu1 %v7898_v56  ;;  %6963 = vmatprep.subr.bf16.mxu0 %v7779_v60 }
 0x484   : > { %7004 = vmatprep.subr.bf16.mxu1 %v7907_v61  ;;  %v3282_v61 = vld [vmem:[%s9200_s30 + $0x38] sm:$0xff] }
 0x486   : > { %6964 = vmatpush1.bf16.msra.mxu0 %v7778_v5 }
 0x487   : > { %7005 = vmatpush1.bf16.msra.mxu1 %v7906_v10  ;;  %6965 = vmatprep.subr.bf16.mxu0 %v7787_v39 }
 0x488   : > { %7006 = vmatprep.subr.bf16.mxu1 %v7915_v11 }
 0x48a   : > { %6966 = vmatpush1.bf16.msra.mxu0 %v7786_v6 }
 0x48b   : > { %7007 = vmatpush1.bf16.msra.mxu1 %v7914_v7  ;;  %6967 = vmatprep.subr.bf16.mxu0 %v7795_v16 }
 0x48c   : > { %7008 = vmatprep.subr.bf16.mxu1 %v7923_v8 }
 0x48e   : > { %6968 = vmatpush1.bf16.msra.mxu0 %v7794_v13 }
 0x48f   : > { %7009 = vmatpush1.bf16.msra.mxu1 %v7922_v19 }
 0x491   : > { %6970 = vmatmul.mubr.bf16.vlgmr.msra.gmra.mrb[36].mxu0 %v9729_v57 }
 0x492   : > { %7011 = vmatmul.mubr.bf16.vlgmr.msra.gmra.mrb[36].mxu1 %v9733_v59 }
 0x4a4   : > { %v6725_v21 = vpop.f32.mrb[24].mxu0 }
 0x4a5   : > { %v6766_v0 = vpop.f32.mrb[24].mxu1  ;;  %v6727_v17 = vpop.f32.mrb[25].mxu0 }
 0x4a6   : > { %v6767_v22 = vadd.f32 %v6766_v0, %v6725_v21  ;;  %v6768_v1 = vpop.f32.mrb[25].mxu1  ;;  %v6729_v9 = vpop.f32.mrb[26].mxu0 }
 0x4a7   : > { %v6769_v23 = vadd.f32 %v6768_v1, %v6727_v17  ;;  %v6770_v54 = vpop.f32.mrb[26].mxu1  ;;  %v6730_v26 = vpop.f32.mrb[27].mxu0 }
 0x4a8   : > { %v6771_v58 = vpop.f32.mrb[27].mxu1 }
 0x4e4   : > { %v6807_v27 = vpop.f32.mrb[28].mxu0 }
 0x4e5   : > { %v6808_v28 = vadd.f32 %v6807_v27, %v6767_v22  ;;  %v6848_v29 = vpop.f32.mrb[28].mxu1  ;;  %v6809_v57 = vpop.f32.mrb[29].mxu0 }
 0x4e6   : > { %v6810_v31 = vadd.f32 %v6809_v57, %v6769_v23  ;;  %v6850_v59 = vpop.f32.mrb[29].mxu1  ;;  %v6811_v32 = vpop.f32.mrb[30].mxu0 }
 0x4e7   : > { %v6849_v18 = vadd.f32 %v6848_v29, %v6808_v28  ;;  %v6852_v36 = vpop.f32.mrb[30].mxu1  ;;  %v6812_v37 = vpop.f32.mrb[31].mxu0 }
 0x4e8   : > { %v6851_v38 = vadd.f32 %v6850_v59, %v6810_v31  ;;  %v6853_v40 = vpop.f32.mrb[31].mxu1 }
 0x4e9   : > { %v7023_v41 = vadd.f32 %v6849_v18, %v3279_v30 }
 0x4ea   : > { %v7024_v42 = vadd.f32 %v6851_v38, %v3280_v35 }
 0x4eb   : > { %7031 = vst [vmem:[%s9200_s30 + $0x20] sm:$0xff] %v7023_v41 }
 0x4ec   : > { %7032 = vst [vmem:[%s9200_s30 + $0x28] sm:$0xff] %v7024_v42 }
 0x524   : > { %v6889_v44 = vpop.f32.mrb[32].mxu0 }
 0x525   : > { %v6930_v45 = vpop.f32.mrb[32].mxu1  ;;  %v6891_v33 = vpop.f32.mrb[33].mxu0 }
 0x526   : > { %v6931_v46 = vadd.f32 %v6930_v45, %v6889_v44  ;;  %v6932_v47 = vpop.f32.mrb[33].mxu1  ;;  %v6893_v48 = vpop.f32.mrb[34].mxu0 }
 0x527   : > { %v6933_v15 = vadd.f32 %v6932_v47, %v6891_v33  ;;  %v6934_v34 = vpop.f32.mrb[34].mxu1  ;;  %v6894_v49 = vpop.f32.mrb[35].mxu0 }
 0x528   : > { %v6935_v50 = vpop.f32.mrb[35].mxu1 }
 0x564   : > { %v6971_v25 = vpop.f32.mrb[36].mxu0 }
 0x565   : > { %v6972_v51 = vadd.f32 %v6971_v25, %v6931_v46  ;;  %v7012_v2 = vpop.f32.mrb[36].mxu1  ;;  %v6973_v52 = vpop.f32.mrb[37].mxu0 }
 0x566   : > { %v6974_v55 = vadd.f32 %v6973_v52, %v6933_v15  ;;  %v7014_v24 = vpop.f32.mrb[37].mxu1  ;;  %v6975_v56 = vpop.f32.mrb[38].mxu0 }
 0x567   : > { %v7013_v60 = vadd.f32 %v7012_v2, %v6972_v51  ;;  %v7016_v62 = vpop.f32.mrb[38].mxu1  ;;  %v6976_v3 = vpop.f32.mrb[39].mxu0 }
 0x568   : > { %v7015_v63 = vadd.f32 %v7014_v24, %v6974_v55  ;;  %v7017_v4 = vpop.f32.mrb[39].mxu1 }
 0x569   : > { %v7025_v5 = vadd.f32 %v7013_v60, %v3281_v53 }
 0x56a   : > { %v7026_v10 = vadd.f32 %v7015_v63, %v3282_v61 }
 0x56b   : > { %7033 = vst [vmem:[%s9200_s30 + $0x30] sm:$0xff] %v7025_v5 }
 0x56c   : > { %7034 = vst [vmem:[%s9200_s30 + $0x38] sm:$0xff] %v7026_v10 }
 0x56d PF: > { %s14_s21 = sadd.s32 1, %s8068_s21   ;;  %s10199_s15 = smov %s8048_s16 }
 0x56e   : > { %p11_p0 = scmp.ge.s32.totalorder %s14_s21, 6   ;;  %s10200_s16 = smov %s8145_s26 }
 0x56f   : > { %s10201_s17 = smov %s8060_s19  ;;  %s10202_s18 = smov %s8064_s20 }
 0x570   : > { %s10203_s19 = smov %s10206_s22  ;;  %s10204_s20 = smov %s10210_s23 }
 0x571   :  { %13 = sbr.rel (!%p11_p0) target bundleno = 4 (0x4), region = 106 }

// kernel: forward_pallas.3
= control target key start
LH: loop header
LB: loop body
LE: loop exit
PB: predicated region body
PF: predicated region fallthrough
CT: control target
= control target key end

     0   :  { %v80_v0 = vlaneseq  ;;  %s2221_s30 = smov 96   ;;  %vm1481_vm11 = vcmask 261120   ;;  %vm2223_vm12 = vmmov 0   ;;  %s2984_s0 = inlined_call_operand.vmem [shape: f32[2,8,1024], index: 0, kind: input, shape index: {}]   ;;  %s2985_s1 = inlined_call_operand.vmem [shape: f32[1,1024], index: 1, kind: input, shape index: {}]   ;;  %s2986_s4 = inlined_call_operand.vmem [shape: bf16[1024,256], index: 4, kind: input, shape index: {}]   ;;  %s2987_s2 = inlined_call_operand.vmem [shape: f32[1,1024], index: 2, kind: input, shape index: {}]   ;;  %s2988_s3 = inlined_call_operand.vmem [shape: f32[1,1024], index: 3, kind: input, shape index: {}]   ;;  %s2989_s5 = inlined_call_operand.vmem [shape: f32[1,256], index: 5, kind: input, shape index: {}]   ;;  %s2990_s8 = inlined_call_operand.vmem [shape: bf16[256,128], index: 8, kind: input, shape index: {}]   ;;  %s2991_s6 = inlined_call_operand.vmem [shape: f32[1,256], index: 6, kind: input, shape index: {}]   ;;  %s2992_s7 = inlined_call_operand.vmem [shape: f32[1,256], index: 7, kind: input, shape index: {}]   ;;  %s2993_s9 = inlined_call_operand.vmem [shape: f32[1,128], index: 9, kind: input, shape index: {}]   ;;  %s2994_s13 = inlined_call_operand.vmem [shape: bf16[32,128], index: 13, kind: input, shape index: {}]   ;;  %s2995_s12 = inlined_call_operand.vmem [shape: bf16[32,128], index: 12, kind: input, shape index: {}]   ;;  %s2996_s10 = inlined_call_operand.vmem [shape: f32[1,128], index: 10, kind: input, shape index: {}]   ;;  %s2997_s11 = inlined_call_operand.vmem [shape: f32[1,128], index: 11, kind: input, shape index: {}]   ;;  %s2998_s14 = inlined_call_operand.vmem [shape: bf16[32,128], index: 14, kind: input, shape index: {}]   ;;  %s2999_s15 = inlined_call_operand.vmem [shape: f32[1,128], index: 15, kind: input, shape index: {}]   ;;  %s3000_s16 = inlined_call_operand.vmem [shape: f32[8,128], index: 16, kind: output, shape index: {}]  }
   0x1   :  { %3002 = sst [smem:[#allocation2_spill]] %s2984_s0  ;;  %v78_v20 = vld [vmem:[%s2985_s1] sm:$0xff] }
   0x2   :  { %s3003_s23 = sld [smem:[#allocation2_spill]]  ;;  %v81_v4 = vshrl.u32 %v80_v0, 7 }
   0x4   :  { %v2336_v11 = vsub.s32 0, %v81_v4  ;;  %v2338_v12 = vsub.s32 1, %v81_v4  ;;  %v2340_v13 = vsub.s32 2, %v81_v4  ;;  %v2345_v18 = vsub.s32 3, %v81_v4 }
   0x5   :  { %v2350_v21 = vsub.s32 4, %v81_v4  ;;  %v2369_v32 = vsub.s32 5, %v81_v4  ;;  %v2371_v33 = vsub.s32 6, %v81_v4  ;;  %v2374_v39 = vsub.s32 7, %v81_v4 }
   0x6   :  { %v83_v25 = vrot.slane %v78_v20, %v2336_v11  ;;  %v87_v26 = vrot.slane %v78_v20, %v2338_v12  ;;  %v91_v27 = vrot.slane %v78_v20, %v2340_v13  ;;  %v95_v30 = vrot.slane %v78_v20, %v2345_v18 }
   0x7   :  { %v99_v31 = vrot.slane %v78_v20, %v2350_v21  ;;  %v103_v38 = vrot.slane %v78_v20, %v2369_v32  ;;  %v107_v44 = vrot.slane %v78_v20, %v2371_v33  ;;  %v111_v50 = vrot.slane %v78_v20, %v2374_v39  ;;  %v2002_v20 = vld [vmem:[%s2986_s4 + $0x10] ss:$8 sps:$4 sm:$0xff]  }
   0x8   :  { %v54_v1 = vld [vmem:[%s3003_s23] sm:$0xff]  ;;  %v55_v2 = vld [vmem:[%s3003_s23 + $0x8] sm:$0xff]  ;;  %v56_v3 = vld [vmem:[%s3003_s23 + $0x10] sm:$0xff] }
   0x9   :  { %v57_v5 = vld [vmem:[%s3003_s23 + $0x18] sm:$0xff]  ;;  %v58_v6 = vld [vmem:[%s3003_s23 + $0x20] sm:$0xff]  ;;  %v63_v8 = vld [vmem:[%s3003_s23 + $0x48] sm:$0xff] }
   0xa   :  { %v62_v7 = vld [vmem:[%s3003_s23 + $0x40] sm:$0xff]  ;;  %v64_v9 = vld [vmem:[%s3003_s23 + $0x50] sm:$0xff]  ;;  %v65_v10 = vld [vmem:[%s3003_s23 + $0x58] sm:$0xff]  ;;  %v71_v16 = vadd.f32 %v63_v8, %v55_v2 }
   0xb   :  { %v66_v14 = vld [vmem:[%s3003_s23 + $0x60] sm:$0xff]  ;;  %v70_v15 = vadd.f32 %v62_v7, %v54_v1  ;;  %v72_v17 = vadd.f32 %v64_v9, %v56_v3  ;;  %v73_v19 = vadd.f32 %v65_v10, %v57_v5  ;;  %v59_v22 = vld [vmem:[%s3003_s23 + $0x28] sm:$0xff]  ;;  %v60_v28 = vld [vmem:[%s3003_s23 + $0x30] sm:$0xff] }
   0xc   :  { %v67_v23 = vld [vmem:[%s3003_s23 + $0x68] sm:$0xff]  ;;  %v74_v24 = vadd.f32 %v66_v14, %v58_v6  ;;  %v68_v29 = vld [vmem:[%s3003_s23 + $0x70] sm:$0xff]  ;;  %v121_v35 = vadd.f32 %v87_v26, %v71_v16  ;;  %v61_v41 = vld [vmem:[%s3003_s23 + $0x38] sm:$0xff] }
   0xd   :  { %v120_v34 = vadd.f32 %v83_v25, %v70_v15  ;;  %v122_v36 = vadd.f32 %v91_v27, %v72_v17  ;;  %v75_v37 = vadd.f32 %v67_v23, %v59_v22  ;;  %v123_v40 = vadd.f32 %v95_v30, %v73_v19  ;;  %v69_v42 = vld [vmem:[%s3003_s23 + $0x78] sm:$0xff]  ;;  %v1992_v10 = vld [vmem:[%s2986_s4 + $0x4] ss:$8 sps:$4 sm:$0xff]   ;;  %v1996_v15 = vld [vmem:[%s2986_s4] ss:$8 sps:$4 sm:$0xff]  }
   0xe   :  { %v76_v43 = vadd.f32 %v68_v29, %v60_v28  ;;  %v124_v45 = vadd.f32 %v99_v31, %v74_v24  ;;  %vm129_vm1 = vcmp.ge.f32.partialorder %v121_v35, 0.0  ;;  %v137_v47 = vmul.f32 0.3, %v121_v35  ;;  %v1994_v14 = vld [vmem:[%s2986_s4 + $0x204] ss:$8 sps:$4 sm:$0xff]   ;;  %1087 = vmatprep.subr.bf16.mxu1 %v1992_v10 }
   0xf   :  { %vm128_vm0 = vcmp.ge.f32.partialorder %v120_v34, 0.0  ;;  %vm130_vm2 = vcmp.ge.f32.partialorder %v122_v36, 0.0  ;;  %v136_v46 = vmul.f32 0.3, %v120_v34  ;;  %v138_v48 = vmul.f32 0.3, %v122_v36  ;;  %1169 = vmatprep.subr.bf16.mxu0 %v1994_v14  ;;  %1088 = vmatpush1.bf16.msra.mxu1 %v1996_v15 }
  0x10   :  { %v77_v49 = vadd.f32 %v69_v42, %v61_v41  ;;  %v125_v51 = vadd.f32 %v103_v38, %v75_v37  ;;  %v139_v52 = vmul.f32 0.3, %v123_v40  ;;  %vm131_vm3 = vcmp.ge.f32.partialorder %v123_v40, 0.0  ;;  %v1997_v16 = vld [vmem:[%s2986_s4 + $0x200] ss:$8 sps:$4 sm:$0xff]  }
  0x11   :  { %v2384_v53 = vsel %vm128_vm0, %v120_v34, %v136_v46  ;;  %v126_v54 = vadd.f32 %v107_v44, %v76_v43  ;;  %v140_v55 = vmul.f32 0.3, %v124_v45  ;;  %v2386_v56 = vsel %vm129_vm1, %v121_v35, %v137_v47  ;;  %v1998_v17 = vld [vmem:[%s2986_s4 + $0x14] ss:$8 sps:$4 sm:$0xff]   ;;  %1170 = vmatpush1.bf16.msra.mxu0 %v1997_v16  ;;  %v2003_v22 = vld [vmem:[%s2986_s4 + $0x210] ss:$8 sps:$4 sm:$0xff]  }
  0x12   :  { %v2388_v57 = vsel %vm130_vm2, %v122_v36, %v138_v48  ;;  %vm132_vm4 = vcmp.ge.f32.partialorder %v124_v45, 0.0  ;;  %v154_v58 = vadd.f32 %v2386_v56, %v2384_v53  ;;  %v127_v59 = vadd.f32 %v111_v50, %v77_v49  ;;  %v2000_v19 = vld [vmem:[%s2986_s4 + $0x214] ss:$8 sps:$4 sm:$0xff]   ;;  %1089 = vmatprep.subr.bf16.mxu1 %v1998_v17  ;;  %v2004_v23 = vld [vmem:[%s2986_s4 + $0x24] ss:$8 sps:$4 sm:$0xff]  }
  0x13   :  { %v141_v60 = vmul.f32 0.3, %v125_v51  ;;  %v2392_v61 = vsel %vm131_vm3, %v123_v40, %v139_v52  ;;  %vm133_vm5 = vcmp.ge.f32.partialorder %v125_v51, 0.0  ;;  %v142_v63 = vmul.f32 0.3, %v126_v54  ;;  %1171 = vmatprep.subr.bf16.mxu0 %v2000_v19  ;;  %1090 = vmatpush1.bf16.msra.mxu1 %v2002_v20 }
  0x14   :  { %v155_v62 = vadd.f32 %v154_v58, %v2388_v57  ;;  %v2395_v0 = vsel %vm132_vm4, %v124_v45, %v140_v55  ;;  %vm134_vm6 = vcmp.ge.f32.partialorder %v126_v54, 0.0  ;;  %v143_v2 = vmul.f32 0.3, %v127_v59  ;;  %v2006_v24 = vld [vmem:[%s2986_s4 + $0x224] ss:$8 sps:$4 sm:$0xff]   ;;  %1091 = vmatprep.subr.bf16.mxu1 %v2004_v23 }
  0x15   :  { %v2398_v3 = vsel %vm133_vm5, %v125_v51, %v141_v60  ;;  %vm135_vm7 = vcmp.ge.f32.partialorder %v127_v59, 0.0  ;;  %v2401_v5 = vsel %vm134_vm6, %v126_v54, %v142_v63  ;;  %v2008_v25 = vld [vmem:[%s2986_s4 + $0x20] ss:$8 sps:$4 sm:$0xff]   ;;  %1172 = vmatpush1.bf16.msra.mxu0 %v2003_v22  ;;  %v2010_v27 = vld [vmem:[%s2986_s4 + $0x34] ss:$8 sps:$4 sm:$0xff]  }
  0x16   :  { %v156_v1 = vadd.f32 %v155_v62, %v2392_v61  ;;  %v2404_v7 = vsel %vm135_vm7, %v127_v59, %v143_v2  ;;  %v2009_v26 = vld [vmem:[%s2986_s4 + $0x220] ss:$8 sps:$4 sm:$0xff]   ;;  %1173 = vmatprep.subr.bf16.mxu0 %v2006_v24  ;;  %v2012_v28 = vld [vmem:[%s2986_s4 + $0x234] ss:$8 sps:$4 sm:$0xff]   ;;  %v2014_v29 = vld [vmem:[%s2986_s4 + $0x30] ss:$8 sps:$4 sm:$0xff]  }
  0x17   :  { %1092 = vmatpush1.bf16.msra.mxu1 %v2008_v25  ;;  %v2015_v30 = vld [vmem:[%s2986_s4 + $0x230] ss:$8 sps:$4 sm:$0xff]   ;;  %v2016_v31 = vld [vmem:[%s2986_s4 + $0x44] ss:$8 sps:$4 sm:$0xff]   ;;  %v2020_v35 = vld [vmem:[%s2986_s4 + $0x40] ss:$8 sps:$4 sm:$0xff]  }
  0x18   :  { %v157_v4 = vadd.f32 %v156_v1, %v2395_v0  ;;  %1093 = vmatprep.subr.bf16.mxu1 %v2010_v27  ;;  %v2018_v34 = vld [vmem:[%s2986_s4 + $0x244] ss:$8 sps:$4 sm:$0xff]   ;;  %v2021_v36 = vld [vmem:[%s2986_s4 + $0x240] ss:$8 sps:$4 sm:$0xff]   ;;  %v2022_v37 = vld [vmem:[%s2986_s4 + $0x54] ss:$8 sps:$4 sm:$0xff]  }
  0x19   :  { %1174 = vmatpush1.bf16.msra.mxu0 %v2009_v26  ;;  %v2024_v38 = vld [vmem:[%s2986_s4 + $0x254] ss:$8 sps:$4 sm:$0xff]   ;;  %v2026_v40 = vld [vmem:[%s2986_s4 + $0x50] ss:$8 sps:$4 sm:$0xff]   ;;  %v2028_v42 = vld [vmem:[%s2986_s4 + $0x64] ss:$8 sps:$4 sm:$0xff]  }
  0x1a   :  { %v158_v6 = vadd.f32 %v157_v4, %v2398_v3  ;;  %1175 = vmatprep.subr.bf16.mxu0 %v2012_v28  ;;  %v2027_v41 = vld [vmem:[%s2986_s4 + $0x250] ss:$8 sps:$4 sm:$0xff]   ;;  %v2030_v43 = vld [vmem:[%s2986_s4 + $0x264] ss:$8 sps:$4 sm:$0xff]   ;;  %v2032_v44 = vld [vmem:[%s2986_s4 + $0x60] ss:$8 sps:$4 sm:$0xff]  }
  0x1b   :  { %1094 = vmatpush1.bf16.msra.mxu1 %v2014_v29  ;;  %v2033_v45 = vld [vmem:[%s2986_s4 + $0x260] ss:$8 sps:$4 sm:$0xff]   ;;  %v2034_v46 = vld [vmem:[%s2986_s4 + $0x74] ss:$8 sps:$4 sm:$0xff]   ;;  %v2038_v48 = vld [vmem:[%s2986_s4 + $0x70] ss:$8 sps:$4 sm:$0xff]  }
  0x1c   :  { %v159_v8 = vadd.f32 %v158_v6, %v2401_v5  ;;  %1095 = vmatprep.subr.bf16.mxu1 %v2016_v31  ;;  %v2036_v47 = vld [vmem:[%s2986_s4 + $0x274] ss:$8 sps:$4 sm:$0xff]   ;;  %v2039_v49 = vld [vmem:[%s2986_s4 + $0x270] ss:$8 sps:$4 sm:$0xff]   ;;  %v2040_v50 = vld [vmem:[%s2986_s4 + $0x84] ss:$8 sps:$4 sm:$0xff]  }
  0x1d   :  { %1176 = vmatpush1.bf16.msra.mxu0 %v2015_v30  ;;  %v2042_v51 = vld [vmem:[%s2986_s4 + $0x284] ss:$8 sps:$4 sm:$0xff]   ;;  %v2044_v52 = vld [vmem:[%s2986_s4 + $0x80] ss:$8 sps:$4 sm:$0xff]   ;;  %v2046_v55 = vld [vmem:[%s2986_s4 + $0x94] ss:$8 sps:$4 sm:$0xff]  }
  0x1e   :  { %v160_v9 = vadd.f32 %v159_v8, %v2404_v7  ;;  %1177 = vmatprep.subr.bf16.mxu0 %v2018_v34  ;;  %v2045_v54 = vld [vmem:[%s2986_s4 + $0x280] ss:$8 sps:$4 sm:$0xff]   ;;  %v2048_v58 = vld [vmem:[%s2986_s4 + $0x294] ss:$8 sps:$4 sm:$0xff]   ;;  %v2050_v59 = vld [vmem:[%s2986_s4 + $0x90] ss:$8 sps:$4 sm:$0xff]  }
  0x1f   :  { %1096 = vmatpush1.bf16.msra.mxu1 %v2020_v35  ;;  %v2051_v60 = vld [vmem:[%s2986_s4 + $0x290] ss:$8 sps:$4 sm:$0xff]   ;;  %v2052_v62 = vld [vmem:[%s2986_s4 + $0xa4] ss:$8 sps:$4 sm:$0xff]   ;;  %v2056_v27 = vld [vmem:[%s2986_s4 + $0xa0] ss:$8 sps:$4 sm:$0xff]  }
  0x20   :  { %161 = vadd.xlane.f32.xlu0 %v160_v9  ;;  %1097 = vmatprep.subr.bf16.mxu1 %v2022_v37  ;;  %v2054_v63 = vld [vmem:[%s2986_s4 + $0x2a4] ss:$8 sps:$4 sm:$0xff]   ;;  %v2058_v28 = vld [vmem:[%s2986_s4 + $0xb4] ss:$8 sps:$4 sm:$0xff]   ;;  %v2062_v30 = vld [vmem:[%s2986_s4 + $0xb0] ss:$8 sps:$4 sm:$0xff]  }
  0x21   :  { %1178 = vmatpush1.bf16.msra.mxu0 %v2021_v36  ;;  %v2060_v29 = vld [vmem:[%s2986_s4 + $0x2b4] ss:$8 sps:$4 sm:$0xff]   ;;  %v2063_v31 = vld [vmem:[%s2986_s4 + $0x2b0] ss:$8 sps:$4 sm:$0xff]   ;;  %v2064_v34 = vld [vmem:[%s2986_s4 + $0xc4] ss:$8 sps:$4 sm:$0xff]  }
  0x22   :  { %1179 = vmatprep.subr.bf16.mxu0 %v2024_v38  ;;  %v2066_v35 = vld [vmem:[%s2986_s4 + $0x2c4] ss:$8 sps:$4 sm:$0xff]   ;;  %v2068_v36 = vld [vmem:[%s2986_s4 + $0xc0] ss:$8 sps:$4 sm:$0xff]   ;;  %v2070_v38 = vld [vmem:[%s2986_s4 + $0xd4] ss:$8 sps:$4 sm:$0xff]  }
  0x23   :  { %1098 = vmatpush1.bf16.msra.mxu1 %v2026_v40  ;;  %v2069_v37 = vld [vmem:[%s2986_s4 + $0x2c0] ss:$8 sps:$4 sm:$0xff]   ;;  %v2072_v40 = vld [vmem:[%s2986_s4 + $0x2d4] ss:$8 sps:$4 sm:$0xff]  }
  0x24   :  { %1099 = vmatprep.subr.bf16.mxu1 %v2028_v42  ;;  %v2075_v42 = vld [vmem:[%s2986_s4 + $0x2d0] ss:$8 sps:$4 sm:$0xff]  }
  0x25   :  { %1180 = vmatpush1.bf16.msra.mxu0 %v2027_v41  ;;  %v2074_v41 = vld [vmem:[%s2986_s4 + $0xd0] ss:$8 sps:$4 sm:$0xff]  }
  0x26   :  { %1181 = vmatprep.subr.bf16.mxu0 %v2030_v43  ;;  %v2076_v43 = vld [vmem:[%s2986_s4 + $0xe4] ss:$8 sps:$4 sm:$0xff]  }
  0x27   :  { %1100 = vmatpush1.bf16.msra.mxu1 %v2032_v44  ;;  %v2078_v44 = vld [vmem:[%s2986_s4 + $0x2e4] ss:$8 sps:$4 sm:$0xff]  }
  0x28   :  { %1101 = vmatprep.subr.bf16.mxu1 %v2034_v46  ;;  %v2081_v46 = vld [vmem:[%s2986_s4 + $0x2e0] ss:$8 sps:$4 sm:$0xff]  }
  0x29   :  { %1182 = vmatpush1.bf16.msra.mxu0 %v2033_v45  ;;  %v2080_v45 = vld [vmem:[%s2986_s4 + $0xe0] ss:$8 sps:$4 sm:$0xff]  }
  0x2a   :  { %1183 = vmatprep.subr.bf16.mxu0 %v2036_v47  ;;  %v2082_v47 = vld [vmem:[%s2986_s4 + $0xf4] ss:$8 sps:$4 sm:$0xff]  }
  0x2b   :  { %1102 = vmatpush1.bf16.msra.mxu1 %v2038_v48  ;;  %v2084_v48 = vld [vmem:[%s2986_s4 + $0x2f4] ss:$8 sps:$4 sm:$0xff]  }
  0x2c   :  { %1103 = vmatprep.subr.bf16.mxu1 %v2040_v50  ;;  %v2087_v50 = vld [vmem:[%s2986_s4 + $0x2f0] ss:$8 sps:$4 sm:$0xff]  }
  0x2d   :  { %1184 = vmatpush1.bf16.msra.mxu0 %v2039_v49  ;;  %v2086_v49 = vld [vmem:[%s2986_s4 + $0xf0] ss:$8 sps:$4 sm:$0xff]  }
  0x2e   :  { %1185 = vmatprep.subr.bf16.mxu0 %v2042_v51  ;;  %v2090_v51 = vld [vmem:[%s2986_s4 + $0x104] ss:$8 sps:$4 sm:$0xff]  }
  0x2f   :  { %1104 = vmatpush1.bf16.msra.mxu1 %v2044_v52  ;;  %v2093_v52 = vld [vmem:[%s2986_s4 + $0x304] ss:$8 sps:$4 sm:$0xff]  }
  0x30   :  { %1105 = vmatprep.subr.bf16.mxu1 %v2046_v55 }
  0x31   :  { %1186 = vmatpush1.bf16.msra.mxu0 %v2045_v54 }
  0x32   :  { %1187 = vmatprep.subr.bf16.mxu0 %v2048_v58 }
  0x33   :  { %1106 = vmatpush1.bf16.msra.mxu1 %v2050_v59  ;;  %v152_v59 = vld [vmem:[%s2987_s2] sm:$0xff] }
  0x34   :  { %1107 = vmatprep.subr.bf16.mxu1 %v2052_v62  ;;  %v209_v62 = vrot.slane %v152_v59, %v2338_v12 }
  0x35   :  { %1188 = vmatpush1.bf16.msra.mxu0 %v2051_v60  ;;  %v153_v60 = vld [vmem:[%s2988_s3] sm:$0xff] }
  0x36   :  { %1189 = vmatprep.subr.bf16.mxu0 %v2054_v63  ;;  %v225_v63 = vrot.slane %v152_v59, %v2369_v32 }
  0x37   :  { %1108 = vmatpush1.bf16.msra.mxu1 %v2056_v27 }
  0x38   :  { %1109 = vmatprep.subr.bf16.mxu1 %v2058_v28 }
  0x3b   :  { %1110 = vmatpush1.bf16.msra.mxu1 %v2062_v30 }
  0x3c   :  { %1111 = vmatprep.subr.bf16.mxu1 %v2064_v34 }
  0x3f   :  { %1112 = vmatpush1.bf16.msra.mxu1 %v2068_v36 }
  0x40   :  { %1113 = vmatprep.subr.bf16.mxu1 %v2070_v38 }
  0x43   :  { %1114 = vmatpush1.bf16.msra.mxu1 %v2074_v41 }
  0x44   :  { %1115 = vmatprep.subr.bf16.mxu1 %v2076_v43  ;;  %v2096_v43 = vld [vmem:[%s2986_s4 + $0x114] ss:$8 sps:$4 sm:$0xff]  }
  0x47   :  { %1116 = vmatpush1.bf16.msra.mxu1 %v2080_v45 }
  0x48   :  { %1117 = vmatprep.subr.bf16.mxu1 %v2082_v47  ;;  %v2094_v47 = vld [vmem:[%s2986_s4 + $0x110] ss:$8 sps:$4 sm:$0xff]  }
  0x4b   :  { %1118 = vmatpush1.bf16.msra.mxu1 %v2086_v49  ;;  %v2102_v49 = vld [vmem:[%s2986_s4 + $0x124] ss:$8 sps:$4 sm:$0xff]  }
  0x4c   :  { %1128 = vmatprep.subr.bf16.mxu1 %v2090_v51  ;;  %v2100_v51 = vld [vmem:[%s2986_s4 + $0x120] ss:$8 sps:$4 sm:$0xff]  }
  0xad   :  { %v162_v1 = vpop.xlane.xlu0 %161 }
  0xae   :  { %v164_v2 = vmul.f32 0.0009765625, %v162_v1  ;;  %v205_v1 = vrot.slane %v152_v59, %v2336_v11 }
  0xb0   :  { %v2535_v4 = vsub.f32 %v2384_v53, %v164_v2  ;;  %v2538_v6 = vsub.f32 %v2386_v56, %v164_v2  ;;  %v2541_v8 = vsub.f32 %v2388_v57, %v164_v2  ;;  %v2544_v9 = vsub.f32 %v2392_v61, %v164_v2 }
  0xb1   :  { %v2551_v15 = vsub.f32 %v2395_v0, %v164_v2  ;;  %v2556_v16 = vsub.f32 %v2398_v3, %v164_v2  ;;  %v2561_v17 = vsub.f32 %v2401_v5, %v164_v2  ;;  %v2566_v0 = vsub.f32 %v2404_v7, %v164_v2  ;;  %v2057_v7 = vld [vmem:[%s2986_s4 + $0x2a0] ss:$8 sps:$4 sm:$0xff]  }
  0xb2   :  { %v173_v10 = vmul.f32 %v2535_v4, %v2535_v4  ;;  %v174_v14 = vmul.f32 %v2538_v6, %v2538_v6  ;;  %v175_v53 = vmul.f32 %v2541_v8, %v2541_v8  ;;  %v176_v57 = vmul.f32 %v2544_v9, %v2544_v9  ;;  %1190 = vmatpush1.bf16.msra.mxu0 %v2057_v7 }
  0xb3   :  { %v177_v19 = vmul.f32 %v2551_v15, %v2551_v15  ;;  %v178_v22 = vmul.f32 %v2556_v16, %v2556_v16  ;;  %v179_v3 = vmul.f32 %v2561_v17, %v2561_v17  ;;  %v180_v25 = vmul.f32 %v2566_v0, %v2566_v0  ;;  %1191 = vmatprep.subr.bf16.mxu0 %v2060_v29 }
  0xb4   :  { %v181_v56 = vadd.f32 %v174_v14, %v173_v10  ;;  %v221_v2 = vrot.slane %v152_v59, %v2350_v21  ;;  %v258_v10 = vrot.slane %v153_v60, %v2338_v12  ;;  %v217_v14 = vrot.slane %v152_v59, %v2345_v18 }
  0xb6   :  { %v182_v61 = vadd.f32 %v181_v56, %v175_v53  ;;  %1192 = vmatpush1.bf16.msra.mxu0 %v2063_v31  ;;  %v233_v53 = vrot.slane %v152_v59, %v2374_v39  ;;  %v213_v56 = vrot.slane %v152_v59, %v2340_v13 }
  0xb7   :  { %1193 = vmatprep.subr.bf16.mxu0 %v2066_v35 }
  0xb8   :  { %v183_v20 = vadd.f32 %v182_v61, %v176_v57  ;;  %v274_v57 = vrot.slane %v153_v60, %v2369_v32  ;;  %v254_v61 = vrot.slane %v153_v60, %v2336_v11 }
  0xba   :  { %v184_v23 = vadd.f32 %v183_v20, %v177_v19  ;;  %1194 = vmatpush1.bf16.msra.mxu0 %v2069_v37  ;;  %v270_v19 = vrot.slane %v153_v60, %v2350_v21  ;;  %v266_v20 = vrot.slane %v153_v60, %v2345_v18 }
  0xbb   :  { %1195 = vmatprep.subr.bf16.mxu0 %v2072_v40  ;;  %v2091_v40 = vld [vmem:[%s2986_s4 + $0x300] ss:$8 sps:$4 sm:$0xff]  }
  0xbc   :  { %v185_v24 = vadd.f32 %v184_v23, %v178_v22  ;;  %v282_v23 = vrot.slane %v153_v60, %v2374_v39 }
  0xbe   :  { %v186_v5 = vadd.f32 %v185_v24, %v179_v3  ;;  %1196 = vmatpush1.bf16.msra.mxu0 %v2075_v42  ;;  %v262_v3 = vrot.slane %v153_v60, %v2340_v13  ;;  %v229_v24 = vrot.slane %v152_v59, %v2371_v33  ;;  %v2109_v59 = vld [vmem:[%s2986_s4 + $0x330] ss:$8 sps:$4 sm:$0xff]  }
  0xbf   :  { %1197 = vmatprep.subr.bf16.mxu0 %v2078_v44  ;;  %v2099_v44 = vld [vmem:[%s2986_s4 + $0x314] ss:$8 sps:$4 sm:$0xff]  }
  0xc0   :  { %v187_v26 = vadd.f32 %v186_v5, %v180_v25  ;;  %v278_v25 = vrot.slane %v153_v60, %v2371_v33  ;;  %v2114_v60 = vld [vmem:[%s2986_s4 + $0x144] ss:$8 sps:$4 sm:$0xff]  }
  0xc2   :  { %188 = vadd.xlane.f32.xlu0 %v187_v26  ;;  %1198 = vmatpush1.bf16.msra.mxu0 %v2081_v46 }
  0xc3   :  { %1199 = vmatprep.subr.bf16.mxu0 %v2084_v48  ;;  %v2097_v48 = vld [vmem:[%s2986_s4 + $0x310] ss:$8 sps:$4 sm:$0xff]  }
  0xc6   :  { %1200 = vmatpush1.bf16.msra.mxu0 %v2087_v50  ;;  %v2105_v50 = vld [vmem:[%s2986_s4 + $0x324] ss:$8 sps:$4 sm:$0xff]  }
  0xc7   :  { %1210 = vmatprep.subr.bf16.mxu0 %v2093_v52  ;;  %v2103_v52 = vld [vmem:[%s2986_s4 + $0x320] ss:$8 sps:$4 sm:$0xff]  }
 0x14f   :  { %v189_v54 = vpop.xlane.xlu0 %188 }
 0x150   :  { %v190_v55 = vmul.f32 0.0009765625, %v189_v54  ;;  %v2108_v54 = vld [vmem:[%s2986_s4 + $0x134] ss:$8 sps:$4 sm:$0xff]  }
 0x152   :  { %v191_v58 = vadd.f32 1e-05, %v190_v55  ;;  %v2111_v55 = vld [vmem:[%s2986_s4 + $0x334] ss:$8 sps:$4 sm:$0xff]  }
 0x154   :  { %2206 = vrsqrt.f32 %v191_v58  ;;  %v2106_v58 = vld [vmem:[%s2986_s4 + $0x130] ss:$8 sps:$4 sm:$0xff]  }
 0x15e   :  { %v2207_v22 = vpop.eup %2206 }
 0x15f   :  { %v194_v5 = vmul.f32 %v2207_v22, %v2538_v6  ;;  %v198_v26 = vmul.f32 %v2207_v22, %v2556_v16  ;;  %v193_v32 = vmul.f32 %v2207_v22, %v2535_v4  ;;  %v197_v27 = vmul.f32 %v2207_v22, %v2551_v15 }
 0x160   :  { %v196_v21 = vmul.f32 %v2207_v22, %v2544_v9  ;;  %v200_v18 = vmul.f32 %v2207_v22, %v2566_v0  ;;  %v195_v39 = vmul.f32 %v2207_v22, %v2541_v8  ;;  %v199_v13 = vmul.f32 %v2207_v22, %v2561_v17  ;;  %v2088_v17 = vld [vmem:[%s2986_s4 + $0x100] ss:$8 sps:$4 sm:$0xff]   ;;  %v2135_v22 = vld [vmem:[%s2986_s4 + $0x374] ss:$8 sps:$4 sm:$0xff]  }
 0x161   :  { %v243_v7 = vmul.f32 %v209_v62, %v194_v5  ;;  %v247_v28 = vmul.f32 %v225_v63, %v198_v26  ;;  %v242_v29 = vmul.f32 %v205_v1, %v193_v32  ;;  %v246_v33 = vmul.f32 %v221_v2, %v197_v27  ;;  %v2117_v62 = vld [vmem:[%s2986_s4 + $0x344] ss:$8 sps:$4 sm:$0xff]   ;;  %v2112_v63 = vld [vmem:[%s2986_s4 + $0x140] ss:$8 sps:$4 sm:$0xff]   ;;  %v2120_v2 = vld [vmem:[%s2986_s4 + $0x154] ss:$8 sps:$4 sm:$0xff]  }
 0x162   :  { %v245_v30 = vmul.f32 %v217_v14, %v196_v21  ;;  %v249_v6 = vmul.f32 %v233_v53, %v200_v18  ;;  %v244_v31 = vmul.f32 %v213_v56, %v195_v39  ;;  %v248_v16 = vmul.f32 %v229_v24, %v199_v13  ;;  %v2115_v1 = vld [vmem:[%s2986_s4 + $0x340] ss:$8 sps:$4 sm:$0xff]   ;;  %v2118_v14 = vld [vmem:[%s2986_s4 + $0x150] ss:$8 sps:$4 sm:$0xff]   ;;  %v2126_v56 = vld [vmem:[%s2986_s4 + $0x164] ss:$8 sps:$4 sm:$0xff]  }
 0x163   :  { %v292_v34 = vadd.f32 %v258_v10, %v243_v7  ;;  %v296_v4 = vadd.f32 %v274_v57, %v247_v28  ;;  %v291_v35 = vadd.f32 %v254_v61, %v242_v29  ;;  %v295_v15 = vadd.f32 %v270_v19, %v246_v33  ;;  %v2123_v10 = vld [vmem:[%s2986_s4 + $0x354] ss:$8 sps:$4 sm:$0xff]   ;;  %v2121_v53 = vld [vmem:[%s2986_s4 + $0x350] ss:$8 sps:$4 sm:$0xff]   ;;  %v2129_v57 = vld [vmem:[%s2986_s4 + $0x364] ss:$8 sps:$4 sm:$0xff]  }
 0x164   :  { %v294_v36 = vadd.f32 %v266_v20, %v245_v30  ;;  %v298_v9 = vadd.f32 %v282_v23, %v249_v6  ;;  %v2676_v37 = vadd.f32 %v262_v3, %v244_v31  ;;  %v2678_v0 = vadd.f32 %v278_v25, %v248_v16  ;;  %v2124_v61 = vld [vmem:[%s2986_s4 + $0x160] ss:$8 sps:$4 sm:$0xff]   ;;  %v2132_v20 = vld [vmem:[%s2986_s4 + $0x174] ss:$8 sps:$4 sm:$0xff]   ;;  %v2130_v23 = vld [vmem:[%s2986_s4 + $0x170] ss:$8 sps:$4 sm:$0xff]  }
 0x165   :  { %v300_v8 = vpack.c.bf16 %v292_v34, %v292_v34  ;;  %v304_v38 = vpack.c.bf16 %v296_v4, %v296_v4  ;;  %v299_v41 = vpack.c.bf16 %v291_v35, %v291_v35  ;;  %v303_v42 = vpack.c.bf16 %v295_v15, %v295_v15  ;;  %v2127_v19 = vld [vmem:[%s2986_s4 + $0x360] ss:$8 sps:$4 sm:$0xff]   ;;  %v2133_v3 = vld [vmem:[%s2986_s4 + $0x370] ss:$8 sps:$4 sm:$0xff]   ;;  %v2138_v24 = vld [vmem:[%s2986_s4 + $0x184] ss:$8 sps:$4 sm:$0xff]  }
 0x166   :  { %v302_v45 = vpack.c.bf16 %v294_v36, %v294_v36  ;;  %v306_v46 = vpack.c.bf16 %v298_v9, %v298_v9  ;;  %v2141_v25 = vld [vmem:[%s2986_s4 + $0x384] ss:$8 sps:$4 sm:$0xff]   ;;  %v2136_v5 = vld [vmem:[%s2986_s4 + $0x180] ss:$8 sps:$4 sm:$0xff]   ;;  %v2144_v32 = vld [vmem:[%s2986_s4 + $0x194] ss:$8 sps:$4 sm:$0xff]  }
 0x167   :  { %1119 = vmatprep.mubr.bf16.mxu1 %v300_v8  ;;  %1201 = vmatprep.mubr.bf16.mxu0 %v304_v38  ;;  %v2139_v26 = vld [vmem:[%s2986_s4 + $0x380] ss:$8 sps:$4 sm:$0xff]   ;;  %v2147_v27 = vld [vmem:[%s2986_s4 + $0x394] ss:$8 sps:$4 sm:$0xff]   ;;  %v2142_v21 = vld [vmem:[%s2986_s4 + $0x190] ss:$8 sps:$4 sm:$0xff]  }
 0x168   :  { %1120 = vmatmul.mubr.bf16.vlgmr.msra.gmra.mrb[0].mxu1 %v299_v41  ;;  %1202 = vmatmul.mubr.bf16.vlgmr.msra.gmra.mrb[0].mxu0 %v303_v42  ;;  %v2145_v18 = vld [vmem:[%s2986_s4 + $0x390] ss:$8 sps:$4 sm:$0xff]   ;;  %v2150_v39 = vld [vmem:[%s2986_s4 + $0x1a4] ss:$8 sps:$4 sm:$0xff]   ;;  %v2148_v7 = vld [vmem:[%s2986_s4 + $0x1a0] ss:$8 sps:$4 sm:$0xff]  }
 0x169   :  { %1129 = vmatpush1.bf16.msra.mxu1 %v2088_v17  ;;  %1211 = vmatpush1.bf16.msra.mxu0 %v2091_v40  ;;  %v2153_v13 = vld [vmem:[%s2986_s4 + $0x3a4] ss:$8 sps:$4 sm:$0xff]   ;;  %v2151_v28 = vld [vmem:[%s2986_s4 + $0x3a0] ss:$8 sps:$4 sm:$0xff]   ;;  %v2156_v29 = vld [vmem:[%s2986_s4 + $0x1b4] ss:$8 sps:$4 sm:$0xff]  }
 0x16a   :  { %1160 = vmatprep.mubr.bf16.mxu1 %v302_v45  ;;  %1242 = vmatprep.mubr.bf16.mxu0 %v306_v46  ;;  %v2159_v33 = vld [vmem:[%s2986_s4 + $0x3b4] ss:$8 sps:$4 sm:$0xff]   ;;  %v2154_v30 = vld [vmem:[%s2986_s4 + $0x1b0] ss:$8 sps:$4 sm:$0xff]   ;;  %v2162_v31 = vld [vmem:[%s2986_s4 + $0x1c4] ss:$8 sps:$4 sm:$0xff]   ;;  %v301_v45 = vpack.c.bf16 %v2676_v37, %v2676_v37  ;;  %v305_v46 = vpack.c.bf16 %v2678_v0, %v2678_v0 }
 0x16b   :  { %1130 = vmatprep.subr.bf16.mxu1 %v2096_v43  ;;  %1212 = vmatprep.subr.bf16.mxu0 %v2099_v44  ;;  %v2157_v6 = vld [vmem:[%s2986_s4 + $0x3b0] ss:$8 sps:$4 sm:$0xff]   ;;  %v2165_v16 = vld [vmem:[%s2986_s4 + $0x3c4] ss:$8 sps:$4 sm:$0xff]   ;;  %v2160_v34 = vld [vmem:[%s2986_s4 + $0x1c0] ss:$8 sps:$4 sm:$0xff]  }
 0x16c   :  { %v2163_v4 = vld [vmem:[%s2986_s4 + $0x3c0] ss:$8 sps:$4 sm:$0xff]   ;;  %v2168_v35 = vld [vmem:[%s2986_s4 + $0x1d4] ss:$8 sps:$4 sm:$0xff]   ;;  %v2166_v36 = vld [vmem:[%s2986_s4 + $0x1d0] ss:$8 sps:$4 sm:$0xff]  }
 0x16d   :  { %1131 = vmatpush1.bf16.msra.mxu1 %v2094_v47  ;;  %1213 = vmatpush1.bf16.msra.mxu0 %v2097_v48  ;;  %v2171_v15 = vld [vmem:[%s2986_s4 + $0x3d4] ss:$8 sps:$4 sm:$0xff]   ;;  %v2169_v9 = vld [vmem:[%s2986_s4 + $0x3d0] ss:$8 sps:$4 sm:$0xff]   ;;  %v2174_v8 = vld [vmem:[%s2986_s4 + $0x1e4] ss:$8 sps:$4 sm:$0xff]  }
 0x16e   :  { %1132 = vmatprep.subr.bf16.mxu1 %v2102_v49  ;;  %1214 = vmatprep.subr.bf16.mxu0 %v2105_v50  ;;  %v2177_v17 = vld [vmem:[%s2986_s4 + $0x3e4] ss:$8 sps:$4 sm:$0xff]   ;;  %v2172_v38 = vld [vmem:[%s2986_s4 + $0x1e0] ss:$8 sps:$4 sm:$0xff]   ;;  %v2180_v41 = vld [vmem:[%s2986_s4 + $0x1f4] ss:$8 sps:$4 sm:$0xff]  }
 0x16f   :  { %v2175_v40 = vld [vmem:[%s2986_s4 + $0x3e0] ss:$8 sps:$4 sm:$0xff]   ;;  %v2183_v42 = vld [vmem:[%s2986_s4 + $0x3f4] ss:$8 sps:$4 sm:$0xff]   ;;  %v2178_v43 = vld [vmem:[%s2986_s4 + $0x1f0] ss:$8 sps:$4 sm:$0xff]  }
 0x170   :  { %v2181_v44 = vld [vmem:[%s2986_s4 + $0x3f0] ss:$8 sps:$4 sm:$0xff]   ;;  %v435_v47 = vld [vmem:[%s2989_s5] sm:$0x3] }
 0x171   :  { %1133 = vmatpush1.bf16.msra.mxu1 %v2100_v51  ;;  %1215 = vmatpush1.bf16.msra.mxu0 %v2103_v52  ;;  %v440_v48 = vrot.slane %v435_v47, %v2336_v11  ;;  %v444_v49 = vrot.slane %v435_v47, %v2338_v12  ;;  %v1892_v47 = vld [vmem:[%s2993_s9] ss:$0 sm:$0xff] }
 0x172   :  { %1134 = vmatprep.subr.bf16.mxu1 %v2108_v54  ;;  %1216 = vmatprep.subr.bf16.mxu0 %v2111_v55 }
 0x175   :  { %1135 = vmatpush1.bf16.msra.mxu1 %v2106_v58  ;;  %1217 = vmatpush1.bf16.msra.mxu0 %v2109_v59 }
 0x176   :  { %1136 = vmatprep.subr.bf16.mxu1 %v2114_v60  ;;  %1218 = vmatprep.subr.bf16.mxu0 %v2117_v62 }
 0x179   :  { %1137 = vmatpush1.bf16.msra.mxu1 %v2112_v63  ;;  %1219 = vmatpush1.bf16.msra.mxu0 %v2115_v1 }
 0x17a   :  { %1138 = vmatprep.subr.bf16.mxu1 %v2120_v2  ;;  %1220 = vmatprep.subr.bf16.mxu0 %v2123_v10 }
 0x17d   :  { %1139 = vmatpush1.bf16.msra.mxu1 %v2118_v14  ;;  %1221 = vmatpush1.bf16.msra.mxu0 %v2121_v53 }
 0x17e   :  { %1140 = vmatprep.subr.bf16.mxu1 %v2126_v56  ;;  %1222 = vmatprep.subr.bf16.mxu0 %v2129_v57  ;;  %v2184_v56 = vld [vmem:[%s2990_s8 + $0x40] sm:$0xff]  }
 0x17f   :  { %v2185_v57 = vld [vmem:[%s2990_s8] sm:$0xff]  }
 0x181   :  { %1141 = vmatpush1.bf16.msra.mxu1 %v2124_v61  ;;  %1223 = vmatpush1.bf16.msra.mxu0 %v2127_v19  ;;  %v2186_v61 = vld [vmem:[%s2990_s8 + $0x48] sm:$0xff]  }
 0x182   :  { %1142 = vmatprep.subr.bf16.mxu1 %v2132_v20  ;;  %1224 = vmatprep.subr.bf16.mxu0 %v2135_v22  ;;  %v2187_v19 = vld [vmem:[%s2990_s8 + $0x8] sm:$0xff]  }
 0x185   :  { %1143 = vmatpush1.bf16.msra.mxu1 %v2130_v23  ;;  %1225 = vmatpush1.bf16.msra.mxu0 %v2133_v3 }
 0x186   :  { %1144 = vmatprep.subr.bf16.mxu1 %v2138_v24  ;;  %1226 = vmatprep.subr.bf16.mxu0 %v2141_v25 }
 0x189   :  { %1145 = vmatpush1.bf16.msra.mxu1 %v2136_v5  ;;  %1227 = vmatpush1.bf16.msra.mxu0 %v2139_v26  ;;  %v2188_v26 = vld [vmem:[%s2990_s8 + $0x50] sm:$0xff]  }
 0x18a   :  { %1146 = vmatprep.subr.bf16.mxu1 %v2144_v32  ;;  %1228 = vmatprep.subr.bf16.mxu0 %v2147_v27  ;;  %v2189_v32 = vld [vmem:[%s2990_s8 + $0x10] sm:$0xff]   ;;  %v2190_v27 = vld [vmem:[%s2990_s8 + $0x58] sm:$0xff]  }
 0x18d   :  { %1147 = vmatpush1.bf16.msra.mxu1 %v2142_v21  ;;  %1229 = vmatpush1.bf16.msra.mxu0 %v2145_v18  ;;  %v2191_v21 = vld [vmem:[%s2990_s8 + $0x18] sm:$0xff]   ;;  %v2192_v18 = vld [vmem:[%s2990_s8 + $0x60] sm:$0xff]  }
 0x18e   :  { %1148 = vmatprep.subr.bf16.mxu1 %v2150_v39  ;;  %1230 = vmatprep.subr.bf16.mxu0 %v2153_v13  ;;  %v2193_v39 = vld [vmem:[%s2990_s8 + $0x20] sm:$0xff]   ;;  %v2194_v13 = vld [vmem:[%s2990_s8 + $0x68] sm:$0xff]  }
 0x191   :  { %1149 = vmatpush1.bf16.msra.mxu1 %v2148_v7  ;;  %1231 = vmatpush1.bf16.msra.mxu0 %v2151_v28  ;;  %v2195_v7 = vld [vmem:[%s2990_s8 + $0x28] sm:$0xff]   ;;  %v2196_v28 = vld [vmem:[%s2990_s8 + $0x70] sm:$0xff]  }
 0x192   :  { %1150 = vmatprep.subr.bf16.mxu1 %v2156_v29  ;;  %1232 = vmatprep.subr.bf16.mxu0 %v2159_v33  ;;  %v2197_v29 = vld [vmem:[%s2990_s8 + $0x30] sm:$0xff]   ;;  %v2198_v33 = vld [vmem:[%s2990_s8 + $0x78] sm:$0xff]  }
 0x195   :  { %1151 = vmatpush1.bf16.msra.mxu1 %v2154_v30  ;;  %1233 = vmatpush1.bf16.msra.mxu0 %v2157_v6  ;;  %v2199_v30 = vld [vmem:[%s2990_s8 + $0x38] sm:$0xff]   ;;  %s2220_s8 = smov 64  }
 0x196   :  { %1152 = vmatprep.subr.bf16.mxu1 %v2162_v31  ;;  %1234 = vmatprep.subr.bf16.mxu0 %v2165_v16 }
 0x199   :  { %1153 = vmatpush1.bf16.msra.mxu1 %v2160_v34  ;;  %1235 = vmatpush1.bf16.msra.mxu0 %v2163_v4  ;;  %v1257_v34 = vld [vmem:[%s2991_s6] sm:$0x3] }
 0x19a   :  { %1154 = vmatprep.subr.bf16.mxu1 %v2168_v35  ;;  %1236 = vmatprep.subr.bf16.mxu0 %v2171_v15  ;;  %v1258_v4 = vld [vmem:[%s2992_s7] sm:$0x3]  ;;  %v1280_v35 = vrot.slane %v1257_v34, %v2336_v11  ;;  %v1284_v15 = vrot.slane %v1257_v34, %v2338_v12 }
 0x19d   :  { %1155 = vmatpush1.bf16.msra.mxu1 %v2166_v36  ;;  %1237 = vmatpush1.bf16.msra.mxu0 %v2169_v9 }
 0x19e   :  { %1156 = vmatprep.subr.bf16.mxu1 %v2174_v8  ;;  %1238 = vmatprep.subr.bf16.mxu0 %v2177_v17  ;;  %v1293_v8 = vrot.slane %v1258_v4, %v2336_v11  ;;  %v1297_v17 = vrot.slane %v1258_v4, %v2338_v12 }
 0x1a1   :  { %1157 = vmatpush1.bf16.msra.mxu1 %v2172_v38  ;;  %1239 = vmatpush1.bf16.msra.mxu0 %v2175_v40 }
 0x1a2   :  { %1158 = vmatprep.subr.bf16.mxu1 %v2180_v41  ;;  %1240 = vmatprep.subr.bf16.mxu0 %v2183_v42 }
 0x1a5   :  { %1159 = vmatpush1.bf16.msra.mxu1 %v2178_v43  ;;  %1241 = vmatpush1.bf16.msra.mxu0 %v2181_v44 }
 0x1a6   :  { %1921 = vmatprep.subr.bf16.mxu0 %v2184_v56 }
 0x1a8   :  { %1161 = vmatmul.mubr.bf16.vlgmr.msra.gmra.mrb[0].mxu1 %v301_v45  ;;  %1243 = vmatmul.mubr.bf16.vlgmr.msra.gmra.mrb[0].mxu0 %v305_v46 }
 0x1a9   :  { %1922 = vmatpush3.bf16.msra.mxu0 %v2185_v57 }
 0x1aa   :  { %1923 = vmatprep.subr.bf16.mxu0 %v2186_v61 }
 0x1ad   :  { %1924 = vmatpush3.bf16.msra.mxu0 %v2187_v19 }
 0x1ae   :  { %1925 = vmatprep.subr.bf16.mxu0 %v2188_v26 }
 0x1b1   :  { %1926 = vmatpush3.bf16.msra.mxu0 %v2189_v32 }
 0x1b2   :  { %1927 = vmatprep.subr.bf16.mxu0 %v2190_v27 }
 0x1b5   :  { %1928 = vmatpush3.bf16.msra.mxu0 %v2191_v21 }
 0x1b6   :  { %1929 = vmatprep.subr.bf16.mxu0 %v2192_v18 }
 0x1b9   :  { %1930 = vmatpush3.bf16.msra.mxu0 %v2193_v39 }
 0x1ba   :  { %1931 = vmatprep.subr.bf16.mxu0 %v2194_v13 }
 0x1bd   :  { %1932 = vmatpush3.bf16.msra.mxu0 %v2195_v7  ;;  %v1909_v7 = vld [vmem:[%s2996_s10] ss:$0 sm:$0xff] }
 0x1be   :  { %1933 = vmatprep.subr.bf16.mxu0 %v2196_v28 }
 0x1c1   :  { %1934 = vmatpush3.bf16.msra.mxu0 %v2197_v29  ;;  %v1910_v29 = vld [vmem:[%s2997_s11] ss:$0 sm:$0xff] }
 0x1c2   :  { %1935 = vmatprep.subr.bf16.mxu0 %v2198_v33 }
 0x1c5   :  { %1936 = vmatpush3.bf16.msra.mxu0 %v2199_v30 }
 0x27b   :  { %v1162_v50 = vpop.f32.mrb[0].mxu1  ;;  %v1244_v51 = vpop.f32.mrb[0].mxu0 }
 0x27c   :  { %v1976_v52 = vadd.f32 %v1162_v50, %v440_v48  ;;  %v1164_v54 = vpop.f32.mrb[1].mxu1  ;;  %v1246_v55 = vpop.f32.mrb[1].mxu0 }
 0x27d   :  { %v1978_v58 = vadd.f32 %v1164_v54, %v444_v49  ;;  %v1166_v37 = vpop.f32.mrb[2].mxu1  ;;  %v1248_v59 = vpop.f32.mrb[2].mxu0 }
 0x27e   :  { %v1977_v60 = vadd.f32 %v1976_v52, %v1244_v51  ;;  %v1167_v0 = vpop.f32.mrb[3].mxu1  ;;  %v1249_v62 = vpop.f32.mrb[3].mxu0 }
 0x27f   :  { %v1979_v63 = vadd.f32 %v1978_v58, %v1246_v55 }
 0x280   :  { %v1253_v1 = vmul.f32 0.3, %v1977_v60  ;;  %vm1251_vm8 = vcmp.ge.f32.partialorder %v1977_v60, 0.0 }
 0x281   :  { %v1254_v2 = vmul.f32 0.3, %v1979_v63  ;;  %vm1252_vm9 = vcmp.ge.f32.partialorder %v1979_v63, 0.0 }
 0x282   :  { %v1255_v10 = vsel %vm1251_vm8, %v1977_v60, %v1253_v1 }
 0x283   :  { %v1256_v14 = vsel %vm1252_vm9, %v1979_v63, %v1254_v2 }
 0x284   :  { %v1259_v53 = vadd.f32 %v1256_v14, %v1255_v10 }
 0x286   :  { %1260 = vadd.xlane.f32.xlu1 %v1259_v53 }
 0x313   :  { %v1261_v20 = vpop.xlane.xlu1 %1260 }
 0x314   :  { %v1263_v22 = vmul.f32 0.00390625, %v1261_v20 }
 0x316   :  { %v1264_v23 = vsub.f32 %v1255_v10, %v1263_v22  ;;  %v1265_v3 = vsub.f32 %v1256_v14, %v1263_v22 }
 0x318   :  { %v1266_v24 = vmul.f32 %v1264_v23, %v1264_v23  ;;  %v1267_v25 = vmul.f32 %v1265_v3, %v1265_v3 }
 0x31a   :  { %v1268_v5 = vadd.f32 %v1267_v25, %v1266_v24  ;;  %v2222_v24 = vmov 0.0   ;;  %v2200_v25 = vld [vmem:[%s2994_s13] sm:$0xff]  }
 0x31b   :  { %1952 = vmatprep.subr.bf16.mxu1 %v2222_v24  ;;  %1956 = vmatprep.mubr.msk.bf16.mxu1 %vm2223_vm12, %v2222_v24 }
 0x31c   :  { %1269 = vadd.xlane.f32.xlu1 %v1268_v5  ;;  %1953 = vmatpush3.bf16.msra.mxu1 %v2200_v25  ;;  %v2201_v5 = vld [vmem:[%s2994_s13 + $0x8] sm:$0xff]  }
 0x31d   :  { %1954 = vmatprep.subr.bf16.mxu1 %v2222_v24 }
 0x320   :  { %1955 = vmatpush3.bf16.msra.mxu1 %v2201_v5 }
 0x321   :  { %1960 = vmatprep.subr.bf16.mxu1 %v2222_v24 }
 0x3a9   :  { %v1270_v6 = vpop.xlane.xlu1 %1269 }
 0x3aa   :  { %v1271_v31 = vmul.f32 0.00390625, %v1270_v6 }
 0x3ac   :  { %v1272_v16 = vadd.f32 1e-05, %v1271_v31 }
 0x3ae   :  { %2208 = vrsqrt.f32 %v1272_v16 }
 0x3b8   :  { %v2209_v36 = vpop.eup %2208 }
 0x3b9   :  { %v1275_v9 = vmul.f32 %v2209_v36, %v1265_v3  ;;  %v1274_v38 = vmul.f32 %v2209_v36, %v1264_v23 }
 0x3bb   :  { %v1288_v40 = vmul.f32 %v1284_v15, %v1275_v9  ;;  %v1287_v41 = vmul.f32 %v1280_v35, %v1274_v38  ;;  %v2202_v38 = vld [vmem:[%s2995_s12] sm:$0xff]  }
 0x3bd   :  { %v1301_v42 = vadd.f32 %v1297_v17, %v1288_v40  ;;  %v1300_v43 = vadd.f32 %v1293_v8, %v1287_v41 }
 0x3bf   :  { %v1303_v44 = vpack.c.bf16 %v1301_v42, %v1301_v42  ;;  %v1302_v45 = vpack.c.bf16 %v1300_v43, %v1300_v43  ;;  %v2203_v42 = vld [vmem:[%s2995_s12 + $0x8] sm:$0xff]  }
 0x3c1   :  { %1471 = vmatprep.mubr.bf16.mxu0 %v1303_v44  ;;  %v2204_v44 = vld [vmem:[%s2998_s14] sm:$0xff]  }
 0x3c2   :  { %1472 = vmatmul.mubr.bf16.vlgmr.msra.gmra.mrb[4].mxu0 %v1302_v45 }
 0x495   :  { %v1937_v46 = vpop.f32.mrb[4].mxu0 }
 0x496   :  { %v1938_v48 = vpop.f32.mrb[5].mxu0 }
 0x497   :  { %v1939_v49 = vadd.f32 %v1938_v48, %v1937_v46  ;;  %v1940_v50 = vpop.f32.mrb[6].mxu0  ;;  %v2205_v46 = vld [vmem:[%s2998_s14 + $0x8] sm:$0xff]  }
 0x498   :  { %v1941_v11 = vpop.f32.mrb[7].mxu0 }
 0x499   :  { %v1474_v51 = vadd.f32 %v1939_v49, %v1892_v47 }
 0x49b   :  { %vm1510_vm10 = vcmp.ge.f32.partialorder %v1474_v51, 0.0  ;;  %v1511_v12 = vmul.f32 0.3, %v1474_v51  ;;  %v1482_v14 = vsel %vm1481_vm11, %v1474_v51, 0.0 }
 0x49d   :  { %v1512_v52 = vsel %vm1510_vm10, %v1474_v51, %v1511_v12 }
 0x49e   :  { %1536 = vrot.lane.b32.xlu1 %v1512_v52, %s2220_s8  ;;  %1514 = vrot.lane.b32.xlu0 %v1512_v52, %s2221_s30 }
 0x510   :  { %v1537_v54 = vpop.permute.xlu1 %1536  ;;  %v1515_v55 = vpop.permute.xlu0 %1514 }
 0x511   :  { %v1539_v58 = vsel %vm1481_vm11, %v1537_v54, 0.0  ;;  %v1517_v37 = vsel %vm1481_vm11, %v1515_v55, 0.0 }
 0x512   :  { %1540 = vadd.xlane.f32.xlu0 %v1539_v58  ;;  %1518 = vadd.xlane.f32.xlu1 %v1517_v37  ;;  %v1920_v37 = vld [vmem:[%s2999_s15] ss:$0 sm:$0xff] }
 0x59f   :  { %v1519_v59 = vpop.xlane.xlu1 %1518  ;;  %v1541_v60 = vpop.xlane.xlu0 %1540 }
 0x5a0   :  { %v1520_v0 = vmul.f32 0.03125, %v1519_v59  ;;  %v1542_v62 = vmul.f32 0.03125, %v1541_v60 }
 0x5a2   :  { %v1521_v63 = vsub.f32 %v1512_v52, %v1520_v0  ;;  %v1543_v1 = vsub.f32 %v1512_v52, %v1542_v62 }
 0x5a4   :  { %v1522_v2 = vmul.f32 %v1521_v63, %v1521_v63  ;;  %v1544_v10 = vmul.f32 %v1543_v1, %v1543_v1 }
 0x5a6   :  { %1524 = vrot.lane.b32.xlu0 %v1522_v2, %s2221_s30  ;;  %1546 = vrot.lane.b32.xlu1 %v1544_v10, %s2220_s8 }
 0x5ca   :  { %1483 = vadd.xlane.f32.xlu1 %v1482_v14 }
 0x618   :  { %v1525_v53 = vpop.permute.xlu0 %1524  ;;  %v1547_v57 = vpop.permute.xlu1 %1546 }
 0x619   :  { %v1527_v56 = vsel %vm1481_vm11, %v1525_v53, 0.0  ;;  %v1549_v61 = vsel %vm1481_vm11, %v1547_v57, 0.0 }
 0x61a   :  { %1528 = vadd.xlane.f32.xlu0 %v1527_v56 }
 0x61e   :  { %1550 = vadd.xlane.f32.xlu0 %v1549_v61 }
 0x657   :  { %v1484_v19 = vpop.xlane.xlu1 %1483 }
 0x658   :  { %v1486_v20 = vmul.f32 0.03125, %v1484_v19 }
 0x65a   :  { %v1487_v22 = vsub.f32 %v1474_v51, %v1486_v20 }
 0x65c   :  { %v1488_v23 = vmul.f32 %v1487_v22, %v1487_v22 }
 0x65e   :  { %v1489_v3 = vsel %vm1481_vm11, %v1488_v23, 0.0 }
 0x65f   :  { %1490 = vadd.xlane.f32.xlu1 %v1489_v3 }
 0x6a7   :  { %v1529_v26 = vpop.xlane.xlu0 %1528 }
 0x6a8   :  { %v1530_v32 = vmul.f32 0.03125, %v1529_v26 }
 0x6aa   :  { %v1531_v27 = vadd.f32 1e-05, %v1530_v32 }
 0x6ab   :  { %v1551_v21 = vpop.xlane.xlu0 %1550 }
 0x6ac   :  { %2210 = vrsqrt.f32 %v1531_v27  ;;  %v1552_v18 = vmul.f32 0.03125, %v1551_v21 }
 0x6ae   :  { %v1553_v39 = vadd.f32 1e-05, %v1552_v18 }
 0x6b0   :  { %2212 = vrsqrt.f32 %v1553_v39 }
 0x6b6   :  { %v2211_v13 = vpop.eup %2210 }
 0x6b7   :  { %v1533_v28 = vmul.f32 %v2211_v13, %v1521_v63 }
 0x6b9   :  { %v1534_v33 = vmul.f32 %v1909_v7, %v1533_v28 }
 0x6ba   :  { %v2213_v30 = vpop.eup %2212 }
 0x6bb   :  { %v1535_v6 = vadd.f32 %v1910_v29, %v1534_v33  ;;  %v1555_v31 = vmul.f32 %v2213_v30, %v1543_v1 }
 0x6bd   :  { %v1563_v16 = vpack.c.bf16 %v1535_v6, %v1535_v6  ;;  %v1556_v34 = vmul.f32 %v1909_v7, %v1555_v31 }
 0x6bf   :  { %1569 = vrot.lane.b32.xlu0 %v1563_v16, %s2221_s30  ;;  %v1557_v4 = vadd.f32 %v1910_v29, %v1556_v34 }
 0x6c1   :  { %v1681_v35 = vpack.c.bf16 %v1557_v4, %v1557_v4 }
 0x6c3   :  { %1687 = vrot.lane.b32.xlu1 %v1681_v35, %s2220_s8 }
 0x6ec   :  { %v1491_v15 = vpop.xlane.xlu1 %1490 }
 0x6ed   :  { %v1492_v36 = vmul.f32 0.03125, %v1491_v15 }
 0x6ef   :  { %v1493_v9 = vadd.f32 1e-05, %v1492_v36 }
 0x6f1   :  { %2214 = vrsqrt.f32 %v1493_v9 }
 0x6fb   :  { %v2215_v8 = vpop.eup %2214 }
 0x6fc   :  { %v1495_v17 = vmul.f32 %v2215_v8, %v1487_v22 }
 0x6fe   :  { %v1502_v40 = vmul.f32 %v1909_v7, %v1495_v17 }
 0x700   :  { %v1509_v43 = vadd.f32 %v1910_v29, %v1502_v40 }
 0x702   :  { %v1558_v45 = vpack.c.bf16 %v1509_v43, %v1509_v43 }
 0x731   :  { %v1570_v41 = vpop.permute.xlu0 %1569 }
 0x732   :  { %1957 = vmatmul.mubr.msk.bf16.vlgmr.msra.gmra.mrb[4].mxu1 %vm1481_vm11, %v1570_v41 }
 0x733   :  { %1961 = vmatpush3.bf16.msra.mxu1 %v2202_v38  ;;  %1964 = vmatprep.mubr.msk.bf16.mxu1 %vm2223_vm12, %v2222_v24 }
 0x734   :  { %1962 = vmatprep.subr.bf16.mxu1 %v2222_v24 }
 0x735   :  { %v1688_v47 = vpop.permute.xlu1 %1687 }
 0x737   :  { %1963 = vmatpush3.bf16.msra.mxu1 %v2203_v42 }
 0x738   :  { %1968 = vmatprep.subr.bf16.mxu1 %v2222_v24 }
 0x73a   :  { %1965 = vmatmul.mubr.msk.bf16.vlgmr.msra.gmra.mrb[8].mxu1 %vm1481_vm11, %v1558_v45 }
 0x73b   :  { %1969 = vmatpush3.bf16.msra.mxu1 %v2204_v44  ;;  %1972 = vmatprep.mubr.msk.bf16.mxu1 %vm2223_vm12, %v2222_v24 }
 0x73c   :  { %1970 = vmatprep.subr.bf16.mxu1 %v2222_v24 }
 0x73f   :  { %1971 = vmatpush3.bf16.msra.mxu1 %v2205_v46 }
 0x742   :  { %1973 = vmatmul.mubr.msk.bf16.vlgmr.msra.gmra.mrb[12].mxu1 %vm1481_vm11, %v1688_v47 }
 0x805   :  { %v1620_v48 = vpop.f32.mrb[4].mxu1 }
 0x806   :  { %v1958_v49 = vpop.f32.mrb[5].mxu1 }
 0x807   :  { %v1623_v50 = vpop.f32.mrb[6].mxu1 }
 0x808   :  { %v1959_v11 = vpop.f32.mrb[7].mxu1 }
 0x80d   :  { %v1675_v51 = vpop.f32.mrb[8].mxu1 }
 0x80e   :  { %v1676_v12 = vadd.f32 %v1675_v51, %v1620_v48  ;;  %v1966_v52 = vpop.f32.mrb[9].mxu1 }
 0x80f   :  { %v1678_v54 = vpop.f32.mrb[10].mxu1 }
 0x810   :  { %v1967_v55 = vpop.f32.mrb[11].mxu1 }
 0x815   :  { %v1738_v58 = vpop.f32.mrb[12].mxu1 }
 0x816   :  { %v1744_v59 = vadd.f32 %v1738_v58, %v1676_v12  ;;  %v1974_v60 = vpop.f32.mrb[13].mxu1 }
 0x817   :  { %v1741_v0 = vpop.f32.mrb[14].mxu1 }
 0x818   :  { %v1752_v62 = vadd.f32 %v1920_v37, %v1744_v59  ;;  %v1975_v63 = vpop.f32.mrb[15].mxu1 }
 0x81a   :  { %v1753_v1 = vsub.f32 0.0, %v1752_v62 }
 0x81c   :  { %v1754_v2 = vmul.f32 1.442695, %v1753_v1 }
 0x81e   :  { %2216 = vpow2.f32 %v1754_v2 }
 0x828   :  { %v2217_v10 = vpop.eup %2216 }
 0x829   :  { %v1756_v14 = vadd.f32 1.0, %v2217_v10 }
 0x82b   :  { %2218 = vrcp.f32 %v1756_v14 }
 0x835   :  { %v2219_v53 = vpop.eup %2218 }
 0x836   :  { %1759 = vst [vmem:[%s3000_s16] sm:$0xff] %v2219_v53 }

</bundles_post_ra>
